<compile_context>
chip_gen: v6e
topology: v6e:2x2x1
jax: 0.10.0
libtpu: 0.0.40
codegen_flags: <defaults>
</compile_context>

<pallas_src>
import functools
import numpy as np
import jax
import jax.numpy as jnp
from jax import lax
from jax.experimental import pallas as pl
from jax.experimental.pallas import tpu as pltpu

BF16 = jnp.bfloat16
F32 = jnp.float32


# -----------------------------------------------------------------------------
# Fused Swin block kernel
# -----------------------------------------------------------------------------
def _swin_block_kernel(x_ref, wqk_ref, bqk_ref, hmask_ref, cmask_ref, sumbd_ref,
                       biasw_ref, wvpv_ref, battn_ref,
                       ln1w_ref, ln1b_ref, ln2w_ref, ln2b_ref,
                       w1_ref, b1_ref, w2_ref, b2_ref,
                       o_ref, xn_s, q_s, k_s, x1_s, *, nh, nw, n, eps=1e-5):
    C = x_ref.shape[1]

    # ---- LayerNorm 1 (single pass) over all rows of the window group ----
    x = x_ref[...].astype(F32)
    mu = jnp.mean(x, axis=-1, keepdims=True)
    var = jnp.mean(x * x, axis=-1, keepdims=True) - mu * mu
    xn = (x - mu) * lax.rsqrt(var + eps) * ln1w_ref[...] + ln1b_ref[...]
    xn_s[...] = xn.astype(BF16)

    # ---- fused Q|K projection over all rows (scale folded into the Q half) ----
    qk = jnp.dot(xn.astype(BF16), wqk_ref[...], preferred_element_type=F32) + bqk_ref[...]
    q_s[...] = qk[:, :C].astype(BF16)
    k_s[...] = qk[:, C:].astype(BF16)

    # ---- per-window multi-head attention, all heads per wide MXU matmul ----
    def window_body(w, carry):
        r0 = w * n
        xw = x_ref[pl.ds(r0, n), :].astype(F32)
        xnw = xn_s[pl.ds(r0, n), :]
        qw = q_s[pl.ds(r0, n), :]
        kw = k_s[pl.ds(r0, n), :]

        # block-diagonal K: row block h keeps only head-h channels -> one
        # (n, C) x (nh*n, C)^T matmul yields all heads' QK^T scores side by side.
        kbd = jnp.concatenate([kw * hmask_ref[h] for h in range(nh)], axis=0)
        s = lax.dot_general(qw, kbd, (((1,), (1,)), ((), ())),
                            preferred_element_type=F32)            # (n, nh*n)
        s = s + biasw_ref[w]                                        # rel-pos bias + shift mask

        # per-head softmax: subtracting the global row max is valid per head block;
        # per-head denominators via one matmul against a block-indicator matrix.
        m = jnp.max(s, axis=-1, keepdims=True)
        p = jnp.exp(s - m).astype(BF16)                             # unnormalized probabilities

        # block-diagonal Xn: row block h carries xn in head-h's output columns,
        # so one (n, nh*n) x (nh*n, nh*C) matmul gives every head's P_h @ Xn.
        xnt = jnp.concatenate([xnw] * nh, axis=1)                   # (n, nh*C)
        xbd = jnp.concatenate([xnt * cmask_ref[h] for h in range(nh)], axis=0)
        a_un = jnp.dot(p, xbd, preferred_element_type=F32)          # (n, nh*C)
        den = jnp.dot(p, sumbd_ref[...], preferred_element_type=F32)
        a = a_un * pl.reciprocal(jnp.maximum(den, 1e-30), approx=True)

        # fold back through per-head (Wv_h @ Wproj_h), stacked vertically.
        attn = jnp.dot(a.astype(BF16), wvpv_ref[...],
                       preferred_element_type=F32)                  # (n, C)
        x1_s[pl.ds(r0, n), :] = xw + attn + battn_ref[...]          # residual 1
        return carry

    lax.fori_loop(0, nw, window_body, 0, unroll=True)

    # ---- LayerNorm 2 + MLP (tanh GELU) + residual 2 ----
    x1 = x1_s[...]
    mu2 = jnp.mean(x1, axis=-1, keepdims=True)
    var2 = jnp.mean(x1 * x1, axis=-1, keepdims=True) - mu2 * mu2
    xn2 = (x1 - mu2) * lax.rsqrt(var2 + eps) * ln2w_ref[...] + ln2b_ref[...]
    h1 = jnp.dot(xn2.astype(BF16), w1_ref[...], preferred_element_type=F32) + b1_ref[...]
    g1 = 0.5 * h1 * (1.0 + jnp.tanh(0.7978845608028654 *
                                    (h1 + 0.044715 * h1 * h1 * h1)))
    y2 = jnp.dot(g1.astype(BF16), w2_ref[...], preferred_element_type=F32) + b2_ref[...]
    o_ref[...] = (x1 + y2).astype(o_ref.dtype)


def fused_swin_block_pallas(xw2d, wqk, bqk, hmask, cmask, sumbd, biasw, wvpv, battn,
                            ln1w, ln1b, ln2w, ln2b, w1, b1, w2, b2,
                            *, num_heads, n_tokens, n_windows):
    R, C = xw2d.shape
    nh, N, nW = num_heads, n_tokens, n_windows
    GR = nW * N                       # rows per grid step (all windows of one image)
    Hd = w1.shape[1]
    assert R % GR == 0
    c2 = lambda g: (0, 0)
    c3 = lambda g: (0, 0, 0)
    kernel = functools.partial(_swin_block_kernel, nh=nh, nw=nW, n=N)
    return pl.pallas_call(
        kernel,
        out_shape=jax.ShapeDtypeStruct((R, C), xw2d.dtype),
        grid=(R // GR,),
        in_specs=[
            pl.BlockSpec((GR, C), lambda g: (g, 0)),             # x (window-major permuted rows)
            pl.BlockSpec((C, 2 * C), c2),                         # [Wq*scale | Wk]          (bf16)
            pl.BlockSpec((1, 2 * C), c2),                         # [bq*scale | bk]          (f32)
            pl.BlockSpec((nh, 1, C), c3),                         # per-head channel masks   (bf16)
            pl.BlockSpec((nh, 1, nh * C), c3),                    # per-head placement masks (bf16)
            pl.BlockSpec((nh * N, nh * C), c2),                   # per-head row-sum matrix  (bf16)
            pl.BlockSpec((nW, N, nh * N), c3),                    # rel-pos bias + shift mask(f32)
            pl.BlockSpec((nh * C, C), c2),                        # Wv@Wproj heads stacked   (bf16)
            pl.BlockSpec((1, C), c2),                             # battn                    (f32)
            pl.BlockSpec((1, C), c2), pl.BlockSpec((1, C), c2),   # ln1 w, b
            pl.BlockSpec((1, C), c2), pl.BlockSpec((1, C), c2),   # ln2 w, b
            pl.BlockSpec((C, Hd), c2), pl.BlockSpec((1, Hd), c2), # mlp w1, b1
            pl.BlockSpec((Hd, C), c2), pl.BlockSpec((1, C), c2),  # mlp w2, b2
        ],
        out_specs=pl.BlockSpec((GR, C), lambda g: (g, 0)),
        scratch_shapes=[
            pltpu.VMEM((GR, C), BF16),    # xn  (LN1 output)
            pltpu.VMEM((GR, C), BF16),    # q   (scale folded)
            pltpu.VMEM((GR, C), BF16),    # k
            pltpu.VMEM((GR, C), F32),     # x + attention residual
        ],
        compiler_params=pltpu.CompilerParams(dimension_semantics=("parallel",)),
    )(xw2d, wqk, bqk.reshape(1, 2 * C), hmask, cmask, sumbd, biasw, wvpv,
      battn.reshape(1, C),
      ln1w.reshape(1, C), ln1b.reshape(1, C), ln2w.reshape(1, C), ln2b.reshape(1, C),
      w1, b1.reshape(1, Hd), w2, b2.reshape(1, C))


# -----------------------------------------------------------------------------
# Static tables: rel-pos index, shift mask, roll+window-partition row permutation
# -----------------------------------------------------------------------------
def build_rel_pos_index(ws):
    coords = np.stack(np.meshgrid(np.arange(ws), np.arange(ws), indexing="ij"))
    cf = coords.reshape(2, -1)
    rel = cf[:, :, None] - cf[:, None, :]
    rel = rel.transpose(1, 2, 0).astype(np.int64)
    rel[:, :, 0] += ws - 1
    rel[:, :, 1] += ws - 1
    rel[:, :, 0] *= 2 * ws - 1
    return rel.sum(-1)                                        # (N, N)


def build_attn_mask(H, W, ws, shift):
    img_mask = np.zeros((1, H, W, 1), dtype=np.float32)
    slices = (slice(0, -ws), slice(-ws, -shift), slice(-shift, None))
    cnt = 0
    for hs in slices:
        for wsl in slices:
            img_mask[:, hs, wsl, :] = cnt
            cnt += 1
    mw = (img_mask.reshape(1, H // ws, ws, W // ws, ws, 1)
          .transpose(0, 1, 3, 2, 4, 5).reshape(-1, ws * ws))
    m = mw[:, None, :] - mw[:, :, None]
    return np.where(m != 0, -100.0, 0.0).astype(np.float32)   # (nW, N, N)


def build_window_perm(B, H, W, ws, shift):
    """Row permutation: flattened (B*H*W) rows -> roll(-shift) + window partition order."""
    nWh, nWw = H // ws, W // ws
    hh = (np.arange(nWh)[:, None] * ws + np.arange(ws)[None, :] + shift) % H
    ww = (np.arange(nWw)[:, None] * ws + np.arange(ws)[None, :] + shift) % W
    b = np.arange(B)
    perm = (b[:, None, None, None, None] * (H * W)
            + hh[None, :, None, :, None] * W
            + ww[None, None, :, None, :])
    perm = perm.reshape(-1).astype(np.int32)
    inv = np.empty_like(perm)
    inv[perm] = np.arange(perm.size, dtype=np.int32)
    return perm, inv


# -----------------------------------------------------------------------------
# Block / layer forward (JAX glue: weight folding + composed row gathers)
# -----------------------------------------------------------------------------
def swin_block_forward(xw2d, params, *, num_heads, rel_idx, attn_mask,
                       n_tokens, n_windows):
    R, C = xw2d.shape
    nh, N, nW = num_heads, n_tokens, n_windows
    hd = C // nh
    scale = float(hd ** (-0.5))

    # fold weights once (tiny ops, traced per block under jit)
    wq = params["qkv_w"][:, :C] * scale
    bq = params["qkv_b"][:C] * scale
    wk = params["qkv_w"][:, C:2 * C]
    bk = params["qkv_b"][C:2 * C]
    wqk = jnp.concatenate([wq, wk], axis=1).astype(BF16)              # (C, 2C)
    bqk = jnp.concatenate([bq, bk]).astype(F32)                       # (2C,)

    wv = params["qkv_w"][:, 2 * C:].reshape(C, nh, hd).transpose(1, 0, 2)   # (nh, C, hd)
    wp = params["proj_w"].reshape(nh, hd, C)                                 # (nh, hd, C)
    wvpv = jnp.einsum("hcd,hdk->hck", wv, wp).reshape(nh * C, C).astype(BF16)
    # softmax rows sum to 1 -> V-bias folds into a constant row
    battn = (params["qkv_b"][2 * C:] @ params["proj_w"] + params["proj_b"]).astype(F32)

    # rel-pos bias + shift mask pre-summed into one wide (nW, N, nh*N) table
    rel = (params["rel_pos_table"][rel_idx.reshape(-1)]
           .reshape(N, N, nh).transpose(2, 0, 1))                     # (nh, N, N)
    rel_wide = jnp.concatenate([rel[h] for h in range(nh)], axis=1)   # (N, nh*N)
    if attn_mask is not None:
        biasw = rel_wide[None] + jnp.tile(jnp.asarray(attn_mask, F32), (1, 1, nh))
    else:
        biasw = jnp.tile(rel_wide[None], (nW, 1, 1))
    biasw = biasw.astype(F32)

    # static selector constants for the wide per-window attention matmuls
    hmask = np.zeros((nh, 1, C), np.float32)
    cmask = np.zeros((nh, 1, nh * C), np.float32)
    sumbd = np.zeros((nh * N, nh * C), np.float32)
    for h in range(nh):
        hmask[h, 0, h * hd:(h + 1) * hd] = 1.0
        cmask[h, 0, h * C:(h + 1) * C] = 1.0
        sumbd[h * N:(h + 1) * N, h * C:(h + 1) * C] = 1.0

    return fused_swin_block_pallas(
        xw2d, wqk, bqk, jnp.asarray(hmask, BF16), jnp.asarray(cmask, BF16),
        jnp.asarray(sumbd, BF16), biasw, wvpv, battn,
        params["ln1_w"], params["ln1_b"], params["ln2_w"], params["ln2_b"],
        params["mlp_w1"].astype(BF16), params["mlp_b1"],
        params["mlp_w2"].astype(BF16), params["mlp_b2"],
        num_heads=nh, n_tokens=N, n_windows=nW)


def basic_layer_forward(x, block_params, *, num_heads, rel_idx, block_masks, row_perms,
                        n_tokens, n_windows):
    B, L, C = x.shape
    cur = x.reshape(B * L, C)
    for i, params in enumerate(block_params):
        # composed gather: (inverse perm of previous block) o (forward perm of this block)
        cur = jnp.take(cur, row_perms[i], axis=0)
        cur = swin_block_forward(cur, params, num_heads=num_heads, rel_idx=rel_idx,
                                 attn_mask=block_masks[i], n_tokens=n_tokens,
                                 n_windows=n_windows)
    cur = jnp.take(cur, row_perms[-1], axis=0)
    # TODO(synk): downsample (PatchMerging) is None in this BasicLayer config -> not implemented.
    return cur.reshape(B, L, C)


# -----------------------------------------------------------------------------
# Parameter init (deterministic, synthetic; Linear convention: y = x @ W + b)
# -----------------------------------------------------------------------------
def init_block_params(key, dim, num_heads, ws, mlp_ratio=4.0):
    hidden = int(dim * mlp_ratio)
    ks = jax.random.split(key, 5)
    std = 0.02
    return dict(
        ln1_w=jnp.ones((dim,), F32), ln1_b=jnp.zeros((dim,), F32),
        qkv_w=(jax.random.normal(ks[0], (dim, 3 * dim), F32) * std),
        qkv_b=jnp.zeros((3 * dim,), F32),
        proj_w=(jax.random.normal(ks[1], (dim, dim), F32) * std),
        proj_b=jnp.zeros((dim,), F32),
        ln2_w=jnp.ones((dim,), F32), ln2_b=jnp.zeros((dim,), F32),
        mlp_w1=(jax.random.normal(ks[2], (dim, hidden), F32) * std),
        mlp_b1=jnp.zeros((hidden,), F32),
        mlp_w2=(jax.random.normal(ks[3], (hidden, dim), F32) * std),
        mlp_b2=jnp.zeros((dim,), F32),
        rel_pos_table=(jax.random.normal(
            ks[4], ((2 * ws - 1) * (2 * ws - 1), num_heads), F32) * 0.02),
    )


# -----------------------------------------------------------------------------
# Pure-JAX reference (for a loose numerical self-check)
# -----------------------------------------------------------------------------
def _layernorm(x, w, b, eps=1e-5):
    mu = jnp.mean(x, -1, keepdims=True)
    var = jnp.mean((x - mu) ** 2, -1, keepdims=True)
    return (x - mu) / jnp.sqrt(var + eps) * w + b


def reference_basic_layer(x, block_params, *, H, W, ws, nh, rel_idx, shifts, masks):
    B, L, C = x.shape
    N = ws * ws
    nW = (H // ws) * (W // ws)
    hd = C // nh
    scale = hd ** (-0.5)
    for params, shift, mask in zip(block_params, shifts, masks):
        shortcut = x
        xn = _layernorm(x, params["ln1_w"], params["ln1_b"]).reshape(B, H, W, C)
        if shift > 0:
            xn = jnp.roll(xn, (-shift, -shift), axis=(1, 2))
        xw = (xn.reshape(B, H // ws, ws, W // ws, ws, C)
                .transpose(0, 1, 3, 2, 4, 5).reshape(B * nW, N, C))
        qkv = xw @ params["qkv_w"] + params["qkv_b"]
        q, k, v = qkv[..., :C], qkv[..., C:2 * C], qkv[..., 2 * C:]
        q = q.reshape(-1, N, nh, hd).transpose(0, 2, 1, 3) * scale
        k = k.reshape(-1, N, nh, hd).transpose(0, 2, 1, 3)
        v = v.reshape(-1, N, nh, hd).transpose(0, 2, 1, 3)
        attn = q @ jnp.swapaxes(k, -1, -2)                       # (B*nW, nh, N, N)
        rel = (params["rel_pos_table"][rel_idx.reshape(-1)]
               .reshape(N, N, nh).transpose(2, 0, 1))
        attn = attn + rel[None]
        if mask is not None:
            attn = attn.reshape(B, nW, nh, N, N) + jnp.asarray(mask)[None, :, None]
            attn = attn.reshape(B * nW, nh, N, N)
        attn = jax.nn.softmax(attn, axis=-1)
        o = (attn @ v).transpose(0, 2, 1, 3).reshape(B * nW, N, C)
        o = o @ params["proj_w"] + params["proj_b"]
        o = (o.reshape(B, H // ws, W // ws, ws, ws, C)
               .transpose(0, 1, 3, 2, 4, 5).reshape(B, H, W, C))
        if shift > 0:
            o = jnp.roll(o, (shift, shift), axis=(1, 2))
        x = shortcut + o.reshape(B, L, C)
        xn2 = _layernorm(x, params["ln2_w"], params["ln2_b"])
        h = jax.nn.gelu(xn2 @ params["mlp_w1"] + params["mlp_b1"], approximate=True)
        x = x + (h @ params["mlp_w2"] + params["mlp_b2"])
    return x


# -----------------------------------------------------------------------------
if __name__ == "__main__":
    # BasicLayer config: dim=32, input_resolution=(16,16), depth=2, num_heads=4,
    # window_size=8 (blocks alternate shift 0 / window_size//2=4), downsample=None.
    B, Hres, Wres, C = 2, 16, 16, 32
    depth, num_heads, window_size = 2, 4, 8
    L = Hres * Wres
    N = window_size * window_size
    nW = (Hres // window_size) * (Wres // window_size)

    key = jax.random.PRNGKey(0)
    kx, *pkeys = jax.random.split(key, depth + 1)
    x = jax.random.normal(kx, (B, L, C), F32)

    block_params = [init_block_params(pkeys[i], C, num_heads, window_size)
                    for i in range(depth)]
    rel_idx = build_rel_pos_index(window_size)

    shifts, masks, perms, invs = [], [], [], []
    for i in range(depth):
        shift = 0 if i % 2 == 0 else window_size // 2
        shifts.append(shift)
        masks.append(build_attn_mask(Hres, Wres, window_size, shift) if shift > 0 else None)
        perm, inv = build_window_perm(B, Hres, Wres, window_size, shift)
        perms.append(perm)
        invs.append(inv)
    # compose (inverse of block i) with (forward of block i+1) into a single gather
    row_perms = [jnp.asarray(perms[0])]
    for i in range(1, depth):
        row_perms.append(jnp.asarray(invs[i - 1][perms[i]]))
    row_perms.append(jnp.asarray(invs[-1]))

    fwd = jax.jit(functools.partial(
        basic_layer_forward, num_heads=num_heads, rel_idx=rel_idx,
        block_masks=masks, row_perms=row_perms, n_tokens=N, n_windows=nW))
    out = fwd(x, block_params)
    jax.block_until_ready(out)

    assert out.shape == (B, L, C) and bool(jnp.all(jnp.isfinite(out)))
    ref = reference_basic_layer(x, block_params, H=Hres, W=Wres, ws=window_size,
                                nh=num_heads, rel_idx=rel_idx, shifts=shifts, masks=masks)
    err = float(jnp.max(jnp.abs(out - ref)))
    assert err < 5e-2, f"max abs err vs reference: {err}"
    print("KERNEL_OK")
</pallas_src>

<mosaic_0001>
module attributes {stable_mosaic.version = 11 : i64} {
  func.func @_swin_block_kernel(%arg0: i32, %arg1: memref<256x32xf32, #tpu.memory_space<vmem>>, %arg2: memref<32x64xbf16, #tpu.memory_space<vmem>>, %arg3: memref<1x64xf32, #tpu.memory_space<vmem>>, %arg4: memref<4x1x32xbf16, #tpu.memory_space<vmem>>, %arg5: memref<4x1x128xbf16, #tpu.memory_space<vmem>>, %arg6: memref<256x128xbf16, #tpu.memory_space<vmem>>, %arg7: memref<4x64x256xf32, #tpu.memory_space<vmem>>, %arg8: memref<128x32xbf16, #tpu.memory_space<vmem>>, %arg9: memref<1x32xf32, #tpu.memory_space<vmem>>, %arg10: memref<1x32xf32, #tpu.memory_space<vmem>>, %arg11: memref<1x32xf32, #tpu.memory_space<vmem>>, %arg12: memref<1x32xf32, #tpu.memory_space<vmem>>, %arg13: memref<1x32xf32, #tpu.memory_space<vmem>>, %arg14: memref<32x128xbf16, #tpu.memory_space<vmem>>, %arg15: memref<1x128xf32, #tpu.memory_space<vmem>>, %arg16: memref<128x32xbf16, #tpu.memory_space<vmem>>, %arg17: memref<1x32xf32, #tpu.memory_space<vmem>>, %arg18: memref<256x32xf32, #tpu.memory_space<vmem>>, %arg19: memref<256x32xbf16, #tpu.memory_space<vmem>>, %arg20: memref<256x32xbf16, #tpu.memory_space<vmem>>, %arg21: memref<256x32xbf16, #tpu.memory_space<vmem>>, %arg22: memref<256x32xf32, #tpu.memory_space<vmem>>) attributes {dimension_semantics = [#tpu.dimension_semantics<parallel>], iteration_bounds = array<i64: 2>, scalar_prefetch = 0 : i64, scratch_operands = 4 : i64, tpu.core_type = #tpu.core_type<tc>, window_params = [{transform_indices = @transform_0, window_bounds = array<i64: 256, 32>}, {pipeline_mode = #tpu.pipeline_mode<synchronous>, transform_indices = @transform_1, window_bounds = array<i64: 32, 64>}, {pipeline_mode = #tpu.pipeline_mode<synchronous>, transform_indices = @transform_2, window_bounds = array<i64: 1, 64>}, {pipeline_mode = #tpu.pipeline_mode<synchronous>, transform_indices = @transform_3, window_bounds = array<i64: 4, 1, 32>}, {pipeline_mode = #tpu.pipeline_mode<synchronous>, transform_indices = @transform_4, window_bounds = array<i64: 4, 1, 128>}, {pipeline_mode = #tpu.pipeline_mode<synchronous>, transform_indices = @transform_5, window_bounds = array<i64: 256, 128>}, {pipeline_mode = #tpu.pipeline_mode<synchronous>, transform_indices = @transform_6, window_bounds = array<i64: 4, 64, 256>}, {pipeline_mode = #tpu.pipeline_mode<synchronous>, transform_indices = @transform_7, window_bounds = array<i64: 128, 32>}, {pipeline_mode = #tpu.pipeline_mode<synchronous>, transform_indices = @transform_8, window_bounds = array<i64: 1, 32>}, {pipeline_mode = #tpu.pipeline_mode<synchronous>, transform_indices = @transform_9, window_bounds = array<i64: 1, 32>}, {pipeline_mode = #tpu.pipeline_mode<synchronous>, transform_indices = @transform_10, window_bounds = array<i64: 1, 32>}, {pipeline_mode = #tpu.pipeline_mode<synchronous>, transform_indices = @transform_11, window_bounds = array<i64: 1, 32>}, {pipeline_mode = #tpu.pipeline_mode<synchronous>, transform_indices = @transform_12, window_bounds = array<i64: 1, 32>}, {pipeline_mode = #tpu.pipeline_mode<synchronous>, transform_indices = @transform_13, window_bounds = array<i64: 32, 128>}, {pipeline_mode = #tpu.pipeline_mode<synchronous>, transform_indices = @transform_14, window_bounds = array<i64: 1, 128>}, {pipeline_mode = #tpu.pipeline_mode<synchronous>, transform_indices = @transform_15, window_bounds = array<i64: 128, 32>}, {pipeline_mode = #tpu.pipeline_mode<synchronous>, transform_indices = @transform_16, window_bounds = array<i64: 1, 32>}, {transform_indices = @transform_17, window_bounds = array<i64: 256, 32>}]} {
    %c0 = arith.constant 0 : index
    %c0_0 = arith.constant 0 : index
    %0 = vector.load %arg1[%c0, %c0_0] : memref<256x32xf32, #tpu.memory_space<vmem>>, vector<256x32xf32>
    %cst = arith.constant dense<0.000000e+00> : vector<256xf32>
    %1 = vector.multi_reduction <add>, %0, %cst [1] : vector<256x32xf32> to vector<256xf32>
    %2 = vector.shape_cast %1 : vector<256xf32> to vector<256x1xf32>
    %cst_1 = arith.constant 3.200000e+01 : f32
    %3 = vector.broadcast %cst_1 : f32 to vector<256x1xf32>
    %4 = arith.divf %2, %3 : vector<256x1xf32>
    %5 = arith.mulf %0, %0 : vector<256x32xf32>
    %cst_2 = arith.constant dense<0.000000e+00> : vector<256xf32>
    %6 = vector.multi_reduction <add>, %5, %cst_2 [1] : vector<256x32xf32> to vector<256xf32>
    %7 = vector.shape_cast %6 : vector<256xf32> to vector<256x1xf32>
    %cst_3 = arith.constant 3.200000e+01 : f32
    %8 = vector.broadcast %cst_3 : f32 to vector<256x1xf32>
    %9 = arith.divf %7, %8 : vector<256x1xf32>
    %10 = arith.mulf %4, %4 : vector<256x1xf32>
    %11 = arith.subf %9, %10 : vector<256x1xf32>
    %12 = vector.broadcast %4 : vector<256x1xf32> to vector<256x32xf32>
    %13 = arith.subf %0, %12 : vector<256x32xf32>
    %cst_4 = arith.constant 9.99999974E-6 : f32
    %14 = vector.broadcast %cst_4 : f32 to vector<256x1xf32>
    %15 = arith.addf %11, %14 : vector<256x1xf32>
    %16 = math.rsqrt %15 : vector<256x1xf32>
    %17 = vector.broadcast %16 : vector<256x1xf32> to vector<256x32xf32>
    %18 = arith.mulf %13, %17 : vector<256x32xf32>
    %c0_5 = arith.constant 0 : index
    %c0_6 = arith.constant 0 : index
    %19 = vector.load %arg10[%c0_5, %c0_6] : memref<1x32xf32, #tpu.memory_space<vmem>>, vector<1x32xf32>
    %20 = vector.broadcast %19 : vector<1x32xf32> to vector<256x32xf32>
    %21 = arith.mulf %18, %20 : vector<256x32xf32>
    %c0_7 = arith.constant 0 : index
    %c0_8 = arith.constant 0 : index
    %22 = vector.load %arg11[%c0_7, %c0_8] : memref<1x32xf32, #tpu.memory_space<vmem>>, vector<1x32xf32>
    %23 = vector.broadcast %22 : vector<1x32xf32> to vector<256x32xf32>
    %24 = arith.addf %21, %23 : vector<256x32xf32>
    %25 = arith.truncf %24 : vector<256x32xf32> to vector<256x32xbf16>
    %c0_9 = arith.constant 0 : index
    %c0_10 = arith.constant 0 : index
    %26 = vector.load %arg19[%c0_9, %c0_10] : memref<256x32xbf16, #tpu.memory_space<vmem>>, vector<256x32xbf16>
    tpu.vector_store %arg19[%c0_9, %c0_10], %25 {strides = array<i32>} : memref<256x32xbf16, #tpu.memory_space<vmem>>, vector<256x32xbf16>,
    %27 = arith.truncf %24 : vector<256x32xf32> to vector<256x32xbf16>
    %c0_11 = arith.constant 0 : index
    %c0_12 = arith.constant 0 : index
    %28 = vector.load %arg2[%c0_11, %c0_12] : memref<32x64xbf16, #tpu.memory_space<vmem>>, vector<32x64xbf16>
    %cst_13 = arith.constant dense<0.000000e+00> : vector<256x64xf32>
    %29 = tpu.matmul %27, %28, %cst_13 {dimension_numbers = #tpu.dot_dimension_numbers<[1], [0], [0], [1], [0, 0, 1, 1], [], []>} : vector<256x32xbf16>, vector<32x64xbf16>, vector<256x64xf32> -> vector<256x64xf32>
    %c0_14 = arith.constant 0 : index
    %c0_15 = arith.constant 0 : index
    %30 = vector.load %arg3[%c0_14, %c0_15] : memref<1x64xf32, #tpu.memory_space<vmem>>, vector<1x64xf32>
    %31 = vector.broadcast %30 : vector<1x64xf32> to vector<256x64xf32>
    %32 = arith.addf %29, %31 : vector<256x64xf32>
    %33 = vector.extract_strided_slice %32 {offsets = [0, 0], sizes = [256, 32], strides = [1, 1]} : vector<256x64xf32> to vector<256x32xf32>
    %34 = arith.truncf %33 : vector<256x32xf32> to vector<256x32xbf16>
    %c0_16 = arith.constant 0 : index
    %c0_17 = arith.constant 0 : index
    %35 = vector.load %arg20[%c0_16, %c0_17] : memref<256x32xbf16, #tpu.memory_space<vmem>>, vector<256x32xbf16>
    tpu.vector_store %arg20[%c0_16, %c0_17], %34 {strides = array<i32>} : memref<256x32xbf16, #tpu.memory_space<vmem>>, vector<256x32xbf16>,
    %36 = vector.extract_strided_slice %32 {offsets = [0, 32], sizes = [256, 32], strides = [1, 1]} : vector<256x64xf32> to vector<256x32xf32>
    %37 = arith.truncf %36 : vector<256x32xf32> to vector<256x32xbf16>
    %c0_18 = arith.constant 0 : index
    %c0_19 = arith.constant 0 : index
    %38 = vector.load %arg21[%c0_18, %c0_19] : memref<256x32xbf16, #tpu.memory_space<vmem>>, vector<256x32xbf16>
    tpu.vector_store %arg21[%c0_18, %c0_19], %37 {strides = array<i32>} : memref<256x32xbf16, #tpu.memory_space<vmem>>, vector<256x32xbf16>,
    %c0_i32 = arith.constant 0 : i32
    %c64_i32 = arith.constant 64 : i32
    %39 = arith.muli %c0_i32, %c64_i32 : i32
    %40 = arith.index_cast %39 : i32 to index
    %c0_20 = arith.constant 0 : index
    %41 = vector.load %arg1[%40, %c0_20] : memref<256x32xf32, #tpu.memory_space<vmem>>, vector<64x32xf32>
    %42 = arith.index_cast %39 : i32 to index
    %c0_21 = arith.constant 0 : index
    %43 = vector.load %arg19[%42, %c0_21] : memref<256x32xbf16, #tpu.memory_space<vmem>>, vector<64x32xbf16>
    %44 = arith.index_cast %39 : i32 to index
    %c0_22 = arith.constant 0 : index
    %45 = vector.load %arg20[%44, %c0_22] : memref<256x32xbf16, #tpu.memory_space<vmem>>, vector<64x32xbf16>
    %46 = arith.index_cast %39 : i32 to index
    %c0_23 = arith.constant 0 : index
    %47 = vector.load %arg21[%46, %c0_23] : memref<256x32xbf16, #tpu.memory_space<vmem>>, vector<64x32xbf16>
    %c0_24 = arith.constant 0 : index
    %c0_25 = arith.constant 0 : index
    %c0_26 = arith.constant 0 : index
    %48 = vector.load %arg4[%c0_24, %c0_25, %c0_26] : memref<4x1x32xbf16, #tpu.memory_space<vmem>>, vector<1x1x32xbf16>
    %49 = vector.shape_cast %48 : vector<1x1x32xbf16> to vector<1x32xbf16>
    %50 = vector.broadcast %49 : vector<1x32xbf16> to vector<64x32xbf16>
    %51 = arith.mulf %47, %50 : vector<64x32xbf16>
    %c1 = arith.constant 1 : index
    %c0_27 = arith.constant 0 : index
    %c0_28 = arith.constant 0 : index
    %52 = vector.load %arg4[%c1, %c0_27, %c0_28] : memref<4x1x32xbf16, #tpu.memory_space<vmem>>, vector<1x1x32xbf16>
    %53 = vector.shape_cast %52 : vector<1x1x32xbf16> to vector<1x32xbf16>
    %54 = vector.broadcast %53 : vector<1x32xbf16> to vector<64x32xbf16>
    %55 = arith.mulf %47, %54 : vector<64x32xbf16>
    %c2 = arith.constant 2 : index
    %c0_29 = arith.constant 0 : index
    %c0_30 = arith.constant 0 : index
    %56 = vector.load %arg4[%c2, %c0_29, %c0_30] : memref<4x1x32xbf16, #tpu.memory_space<vmem>>, vector<1x1x32xbf16>
    %57 = vector.shape_cast %56 : vector<1x1x32xbf16> to vector<1x32xbf16>
    %58 = vector.broadcast %57 : vector<1x32xbf16> to vector<64x32xbf16>
    %59 = arith.mulf %47, %58 : vector<64x32xbf16>
    %c3 = arith.constant 3 : index
    %c0_31 = arith.constant 0 : index
    %c0_32 = arith.constant 0 : index
    %60 = vector.load %arg4[%c3, %c0_31, %c0_32] : memref<4x1x32xbf16, #tpu.memory_space<vmem>>, vector<1x1x32xbf16>
    %61 = vector.shape_cast %60 : vector<1x1x32xbf16> to vector<1x32xbf16>
    %62 = vector.broadcast %61 : vector<1x32xbf16> to vector<64x32xbf16>
    %63 = arith.mulf %47, %62 : vector<64x32xbf16>
    %64 = tpu.concatenate %51, %55, %59, %63 in 0 : vector<64x32xbf16>, vector<64x32xbf16>, vector<64x32xbf16>, vector<64x32xbf16> -> vector<256x32xbf16>
    %cst_33 = arith.constant dense<0.000000e+00> : vector<64x256xf32>
    %65 = tpu.matmul %45, %64, %cst_33 {dimension_numbers = #tpu.dot_dimension_numbers<[1], [1], [0], [0], [0, 0, 1, 0], [], []>} : vector<64x32xbf16>, vector<256x32xbf16>, vector<64x256xf32> -> vector<64x256xf32>
    %66 = arith.index_cast %c0_i32 : i32 to index
    %c0_34 = arith.constant 0 : index
    %c0_35 = arith.constant 0 : index
    %67 = vector.load %arg7[%66, %c0_34, %c0_35] : memref<4x64x256xf32, #tpu.memory_space<vmem>>, vector<1x64x256xf32>
    %68 = vector.shape_cast %67 : vector<1x64x256xf32> to vector<64x256xf32>
    %69 = arith.addf %65, %68 : vector<64x256xf32>
    %cst_36 = arith.constant dense<0xFF800000> : vector<64xf32>
    %70 = vector.multi_reduction <maximumf>, %69, %cst_36 [1] : vector<64x256xf32> to vector<64xf32>
    %71 = vector.shape_cast %70 : vector<64xf32> to vector<64x1xf32>
    %72 = vector.broadcast %71 : vector<64x1xf32> to vector<64x256xf32>
    %73 = arith.subf %69, %72 : vector<64x256xf32>
    %74 = math.exp %73 : vector<64x256xf32>
    %75 = arith.truncf %74 : vector<64x256xf32> to vector<64x256xbf16>
    %76 = tpu.concatenate %43, %43, %43, %43 in 1 : vector<64x32xbf16>, vector<64x32xbf16>, vector<64x32xbf16>, vector<64x32xbf16> -> vector<64x128xbf16>
    %c0_37 = arith.constant 0 : index
    %c0_38 = arith.constant 0 : index
    %c0_39 = arith.constant 0 : index
    %77 = vector.load %arg5[%c0_37, %c0_38, %c0_39] : memref<4x1x128xbf16, #tpu.memory_space<vmem>>, vector<1x1x128xbf16>
    %78 = vector.shape_cast %77 : vector<1x1x128xbf16> to vector<1x128xbf16>
    %79 = vector.broadcast %78 : vector<1x128xbf16> to vector<64x128xbf16>
    %80 = arith.mulf %76, %79 : vector<64x128xbf16>
    %c1_40 = arith.constant 1 : index
    %c0_41 = arith.constant 0 : index
    %c0_42 = arith.constant 0 : index
    %81 = vector.load %arg5[%c1_40, %c0_41, %c0_42] : memref<4x1x128xbf16, #tpu.memory_space<vmem>>, vector<1x1x128xbf16>
    %82 = vector.shape_cast %81 : vector<1x1x128xbf16> to vector<1x128xbf16>
    %83 = vector.broadcast %82 : vector<1x128xbf16> to vector<64x128xbf16>
    %84 = arith.mulf %76, %83 : vector<64x128xbf16>
    %c2_43 = arith.constant 2 : index
    %c0_44 = arith.constant 0 : index
    %c0_45 = arith.constant 0 : index
    %85 = vector.load %arg5[%c2_43, %c0_44, %c0_45] : memref<4x1x128xbf16, #tpu.memory_space<vmem>>, vector<1x1x128xbf16>
    %86 = vector.shape_cast %85 : vector<1x1x128xbf16> to vector<1x128xbf16>
    %87 = vector.broadcast %86 : vector<1x128xbf16> to vector<64x128xbf16>
    %88 = arith.mulf %76, %87 : vector<64x128xbf16>
    %c3_46 = arith.constant 3 : index
    %c0_47 = arith.constant 0 : index
    %c0_48 = arith.constant 0 : index
    %89 = vector.load %arg5[%c3_46, %c0_47, %c0_48] : memref<4x1x128xbf16, #tpu.memory_space<vmem>>, vector<1x1x128xbf16>
    %90 = vector.shape_cast %89 : vector<1x1x128xbf16> to vector<1x128xbf16>
    %91 = vector.broadcast %90 : vector<1x128xbf16> to vector<64x128xbf16>
    %92 = arith.mulf %76, %91 : vector<64x128xbf16>
    %93 = tpu.concatenate %80, %84, %88, %92 in 0 : vector<64x128xbf16>, vector<64x128xbf16>, vector<64x128xbf16>, vector<64x128xbf16> -> vector<256x128xbf16>
    %cst_49 = arith.constant dense<0.000000e+00> : vector<64x128xf32>
    %94 = tpu.matmul %75, %93, %cst_49 {dimension_numbers = #tpu.dot_dimension_numbers<[1], [0], [0], [1], [0, 0, 1, 1], [], []>} : vector<64x256xbf16>, vector<256x128xbf16>, vector<64x128xf32> -> vector<64x128xf32>
    %c0_50 = arith.constant 0 : index
    %c0_51 = arith.constant 0 : index
    %95 = vector.load %arg6[%c0_50, %c0_51] : memref<256x128xbf16, #tpu.memory_space<vmem>>, vector<256x128xbf16>
    %cst_52 = arith.constant dense<0.000000e+00> : vector<64x128xf32>
    %96 = tpu.matmul %75, %95, %cst_52 {dimension_numbers = #tpu.dot_dimension_numbers<[1], [0], [0], [1], [0, 0, 1, 1], [], []>} : vector<64x256xbf16>, vector<256x128xbf16>, vector<64x128xf32> -> vector<64x128xf32>
    %cst_53 = arith.constant 1.000000e-30 : f32
    %97 = vector.broadcast %cst_53 : f32 to vector<64x128xf32>
    %98 = arith.maximumf %96, %97 : vector<64x128xf32>
    %99 = tpu.reciprocal %98 {approx = true} : vector<64x128xf32> -> vector<64x128xf32>
    %100 = arith.mulf %94, %99 : vector<64x128xf32>
    %101 = arith.truncf %100 : vector<64x128xf32> to vector<64x128xbf16>
    %c0_54 = arith.constant 0 : index
    %c0_55 = arith.constant 0 : index
    %102 = vector.load %arg8[%c0_54, %c0_55] : memref<128x32xbf16, #tpu.memory_space<vmem>>, vector<128x32xbf16>
    %cst_56 = arith.constant dense<0.000000e+00> : vector<64x32xf32>
    %103 = tpu.matmul %101, %102, %cst_56 {dimension_numbers = #tpu.dot_dimension_numbers<[1], [0], [0], [1], [0, 0, 1, 1], [], []>} : vector<64x128xbf16>, vector<128x32xbf16>, vector<64x32xf32> -> vector<64x32xf32>
    %104 = arith.addf %41, %103 : vector<64x32xf32>
    %c0_57 = arith.constant 0 : index
    %c0_58 = arith.constant 0 : index
    %105 = vector.load %arg9[%c0_57, %c0_58] : memref<1x32xf32, #tpu.memory_space<vmem>>, vector<1x32xf32>
    %106 = vector.broadcast %105 : vector<1x32xf32> to vector<64x32xf32>
    %107 = arith.addf %104, %106 : vector<64x32xf32>
    %108 = arith.index_cast %39 : i32 to index
    %c0_59 = arith.constant 0 : index
    %109 = vector.load %arg22[%108, %c0_59] : memref<256x32xf32, #tpu.memory_space<vmem>>, vector<64x32xf32>
    tpu.vector_store %arg22[%108, %c0_59], %107 {strides = array<i32>} : memref<256x32xf32, #tpu.memory_space<vmem>>, vector<64x32xf32>,
    %c1_i32 = arith.constant 1 : i32
    %c64_i32_60 = arith.constant 64 : i32
    %110 = arith.muli %c1_i32, %c64_i32_60 : i32
    %111 = arith.index_cast %110 : i32 to index
    %c0_61 = arith.constant 0 : index
    %112 = vector.load %arg1[%111, %c0_61] : memref<256x32xf32, #tpu.memory_space<vmem>>, vector<64x32xf32>
    %113 = arith.index_cast %110 : i32 to index
    %c0_62 = arith.constant 0 : index
    %114 = vector.load %arg19[%113, %c0_62] : memref<256x32xbf16, #tpu.memory_space<vmem>>, vector<64x32xbf16>
    %115 = arith.index_cast %110 : i32 to index
    %c0_63 = arith.constant 0 : index
    %116 = vector.load %arg20[%115, %c0_63] : memref<256x32xbf16, #tpu.memory_space<vmem>>, vector<64x32xbf16>
    %117 = arith.index_cast %110 : i32 to index
    %c0_64 = arith.constant 0 : index
    %118 = vector.load %arg21[%117, %c0_64] : memref<256x32xbf16, #tpu.memory_space<vmem>>, vector<64x32xbf16>
    %c0_65 = arith.constant 0 : index
    %c0_66 = arith.constant 0 : index
    %c0_67 = arith.constant 0 : index
    %119 = vector.load %arg4[%c0_65, %c0_66, %c0_67] : memref<4x1x32xbf16, #tpu.memory_space<vmem>>, vector<1x1x32xbf16>
    %120 = vector.shape_cast %119 : vector<1x1x32xbf16> to vector<1x32xbf16>
    %121 = vector.broadcast %120 : vector<1x32xbf16> to vector<64x32xbf16>
    %122 = arith.mulf %118, %121 : vector<64x32xbf16>
    %c1_68 = arith.constant 1 : index
    %c0_69 = arith.constant 0 : index
    %c0_70 = arith.constant 0 : index
    %123 = vector.load %arg4[%c1_68, %c0_69, %c0_70] : memref<4x1x32xbf16, #tpu.memory_space<vmem>>, vector<1x1x32xbf16>
    %124 = vector.shape_cast %123 : vector<1x1x32xbf16> to vector<1x32xbf16>
    %125 = vector.broadcast %124 : vector<1x32xbf16> to vector<64x32xbf16>
    %126 = arith.mulf %118, %125 : vector<64x32xbf16>
    %c2_71 = arith.constant 2 : index
    %c0_72 = arith.constant 0 : index
    %c0_73 = arith.constant 0 : index
    %127 = vector.load %arg4[%c2_71, %c0_72, %c0_73] : memref<4x1x32xbf16, #tpu.memory_space<vmem>>, vector<1x1x32xbf16>
    %128 = vector.shape_cast %127 : vector<1x1x32xbf16> to vector<1x32xbf16>
    %129 = vector.broadcast %128 : vector<1x32xbf16> to vector<64x32xbf16>
    %130 = arith.mulf %118, %129 : vector<64x32xbf16>
    %c3_74 = arith.constant 3 : index
    %c0_75 = arith.constant 0 : index
    %c0_76 = arith.constant 0 : index
    %131 = vector.load %arg4[%c3_74, %c0_75, %c0_76] : memref<4x1x32xbf16, #tpu.memory_space<vmem>>, vector<1x1x32xbf16>
    %132 = vector.shape_cast %131 : vector<1x1x32xbf16> to vector<1x32xbf16>
    %133 = vector.broadcast %132 : vector<1x32xbf16> to vector<64x32xbf16>
    %134 = arith.mulf %118, %133 : vector<64x32xbf16>
    %135 = tpu.concatenate %122, %126, %130, %134 in 0 : vector<64x32xbf16>, vector<64x32xbf16>, vector<64x32xbf16>, vector<64x32xbf16> -> vector<256x32xbf16>
    %cst_77 = arith.constant dense<0.000000e+00> : vector<64x256xf32>
    %136 = tpu.matmul %116, %135, %cst_77 {dimension_numbers = #tpu.dot_dimension_numbers<[1], [1], [0], [0], [0, 0, 1, 0], [], []>} : vector<64x32xbf16>, vector<256x32xbf16>, vector<64x256xf32> -> vector<64x256xf32>
    %137 = arith.index_cast %c1_i32 : i32 to index
    %c0_78 = arith.constant 0 : index
    %c0_79 = arith.constant 0 : index
    %138 = vector.load %arg7[%137, %c0_78, %c0_79] : memref<4x64x256xf32, #tpu.memory_space<vmem>>, vector<1x64x256xf32>
    %139 = vector.shape_cast %138 : vector<1x64x256xf32> to vector<64x256xf32>
    %140 = arith.addf %136, %139 : vector<64x256xf32>
    %cst_80 = arith.constant dense<0xFF800000> : vector<64xf32>
    %141 = vector.multi_reduction <maximumf>, %140, %cst_80 [1] : vector<64x256xf32> to vector<64xf32>
    %142 = vector.shape_cast %141 : vector<64xf32> to vector<64x1xf32>
    %143 = vector.broadcast %142 : vector<64x1xf32> to vector<64x256xf32>
    %144 = arith.subf %140, %143 : vector<64x256xf32>
    %145 = math.exp %144 : vector<64x256xf32>
    %146 = arith.truncf %145 : vector<64x256xf32> to vector<64x256xbf16>
    %147 = tpu.concatenate %114, %114, %114, %114 in 1 : vector<64x32xbf16>, vector<64x32xbf16>, vector<64x32xbf16>, vector<64x32xbf16> -> vector<64x128xbf16>
    %c0_81 = arith.constant 0 : index
    %c0_82 = arith.constant 0 : index
    %c0_83 = arith.constant 0 : index
    %148 = vector.load %arg5[%c0_81, %c0_82, %c0_83] : memref<4x1x128xbf16, #tpu.memory_space<vmem>>, vector<1x1x128xbf16>
    %149 = vector.shape_cast %148 : vector<1x1x128xbf16> to vector<1x128xbf16>
    %150 = vector.broadcast %149 : vector<1x128xbf16> to vector<64x128xbf16>
    %151 = arith.mulf %147, %150 : vector<64x128xbf16>
    %c1_84 = arith.constant 1 : index
    %c0_85 = arith.constant 0 : index
    %c0_86 = arith.constant 0 : index
    %152 = vector.load %arg5[%c1_84, %c0_85, %c0_86] : memref<4x1x128xbf16, #tpu.memory_space<vmem>>, vector<1x1x128xbf16>
    %153 = vector.shape_cast %152 : vector<1x1x128xbf16> to vector<1x128xbf16>
    %154 = vector.broadcast %153 : vector<1x128xbf16> to vector<64x128xbf16>
    %155 = arith.mulf %147, %154 : vector<64x128xbf16>
    %c2_87 = arith.constant 2 : index
    %c0_88 = arith.constant 0 : index
    %c0_89 = arith.constant 0 : index
    %156 = vector.load %arg5[%c2_87, %c0_88, %c0_89] : memref<4x1x128xbf16, #tpu.memory_space<vmem>>, vector<1x1x128xbf16>
    %157 = vector.shape_cast %156 : vector<1x1x128xbf16> to vector<1x128xbf16>
    %158 = vector.broadcast %157 : vector<1x128xbf16> to vector<64x128xbf16>
    %159 = arith.mulf %147, %158 : vector<64x128xbf16>
    %c3_90 = arith.constant 3 : index
    %c0_91 = arith.constant 0 : index
    %c0_92 = arith.constant 0 : index
    %160 = vector.load %arg5[%c3_90, %c0_91, %c0_92] : memref<4x1x128xbf16, #tpu.memory_space<vmem>>, vector<1x1x128xbf16>
    %161 = vector.shape_cast %160 : vector<1x1x128xbf16> to vector<1x128xbf16>
    %162 = vector.broadcast %161 : vector<1x128xbf16> to vector<64x128xbf16>
    %163 = arith.mulf %147, %162 : vector<64x128xbf16>
    %164 = tpu.concatenate %151, %155, %159, %163 in 0 : vector<64x128xbf16>, vector<64x128xbf16>, vector<64x128xbf16>, vector<64x128xbf16> -> vector<256x128xbf16>
    %cst_93 = arith.constant dense<0.000000e+00> : vector<64x128xf32>
    %165 = tpu.matmul %146, %164, %cst_93 {dimension_numbers = #tpu.dot_dimension_numbers<[1], [0], [0], [1], [0, 0, 1, 1], [], []>} : vector<64x256xbf16>, vector<256x128xbf16>, vector<64x128xf32> -> vector<64x128xf32>
    %c0_94 = arith.constant 0 : index
    %c0_95 = arith.constant 0 : index
    %166 = vector.load %arg6[%c0_94, %c0_95] : memref<256x128xbf16, #tpu.memory_space<vmem>>, vector<256x128xbf16>
    %cst_96 = arith.constant dense<0.000000e+00> : vector<64x128xf32>
    %167 = tpu.matmul %146, %166, %cst_96 {dimension_numbers = #tpu.dot_dimension_numbers<[1], [0], [0], [1], [0, 0, 1, 1], [], []>} : vector<64x256xbf16>, vector<256x128xbf16>, vector<64x128xf32> -> vector<64x128xf32>
    %cst_97 = arith.constant 1.000000e-30 : f32
    %168 = vector.broadcast %cst_97 : f32 to vector<64x128xf32>
    %169 = arith.maximumf %167, %168 : vector<64x128xf32>
    %170 = tpu.reciprocal %169 {approx = true} : vector<64x128xf32> -> vector<64x128xf32>
    %171 = arith.mulf %165, %170 : vector<64x128xf32>
    %172 = arith.truncf %171 : vector<64x128xf32> to vector<64x128xbf16>
    %c0_98 = arith.constant 0 : index
    %c0_99 = arith.constant 0 : index
    %173 = vector.load %arg8[%c0_98, %c0_99] : memref<128x32xbf16, #tpu.memory_space<vmem>>, vector<128x32xbf16>
    %cst_100 = arith.constant dense<0.000000e+00> : vector<64x32xf32>
    %174 = tpu.matmul %172, %173, %cst_100 {dimension_numbers = #tpu.dot_dimension_numbers<[1], [0], [0], [1], [0, 0, 1, 1], [], []>} : vector<64x128xbf16>, vector<128x32xbf16>, vector<64x32xf32> -> vector<64x32xf32>
    %175 = arith.addf %112, %174 : vector<64x32xf32>
    %c0_101 = arith.constant 0 : index
    %c0_102 = arith.constant 0 : index
    %176 = vector.load %arg9[%c0_101, %c0_102] : memref<1x32xf32, #tpu.memory_space<vmem>>, vector<1x32xf32>
    %177 = vector.broadcast %176 : vector<1x32xf32> to vector<64x32xf32>
    %178 = arith.addf %175, %177 : vector<64x32xf32>
    %179 = arith.index_cast %110 : i32 to index
    %c0_103 = arith.constant 0 : index
    %180 = vector.load %arg22[%179, %c0_103] : memref<256x32xf32, #tpu.memory_space<vmem>>, vector<64x32xf32>
    tpu.vector_store %arg22[%179, %c0_103], %178 {strides = array<i32>} : memref<256x32xf32, #tpu.memory_space<vmem>>, vector<64x32xf32>,
    %c2_i32 = arith.constant 2 : i32
    %c64_i32_104 = arith.constant 64 : i32
    %181 = arith.muli %c2_i32, %c64_i32_104 : i32
    %182 = arith.index_cast %181 : i32 to index
    %c0_105 = arith.constant 0 : index
    %183 = vector.load %arg1[%182, %c0_105] : memref<256x32xf32, #tpu.memory_space<vmem>>, vector<64x32xf32>
    %184 = arith.index_cast %181 : i32 to index
    %c0_106 = arith.constant 0 : index
    %185 = vector.load %arg19[%184, %c0_106] : memref<256x32xbf16, #tpu.memory_space<vmem>>, vector<64x32xbf16>
    %186 = arith.index_cast %181 : i32 to index
    %c0_107 = arith.constant 0 : index
    %187 = vector.load %arg20[%186, %c0_107] : memref<256x32xbf16, #tpu.memory_space<vmem>>, vector<64x32xbf16>
    %188 = arith.index_cast %181 : i32 to index
    %c0_108 = arith.constant 0 : index
    %189 = vector.load %arg21[%188, %c0_108] : memref<256x32xbf16, #tpu.memory_space<vmem>>, vector<64x32xbf16>
    %c0_109 = arith.constant 0 : index
    %c0_110 = arith.constant 0 : index
    %c0_111 = arith.constant 0 : index
    %190 = vector.load %arg4[%c0_109, %c0_110, %c0_111] : memref<4x1x32xbf16, #tpu.memory_space<vmem>>, vector<1x1x32xbf16>
    %191 = vector.shape_cast %190 : vector<1x1x32xbf16> to vector<1x32xbf16>
    %192 = vector.broadcast %191 : vector<1x32xbf16> to vector<64x32xbf16>
    %193 = arith.mulf %189, %192 : vector<64x32xbf16>
    %c1_112 = arith.constant 1 : index
    %c0_113 = arith.constant 0 : index
    %c0_114 = arith.constant 0 : index
    %194 = vector.load %arg4[%c1_112, %c0_113, %c0_114] : memref<4x1x32xbf16, #tpu.memory_space<vmem>>, vector<1x1x32xbf16>
    %195 = vector.shape_cast %194 : vector<1x1x32xbf16> to vector<1x32xbf16>
    %196 = vector.broadcast %195 : vector<1x32xbf16> to vector<64x32xbf16>
    %197 = arith.mulf %189, %196 : vector<64x32xbf16>
    %c2_115 = arith.constant 2 : index
    %c0_116 = arith.constant 0 : index
    %c0_117 = arith.constant 0 : index
    %198 = vector.load %arg4[%c2_115, %c0_116, %c0_117] : memref<4x1x32xbf16, #tpu.memory_space<vmem>>, vector<1x1x32xbf16>
    %199 = vector.shape_cast %198 : vector<1x1x32xbf16> to vector<1x32xbf16>
    %200 = vector.broadcast %199 : vector<1x32xbf16> to vector<64x32xbf16>
    %201 = arith.mulf %189, %200 : vector<64x32xbf16>
    %c3_118 = arith.constant 3 : index
    %c0_119 = arith.constant 0 : index
    %c0_120 = arith.constant 0 : index
    %202 = vector.load %arg4[%c3_118, %c0_119, %c0_120] : memref<4x1x32xbf16, #tpu.memory_space<vmem>>, vector<1x1x32xbf16>
    %203 = vector.shape_cast %202 : vector<1x1x32xbf16> to vector<1x32xbf16>
    %204 = vector.broadcast %203 : vector<1x32xbf16> to vector<64x32xbf16>
    %205 = arith.mulf %189, %204 : vector<64x32xbf16>
    %206 = tpu.concatenate %193, %197, %201, %205 in 0 : vector<64x32xbf16>, vector<64x32xbf16>, vector<64x32xbf16>, vector<64x32xbf16> -> vector<256x32xbf16>
    %cst_121 = arith.constant dense<0.000000e+00> : vector<64x256xf32>
    %207 = tpu.matmul %187, %206, %cst_121 {dimension_numbers = #tpu.dot_dimension_numbers<[1], [1], [0], [0], [0, 0, 1, 0], [], []>} : vector<64x32xbf16>, vector<256x32xbf16>, vector<64x256xf32> -> vector<64x256xf32>
    %208 = arith.index_cast %c2_i32 : i32 to index
    %c0_122 = arith.constant 0 : index
    %c0_123 = arith.constant 0 : index
    %209 = vector.load %arg7[%208, %c0_122, %c0_123] : memref<4x64x256xf32, #tpu.memory_space<vmem>>, vector<1x64x256xf32>
    %210 = vector.shape_cast %209 : vector<1x64x256xf32> to vector<64x256xf32>
    %211 = arith.addf %207, %210 : vector<64x256xf32>
    %cst_124 = arith.constant dense<0xFF800000> : vector<64xf32>
    %212 = vector.multi_reduction <maximumf>, %211, %cst_124 [1] : vector<64x256xf32> to vector<64xf32>
    %213 = vector.shape_cast %212 : vector<64xf32> to vector<64x1xf32>
    %214 = vector.broadcast %213 : vector<64x1xf32> to vector<64x256xf32>
    %215 = arith.subf %211, %214 : vector<64x256xf32>
    %216 = math.exp %215 : vector<64x256xf32>
    %217 = arith.truncf %216 : vector<64x256xf32> to vector<64x256xbf16>
    %218 = tpu.concatenate %185, %185, %185, %185 in 1 : vector<64x32xbf16>, vector<64x32xbf16>, vector<64x32xbf16>, vector<64x32xbf16> -> vector<64x128xbf16>
    %c0_125 = arith.constant 0 : index
    %c0_126 = arith.constant 0 : index
    %c0_127 = arith.constant 0 : index
    %219 = vector.load %arg5[%c0_125, %c0_126, %c0_127] : memref<4x1x128xbf16, #tpu.memory_space<vmem>>, vector<1x1x128xbf16>
    %220 = vector.shape_cast %219 : vector<1x1x128xbf16> to vector<1x128xbf16>
    %221 = vector.broadcast %220 : vector<1x128xbf16> to vector<64x128xbf16>
    %222 = arith.mulf %218, %221 : vector<64x128xbf16>
    %c1_128 = arith.constant 1 : index
    %c0_129 = arith.constant 0 : index
    %c0_130 = arith.constant 0 : index
    %223 = vector.load %arg5[%c1_128, %c0_129, %c0_130] : memref<4x1x128xbf16, #tpu.memory_space<vmem>>, vector<1x1x128xbf16>
    %224 = vector.shape_cast %223 : vector<1x1x128xbf16> to vector<1x128xbf16>
    %225 = vector.broadcast %224 : vector<1x128xbf16> to vector<64x128xbf16>
    %226 = arith.mulf %218, %225 : vector<64x128xbf16>
    %c2_131 = arith.constant 2 : index
    %c0_132 = arith.constant 0 : index
    %c0_133 = arith.constant 0 : index
    %227 = vector.load %arg5[%c2_131, %c0_132, %c0_133] : memref<4x1x128xbf16, #tpu.memory_space<vmem>>, vector<1x1x128xbf16>
    %228 = vector.shape_cast %227 : vector<1x1x128xbf16> to vector<1x128xbf16>
    %229 = vector.broadcast %228 : vector<1x128xbf16> to vector<64x128xbf16>
    %230 = arith.mulf %218, %229 : vector<64x128xbf16>
    %c3_134 = arith.constant 3 : index
    %c0_135 = arith.constant 0 : index
    %c0_136 = arith.constant 0 : index
    %231 = vector.load %arg5[%c3_134, %c0_135, %c0_136] : memref<4x1x128xbf16, #tpu.memory_space<vmem>>, vector<1x1x128xbf16>
    %232 = vector.shape_cast %231 : vector<1x1x128xbf16> to vector<1x128xbf16>
    %233 = vector.broadcast %232 : vector<1x128xbf16> to vector<64x128xbf16>
    %234 = arith.mulf %218, %233 : vector<64x128xbf16>
    %235 = tpu.concatenate %222, %226, %230, %234 in 0 : vector<64x128xbf16>, vector<64x128xbf16>, vector<64x128xbf16>, vector<64x128xbf16> -> vector<256x128xbf16>
    %cst_137 = arith.constant dense<0.000000e+00> : vector<64x128xf32>
    %236 = tpu.matmul %217, %235, %cst_137 {dimension_numbers = #tpu.dot_dimension_numbers<[1], [0], [0], [1], [0, 0, 1, 1], [], []>} : vector<64x256xbf16>, vector<256x128xbf16>, vector<64x128xf32> -> vector<64x128xf32>
    %c0_138 = arith.constant 0 : index
    %c0_139 = arith.constant 0 : index
    %237 = vector.load %arg6[%c0_138, %c0_139] : memref<256x128xbf16, #tpu.memory_space<vmem>>, vector<256x128xbf16>
    %cst_140 = arith.constant dense<0.000000e+00> : vector<64x128xf32>
    %238 = tpu.matmul %217, %237, %cst_140 {dimension_numbers = #tpu.dot_dimension_numbers<[1], [0], [0], [1], [0, 0, 1, 1], [], []>} : vector<64x256xbf16>, vector<256x128xbf16>, vector<64x128xf32> -> vector<64x128xf32>
    %cst_141 = arith.constant 1.000000e-30 : f32
    %239 = vector.broadcast %cst_141 : f32 to vector<64x128xf32>
    %240 = arith.maximumf %238, %239 : vector<64x128xf32>
    %241 = tpu.reciprocal %240 {approx = true} : vector<64x128xf32> -> vector<64x128xf32>
    %242 = arith.mulf %236, %241 : vector<64x128xf32>
    %243 = arith.truncf %242 : vector<64x128xf32> to vector<64x128xbf16>
    %c0_142 = arith.constant 0 : index
    %c0_143 = arith.constant 0 : index
    %244 = vector.load %arg8[%c0_142, %c0_143] : memref<128x32xbf16, #tpu.memory_space<vmem>>, vector<128x32xbf16>
    %cst_144 = arith.constant dense<0.000000e+00> : vector<64x32xf32>
    %245 = tpu.matmul %243, %244, %cst_144 {dimension_numbers = #tpu.dot_dimension_numbers<[1], [0], [0], [1], [0, 0, 1, 1], [], []>} : vector<64x128xbf16>, vector<128x32xbf16>, vector<64x32xf32> -> vector<64x32xf32>
    %246 = arith.addf %183, %245 : vector<64x32xf32>
    %c0_145 = arith.constant 0 : index
    %c0_146 = arith.constant 0 : index
    %247 = vector.load %arg9[%c0_145, %c0_146] : memref<1x32xf32, #tpu.memory_space<vmem>>, vector<1x32xf32>
    %248 = vector.broadcast %247 : vector<1x32xf32> to vector<64x32xf32>
    %249 = arith.addf %246, %248 : vector<64x32xf32>
    %250 = arith.index_cast %181 : i32 to index
    %c0_147 = arith.constant 0 : index
    %251 = vector.load %arg22[%250, %c0_147] : memref<256x32xf32, #tpu.memory_space<vmem>>, vector<64x32xf32>
    tpu.vector_store %arg22[%250, %c0_147], %249 {strides = array<i32>} : memref<256x32xf32, #tpu.memory_space<vmem>>, vector<64x32xf32>,
    %c3_i32 = arith.constant 3 : i32
    %c64_i32_148 = arith.constant 64 : i32
    %252 = arith.muli %c3_i32, %c64_i32_148 : i32
    %253 = arith.index_cast %252 : i32 to index
    %c0_149 = arith.constant 0 : index
    %254 = vector.load %arg1[%253, %c0_149] : memref<256x32xf32, #tpu.memory_space<vmem>>, vector<64x32xf32>
    %255 = arith.index_cast %252 : i32 to index
    %c0_150 = arith.constant 0 : index
    %256 = vector.load %arg19[%255, %c0_150] : memref<256x32xbf16, #tpu.memory_space<vmem>>, vector<64x32xbf16>
    %257 = arith.index_cast %252 : i32 to index
    %c0_151 = arith.constant 0 : index
    %258 = vector.load %arg20[%257, %c0_151] : memref<256x32xbf16, #tpu.memory_space<vmem>>, vector<64x32xbf16>
    %259 = arith.index_cast %252 : i32 to index
    %c0_152 = arith.constant 0 : index
    %260 = vector.load %arg21[%259, %c0_152] : memref<256x32xbf16, #tpu.memory_space<vmem>>, vector<64x32xbf16>
    %c0_153 = arith.constant 0 : index
    %c0_154 = arith.constant 0 : index
    %c0_155 = arith.constant 0 : index
    %261 = vector.load %arg4[%c0_153, %c0_154, %c0_155] : memref<4x1x32xbf16, #tpu.memory_space<vmem>>, vector<1x1x32xbf16>
    %262 = vector.shape_cast %261 : vector<1x1x32xbf16> to vector<1x32xbf16>
    %263 = vector.broadcast %262 : vector<1x32xbf16> to vector<64x32xbf16>
    %264 = arith.mulf %260, %263 : vector<64x32xbf16>
    %c1_156 = arith.constant 1 : index
    %c0_157 = arith.constant 0 : index
    %c0_158 = arith.constant 0 : index
    %265 = vector.load %arg4[%c1_156, %c0_157, %c0_158] : memref<4x1x32xbf16, #tpu.memory_space<vmem>>, vector<1x1x32xbf16>
    %266 = vector.shape_cast %265 : vector<1x1x32xbf16> to vector<1x32xbf16>
    %267 = vector.broadcast %266 : vector<1x32xbf16> to vector<64x32xbf16>
    %268 = arith.mulf %260, %267 : vector<64x32xbf16>
    %c2_159 = arith.constant 2 : index
    %c0_160 = arith.constant 0 : index
    %c0_161 = arith.constant 0 : index
    %269 = vector.load %arg4[%c2_159, %c0_160, %c0_161] : memref<4x1x32xbf16, #tpu.memory_space<vmem>>, vector<1x1x32xbf16>
    %270 = vector.shape_cast %269 : vector<1x1x32xbf16> to vector<1x32xbf16>
    %271 = vector.broadcast %270 : vector<1x32xbf16> to vector<64x32xbf16>
    %272 = arith.mulf %260, %271 : vector<64x32xbf16>
    %c3_162 = arith.constant 3 : index
    %c0_163 = arith.constant 0 : index
    %c0_164 = arith.constant 0 : index
    %273 = vector.load %arg4[%c3_162, %c0_163, %c0_164] : memref<4x1x32xbf16, #tpu.memory_space<vmem>>, vector<1x1x32xbf16>
    %274 = vector.shape_cast %273 : vector<1x1x32xbf16> to vector<1x32xbf16>
    %275 = vector.broadcast %274 : vector<1x32xbf16> to vector<64x32xbf16>
    %276 = arith.mulf %260, %275 : vector<64x32xbf16>
    %277 = tpu.concatenate %264, %268, %272, %276 in 0 : vector<64x32xbf16>, vector<64x32xbf16>, vector<64x32xbf16>, vector<64x32xbf16> -> vector<256x32xbf16>
    %cst_165 = arith.constant dense<0.000000e+00> : vector<64x256xf32>
    %278 = tpu.matmul %258, %277, %cst_165 {dimension_numbers = #tpu.dot_dimension_numbers<[1], [1], [0], [0], [0, 0, 1, 0], [], []>} : vector<64x32xbf16>, vector<256x32xbf16>, vector<64x256xf32> -> vector<64x256xf32>
    %279 = arith.index_cast %c3_i32 : i32 to index
    %c0_166 = arith.constant 0 : index
    %c0_167 = arith.constant 0 : index
    %280 = vector.load %arg7[%279, %c0_166, %c0_167] : memref<4x64x256xf32, #tpu.memory_space<vmem>>, vector<1x64x256xf32>
    %281 = vector.shape_cast %280 : vector<1x64x256xf32> to vector<64x256xf32>
    %282 = arith.addf %278, %281 : vector<64x256xf32>
    %cst_168 = arith.constant dense<0xFF800000> : vector<64xf32>
    %283 = vector.multi_reduction <maximumf>, %282, %cst_168 [1] : vector<64x256xf32> to vector<64xf32>
    %284 = vector.shape_cast %283 : vector<64xf32> to vector<64x1xf32>
    %285 = vector.broadcast %284 : vector<64x1xf32> to vector<64x256xf32>
    %286 = arith.subf %282, %285 : vector<64x256xf32>
    %287 = math.exp %286 : vector<64x256xf32>
    %288 = arith.truncf %287 : vector<64x256xf32> to vector<64x256xbf16>
    %289 = tpu.concatenate %256, %256, %256, %256 in 1 : vector<64x32xbf16>, vector<64x32xbf16>, vector<64x32xbf16>, vector<64x32xbf16> -> vector<64x128xbf16>
    %c0_169 = arith.constant 0 : index
    %c0_170 = arith.constant 0 : index
    %c0_171 = arith.constant 0 : index
    %290 = vector.load %arg5[%c0_169, %c0_170, %c0_171] : memref<4x1x128xbf16, #tpu.memory_space<vmem>>, vector<1x1x128xbf16>
    %291 = vector.shape_cast %290 : vector<1x1x128xbf16> to vector<1x128xbf16>
    %292 = vector.broadcast %291 : vector<1x128xbf16> to vector<64x128xbf16>
    %293 = arith.mulf %289, %292 : vector<64x128xbf16>
    %c1_172 = arith.constant 1 : index
    %c0_173 = arith.constant 0 : index
    %c0_174 = arith.constant 0 : index
    %294 = vector.load %arg5[%c1_172, %c0_173, %c0_174] : memref<4x1x128xbf16, #tpu.memory_space<vmem>>, vector<1x1x128xbf16>
    %295 = vector.shape_cast %294 : vector<1x1x128xbf16> to vector<1x128xbf16>
    %296 = vector.broadcast %295 : vector<1x128xbf16> to vector<64x128xbf16>
    %297 = arith.mulf %289, %296 : vector<64x128xbf16>
    %c2_175 = arith.constant 2 : index
    %c0_176 = arith.constant 0 : index
    %c0_177 = arith.constant 0 : index
    %298 = vector.load %arg5[%c2_175, %c0_176, %c0_177] : memref<4x1x128xbf16, #tpu.memory_space<vmem>>, vector<1x1x128xbf16>
    %299 = vector.shape_cast %298 : vector<1x1x128xbf16> to vector<1x128xbf16>
    %300 = vector.broadcast %299 : vector<1x128xbf16> to vector<64x128xbf16>
    %301 = arith.mulf %289, %300 : vector<64x128xbf16>
    %c3_178 = arith.constant 3 : index
    %c0_179 = arith.constant 0 : index
    %c0_180 = arith.constant 0 : index
    %302 = vector.load %arg5[%c3_178, %c0_179, %c0_180] : memref<4x1x128xbf16, #tpu.memory_space<vmem>>, vector<1x1x128xbf16>
    %303 = vector.shape_cast %302 : vector<1x1x128xbf16> to vector<1x128xbf16>
    %304 = vector.broadcast %303 : vector<1x128xbf16> to vector<64x128xbf16>
    %305 = arith.mulf %289, %304 : vector<64x128xbf16>
    %306 = tpu.concatenate %293, %297, %301, %305 in 0 : vector<64x128xbf16>, vector<64x128xbf16>, vector<64x128xbf16>, vector<64x128xbf16> -> vector<256x128xbf16>
    %cst_181 = arith.constant dense<0.000000e+00> : vector<64x128xf32>
    %307 = tpu.matmul %288, %306, %cst_181 {dimension_numbers = #tpu.dot_dimension_numbers<[1], [0], [0], [1], [0, 0, 1, 1], [], []>} : vector<64x256xbf16>, vector<256x128xbf16>, vector<64x128xf32> -> vector<64x128xf32>
    %c0_182 = arith.constant 0 : index
    %c0_183 = arith.constant 0 : index
    %308 = vector.load %arg6[%c0_182, %c0_183] : memref<256x128xbf16, #tpu.memory_space<vmem>>, vector<256x128xbf16>
    %cst_184 = arith.constant dense<0.000000e+00> : vector<64x128xf32>
    %309 = tpu.matmul %288, %308, %cst_184 {dimension_numbers = #tpu.dot_dimension_numbers<[1], [0], [0], [1], [0, 0, 1, 1], [], []>} : vector<64x256xbf16>, vector<256x128xbf16>, vector<64x128xf32> -> vector<64x128xf32>
    %cst_185 = arith.constant 1.000000e-30 : f32
    %310 = vector.broadcast %cst_185 : f32 to vector<64x128xf32>
    %311 = arith.maximumf %309, %310 : vector<64x128xf32>
    %312 = tpu.reciprocal %311 {approx = true} : vector<64x128xf32> -> vector<64x128xf32>
    %313 = arith.mulf %307, %312 : vector<64x128xf32>
    %314 = arith.truncf %313 : vector<64x128xf32> to vector<64x128xbf16>
    %c0_186 = arith.constant 0 : index
    %c0_187 = arith.constant 0 : index
    %315 = vector.load %arg8[%c0_186, %c0_187] : memref<128x32xbf16, #tpu.memory_space<vmem>>, vector<128x32xbf16>
    %cst_188 = arith.constant dense<0.000000e+00> : vector<64x32xf32>
    %316 = tpu.matmul %314, %315, %cst_188 {dimension_numbers = #tpu.dot_dimension_numbers<[1], [0], [0], [1], [0, 0, 1, 1], [], []>} : vector<64x128xbf16>, vector<128x32xbf16>, vector<64x32xf32> -> vector<64x32xf32>
    %317 = arith.addf %254, %316 : vector<64x32xf32>
    %c0_189 = arith.constant 0 : index
    %c0_190 = arith.constant 0 : index
    %318 = vector.load %arg9[%c0_189, %c0_190] : memref<1x32xf32, #tpu.memory_space<vmem>>, vector<1x32xf32>
    %319 = vector.broadcast %318 : vector<1x32xf32> to vector<64x32xf32>
    %320 = arith.addf %317, %319 : vector<64x32xf32>
    %321 = arith.index_cast %252 : i32 to index
    %c0_191 = arith.constant 0 : index
    %322 = vector.load %arg22[%321, %c0_191] : memref<256x32xf32, #tpu.memory_space<vmem>>, vector<64x32xf32>
    tpu.vector_store %arg22[%321, %c0_191], %320 {strides = array<i32>} : memref<256x32xf32, #tpu.memory_space<vmem>>, vector<64x32xf32>,
    %c4_i32 = arith.constant 4 : i32
    %c0_192 = arith.constant 0 : index
    %c0_193 = arith.constant 0 : index
    %323 = vector.load %arg22[%c0_192, %c0_193] : memref<256x32xf32, #tpu.memory_space<vmem>>, vector<256x32xf32>
    %cst_194 = arith.constant dense<0.000000e+00> : vector<256xf32>
    %324 = vector.multi_reduction <add>, %323, %cst_194 [1] : vector<256x32xf32> to vector<256xf32>
    %325 = vector.shape_cast %324 : vector<256xf32> to vector<256x1xf32>
    %cst_195 = arith.constant 3.200000e+01 : f32
    %326 = vector.broadcast %cst_195 : f32 to vector<256x1xf32>
    %327 = arith.divf %325, %326 : vector<256x1xf32>
    %328 = arith.mulf %323, %323 : vector<256x32xf32>
    %cst_196 = arith.constant dense<0.000000e+00> : vector<256xf32>
    %329 = vector.multi_reduction <add>, %328, %cst_196 [1] : vector<256x32xf32> to vector<256xf32>
    %330 = vector.shape_cast %329 : vector<256xf32> to vector<256x1xf32>
    %cst_197 = arith.constant 3.200000e+01 : f32
    %331 = vector.broadcast %cst_197 : f32 to vector<256x1xf32>
    %332 = arith.divf %330, %331 : vector<256x1xf32>
    %333 = arith.mulf %327, %327 : vector<256x1xf32>
    %334 = arith.subf %332, %333 : vector<256x1xf32>
    %335 = vector.broadcast %327 : vector<256x1xf32> to vector<256x32xf32>
    %336 = arith.subf %323, %335 : vector<256x32xf32>
    %cst_198 = arith.constant 9.99999974E-6 : f32
    %337 = vector.broadcast %cst_198 : f32 to vector<256x1xf32>
    %338 = arith.addf %334, %337 : vector<256x1xf32>
    %339 = math.rsqrt %338 : vector<256x1xf32>
    %340 = vector.broadcast %339 : vector<256x1xf32> to vector<256x32xf32>
    %341 = arith.mulf %336, %340 : vector<256x32xf32>
    %c0_199 = arith.constant 0 : index
    %c0_200 = arith.constant 0 : index
    %342 = vector.load %arg12[%c0_199, %c0_200] : memref<1x32xf32, #tpu.memory_space<vmem>>, vector<1x32xf32>
    %343 = vector.broadcast %342 : vector<1x32xf32> to vector<256x32xf32>
    %344 = arith.mulf %341, %343 : vector<256x32xf32>
    %c0_201 = arith.constant 0 : index
    %c0_202 = arith.constant 0 : index
    %345 = vector.load %arg13[%c0_201, %c0_202] : memref<1x32xf32, #tpu.memory_space<vmem>>, vector<1x32xf32>
    %346 = vector.broadcast %345 : vector<1x32xf32> to vector<256x32xf32>
    %347 = arith.addf %344, %346 : vector<256x32xf32>
    %348 = arith.truncf %347 : vector<256x32xf32> to vector<256x32xbf16>
    %c0_203 = arith.constant 0 : index
    %c0_204 = arith.constant 0 : index
    %349 = vector.load %arg14[%c0_203, %c0_204] : memref<32x128xbf16, #tpu.memory_space<vmem>>, vector<32x128xbf16>
    %cst_205 = arith.constant dense<0.000000e+00> : vector<256x128xf32>
    %350 = tpu.matmul %348, %349, %cst_205 {dimension_numbers = #tpu.dot_dimension_numbers<[1], [0], [0], [1], [0, 0, 1, 1], [], []>} : vector<256x32xbf16>, vector<32x128xbf16>, vector<256x128xf32> -> vector<256x128xf32>
    %c0_206 = arith.constant 0 : index
    %c0_207 = arith.constant 0 : index
    %351 = vector.load %arg15[%c0_206, %c0_207] : memref<1x128xf32, #tpu.memory_space<vmem>>, vector<1x128xf32>
    %352 = vector.broadcast %351 : vector<1x128xf32> to vector<256x128xf32>
    %353 = arith.addf %350, %352 : vector<256x128xf32>
    %cst_208 = arith.constant 5.000000e-01 : f32
    %354 = vector.broadcast %cst_208 : f32 to vector<256x128xf32>
    %355 = arith.mulf %354, %353 : vector<256x128xf32>
    %cst_209 = arith.constant 4.471500e-02 : f32
    %356 = vector.broadcast %cst_209 : f32 to vector<256x128xf32>
    %357 = arith.mulf %356, %353 : vector<256x128xf32>
    %358 = arith.mulf %357, %353 : vector<256x128xf32>
    %359 = arith.mulf %358, %353 : vector<256x128xf32>
    %360 = arith.addf %353, %359 : vector<256x128xf32>
    %cst_210 = arith.constant 0.797884583 : f32
    %361 = vector.broadcast %cst_210 : f32 to vector<256x128xf32>
    %362 = arith.mulf %361, %360 : vector<256x128xf32>
    %363 = math.tanh %362 : vector<256x128xf32>
    %cst_211 = arith.constant 1.000000e+00 : f32
    %364 = vector.broadcast %cst_211 : f32 to vector<256x128xf32>
    %365 = arith.addf %364, %363 : vector<256x128xf32>
    %366 = arith.mulf %355, %365 : vector<256x128xf32>
    %367 = arith.truncf %366 : vector<256x128xf32> to vector<256x128xbf16>
    %c0_212 = arith.constant 0 : index
    %c0_213 = arith.constant 0 : index
    %368 = vector.load %arg16[%c0_212, %c0_213] : memref<128x32xbf16, #tpu.memory_space<vmem>>, vector<128x32xbf16>
    %cst_214 = arith.constant dense<0.000000e+00> : vector<256x32xf32>
    %369 = tpu.matmul %367, %368, %cst_214 {dimension_numbers = #tpu.dot_dimension_numbers<[1], [0], [0], [1], [0, 0, 1, 1], [], []>} : vector<256x128xbf16>, vector<128x32xbf16>, vector<256x32xf32> -> vector<256x32xf32>
    %c0_215 = arith.constant 0 : index
    %c0_216 = arith.constant 0 : index
    %370 = vector.load %arg17[%c0_215, %c0_216] : memref<1x32xf32, #tpu.memory_space<vmem>>, vector<1x32xf32>
    %371 = vector.broadcast %370 : vector<1x32xf32> to vector<256x32xf32>
    %372 = arith.addf %369, %371 : vector<256x32xf32>
    %373 = arith.addf %323, %372 : vector<256x32xf32>
    %c0_217 = arith.constant 0 : index
    %c0_218 = arith.constant 0 : index
    %374 = vector.load %arg18[%c0_217, %c0_218] : memref<256x32xf32, #tpu.memory_space<vmem>>, vector<256x32xf32>
    tpu.vector_store %arg18[%c0_217, %c0_218], %373 {strides = array<i32>} : memref<256x32xf32, #tpu.memory_space<vmem>>, vector<256x32xf32>,
    return
  }
  func.func @transform_0(%arg0: i32) -> (i32, i32) {
    %c0_i32 = arith.constant 0 : i32
    %c0_i32_0 = arith.constant 0 : i32
    return %arg0, %c0_i32 : i32, i32
  }
  func.func @transform_1(%arg0: i32) -> (i32, i32) {
    %c0_i32 = arith.constant 0 : i32
    %c0_i32_0 = arith.constant 0 : i32
    %c0_i32_1 = arith.constant 0 : i32
    return %c0_i32, %c0_i32_0 : i32, i32
  }
  func.func @transform_2(%arg0: i32) -> (i32, i32) {
    %c0_i32 = arith.constant 0 : i32
    %c0_i32_0 = arith.constant 0 : i32
    %c0_i32_1 = arith.constant 0 : i32
    return %c0_i32, %c0_i32_0 : i32, i32
  }
  func.func @transform_3(%arg0: i32) -> (i32, i32, i32) {
    %c0_i32 = arith.constant 0 : i32
    %c0_i32_0 = arith.constant 0 : i32
    %c0_i32_1 = arith.constant 0 : i32
    %c0_i32_2 = arith.constant 0 : i32
    return %c0_i32, %c0_i32_0, %c0_i32_1 : i32, i32, i32
  }
  func.func @transform_4(%arg0: i32) -> (i32, i32, i32) {
    %c0_i32 = arith.constant 0 : i32
    %c0_i32_0 = arith.constant 0 : i32
    %c0_i32_1 = arith.constant 0 : i32
    %c0_i32_2 = arith.constant 0 : i32
    return %c0_i32, %c0_i32_0, %c0_i32_1 : i32, i32, i32
  }
  func.func @transform_5(%arg0: i32) -> (i32, i32) {
    %c0_i32 = arith.constant 0 : i32
    %c0_i32_0 = arith.constant 0 : i32
    %c0_i32_1 = arith.constant 0 : i32
    return %c0_i32, %c0_i32_0 : i32, i32
  }
  func.func @transform_6(%arg0: i32) -> (i32, i32, i32) {
    %c0_i32 = arith.constant 0 : i32
    %c0_i32_0 = arith.constant 0 : i32
    %c0_i32_1 = arith.constant 0 : i32
    %c0_i32_2 = arith.constant 0 : i32
    return %c0_i32, %c0_i32_0, %c0_i32_1 : i32, i32, i32
  }
  func.func @transform_7(%arg0: i32) -> (i32, i32) {
    %c0_i32 = arith.constant 0 : i32
    %c0_i32_0 = arith.constant 0 : i32
    %c0_i32_1 = arith.constant 0 : i32
    return %c0_i32, %c0_i32_0 : i32, i32
  }
  func.func @transform_8(%arg0: i32) -> (i32, i32) {
    %c0_i32 = arith.constant 0 : i32
    %c0_i32_0 = arith.constant 0 : i32
    %c0_i32_1 = arith.constant 0 : i32
    return %c0_i32, %c0_i32_0 : i32, i32
  }
  func.func @transform_9(%arg0: i32) -> (i32, i32) {
    %c0_i32 = arith.constant 0 : i32
    %c0_i32_0 = arith.constant 0 : i32
    %c0_i32_1 = arith.constant 0 : i32
    return %c0_i32, %c0_i32_0 : i32, i32
  }
  func.func @transform_10(%arg0: i32) -> (i32, i32) {
    %c0_i32 = arith.constant 0 : i32
    %c0_i32_0 = arith.constant 0 : i32
    %c0_i32_1 = arith.constant 0 : i32
    return %c0_i32, %c0_i32_0 : i32, i32
  }
  func.func @transform_11(%arg0: i32) -> (i32, i32) {
    %c0_i32 = arith.constant 0 : i32
    %c0_i32_0 = arith.constant 0 : i32
    %c0_i32_1 = arith.constant 0 : i32
    return %c0_i32, %c0_i32_0 : i32, i32
  }
  func.func @transform_12(%arg0: i32) -> (i32, i32) {
    %c0_i32 = arith.constant 0 : i32
    %c0_i32_0 = arith.constant 0 : i32
    %c0_i32_1 = arith.constant 0 : i32
    return %c0_i32, %c0_i32_0 : i32, i32
  }
  func.func @transform_13(%arg0: i32) -> (i32, i32) {
    %c0_i32 = arith.constant 0 : i32
    %c0_i32_0 = arith.constant 0 : i32
    %c0_i32_1 = arith.constant 0 : i32
    return %c0_i32, %c0_i32_0 : i32, i32
  }
  func.func @transform_14(%arg0: i32) -> (i32, i32) {
    %c0_i32 = arith.constant 0 : i32
    %c0_i32_0 = arith.constant 0 : i32
    %c0_i32_1 = arith.constant 0 : i32
    return %c0_i32, %c0_i32_0 : i32, i32
  }
  func.func @transform_15(%arg0: i32) -> (i32, i32) {
    %c0_i32 = arith.constant 0 : i32
    %c0_i32_0 = arith.constant 0 : i32
    %c0_i32_1 = arith.constant 0 : i32
    return %c0_i32, %c0_i32_0 : i32, i32
  }
  func.func @transform_16(%arg0: i32) -> (i32, i32) {
    %c0_i32 = arith.constant 0 : i32
    %c0_i32_0 = arith.constant 0 : i32
    %c0_i32_1 = arith.constant 0 : i32
    return %c0_i32, %c0_i32_0 : i32, i32
  }
  func.func @transform_17(%arg0: i32) -> (i32, i32) {
    %c0_i32 = arith.constant 0 : i32
    %c0_i32_0 = arith.constant 0 : i32
    return %arg0, %c0_i32 : i32, i32
  }
}

</mosaic_0001>

<bundles_post_ra>
// kernel: tile.15
= control target key start
LH: loop header
LB: loop body
LE: loop exit
PB: predicated region body
PF: predicated region fallthrough
CT: control target
= control target key end

     0   :  { %s4381_s22 = smov 3  ;;  %vm1283_vm0 = vcmask 523264   ;;  %s4383_s23 = smov 3  ;;  %vm2819_vm1 = vcmask 1047556   ;;  %vm2823_vm2 = vcmask 1048064   ;;  %s6824_s0 = inlined_call_operand.vmem [shape: f32[4,64,4,64], index: 0, kind: input, shape index: {}]   ;;  %s6825_s1 = inlined_call_operand.vmem [shape: f32[4,64,256], index: 1, kind: output, shape index: {}]  }
   0x1   :  { %v4020_v0 = vld [vmem:[%s6824_s0 + $0x1c] sm:$0xf]  ;;  %v4021_v1 = vld [vmem:[%s6824_s0 + $0x18] sm:$0xf]  ;;  %v4022_v2 = vld [vmem:[%s6824_s0 + $0x14] sm:$0xf] }
   0x2   :  { %1249 = vst [vmem:[#allocation0 + $0x38] sm:$0xf] %v4020_v0  ;;  %1254 = vst [vmem:[#allocation0 + $0x30] sm:$0xf] %v4021_v1  ;;  %v4023_v3 = vld [vmem:[%s6824_s0 + $0x10] sm:$0xf] }
   0x3   :  { %1259 = vst [vmem:[#allocation0 + $0x28] sm:$0xf] %v4022_v2  ;;  %v4024_v4 = vld [vmem:[%s6824_s0 + $0xc] sm:$0xf]  ;;  %v4025_v5 = vld [vmem:[%s6824_s0 + $0x8] sm:$0xf] }
   0x4   :  { %1264 = vst [vmem:[#allocation0 + $0x20] sm:$0xf] %v4023_v3  ;;  %1269 = vst [vmem:[#allocation0 + $0x18] sm:$0xf] %v4024_v4  ;;  %v4026_v6 = vld [vmem:[%s6824_s0 + $0x4] sm:$0xf] }
   0x5   :  { %1274 = vst [vmem:[#allocation0 + $0x10] sm:$0xf] %v4025_v5  ;;  %v1279_v7 = vld [vmem:[%s6824_s0] sm:$0xf]  ;;  %1278 = vst [vmem:[#allocation0 + $0x8] sm:$0xf] %v4026_v6 }
   0x6   :  { %1280 = vst [vmem:[#allocation0] sm:$0xf] %v1279_v7  ;;  %s4385_s24 = smov 3  ;;  %v4019_v8 = vld [vmem:[%s6824_s0 + $0x20] sm:$0xf]  ;;  %s1298_s27 = smov 3 }
   0x7   :  { %s1304_s28 = smov 3  ;;  %1244 = vst [vmem:[#allocation0 + $0x40] sm:$0xf] %v4019_v8  ;;  %v3988_v9 = vld [vmem:[%s6824_s0 + $0x9c] sm:$0xf]  ;;  %s1310_s4 = smov 3 }
   0x8   :  { %v3989_v10 = vld [vmem:[%s6824_s0 + $0x98] sm:$0xf]  ;;  %s1316_s5 = smov 3  ;;  %1089 = vst [vmem:[#allocation0 + $0x138] sm:$0xf] %v3988_v9  ;;  %s4402_s10 = smov 3 }
   0x9   :  { %1094 = vst [vmem:[#allocation0 + $0x130] sm:$0xf] %v3989_v10  ;;  %v3990_v11 = vld [vmem:[%s6824_s0 + $0x94] sm:$0xf]  ;;  %v3991_v12 = vld [vmem:[%s6824_s0 + $0x90] sm:$0xf] }
   0xa   :  { %1099 = vst [vmem:[#allocation0 + $0x128] sm:$0xf] %v3990_v11  ;;  %1104 = vst [vmem:[#allocation0 + $0x120] sm:$0xf] %v3991_v12  ;;  %v3992_v13 = vld [vmem:[%s6824_s0 + $0x8c] sm:$0xf] }
   0xb   :  { %v3993_v14 = vld [vmem:[%s6824_s0 + $0x88] sm:$0xf]  ;;  %1109 = vst [vmem:[#allocation0 + $0x118] sm:$0xf] %v3992_v13  ;;  %v3994_v15 = vld [vmem:[%s6824_s0 + $0x84] sm:$0xf] }
   0xc   :  { %1114 = vst [vmem:[#allocation0 + $0x110] sm:$0xf] %v3993_v14  ;;  %v3995_v16 = vld [vmem:[%s6824_s0 + $0x80] sm:$0xf]  ;;  %v3996_v17 = vld [vmem:[%s6824_s0 + $0x7c] sm:$0xf] }
   0xd   :  { %v1311_v18 = vld [vmem:[#allocation0 + $0x28] ss:$2 sm:%s1310_s4]   ;;  %1119 = vst [vmem:[#allocation0 + $0x108] sm:$0xf] %v3994_v15  ;;  %1124 = vst [vmem:[#allocation0 + $0x100] sm:$0xf] %v3995_v16 }
   0xe   :  { %v1317_v19 = vld [vmem:[#allocation0 + $0x30] ss:$2 sm:%s1316_s5]   ;;  %1129 = vst [vmem:[#allocation0 + $0xf8] sm:$0xf] %v3996_v17  ;;  %s4419_s21 = smov 3  ;;  %s4421_s25 = smov 3 }
   0xf   :  { %v1293_v20 = vld [vmem:[#allocation0 + $0x10] ss:$2 sm:%s4385_s24]   ;;  %v1305_v22 = vld [vmem:[#allocation0 + $0x20] ss:$2 sm:%s1304_s28]   ;;  %s1478_s4 = smov 3  ;;  %s1484_s5 = smov 3 }
  0x10   :  { %v1299_v21 = vld [vmem:[#allocation0 + $0x18] ss:$2 sm:%s1298_s27]   ;;  %4031 = vst.msk [vmem:[%s6825_s1 + $0x5] ss:$8 sm:$0x3] %vm1283_vm0, %v1311_v18   ;;  %s1496_s11 = smov 3 }
  0x11   :  { %4032 = vst.msk [vmem:[%s6825_s1 + $0x6] ss:$8 sm:$0x3] %vm1283_vm0, %v1317_v19   ;;  %v1282_v23 = vld [vmem:[#allocation0] ss:$2 sm:%s4381_s22]   ;;  %s4346_s14 = smov 64  }
  0x12   :  { %v1287_v24 = vld [vmem:[#allocation0 + $0x8] ss:$2 sm:%s4383_s23]   ;;  %4028 = vst.msk [vmem:[%s6825_s1 + $0x2] ss:$8 sm:$0x3] %vm1283_vm0, %v1293_v20   ;;  %s1502_s17 = smov 3 }
  0x13   :  { %4029 = vst.msk [vmem:[%s6825_s1 + $0x3] ss:$8 sm:$0x3] %vm1283_vm0, %v1299_v21   ;;  %4030 = vst.msk [vmem:[%s6825_s1 + $0x4] ss:$8 sm:$0x3] %vm1283_vm0, %v1305_v22  }
  0x14   :  { %1284 = vst.msk [vmem:[%s6825_s1] ss:$8 sm:$0x3] %vm1283_vm0, %v1282_v23   ;;  %4027 = vst.msk [vmem:[%s6825_s1 + $0x1] ss:$8 sm:$0x3] %vm1283_vm0, %v1287_v24  }
  0x15   :  { %v2816_v25 = vld [vmem:[#allocation0 + $0x1] ss:$8 sm:$0xf]   ;;  %v1323_v28 = vld [vmem:[#allocation0 + $0x38] ss:$2 sm:%s4402_s10]   ;;  %s1490_s10 = smov 3 }
  0x16   :  { %v2818_v26 = vld [vmem:[#allocation0 + $0x1] ss:$8 sm:$0xf0]   ;;  %4033 = vst.msk [vmem:[%s6825_s1 + $0x7] ss:$8 sm:$0x3] %vm1283_vm0, %v1323_v28  }
  0x17   :  { %v2820_v27 = vsel %vm2819_vm1, %v2818_v26, %v2816_v25  ;;  %v3987_v29 = vld [vmem:[%s6824_s0 + $0xa0] sm:$0xf]  ;;  %s1508_s18 = smov 3  ;;  %v4004_v31 = vld [vmem:[%s6824_s0 + $0x5c] sm:$0xf]  ;;  %s1514_s6 = smov 3 }
  0x18   :  { %2821 = vrot.lane.b32.xlu0 %v2820_v27, %s4346_s14  ;;  %v1497_v30 = vld [vmem:[#allocation0 + $0x120] ss:$2 sm:%s1496_s11]   ;;  %1084 = vst [vmem:[#allocation0 + $0x140] sm:$0xf] %v3987_v29  ;;  %v1485_v32 = vld [vmem:[#allocation0 + $0x110] ss:$2 sm:%s1484_s5]  }
  0x19   :  { %v1491_v33 = vld [vmem:[#allocation0 + $0x118] ss:$2 sm:%s1490_s10]   ;;  %4062 = vst.msk [vmem:[%s6825_s1 + $0x44] ss:$8 sm:$0x3] %vm1283_vm0, %v1497_v30   ;;  %s4504_s11 = smov 3 }
  0x1a   :  { %v1503_v34 = vld [vmem:[#allocation0 + $0x128] ss:$2 sm:%s1502_s17]   ;;  %1169 = vst [vmem:[#allocation0 + $0xb8] sm:$0xf] %v4004_v31  ;;  %v1467_v35 = vld [vmem:[#allocation0 + $0xf8] ss:$2 sm:%s4419_s21]  }
  0x1b   :  { %v1473_v36 = vld [vmem:[#allocation0 + $0x100] ss:$2 sm:%s4421_s25]   ;;  %4060 = vst.msk [vmem:[%s6825_s1 + $0x42] ss:$8 sm:$0x3] %vm1283_vm0, %v1485_v32   ;;  %s4554_s16 = smov 3 }
  0x1c   :  { %v1479_v37 = vld [vmem:[#allocation0 + $0x108] ss:$2 sm:%s1478_s4]   ;;  %4061 = vst.msk [vmem:[%s6825_s1 + $0x43] ss:$8 sm:$0x3] %vm1283_vm0, %v1491_v33   ;;  %s4556_s17 = smov 3 }
  0x1d   :  { %4063 = vst.msk [vmem:[%s6825_s1 + $0x45] ss:$8 sm:$0x3] %vm1283_vm0, %v1503_v34   ;;  %4057 = vst.msk [vmem:[%s6825_s1 + $0x37] ss:$8 sm:$0x3] %vm1283_vm0, %v1467_v35  }
  0x1e   :  { %4058 = vst.msk [vmem:[%s6825_s1 + $0x40] ss:$8 sm:$0x3] %vm1283_vm0, %v1473_v36   ;;  %4059 = vst.msk [vmem:[%s6825_s1 + $0x41] ss:$8 sm:$0x3] %vm1283_vm0, %v1479_v37  }
  0x1f   :  { %v2837_v38 = vld [vmem:[#allocation0 + $0x101] ss:$8 sm:$0xf]   ;;  %v1509_v39 = vld [vmem:[#allocation0 + $0x130] ss:$2 sm:%s1508_s18]   ;;  %s1586_s26 = smov 3 }
  0x20   :  { %v2839_v40 = vld [vmem:[#allocation0 + $0x101] ss:$8 sm:$0xf0]   ;;  %4064 = vst.msk [vmem:[%s6825_s1 + $0x46] ss:$8 sm:$0x3] %vm1283_vm0, %v1509_v39  }
  0x21   :  { %v4005_v41 = vld [vmem:[%s6824_s0 + $0x58] sm:$0xf]  ;;  %v2841_v42 = vsel %vm2819_vm1, %v2839_v40, %v2837_v38  ;;  %v4006_v43 = vld [vmem:[%s6824_s0 + $0x54] sm:$0xf]  ;;  %v4007_v44 = vld [vmem:[%s6824_s0 + $0x50] sm:$0xf] }
  0x22   :  { %1174 = vst [vmem:[#allocation0 + $0xb0] sm:$0xf] %v4005_v41  ;;  %v4008_v45 = vld [vmem:[%s6824_s0 + $0x4c] sm:$0xf]  ;;  %2842 = vrot.lane.b32.xlu1 %v2841_v42, %s4346_s14  ;;  %1179 = vst [vmem:[#allocation0 + $0xa8] sm:$0xf] %v4006_v43 }
  0x23   :  { %1184 = vst [vmem:[#allocation0 + $0xa0] sm:$0xf] %v4007_v44  ;;  %1189 = vst [vmem:[#allocation0 + $0x98] sm:$0xf] %v4008_v45  ;;  %v4009_v46 = vld [vmem:[%s6824_s0 + $0x48] sm:$0xf] }
  0x24   :  { %v4010_v47 = vld [vmem:[%s6824_s0 + $0x44] sm:$0xf]  ;;  %v4011_v48 = vld [vmem:[%s6824_s0 + $0x40] sm:$0xf]  ;;  %1194 = vst [vmem:[#allocation0 + $0x90] sm:$0xf] %v4009_v46 }
  0x25   :  { %v1515_v49 = vld [vmem:[#allocation0 + $0x138] ss:$2 sm:%s1514_s6]   ;;  %1199 = vst [vmem:[#allocation0 + $0x88] sm:$0xf] %v4010_v47  ;;  %1204 = vst [vmem:[#allocation0 + $0x80] sm:$0xf] %v4011_v48 }
  0x26   :  { %v3972_v50 = vld [vmem:[%s6824_s0 + $0xdc] sm:$0xf]  ;;  %v3973_v51 = vld [vmem:[%s6824_s0 + $0xd8] sm:$0xf]  ;;  %v3974_v52 = vld [vmem:[%s6824_s0 + $0xd4] sm:$0xf] }
  0x27   :  { %4065 = vst.msk [vmem:[%s6825_s1 + $0x47] ss:$8 sm:$0x3] %vm1283_vm0, %v1515_v49   ;;  %1009 = vst [vmem:[#allocation0 + $0x1b8] sm:$0xf] %v3972_v50  ;;  %s1592_s21 = smov 3 }
  0x28   :  { %1014 = vst [vmem:[#allocation0 + $0x1b0] sm:$0xf] %v3973_v51  ;;  %v3975_v53 = vld [vmem:[%s6824_s0 + $0xd0] sm:$0xf]  ;;  %v3976_v54 = vld [vmem:[%s6824_s0 + $0xcc] sm:$0xf] }
  0x29   :  { %1019 = vst [vmem:[#allocation0 + $0x1a8] sm:$0xf] %v3974_v52  ;;  %1024 = vst [vmem:[#allocation0 + $0x1a0] sm:$0xf] %v3975_v53  ;;  %v3977_v55 = vld [vmem:[%s6824_s0 + $0xc8] sm:$0xf] }
  0x2a   :  { %1029 = vst [vmem:[#allocation0 + $0x198] sm:$0xf] %v3976_v54  ;;  %v3978_v56 = vld [vmem:[%s6824_s0 + $0xc4] sm:$0xf]  ;;  %v3979_v57 = vld [vmem:[%s6824_s0 + $0xc0] sm:$0xf] }
  0x2b   :  { %1034 = vst [vmem:[#allocation0 + $0x190] sm:$0xf] %v3977_v55  ;;  %1039 = vst [vmem:[#allocation0 + $0x188] sm:$0xf] %v3978_v56  ;;  %v3956_v58 = vld [vmem:[%s6824_s0 + $0x11c] sm:$0xf] }
  0x2c   :  { %1044 = vst [vmem:[#allocation0 + $0x180] sm:$0xf] %v3979_v57  ;;  %v3957_v59 = vld [vmem:[%s6824_s0 + $0x118] sm:$0xf]  ;;  %929 = vst [vmem:[#allocation0 + $0x238] sm:$0xf] %v3956_v58 }
  0x2d   :  { %934 = vst [vmem:[#allocation0 + $0x230] sm:$0xf] %v3957_v59  ;;  %v3958_v60 = vld [vmem:[%s6824_s0 + $0x114] sm:$0xf]  ;;  %v3959_v61 = vld [vmem:[%s6824_s0 + $0x110] sm:$0xf] }
  0x2e   :  { %s1598_s23 = smov 3  ;;  %s1604_s29 = smov 3  ;;  %939 = vst [vmem:[#allocation0 + $0x228] sm:$0xf] %v3958_v60  ;;  %944 = vst [vmem:[#allocation0 + $0x220] sm:$0xf] %v3959_v61 }
  0x2f   :  { %v3960_v62 = vld [vmem:[%s6824_s0 + $0x10c] sm:$0xf]  ;;  %v3961_v63 = vld [vmem:[%s6824_s0 + $0x108] sm:$0xf]  ;;  %v3962_v1 = vld [vmem:[%s6824_s0 + $0x104] sm:$0xf] }
  0x30   :  { %v2828_v0 = vld [vmem:[#allocation0 + $0x81] ss:$8 sm:$0xf0]   ;;  %949 = vst [vmem:[#allocation0 + $0x218] sm:$0xf] %v3960_v62  ;;  %s4579_s7 = smov 3 }
  0x31   :  { %954 = vst [vmem:[#allocation0 + $0x210] sm:$0xf] %v3961_v63  ;;  %v2826_v2 = vld [vmem:[#allocation0 + $0x81] ss:$8 sm:$0xf]   ;;  %s4584_s10 = smov 3 }
  0x32   :  { %959 = vst [vmem:[#allocation0 + $0x208] sm:$0xf] %v3962_v1  ;;  %v3963_v3 = vld [vmem:[%s6824_s0 + $0x100] sm:$0xf]  ;;  %v2830_v4 = vsel %vm2819_vm1, %v2828_v0, %v2826_v2  ;;  %v1605_v5 = vld [vmem:[#allocation0 + $0x1b0] ss:$2 sm:%s1604_s29]  }
  0x33   :  { %964 = vst [vmem:[#allocation0 + $0x200] sm:$0xf] %v3963_v3  ;;  %v3940_v6 = vld [vmem:[%s6824_s0 + $0x15c] sm:$0xf]  ;;  %v3941_v7 = vld [vmem:[%s6824_s0 + $0x158] sm:$0xf]  ;;  %2831 = vrot.lane.b32.xlu0 %v2830_v4, %s4346_s14 }
  0x34   :  { %v1587_v8 = vld [vmem:[#allocation0 + $0x198] ss:$2 sm:%s1586_s26]   ;;  %v1599_v10 = vld [vmem:[#allocation0 + $0x1a8] ss:$2 sm:%s1598_s23]   ;;  %849 = vst [vmem:[#allocation0 + $0x2b8] sm:$0xf] %v3940_v6 }
  0x35   :  { %v1593_v9 = vld [vmem:[#allocation0 + $0x1a0] ss:$2 sm:%s1592_s21]   ;;  %4080 = vst.msk [vmem:[%s6825_s1 + $0x66] ss:$8 sm:$0x3] %vm1283_vm0, %v1605_v5   ;;  %s4629_s3 = smov 3 }
  0x36   :  { %854 = vst [vmem:[#allocation0 + $0x2b0] sm:$0xf] %v3941_v7  ;;  %v1569_v11 = vld [vmem:[#allocation0 + $0x180] ss:$2 sm:%s4504_s11]   ;;  %v1581_v13 = vld [vmem:[#allocation0 + $0x190] ss:$2 sm:%s4556_s17]  }
  0x37   :  { %v1575_v12 = vld [vmem:[#allocation0 + $0x188] ss:$2 sm:%s4554_s16]   ;;  %4077 = vst.msk [vmem:[%s6825_s1 + $0x63] ss:$8 sm:$0x3] %vm1283_vm0, %v1587_v8   ;;  %s4647_s20 = smov 3 }
  0x38   :  { %4078 = vst.msk [vmem:[%s6825_s1 + $0x64] ss:$8 sm:$0x3] %vm1283_vm0, %v1593_v9   ;;  %4079 = vst.msk [vmem:[%s6825_s1 + $0x65] ss:$8 sm:$0x3] %vm1283_vm0, %v1599_v10  }
  0x39   :  { %4074 = vst.msk [vmem:[%s6825_s1 + $0x60] ss:$8 sm:$0x3] %vm1283_vm0, %v1569_v11   ;;  %4075 = vst.msk [vmem:[%s6825_s1 + $0x61] ss:$8 sm:$0x3] %vm1283_vm0, %v1575_v12  }
  0x3a   :  { %4076 = vst.msk [vmem:[%s6825_s1 + $0x62] ss:$8 sm:$0x3] %vm1283_vm0, %v1581_v13   ;;  %v2848_v14 = vld [vmem:[#allocation0 + $0x181] ss:$8 sm:$0xf]  }
  0x3b   :  { %v2850_v15 = vld [vmem:[#allocation0 + $0x181] ss:$8 sm:$0xf0]   ;;  %v3942_v18 = vld [vmem:[%s6824_s0 + $0x154] sm:$0xf]  ;;  %s4649_s11 = smov 3 }
  0x3c   :  { %v2852_v16 = vsel %vm2819_vm1, %v2850_v15, %v2848_v14  ;;  %v2861_v17 = vld [vmem:[#allocation0 + $0x201] ss:$8 sm:$0xf0]   ;;  %859 = vst [vmem:[#allocation0 + $0x2a8] sm:$0xf] %v3942_v18  ;;  %s4654_s24 = smov 3 }
  0x3d   :  { %2853 = vrot.lane.b32.xlu1 %v2852_v16, %s4346_s14  ;;  %v3943_v19 = vld [vmem:[%s6824_s0 + $0x150] sm:$0xf]  ;;  %v3944_v20 = vld [vmem:[%s6824_s0 + $0x14c] sm:$0xf]  ;;  %v3945_v21 = vld [vmem:[%s6824_s0 + $0x148] sm:$0xf] }
  0x3e   :  { %864 = vst [vmem:[#allocation0 + $0x2a0] sm:$0xf] %v3943_v19  ;;  %869 = vst [vmem:[#allocation0 + $0x298] sm:$0xf] %v3944_v20  ;;  %v3946_v22 = vld [vmem:[%s6824_s0 + $0x144] sm:$0xf] }
  0x3f   :  { %874 = vst [vmem:[#allocation0 + $0x290] sm:$0xf] %v3945_v21  ;;  %v3947_v23 = vld [vmem:[%s6824_s0 + $0x140] sm:$0xf]  ;;  %879 = vst [vmem:[#allocation0 + $0x288] sm:$0xf] %v3946_v22 }
  0x40   :  { %v2859_v24 = vld [vmem:[#allocation0 + $0x201] ss:$8 sm:$0xf]   ;;  %884 = vst [vmem:[#allocation0 + $0x280] sm:$0xf] %v3947_v23  ;;  %s1976_s4 = smov 3 }
  0x41   :  { %v3924_v25 = vld [vmem:[%s6824_s0 + $0x19c] sm:$0xf]  ;;  %v2863_v26 = vsel %vm2819_vm1, %v2861_v17, %v2859_v24  ;;  %v3925_v27 = vld [vmem:[%s6824_s0 + $0x198] sm:$0xf]  ;;  %v3926_v28 = vld [vmem:[%s6824_s0 + $0x194] sm:$0xf] }
  0x42   :  { %769 = vst [vmem:[#allocation0 + $0x338] sm:$0xf] %v3924_v25  ;;  %v3927_v29 = vld [vmem:[%s6824_s0 + $0x190] sm:$0xf]  ;;  %2864 = vrot.lane.b32.xlu0 %v2863_v26, %s4346_s14  ;;  %774 = vst [vmem:[#allocation0 + $0x330] sm:$0xf] %v3925_v27 }
  0x43   :  { %779 = vst [vmem:[#allocation0 + $0x328] sm:$0xf] %v3926_v28  ;;  %784 = vst [vmem:[#allocation0 + $0x320] sm:$0xf] %v3927_v29  ;;  %v3928_v30 = vld [vmem:[%s6824_s0 + $0x18c] sm:$0xf] }
  0x44   :  { %v3929_v31 = vld [vmem:[%s6824_s0 + $0x188] sm:$0xf]  ;;  %v3930_v32 = vld [vmem:[%s6824_s0 + $0x184] sm:$0xf]  ;;  %789 = vst [vmem:[#allocation0 + $0x318] sm:$0xf] %v3928_v30 }
  0x45   :  { %794 = vst [vmem:[#allocation0 + $0x310] sm:$0xf] %v3929_v31  ;;  %799 = vst [vmem:[#allocation0 + $0x308] sm:$0xf] %v3930_v32  ;;  %v3931_v33 = vld [vmem:[%s6824_s0 + $0x180] sm:$0xf] }
  0x46   :  { %v3908_v34 = vld [vmem:[%s6824_s0 + $0x1dc] sm:$0xf]  ;;  %v3909_v35 = vld [vmem:[%s6824_s0 + $0x1d8] sm:$0xf]  ;;  %804 = vst [vmem:[#allocation0 + $0x300] sm:$0xf] %v3931_v33 }
  0x47   :  { %689 = vst [vmem:[#allocation0 + $0x3b8] sm:$0xf] %v3908_v34  ;;  %694 = vst [vmem:[#allocation0 + $0x3b0] sm:$0xf] %v3909_v35  ;;  %v3910_v36 = vld [vmem:[%s6824_s0 + $0x1d4] sm:$0xf] }
  0x48   :  { %v3911_v37 = vld [vmem:[%s6824_s0 + $0x1d0] sm:$0xf]  ;;  %v3912_v38 = vld [vmem:[%s6824_s0 + $0x1cc] sm:$0xf]  ;;  %699 = vst [vmem:[#allocation0 + $0x3a8] sm:$0xf] %v3910_v36 }
  0x49   :  { %704 = vst [vmem:[#allocation0 + $0x3a0] sm:$0xf] %v3911_v37  ;;  %709 = vst [vmem:[#allocation0 + $0x398] sm:$0xf] %v3912_v38  ;;  %v3913_v39 = vld [vmem:[%s6824_s0 + $0x1c8] sm:$0xf] }
  0x4a   :  { %v3914_v40 = vld [vmem:[%s6824_s0 + $0x1c4] sm:$0xf]  ;;  %v3915_v41 = vld [vmem:[%s6824_s0 + $0x1c0] sm:$0xf]  ;;  %v1773_v42 = vld [vmem:[#allocation0 + $0x290] ss:$2 sm:%s4629_s3]  }
  0x4b   :  { %v1779_v43 = vld [vmem:[#allocation0 + $0x298] ss:$2 sm:%s4647_s20]   ;;  %714 = vst [vmem:[#allocation0 + $0x390] sm:$0xf] %v3913_v39  ;;  %719 = vst [vmem:[#allocation0 + $0x388] sm:$0xf] %v3914_v40 }
  0x4c   :  { %724 = vst [vmem:[#allocation0 + $0x380] sm:$0xf] %v3915_v41  ;;  %s4705_s3 = smov 3  ;;  %s1970_s20 = smov 3  ;;  %v1761_v44 = vld [vmem:[#allocation0 + $0x280] ss:$2 sm:%s4579_s7]  }
  0x4d   :  { %v1767_v45 = vld [vmem:[#allocation0 + $0x288] ss:$2 sm:%s4584_s10]   ;;  %4108 = vst.msk [vmem:[%s6825_s1 + $0xa2] ss:$8 sm:$0x3] %vm1283_vm0, %v1773_v42   ;;  %s1982_s5 = smov 3 }
  0x4e   :  { %4109 = vst.msk [vmem:[%s6825_s1 + $0xa3] ss:$8 sm:$0x3] %vm1283_vm0, %v1779_v43   ;;  %4106 = vst.msk [vmem:[%s6825_s1 + $0xa0] ss:$8 sm:$0x3] %vm1283_vm0, %v1761_v44  }
  0x4f   :  { %4107 = vst.msk [vmem:[%s6825_s1 + $0xa1] ss:$8 sm:$0x3] %vm1283_vm0, %v1767_v45   ;;  %v2870_v46 = vld [vmem:[#allocation0 + $0x281] ss:$8 sm:$0xf]  }
  0x50   :  { %v2872_v47 = vld [vmem:[#allocation0 + $0x281] ss:$8 sm:$0xf0]   ;;  %s1988_s13 = smov 3  ;;  %v3892_v50 = vld [vmem:[%s6824_s0 + $0x21c] sm:$0xf] }
  0x51   :  { %v2874_v48 = vsel %vm2819_vm1, %v2872_v47, %v2870_v46  ;;  %v2883_v49 = vld [vmem:[#allocation0 + $0x301] ss:$8 sm:$0xf0]   ;;  %609 = vst [vmem:[#allocation0 + $0x438] sm:$0xf] %v3892_v50  ;;  %s4786_s19 = smov 3 }
  0x52   :  { %2875 = vrot.lane.b32.xlu1 %v2874_v48, %s4346_s14  ;;  %v3893_v51 = vld [vmem:[%s6824_s0 + $0x218] sm:$0xf]  ;;  %v3894_v52 = vld [vmem:[%s6824_s0 + $0x214] sm:$0xf]  ;;  %v3895_v53 = vld [vmem:[%s6824_s0 + $0x210] sm:$0xf] }
  0x53   :  { %v2881_v54 = vld [vmem:[#allocation0 + $0x301] ss:$8 sm:$0xf]   ;;  %v1989_v55 = vld [vmem:[#allocation0 + $0x3b0] ss:$2 sm:%s1988_s13]   ;;  %s4788_s16 = smov 3 }
  0x54   :  { %614 = vst [vmem:[#allocation0 + $0x430] sm:$0xf] %v3893_v51  ;;  %619 = vst [vmem:[#allocation0 + $0x428] sm:$0xf] %v3894_v52  ;;  %v2885_v56 = vsel %vm2819_vm1, %v2883_v49, %v2881_v54  ;;  %v1971_v57 = vld [vmem:[#allocation0 + $0x398] ss:$2 sm:%s1970_s20]  }
  0x55   :  { %624 = vst [vmem:[#allocation0 + $0x420] sm:$0xf] %v3895_v53  ;;  %v1977_v58 = vld [vmem:[#allocation0 + $0x3a0] ss:$2 sm:%s1976_s4]   ;;  %2886 = vrot.lane.b32.xlu0 %v2885_v56, %s4346_s14  ;;  %v1965_v62 = vld [vmem:[#allocation0 + $0x390] ss:$2 sm:%s4705_s3]  }
  0x56   :  { %v1983_v59 = vld [vmem:[#allocation0 + $0x3a8] ss:$2 sm:%s1982_s5]   ;;  %4144 = vst.msk [vmem:[%s6825_s1 + $0xe6] ss:$8 sm:$0x3] %vm1283_vm0, %v1989_v55   ;;  %s4793_s21 = smov 3 }
  0x57   :  { %v1953_v60 = vld [vmem:[#allocation0 + $0x380] ss:$2 sm:%s4649_s11]   ;;  %4141 = vst.msk [vmem:[%s6825_s1 + $0xe3] ss:$8 sm:$0x3] %vm1283_vm0, %v1971_v57   ;;  %s2072_s25 = smov 3 }
  0x58   :  { %v1959_v61 = vld [vmem:[#allocation0 + $0x388] ss:$2 sm:%s4654_s24]   ;;  %4142 = vst.msk [vmem:[%s6825_s1 + $0xe4] ss:$8 sm:$0x3] %vm1283_vm0, %v1977_v58   ;;  %s2078_s22 = smov 3 }
  0x59   :  { %4143 = vst.msk [vmem:[%s6825_s1 + $0xe5] ss:$8 sm:$0x3] %vm1283_vm0, %v1983_v59   ;;  %4138 = vst.msk [vmem:[%s6825_s1 + $0xe0] ss:$8 sm:$0x3] %vm1283_vm0, %v1953_v60  }
  0x5a   :  { %4139 = vst.msk [vmem:[%s6825_s1 + $0xe1] ss:$8 sm:$0x3] %vm1283_vm0, %v1959_v61   ;;  %4140 = vst.msk [vmem:[%s6825_s1 + $0xe2] ss:$8 sm:$0x3] %vm1283_vm0, %v1965_v62  }
  0x5b   :  { %v2892_v63 = vld [vmem:[#allocation0 + $0x381] ss:$8 sm:$0xf]   ;;  %v3896_v2 = vld [vmem:[%s6824_s0 + $0x20c] sm:$0xf]  ;;  %s2084_s23 = smov 3 }
  0x5c   :  { %v2894_v0 = vld [vmem:[#allocation0 + $0x381] ss:$8 sm:$0xf0]   ;;  %v3898_v4 = vld [vmem:[%s6824_s0 + $0x204] sm:$0xf]  ;;  %s2066_s20 = smov 3 }
  0x5d   :  { %v2896_v1 = vsel %vm2819_vm1, %v2894_v0, %v2892_v63  ;;  %v3897_v3 = vld [vmem:[%s6824_s0 + $0x208] sm:$0xf]  ;;  %629 = vst [vmem:[#allocation0 + $0x418] sm:$0xf] %v3896_v2  ;;  %639 = vst [vmem:[#allocation0 + $0x408] sm:$0xf] %v3898_v4 }
  0x5e   :  { %2897 = vrot.lane.b32.xlu1 %v2896_v1, %s4346_s14  ;;  %634 = vst [vmem:[#allocation0 + $0x410] sm:$0xf] %v3897_v3  ;;  %v3899_v5 = vld [vmem:[%s6824_s0 + $0x200] sm:$0xf]  ;;  %v3876_v7 = vld [vmem:[%s6824_s0 + $0x25c] sm:$0xf] }
  0x5f   :  { %v3891_v6 = vld [vmem:[%s6824_s0 + $0x220] sm:$0xf]  ;;  %644 = vst [vmem:[#allocation0 + $0x400] sm:$0xf] %v3899_v5  ;;  %v3877_v8 = vld [vmem:[%s6824_s0 + $0x258] sm:$0xf] }
  0x60   :  { %604 = vst [vmem:[#allocation0 + $0x440] sm:$0xf] %v3891_v6  ;;  %v2073_v9 = vld [vmem:[#allocation0 + $0x420] ss:$2 sm:%s2072_s25]   ;;  %529 = vst [vmem:[#allocation0 + $0x4b8] sm:$0xf] %v3876_v7 }
  0x61   :  { %534 = vst [vmem:[#allocation0 + $0x4b0] sm:$0xf] %v3877_v8  ;;  %v3878_v10 = vld [vmem:[%s6824_s0 + $0x254] sm:$0xf]  ;;  %s4808_s30 = smov 3  ;;  %s4833_s28 = smov 3 }
  0x62   :  { %4158 = vst.msk [vmem:[%s6825_s1 + $0x104] ss:$8 sm:$0x3] %vm1283_vm0, %v2073_v9   ;;  %v2079_v11 = vld [vmem:[#allocation0 + $0x428] ss:$2 sm:%s2078_s22]   ;;  %s4835_s11 = smov 3 }
  0x63   :  { %539 = vst [vmem:[#allocation0 + $0x4a8] sm:$0xf] %v3878_v10  ;;  %4159 = vst.msk [vmem:[%s6825_s1 + $0x105] ss:$8 sm:$0x3] %vm1283_vm0, %v2079_v11   ;;  %s2156_s10 = smov 3 }
  0x64   :  { %v2905_v12 = vld [vmem:[#allocation0 + $0x401] ss:$8 sm:$0xf0]   ;;  %v2085_v13 = vld [vmem:[#allocation0 + $0x430] ss:$2 sm:%s2084_s23]   ;;  %s2168_s5 = smov 3 }
  0x65   :  { %v3879_v14 = vld [vmem:[%s6824_s0 + $0x250] sm:$0xf]  ;;  %v3880_v15 = vld [vmem:[%s6824_s0 + $0x24c] sm:$0xf]  ;;  %v3881_v16 = vld [vmem:[%s6824_s0 + $0x248] sm:$0xf] }
  0x66   :  { %4160 = vst.msk [vmem:[%s6825_s1 + $0x106] ss:$8 sm:$0x3] %vm1283_vm0, %v2085_v13   ;;  %544 = vst [vmem:[#allocation0 + $0x4a0] sm:$0xf] %v3879_v14  ;;  %s2174_s13 = smov 3 }
  0x67   :  { %549 = vst [vmem:[#allocation0 + $0x498] sm:$0xf] %v3880_v15  ;;  %v3882_v17 = vld [vmem:[%s6824_s0 + $0x244] sm:$0xf]  ;;  %v3883_v18 = vld [vmem:[%s6824_s0 + $0x240] sm:$0xf] }
  0x68   :  { %554 = vst [vmem:[#allocation0 + $0x490] sm:$0xf] %v3881_v16  ;;  %559 = vst [vmem:[#allocation0 + $0x488] sm:$0xf] %v3882_v17  ;;  %v3875_v19 = vld [vmem:[%s6824_s0 + $0x260] sm:$0xf] }
  0x69   :  { %564 = vst [vmem:[#allocation0 + $0x480] sm:$0xf] %v3883_v18  ;;  %v3860_v20 = vld [vmem:[%s6824_s0 + $0x29c] sm:$0xf]  ;;  %v2055_v21 = vld [vmem:[#allocation0 + $0x408] ss:$2 sm:%s4788_s16]  }
  0x6a   :  { %v2061_v22 = vld [vmem:[#allocation0 + $0x410] ss:$2 sm:%s4793_s21]   ;;  %524 = vst [vmem:[#allocation0 + $0x4c0] sm:$0xf] %v3875_v19  ;;  %449 = vst [vmem:[#allocation0 + $0x538] sm:$0xf] %v3860_v20 }
  0x6b   :  { %v2067_v23 = vld [vmem:[#allocation0 + $0x418] ss:$2 sm:%s2066_s20]   ;;  %4155 = vst.msk [vmem:[%s6825_s1 + $0x101] ss:$8 sm:$0x3] %vm1283_vm0, %v2055_v21   ;;  %s2180_s15 = smov 3 }
  0x6c   :  { %v2049_v24 = vld [vmem:[#allocation0 + $0x400] ss:$2 sm:%s4786_s19]   ;;  %4156 = vst.msk [vmem:[%s6825_s1 + $0x102] ss:$8 sm:$0x3] %vm1283_vm0, %v2061_v22   ;;  %s2186_s27 = smov 3 }
  0x6d   :  { %4157 = vst.msk [vmem:[%s6825_s1 + $0x103] ss:$8 sm:$0x3] %vm1283_vm0, %v2067_v23   ;;  %v2903_v25 = vld [vmem:[#allocation0 + $0x401] ss:$8 sm:$0xf]  }
  0x6e   :  { %4154 = vst.msk [vmem:[%s6825_s1 + $0x100] ss:$8 sm:$0x3] %vm1283_vm0, %v2049_v24   ;;  %v2907_v26 = vsel %vm2819_vm1, %v2905_v12, %v2903_v25  ;;  %v2091_v27 = vld [vmem:[#allocation0 + $0x438] ss:$2 sm:%s4808_s30]   ;;  %s2162_s30 = smov 3 }
  0x6f   :  { %v3861_v28 = vld [vmem:[%s6824_s0 + $0x298] sm:$0xf]  ;;  %2908 = vrot.lane.b32.xlu0 %v2907_v26, %s4346_s14  ;;  %4161 = vst.msk [vmem:[%s6825_s1 + $0x107] ss:$8 sm:$0x3] %vm1283_vm0, %v2091_v27   ;;  %s4926_s17 = smov 3 }
  0x70   :  { %454 = vst [vmem:[#allocation0 + $0x530] sm:$0xf] %v3861_v28  ;;  %v3862_v29 = vld [vmem:[%s6824_s0 + $0x294] sm:$0xf]  ;;  %v3863_v30 = vld [vmem:[%s6824_s0 + $0x290] sm:$0xf] }
  0x71   :  { %v2175_v31 = vld [vmem:[#allocation0 + $0x4a8] ss:$2 sm:%s2174_s13]   ;;  %459 = vst [vmem:[#allocation0 + $0x528] sm:$0xf] %v3862_v29  ;;  %464 = vst [vmem:[#allocation0 + $0x520] sm:$0xf] %v3863_v30 }
  0x72   :  { %v2181_v32 = vld [vmem:[#allocation0 + $0x4b0] ss:$2 sm:%s2180_s15]   ;;  %v2169_v34 = vld [vmem:[#allocation0 + $0x4a0] ss:$2 sm:%s2168_s5]   ;;  %s2264_s24 = smov 3  ;;  %s2270_s16 = smov 3 }
  0x73   :  { %v2163_v33 = vld [vmem:[#allocation0 + $0x498] ss:$2 sm:%s2162_s30]   ;;  %4175 = vst.msk [vmem:[%s6825_s1 + $0x125] ss:$8 sm:$0x3] %vm1283_vm0, %v2175_v31   ;;  %s2246_s3 = smov 3 }
  0x74   :  { %4176 = vst.msk [vmem:[%s6825_s1 + $0x126] ss:$8 sm:$0x3] %vm1283_vm0, %v2181_v32   ;;  %v3864_v35 = vld [vmem:[%s6824_s0 + $0x28c] sm:$0xf]  ;;  %s2252_s20 = smov 3 }
  0x75   :  { %v2145_v36 = vld [vmem:[#allocation0 + $0x480] ss:$2 sm:%s4833_s28]   ;;  %v2157_v38 = vld [vmem:[#allocation0 + $0x490] ss:$2 sm:%s2156_s10]   ;;  %469 = vst [vmem:[#allocation0 + $0x518] sm:$0xf] %v3864_v35 }
  0x76   :  { %v2151_v37 = vld [vmem:[#allocation0 + $0x488] ss:$2 sm:%s4835_s11]   ;;  %4173 = vst.msk [vmem:[%s6825_s1 + $0x123] ss:$8 sm:$0x3] %vm1283_vm0, %v2163_v33   ;;  %s2276_s28 = smov 3 }
  0x77   :  { %4174 = vst.msk [vmem:[%s6825_s1 + $0x124] ss:$8 sm:$0x3] %vm1283_vm0, %v2169_v34   ;;  %4170 = vst.msk [vmem:[%s6825_s1 + $0x120] ss:$8 sm:$0x3] %vm1283_vm0, %v2145_v36  }
  0x78   :  { %4171 = vst.msk [vmem:[%s6825_s1 + $0x121] ss:$8 sm:$0x3] %vm1283_vm0, %v2151_v37   ;;  %4172 = vst.msk [vmem:[%s6825_s1 + $0x122] ss:$8 sm:$0x3] %vm1283_vm0, %v2157_v38  }
  0x79   :  { %v2914_v39 = vld [vmem:[#allocation0 + $0x481] ss:$8 sm:$0xf]   ;;  %v2187_v42 = vld [vmem:[#allocation0 + $0x4b8] ss:$2 sm:%s2186_s27]   ;;  %s2258_s27 = smov 3 }
  0x7a   :  { %v2916_v40 = vld [vmem:[#allocation0 + $0x481] ss:$8 sm:$0xf0]   ;;  %v3866_v44 = vld [vmem:[%s6824_s0 + $0x284] sm:$0xf]  ;;  %s2366_s2 = smov 3 }
  0x7b   :  { %v2918_v41 = vsel %vm2819_vm1, %v2916_v40, %v2914_v39  ;;  %v3865_v43 = vld [vmem:[%s6824_s0 + $0x288] sm:$0xf]  ;;  %4177 = vst.msk [vmem:[%s6825_s1 + $0x127] ss:$8 sm:$0x3] %vm1283_vm0, %v2187_v42   ;;  %s2372_s4 = smov 3 }
  0x7c   :  { %2919 = vrot.lane.b32.xlu1 %v2918_v41, %s4346_s14  ;;  %474 = vst [vmem:[#allocation0 + $0x510] sm:$0xf] %v3865_v43  ;;  %479 = vst [vmem:[#allocation0 + $0x508] sm:$0xf] %v3866_v44  ;;  %v3867_v45 = vld [vmem:[%s6824_s0 + $0x280] sm:$0xf] }
  0x7d   :  { %v3859_v46 = vld [vmem:[%s6824_s0 + $0x2a0] sm:$0xf]  ;;  %484 = vst [vmem:[#allocation0 + $0x500] sm:$0xf] %v3867_v45  ;;  %v3844_v47 = vld [vmem:[%s6824_s0 + $0x2dc] sm:$0xf] }
  0x7e   :  { %444 = vst [vmem:[#allocation0 + $0x540] sm:$0xf] %v3859_v46  ;;  %v3845_v48 = vld [vmem:[%s6824_s0 + $0x2d8] sm:$0xf]  ;;  %v2265_v49 = vld [vmem:[#allocation0 + $0x520] ss:$2 sm:%s2264_s24]  }
  0x7f   :  { %369 = vst [vmem:[#allocation0 + $0x5b8] sm:$0xf] %v3844_v47  ;;  %374 = vst [vmem:[#allocation0 + $0x5b0] sm:$0xf] %v3845_v48  ;;  %v3846_v50 = vld [vmem:[%s6824_s0 + $0x2d4] sm:$0xf] }
  0x80   :  { %4190 = vst.msk [vmem:[%s6825_s1 + $0x144] ss:$8 sm:$0x3] %vm1283_vm0, %v2265_v49   ;;  %v2271_v51 = vld [vmem:[#allocation0 + $0x528] ss:$2 sm:%s2270_s16]   ;;  %s2282_s24 = smov 3 }
  0x81   :  { %379 = vst [vmem:[#allocation0 + $0x5a8] sm:$0xf] %v3846_v50  ;;  %v2259_v52 = vld [vmem:[#allocation0 + $0x518] ss:$2 sm:%s2258_s27]   ;;  %v3847_v55 = vld [vmem:[%s6824_s0 + $0x2d0] sm:$0xf] }
  0x82   :  { %4191 = vst.msk [vmem:[%s6825_s1 + $0x145] ss:$8 sm:$0x3] %vm1283_vm0, %v2271_v51   ;;  %v2927_v53 = vld [vmem:[#allocation0 + $0x501] ss:$8 sm:$0xf0]  }
  0x83   :  { %v2277_v54 = vld [vmem:[#allocation0 + $0x530] ss:$2 sm:%s2276_s28]   ;;  %4189 = vst.msk [vmem:[%s6825_s1 + $0x143] ss:$8 sm:$0x3] %vm1283_vm0, %v2259_v52   ;;  %s4974_s16 = smov 3 }
  0x84   :  { %4192 = vst.msk [vmem:[%s6825_s1 + $0x146] ss:$8 sm:$0x3] %vm1283_vm0, %v2277_v54   ;;  %384 = vst [vmem:[#allocation0 + $0x5a0] sm:$0xf] %v3847_v55  ;;  %s4976_s28 = smov 3 }
  0x85   :  { %v3848_v56 = vld [vmem:[%s6824_s0 + $0x2cc] sm:$0xf]  ;;  %v3849_v57 = vld [vmem:[%s6824_s0 + $0x2c8] sm:$0xf]  ;;  %v3850_v58 = vld [vmem:[%s6824_s0 + $0x2c4] sm:$0xf] }
  0x86   :  { %389 = vst [vmem:[#allocation0 + $0x598] sm:$0xf] %v3848_v56  ;;  %394 = vst [vmem:[#allocation0 + $0x590] sm:$0xf] %v3849_v57  ;;  %v3851_v59 = vld [vmem:[%s6824_s0 + $0x2c0] sm:$0xf] }
  0x87   :  { %399 = vst [vmem:[#allocation0 + $0x588] sm:$0xf] %v3850_v58  ;;  %v3843_v60 = vld [vmem:[%s6824_s0 + $0x2e0] sm:$0xf]  ;;  %v2247_v61 = vld [vmem:[#allocation0 + $0x508] ss:$2 sm:%s2246_s3]  }
  0x88   :  { %v2253_v62 = vld [vmem:[#allocation0 + $0x510] ss:$2 sm:%s2252_s20]   ;;  %404 = vst [vmem:[#allocation0 + $0x580] sm:$0xf] %v3851_v59  ;;  %364 = vst [vmem:[#allocation0 + $0x5c0] sm:$0xf] %v3843_v60 }
  0x89   :  { %v2241_v63 = vld [vmem:[#allocation0 + $0x500] ss:$2 sm:%s4926_s17]   ;;  %4187 = vst.msk [vmem:[%s6825_s1 + $0x141] ss:$8 sm:$0x3] %vm1283_vm0, %v2247_v61   ;;  %s2360_s20 = smov 3 }
  0x8a   :  { %4188 = vst.msk [vmem:[%s6825_s1 + $0x142] ss:$8 sm:$0x3] %vm1283_vm0, %v2253_v62   ;;  %v2925_v0 = vld [vmem:[#allocation0 + $0x501] ss:$8 sm:$0xf]  }
  0x8b   :  { %4186 = vst.msk [vmem:[%s6825_s1 + $0x140] ss:$8 sm:$0x3] %vm1283_vm0, %v2241_v63   ;;  %v2929_v1 = vsel %vm2819_vm1, %v2927_v53, %v2925_v0  ;;  %v2283_v2 = vld [vmem:[#allocation0 + $0x538] ss:$2 sm:%s2282_s24]   ;;  %s2348_s9 = smov 3 }
  0x8c   :  { %v3828_v3 = vld [vmem:[%s6824_s0 + $0x31c] sm:$0xf]  ;;  %2930 = vrot.lane.b32.xlu0 %v2929_v1, %s4346_s14  ;;  %4193 = vst.msk [vmem:[%s6825_s1 + $0x147] ss:$8 sm:$0x3] %vm1283_vm0, %v2283_v2   ;;  %s2354_s12 = smov 3 }
  0x8d   :  { %v2367_v4 = vld [vmem:[#allocation0 + $0x5a8] ss:$2 sm:%s2366_s2]   ;;  %289 = vst [vmem:[#allocation0 + $0x638] sm:$0xf] %v3828_v3  ;;  %v3829_v6 = vld [vmem:[%s6824_s0 + $0x318] sm:$0xf] }
  0x8e   :  { %v2373_v5 = vld [vmem:[#allocation0 + $0x5b0] ss:$2 sm:%s2372_s4]   ;;  %4207 = vst.msk [vmem:[%s6825_s1 + $0x165] ss:$8 sm:$0x3] %vm1283_vm0, %v2367_v4   ;;  %s2378_s19 = smov 3 }
  0x8f   :  { %4208 = vst.msk [vmem:[%s6825_s1 + $0x166] ss:$8 sm:$0x3] %vm1283_vm0, %v2373_v5   ;;  %v3830_v7 = vld [vmem:[%s6824_s0 + $0x314] sm:$0xf]  ;;  %s5035_s10 = smov 3 }
  0x90   :  { %v3831_v8 = vld [vmem:[%s6824_s0 + $0x310] sm:$0xf]  ;;  %v2361_v9 = vld [vmem:[#allocation0 + $0x5a0] ss:$2 sm:%s2360_s20]   ;;  %294 = vst [vmem:[#allocation0 + $0x630] sm:$0xf] %v3829_v6 }
  0x91   :  { %v2938_v10 = vld [vmem:[#allocation0 + $0x581] ss:$8 sm:$0xf0]   ;;  %299 = vst [vmem:[#allocation0 + $0x628] sm:$0xf] %v3830_v7  ;;  %s5059_s25 = smov 3 }
  0x92   :  { %304 = vst [vmem:[#allocation0 + $0x620] sm:$0xf] %v3831_v8  ;;  %v2343_v11 = vld [vmem:[#allocation0 + $0x588] ss:$2 sm:%s4976_s28]   ;;  %v2355_v13 = vld [vmem:[#allocation0 + $0x598] ss:$2 sm:%s2354_s12]  }
  0x93   :  { %v2349_v12 = vld [vmem:[#allocation0 + $0x590] ss:$2 sm:%s2348_s9]   ;;  %4206 = vst.msk [vmem:[%s6825_s1 + $0x164] ss:$8 sm:$0x3] %vm1283_vm0, %v2361_v9   ;;  %s2456_s27 = smov 3 }
  0x94   :  { %v2337_v14 = vld [vmem:[#allocation0 + $0x580] ss:$2 sm:%s4974_s16]   ;;  %4203 = vst.msk [vmem:[%s6825_s1 + $0x161] ss:$8 sm:$0x3] %vm1283_vm0, %v2343_v11   ;;  %s2462_s24 = smov 3 }
  0x95   :  { %4204 = vst.msk [vmem:[%s6825_s1 + $0x162] ss:$8 sm:$0x3] %vm1283_vm0, %v2349_v12   ;;  %4205 = vst.msk [vmem:[%s6825_s1 + $0x163] ss:$8 sm:$0x3] %vm1283_vm0, %v2355_v13  }
  0x96   :  { %v2936_v15 = vld [vmem:[#allocation0 + $0x581] ss:$8 sm:$0xf]   ;;  %4202 = vst.msk [vmem:[%s6825_s1 + $0x160] ss:$8 sm:$0x3] %vm1283_vm0, %v2337_v14  }
  0x97   :  { %v2940_v16 = vsel %vm2819_vm1, %v2938_v10, %v2936_v15  ;;  %v2379_v17 = vld [vmem:[#allocation0 + $0x5b8] ss:$2 sm:%s2378_s19]   ;;  %v3832_v18 = vld [vmem:[%s6824_s0 + $0x30c] sm:$0xf]  ;;  %v3833_v19 = vld [vmem:[%s6824_s0 + $0x308] sm:$0xf] }
  0x98   :  { %2941 = vrot.lane.b32.xlu1 %v2940_v16, %s4346_s14  ;;  %4209 = vst.msk [vmem:[%s6825_s1 + $0x167] ss:$8 sm:$0x3] %vm1283_vm0, %v2379_v17   ;;  %309 = vst [vmem:[#allocation0 + $0x618] sm:$0xf] %v3832_v18  ;;  %s2468_s22 = smov 3 }
  0x99   :  { %314 = vst [vmem:[#allocation0 + $0x610] sm:$0xf] %v3833_v19  ;;  %v3834_v20 = vld [vmem:[%s6824_s0 + $0x304] sm:$0xf]  ;;  %v3835_v21 = vld [vmem:[%s6824_s0 + $0x300] sm:$0xf] }
  0x9a   :  { %319 = vst [vmem:[#allocation0 + $0x608] sm:$0xf] %v3834_v20  ;;  %324 = vst [vmem:[#allocation0 + $0x600] sm:$0xf] %v3835_v21  ;;  %v3812_v22 = vld [vmem:[%s6824_s0 + $0x35c] sm:$0xf] }
  0x9b   :  { %v3813_v23 = vld [vmem:[%s6824_s0 + $0x358] sm:$0xf]  ;;  %209 = vst [vmem:[#allocation0 + $0x6b8] sm:$0xf] %v3812_v22  ;;  %v3814_v24 = vld [vmem:[%s6824_s0 + $0x354] sm:$0xf] }
  0x9c   :  { %214 = vst [vmem:[#allocation0 + $0x6b0] sm:$0xf] %v3813_v23  ;;  %v3815_v25 = vld [vmem:[%s6824_s0 + $0x350] sm:$0xf]  ;;  %v3816_v26 = vld [vmem:[%s6824_s0 + $0x34c] sm:$0xf] }
  0x9d   :  { %v2457_v27 = vld [vmem:[#allocation0 + $0x620] ss:$2 sm:%s2456_s27]   ;;  %v2469_v29 = vld [vmem:[#allocation0 + $0x630] ss:$2 sm:%s2468_s22]   ;;  %219 = vst [vmem:[#allocation0 + $0x6a8] sm:$0xf] %v3814_v24 }
  0x9e   :  { %v2463_v28 = vld [vmem:[#allocation0 + $0x628] ss:$2 sm:%s2462_s24]   ;;  %224 = vst [vmem:[#allocation0 + $0x6a0] sm:$0xf] %v3815_v25  ;;  %229 = vst [vmem:[#allocation0 + $0x698] sm:$0xf] %v3816_v26 }
  0x9f   :  { %s2444_s7 = smov 3  ;;  %s2450_s2 = smov 3  ;;  %4222 = vst.msk [vmem:[%s6825_s1 + $0x184] ss:$8 sm:$0x3] %vm1283_vm0, %v2457_v27  }
  0xa0   :  { %4223 = vst.msk [vmem:[%s6825_s1 + $0x185] ss:$8 sm:$0x3] %vm1283_vm0, %v2463_v28   ;;  %4224 = vst.msk [vmem:[%s6825_s1 + $0x186] ss:$8 sm:$0x3] %vm1283_vm0, %v2469_v29  }
  0xa1   :  { %v3817_v30 = vld [vmem:[%s6824_s0 + $0x348] sm:$0xf]  ;;  %v3818_v32 = vld [vmem:[%s6824_s0 + $0x344] sm:$0xf]  ;;  %v3819_v33 = vld [vmem:[%s6824_s0 + $0x340] sm:$0xf] }
  0xa2   :  { %v2949_v31 = vld [vmem:[#allocation0 + $0x601] ss:$8 sm:$0xf0]   ;;  %234 = vst [vmem:[#allocation0 + $0x690] sm:$0xf] %v3817_v30  ;;  %s2546_s24 = smov 3 }
  0xa3   :  { %s2552_s22 = smov 3  ;;  %239 = vst [vmem:[#allocation0 + $0x688] sm:$0xf] %v3818_v32  ;;  %244 = vst [vmem:[#allocation0 + $0x680] sm:$0xf] %v3819_v33  ;;  %s2558_s23 = smov 3 }
  0xa4   :  { %s2564_s29 = smov 3  ;;  %v3811_v34 = vld [vmem:[%s6824_s0 + $0x360] sm:$0xf]  ;;  %v3796_v35 = vld [vmem:[%s6824_s0 + $0x39c] sm:$0xf]  ;;  %s2618_s11 = smov 3 }
  0xa5   :  { %v2445_v36 = vld [vmem:[#allocation0 + $0x610] ss:$2 sm:%s2444_s7]   ;;  %204 = vst [vmem:[#allocation0 + $0x6c0] sm:$0xf] %v3811_v34  ;;  %129 = vst [vmem:[#allocation0 + $0x738] sm:$0xf] %v3796_v35 }
  0xa6   :  { %v2451_v37 = vld [vmem:[#allocation0 + $0x618] ss:$2 sm:%s2450_s2]   ;;  %v2439_v40 = vld [vmem:[#allocation0 + $0x608] ss:$2 sm:%s5059_s25]   ;;  %s5160_s25 = smov 3  ;;  %s5166_s7 = smov 3 }
  0xa7   :  { %v3797_v38 = vld [vmem:[%s6824_s0 + $0x398] sm:$0xf]  ;;  %v2433_v39 = vld [vmem:[#allocation0 + $0x600] ss:$2 sm:%s5035_s10]   ;;  %v3798_v41 = vld [vmem:[%s6824_s0 + $0x394] sm:$0xf] }
  0xa8   :  { %4220 = vst.msk [vmem:[%s6825_s1 + $0x182] ss:$8 sm:$0x3] %vm1283_vm0, %v2445_v36   ;;  %4221 = vst.msk [vmem:[%s6825_s1 + $0x183] ss:$8 sm:$0x3] %vm1283_vm0, %v2451_v37  }
  0xa9   :  { %134 = vst [vmem:[#allocation0 + $0x730] sm:$0xf] %v3797_v38  ;;  %4218 = vst.msk [vmem:[%s6825_s1 + $0x180] ss:$8 sm:$0x3] %vm1283_vm0, %v2433_v39   ;;  %s1376_s2 = smov 3 }
  0xaa   :  { %4219 = vst.msk [vmem:[%s6825_s1 + $0x181] ss:$8 sm:$0x3] %vm1283_vm0, %v2439_v40   ;;  %v2947_v42 = vld [vmem:[#allocation0 + $0x601] ss:$8 sm:$0xf]  }
  0xab   :  { %v2565_v43 = vld [vmem:[#allocation0 + $0x6b0] ss:$2 sm:%s2564_s29]   ;;  %139 = vst [vmem:[#allocation0 + $0x728] sm:$0xf] %v3798_v41  ;;  %v2951_v44 = vsel %vm2819_vm1, %v2949_v31, %v2947_v42  ;;  %v2553_v46 = vld [vmem:[#allocation0 + $0x6a0] ss:$2 sm:%s2552_s22]  }
  0xac   :  { %v2547_v45 = vld [vmem:[#allocation0 + $0x698] ss:$2 sm:%s2546_s24]   ;;  %v2559_v47 = vld [vmem:[#allocation0 + $0x6a8] ss:$2 sm:%s2558_s23]   ;;  %2952 = vrot.lane.b32.xlu0 %v2951_v44, %s4346_s14  ;;  %s2570_s24 = smov 3  ;;  %s2624_s21 = smov 3 }
  0xad   :  { %4240 = vst.msk [vmem:[%s6825_s1 + $0x1a6] ss:$8 sm:$0x3] %vm1283_vm0, %v2565_v43   ;;  %4237 = vst.msk [vmem:[%s6825_s1 + $0x1a3] ss:$8 sm:$0x3] %vm1283_vm0, %v2547_v45  }
  0xae   :  { %4238 = vst.msk [vmem:[%s6825_s1 + $0x1a4] ss:$8 sm:$0x3] %vm1283_vm0, %v2553_v46   ;;  %4239 = vst.msk [vmem:[%s6825_s1 + $0x1a5] ss:$8 sm:$0x3] %vm1283_vm0, %v2559_v47  }
  0xaf   :  { %v2960_v48 = vld [vmem:[#allocation0 + $0x681] ss:$8 sm:$0xf0]   ;;  %v3800_v50 = vld [vmem:[%s6824_s0 + $0x38c] sm:$0xf]  ;;  %s1382_s10 = smov 3 }
  0xb0   :  { %v3799_v49 = vld [vmem:[%s6824_s0 + $0x390] sm:$0xf]  ;;  %v3801_v51 = vld [vmem:[%s6824_s0 + $0x388] sm:$0xf]  ;;  %v3802_v52 = vld [vmem:[%s6824_s0 + $0x384] sm:$0xf] }
  0xb1   :  { %144 = vst [vmem:[#allocation0 + $0x720] sm:$0xf] %v3799_v49  ;;  %v2958_v53 = vld [vmem:[#allocation0 + $0x681] ss:$8 sm:$0xf]   ;;  %s1388_s6 = smov 3 }
  0xb2   :  { %149 = vst [vmem:[#allocation0 + $0x718] sm:$0xf] %v3800_v50  ;;  %154 = vst [vmem:[#allocation0 + $0x710] sm:$0xf] %v3801_v51  ;;  %v3803_v54 = vld [vmem:[%s6824_s0 + $0x380] sm:$0xf]  ;;  %v2962_v55 = vsel %vm2819_vm1, %v2960_v48, %v2958_v53 }
  0xb3   :  { %159 = vst [vmem:[#allocation0 + $0x708] sm:$0xf] %v3802_v52  ;;  %v2571_v56 = vld [vmem:[#allocation0 + $0x6b8] ss:$2 sm:%s2570_s24]   ;;  %164 = vst [vmem:[#allocation0 + $0x700] sm:$0xf] %v3803_v54  ;;  %2963 = vrot.lane.b32.xlu1 %v2962_v55, %s4346_s14 }
  0xb4   :  { %v3804_v57 = vld [vmem:[%s6824_s0 + $0x37c] sm:$0xf]  ;;  %4241 = vst.msk [vmem:[%s6825_s1 + $0x1a7] ss:$8 sm:$0x3] %vm1283_vm0, %v2571_v56   ;;  %s1394_s12 = smov 3 }
  0xb5   :  { %169 = vst [vmem:[#allocation0 + $0x6f8] sm:$0xf] %v3804_v57  ;;  %v3780_v58 = vld [vmem:[%s6824_s0 + $0x3dc] sm:$0xf]  ;;  %v3781_v59 = vld [vmem:[%s6824_s0 + $0x3d8] sm:$0xf] }
  0xb6   :  { %v3782_v60 = vld [vmem:[%s6824_s0 + $0x3d4] sm:$0xf]  ;;  %49 = vst [vmem:[#allocation0 + $0x7b8] sm:$0xf] %v3780_v58  ;;  %54 = vst [vmem:[#allocation0 + $0x7b0] sm:$0xf] %v3781_v59 }
  0xb7   :  { %59 = vst [vmem:[#allocation0 + $0x7a8] sm:$0xf] %v3782_v60  ;;  %v3783_v61 = vld [vmem:[%s6824_s0 + $0x3d0] sm:$0xf]  ;;  %v3784_v62 = vld [vmem:[%s6824_s0 + $0x3cc] sm:$0xf] }
  0xb8   :  { %v3785_v63 = vld [vmem:[%s6824_s0 + $0x3c8] sm:$0xf]  ;;  %64 = vst [vmem:[#allocation0 + $0x7a0] sm:$0xf] %v3783_v61  ;;  %69 = vst [vmem:[#allocation0 + $0x798] sm:$0xf] %v3784_v62 }
  0xb9   :  { %74 = vst [vmem:[#allocation0 + $0x790] sm:$0xf] %v3785_v63  ;;  %v3786_v0 = vld [vmem:[%s6824_s0 + $0x3c4] sm:$0xf]  ;;  %v3787_v1 = vld [vmem:[%s6824_s0 + $0x3c0] sm:$0xf] }
  0xba   :  { %v4003_v2 = vld [vmem:[%s6824_s0 + $0x60] sm:$0xf]  ;;  %79 = vst [vmem:[#allocation0 + $0x788] sm:$0xf] %v3786_v0  ;;  %84 = vst [vmem:[#allocation0 + $0x780] sm:$0xf] %v3787_v1 }
  0xbb   :  { %1164 = vst [vmem:[#allocation0 + $0xc0] sm:$0xf] %v4003_v2  ;;  %v2971_v3 = vld [vmem:[#allocation0 + $0x701] ss:$8 sm:$0xf0]   ;;  %s1400_s13 = smov 3 }
  0xbc   :  { %v2991_v4 = vld [vmem:[#allocation0 + $0x3] ss:$8 sm:$0xf]   ;;  %v1377_v6 = vld [vmem:[#allocation0 + $0x80] ss:$2 sm:%s1376_s2]   ;;  %s1406_s24 = smov 3 }
  0xbd   :  { %v2993_v5 = vld [vmem:[#allocation0 + $0x3] ss:$8 sm:$0xf0]   ;;  %v2631_v7 = vld [vmem:[#allocation0 + $0x708] ss:$2 sm:%s5160_s25]   ;;  %s1412_s22 = smov 3 }
  0xbe   :  { %v2637_v8 = vld [vmem:[#allocation0 + $0x710] ss:$2 sm:%s5166_s7]   ;;  %4042 = vst.msk [vmem:[%s6825_s1 + $0x20] ss:$8 sm:$0x3] %vm1283_vm0, %v1377_v6   ;;  %v2995_v18 = vsel %vm2819_vm1, %v2993_v5, %v2991_v4  ;;  %s1418_s17 = smov 3 }
  0xbf   :  { %v1383_v9 = vld [vmem:[#allocation0 + $0x88] ss:$2 sm:%s1382_s10]   ;;  %4251 = vst.msk [vmem:[%s6825_s1 + $0x1c1] ss:$8 sm:$0x3] %vm1283_vm0, %v2631_v7   ;;  %s1670_s3 = smov 3 }
  0xc0   :  { %v2625_v10 = vld [vmem:[#allocation0 + $0x700] ss:$2 sm:%s2624_s21]   ;;  %4252 = vst.msk [vmem:[%s6825_s1 + $0x1c2] ss:$8 sm:$0x3] %vm1283_vm0, %v2637_v8   ;;  %s1664_s21 = smov 3 }
  0xc1   :  { %v2969_v11 = vld [vmem:[#allocation0 + $0x701] ss:$8 sm:$0xf]   ;;  %4043 = vst.msk [vmem:[%s6825_s1 + $0x21] ss:$8 sm:$0x3] %vm1283_vm0, %v1383_v9  }
  0xc2   :  { %v2619_v12 = vld [vmem:[#allocation0 + $0x6f8] ss:$2 sm:%s2618_s11]   ;;  %4250 = vst.msk [vmem:[%s6825_s1 + $0x1c0] ss:$8 sm:$0x3] %vm1283_vm0, %v2625_v10   ;;  %v2973_v13 = vsel %vm2819_vm1, %v2971_v3, %v2969_v11  ;;  %s1676_s30 = smov 3 }
  0xc3   :  { %v1389_v14 = vld [vmem:[#allocation0 + $0x90] ss:$2 sm:%s1388_s6]   ;;  %4249 = vst.msk [vmem:[%s6825_s1 + $0x1b7] ss:$8 sm:$0x3] %vm1283_vm0, %v2619_v12   ;;  %2974 = vrot.lane.b32.xlu0 %v2973_v13, %s4346_s14  ;;  %s1682_s15 = smov 3 }
  0xc4   :  { %4044 = vst.msk [vmem:[%s6825_s1 + $0x22] ss:$8 sm:$0x3] %vm1283_vm0, %v1389_v14   ;;  %v1395_v15 = vld [vmem:[#allocation0 + $0x98] ss:$2 sm:%s1394_s12]   ;;  %s1688_s18 = smov 3 }
  0xc5   :  { %v1401_v16 = vld [vmem:[#allocation0 + $0xa0] ss:$2 sm:%s1400_s13]   ;;  %v2982_v17 = vld [vmem:[#allocation0 + $0x781] ss:$8 sm:$0xf0]   ;;  %s1694_s26 = smov 3 }
  0xc6   :  { %4045 = vst.msk [vmem:[%s6825_s1 + $0x23] ss:$8 sm:$0x3] %vm1283_vm0, %v1395_v15   ;;  %4046 = vst.msk [vmem:[%s6825_s1 + $0x24] ss:$8 sm:$0x3] %vm1283_vm0, %v1401_v16  }
  0xc7   :  { %v1407_v19 = vld [vmem:[#allocation0 + $0xa8] ss:$2 sm:%s1406_s24]   ;;  %v2980_v20 = vld [vmem:[#allocation0 + $0x781] ss:$8 sm:$0xf]   ;;  %2996 = vrot.lane.b32.xlu0 %v2995_v18, %s4346_s14  ;;  %s1700_s27 = smov 3 }
  0xc8   :  { %4047 = vst.msk [vmem:[%s6825_s1 + $0x25] ss:$8 sm:$0x3] %vm1283_vm0, %v1407_v19   ;;  %v1413_v21 = vld [vmem:[#allocation0 + $0xb0] ss:$2 sm:%s1412_s22]   ;;  %v2984_v22 = vsel %vm2819_vm1, %v2982_v17, %v2980_v20  ;;  %s1706_s19 = smov 3 }
  0xc9   :  { %4048 = vst.msk [vmem:[%s6825_s1 + $0x26] ss:$8 sm:$0x3] %vm1283_vm0, %v1413_v21   ;;  %v1419_v23 = vld [vmem:[#allocation0 + $0xb8] ss:$2 sm:%s1418_s17]   ;;  %2985 = vrot.lane.b32.xlu1 %v2984_v22, %s4346_s14  ;;  %s1784_s28 = smov 3 }
  0xca   :  { %v3002_v24 = vld [vmem:[#allocation0 + $0x83] ss:$8 sm:$0xf]   ;;  %4049 = vst.msk [vmem:[%s6825_s1 + $0x27] ss:$8 sm:$0x3] %vm1283_vm0, %v1419_v23  }
  0xcb   :  { %v3004_v25 = vld [vmem:[#allocation0 + $0x83] ss:$8 sm:$0xf0]   ;;  %v1665_v33 = vld [vmem:[#allocation0 + $0x200] ss:$2 sm:%s1664_s21]   ;;  %s1796_s20 = smov 3 }
  0xcc   :  { %v3013_v26 = vld [vmem:[#allocation0 + $0x103] ss:$8 sm:$0xf]   ;;  %v3006_v27 = vsel %vm2819_vm1, %v3004_v25, %v3002_v24  ;;  %v1671_v34 = vld [vmem:[#allocation0 + $0x208] ss:$2 sm:%s1670_s3]   ;;  %s1790_s3 = smov 3 }
  0xcd   :  { %v3015_v28 = vld [vmem:[#allocation0 + $0x103] ss:$8 sm:$0xf0]   ;;  %v1677_v35 = vld [vmem:[#allocation0 + $0x210] ss:$2 sm:%s1676_s30]   ;;  %3007 = vrot.lane.b32.xlu1 %v3006_v27, %s4346_s14  ;;  %s5297_s7 = smov 3 }
  0xce   :  { %v3024_v29 = vld [vmem:[#allocation0 + $0x183] ss:$8 sm:$0xf]   ;;  %v3017_v30 = vsel %vm2819_vm1, %v3015_v28, %v3013_v26  ;;  %4090 = vst.msk [vmem:[%s6825_s1 + $0x80] ss:$8 sm:$0x3] %vm1283_vm0, %v1665_v33  }
  0xcf   :  { %v3026_v31 = vld [vmem:[#allocation0 + $0x183] ss:$8 sm:$0xf0]   ;;  %3018 = vrot.lane.b32.xlu0 %v3017_v30, %s4346_s14  ;;  %4091 = vst.msk [vmem:[%s6825_s1 + $0x81] ss:$8 sm:$0x3] %vm1283_vm0, %v1671_v34  }
  0xd0   :  { %v3955_v32 = vld [vmem:[%s6824_s0 + $0x120] sm:$0xf]  ;;  %4092 = vst.msk [vmem:[%s6825_s1 + $0x82] ss:$8 sm:$0x3] %vm1283_vm0, %v1677_v35   ;;  %v3028_v37 = vsel %vm2819_vm1, %v3026_v31, %v3024_v29  ;;  %s1856_s6 = smov 3 }
  0xd1   :  { %924 = vst [vmem:[#allocation0 + $0x240] sm:$0xf] %v3955_v32  ;;  %v3035_v36 = vld [vmem:[#allocation0 + $0x203] ss:$8 sm:$0xf]   ;;  %3029 = vrot.lane.b32.xlu1 %v3028_v37, %s4346_s14  ;;  %s1862_s12 = smov 3 }
  0xd2   :  { %v1683_v38 = vld [vmem:[#allocation0 + $0x218] ss:$2 sm:%s1682_s15]   ;;  %v1695_v40 = vld [vmem:[#allocation0 + $0x228] ss:$2 sm:%s1694_s26]   ;;  %s1868_s29 = smov 3  ;;  %s1886_s17 = smov 3 }
  0xd3   :  { %v1689_v39 = vld [vmem:[#allocation0 + $0x220] ss:$2 sm:%s1688_s18]   ;;  %4093 = vst.msk [vmem:[%s6825_s1 + $0x83] ss:$8 sm:$0x3] %vm1283_vm0, %v1683_v38   ;;  %s1892_s25 = smov 3 }
  0xd4   :  { %4094 = vst.msk [vmem:[%s6825_s1 + $0x84] ss:$8 sm:$0x3] %vm1283_vm0, %v1689_v39   ;;  %v1701_v41 = vld [vmem:[#allocation0 + $0x230] ss:$2 sm:%s1700_s27]   ;;  %s2528_s30 = smov 3 }
  0xd5   :  { %4095 = vst.msk [vmem:[%s6825_s1 + $0x85] ss:$8 sm:$0x3] %vm1283_vm0, %v1695_v40   ;;  %4096 = vst.msk [vmem:[%s6825_s1 + $0x86] ss:$8 sm:$0x3] %vm1283_vm0, %v1701_v41  }
  0xd6   :  { %v3037_v42 = vld [vmem:[#allocation0 + $0x203] ss:$8 sm:$0xf0]   ;;  %v1785_v45 = vld [vmem:[#allocation0 + $0x2a0] ss:$2 sm:%s1784_s28]   ;;  %s1880_s28 = smov 3 }
  0xd7   :  { %v3939_v43 = vld [vmem:[%s6824_s0 + $0x160] sm:$0xf]  ;;  %v3039_v44 = vsel %vm2819_vm1, %v3037_v42, %v3035_v36  ;;  %v1791_v46 = vld [vmem:[#allocation0 + $0x2a8] ss:$2 sm:%s1790_s3]   ;;  %s1898_s3 = smov 3  ;;  %s2534_s5 = smov 3 }
  0xd8   :  { %844 = vst [vmem:[#allocation0 + $0x2c0] sm:$0xf] %v3939_v43  ;;  %3040 = vrot.lane.b32.xlu0 %v3039_v44, %s4346_s14  ;;  %4110 = vst.msk [vmem:[%s6825_s1 + $0xa4] ss:$8 sm:$0x3] %vm1283_vm0, %v1785_v45   ;;  %s2540_s13 = smov 3 }
  0xd9   :  { %4111 = vst.msk [vmem:[%s6825_s1 + $0xa5] ss:$8 sm:$0x3] %vm1283_vm0, %v1791_v46   ;;  %v1797_v47 = vld [vmem:[#allocation0 + $0x2b0] ss:$2 sm:%s1796_s20]   ;;  %s2660_s16 = smov 3 }
  0xda   :  { %v3046_v48 = vld [vmem:[#allocation0 + $0x283] ss:$8 sm:$0xf]   ;;  %v1707_v49 = vld [vmem:[#allocation0 + $0x238] ss:$2 sm:%s1706_s19]   ;;  %s1874_s19 = smov 3 }
  0xdb   :  { %4112 = vst.msk [vmem:[%s6825_s1 + $0xa6] ss:$8 sm:$0x3] %vm1283_vm0, %v1797_v47   ;;  %v3048_v50 = vld [vmem:[#allocation0 + $0x283] ss:$8 sm:$0xf0]  }
  0xdc   :  { %4097 = vst.msk [vmem:[%s6825_s1 + $0x87] ss:$8 sm:$0x3] %vm1283_vm0, %v1707_v49   ;;  %v3050_v51 = vsel %vm2819_vm1, %v3048_v50, %v3046_v48  ;;  %v3923_v52 = vld [vmem:[%s6824_s0 + $0x1a0] sm:$0xf]  ;;  %s2726_s2 = smov 3 }
  0xdd   :  { %v1857_v53 = vld [vmem:[#allocation0 + $0x300] ss:$2 sm:%s1856_s6]   ;;  %3051 = vrot.lane.b32.xlu1 %v3050_v51, %s4346_s14  ;;  %764 = vst [vmem:[#allocation0 + $0x340] sm:$0xf] %v3923_v52  ;;  %v1869_v56 = vld [vmem:[#allocation0 + $0x310] ss:$2 sm:%s1868_s29]  }
  0xde   :  { %v1863_v54 = vld [vmem:[#allocation0 + $0x308] ss:$2 sm:%s1862_s12]   ;;  %4122 = vst.msk [vmem:[%s6825_s1 + $0xc0] ss:$8 sm:$0x3] %vm1283_vm0, %v1857_v53   ;;  %s2732_s4 = smov 3 }
  0xdf   :  { %4123 = vst.msk [vmem:[%s6825_s1 + $0xc1] ss:$8 sm:$0x3] %vm1283_vm0, %v1863_v54   ;;  %v3057_v55 = vld [vmem:[#allocation0 + $0x303] ss:$8 sm:$0xf]  }
  0xe0   :  { %v1875_v57 = vld [vmem:[#allocation0 + $0x318] ss:$2 sm:%s1874_s19]   ;;  %4124 = vst.msk [vmem:[%s6825_s1 + $0xc2] ss:$8 sm:$0x3] %vm1283_vm0, %v1869_v56   ;;  %s2642_s19 = smov 3 }
  0xe1   :  { %4125 = vst.msk [vmem:[%s6825_s1 + $0xc3] ss:$8 sm:$0x3] %vm1283_vm0, %v1875_v57   ;;  %v1881_v58 = vld [vmem:[#allocation0 + $0x320] ss:$2 sm:%s1880_s28]   ;;  %s2648_s28 = smov 3 }
  0xe2   :  { %v1887_v59 = vld [vmem:[#allocation0 + $0x328] ss:$2 sm:%s1886_s17]   ;;  %v1803_v60 = vld [vmem:[#allocation0 + $0x2b8] ss:$2 sm:%s5297_s7]   ;;  %s2654_s17 = smov 3  ;;  %s2738_s9 = smov 3 }
  0xe3   :  { %4126 = vst.msk [vmem:[%s6825_s1 + $0xc4] ss:$8 sm:$0x3] %vm1283_vm0, %v1881_v58   ;;  %4127 = vst.msk [vmem:[%s6825_s1 + $0xc5] ss:$8 sm:$0x3] %vm1283_vm0, %v1887_v59  }
  0xe4   :  { %v1893_v61 = vld [vmem:[#allocation0 + $0x330] ss:$2 sm:%s1892_s25]   ;;  %4113 = vst.msk [vmem:[%s6825_s1 + $0xa7] ss:$8 sm:$0x3] %vm1283_vm0, %v1803_v60   ;;  %s2744_s12 = smov 3  ;;  %v5508_v60 = vpop.permute.xlu0 %2821  }
  0xe5   :  { %4128 = vst.msk [vmem:[%s6825_s1 + $0xc6] ss:$8 sm:$0x3] %vm1283_vm0, %v1893_v61   ;;  %v3059_v62 = vld [vmem:[#allocation0 + $0x303] ss:$8 sm:$0xf0]   ;;  %v5510_v61 = vpop.permute.xlu1 %2842  }
  0xe6   :  { %v3068_v63 = vld [vmem:[#allocation0 + $0x383] ss:$8 sm:$0xf]   ;;  %v3061_v0 = vsel %vm2819_vm1, %v3059_v62, %v3057_v55  ;;  %v1899_v6 = vld [vmem:[#allocation0 + $0x338] ss:$2 sm:%s1898_s3]   ;;  %s2720_s3 = smov 3 }
  0xe7   :  { %v3070_v1 = vld [vmem:[#allocation0 + $0x383] ss:$8 sm:$0xf0]   ;;  %3062 = vrot.lane.b32.xlu0 %v3061_v0, %s4346_s14  ;;  %4129 = vst.msk [vmem:[%s6825_s1 + $0xc7] ss:$8 sm:$0x3] %vm1283_vm0, %v1899_v6  }
  0xe8   :  { %v3079_v2 = vld [vmem:[#allocation0 + $0x403] ss:$8 sm:$0xf]   ;;  %v3072_v3 = vsel %vm2819_vm1, %v3070_v1, %v3068_v63  ;;  %v2529_v16 = vld [vmem:[#allocation0 + $0x680] ss:$2 sm:%s2528_s30]   ;;  %s2750_s27 = smov 3 }
  0xe9   :  { %v3081_v4 = vld [vmem:[#allocation0 + $0x403] ss:$8 sm:$0xf0]   ;;  %3073 = vrot.lane.b32.xlu1 %v3072_v3, %s4346_s14  ;;  %v2535_v17 = vld [vmem:[#allocation0 + $0x688] ss:$2 sm:%s2534_s5]   ;;  %s2756_s24 = smov 3 }
  0xea   :  { %v3090_v5 = vld [vmem:[#allocation0 + $0x483] ss:$8 sm:$0xf]   ;;  %v3083_v7 = vsel %vm2819_vm1, %v3081_v4, %v3079_v2  ;;  %v2541_v18 = vld [vmem:[#allocation0 + $0x690] ss:$2 sm:%s2540_s13]   ;;  %s5457_s15 = smov 3 }
  0xeb   :  { %v3092_v8 = vld [vmem:[#allocation0 + $0x483] ss:$8 sm:$0xf0]   ;;  %3084 = vrot.lane.b32.xlu0 %v3083_v7, %s4346_s14  ;;  %4234 = vst.msk [vmem:[%s6825_s1 + $0x1a0] ss:$8 sm:$0x3] %vm1283_vm0, %v2529_v16  }
  0xec   :  { %v3094_v9 = vsel %vm2819_vm1, %v3092_v8, %v3090_v5  ;;  %v3101_v10 = vld [vmem:[#allocation0 + $0x503] ss:$8 sm:$0xf]   ;;  %4235 = vst.msk [vmem:[%s6825_s1 + $0x1a1] ss:$8 sm:$0x3] %vm1283_vm0, %v2535_v17   ;;  %v5549_v8 = vpop.permute.xlu0 %2831  }
  0xed   :  { %v3103_v11 = vld [vmem:[#allocation0 + $0x503] ss:$8 sm:$0xf0]   ;;  %3095 = vrot.lane.b32.xlu1 %v3094_v9, %s4346_s14  ;;  %4236 = vst.msk [vmem:[%s6825_s1 + $0x1a2] ss:$8 sm:$0x3] %vm1283_vm0, %v2541_v18   ;;  %v5551_v9 = vpop.permute.xlu1 %2853  }
  0xee   :  { %v3112_v12 = vld [vmem:[#allocation0 + $0x583] ss:$8 sm:$0xf]   ;;  %v3105_v15 = vsel %vm2819_vm1, %v3103_v11, %v3101_v10  ;;  %v2643_v23 = vld [vmem:[#allocation0 + $0x718] ss:$2 sm:%s2642_s19]   ;;  %s5459_s18 = smov 3 }
  0xef   :  { %v3114_v13 = vld [vmem:[#allocation0 + $0x583] ss:$8 sm:$0xf0]   ;;  %3106 = vrot.lane.b32.xlu0 %v3105_v15, %s4346_s14  ;;  %v2649_v24 = vld [vmem:[#allocation0 + $0x720] ss:$2 sm:%s2648_s28]   ;;  %s5466_s22 = smov 3 }
  0xf0   :  { %v3123_v14 = vld [vmem:[#allocation0 + $0x603] ss:$8 sm:$0xf]   ;;  %v3116_v19 = vsel %vm2819_vm1, %v3114_v13, %v3112_v12  ;;  %4253 = vst.msk [vmem:[%s6825_s1 + $0x1c3] ss:$8 sm:$0x3] %vm1283_vm0, %v2643_v23  }
  0xf1   :  { %v3125_v20 = vld [vmem:[#allocation0 + $0x603] ss:$8 sm:$0xf0]   ;;  %3117 = vrot.lane.b32.xlu1 %v3116_v19, %s4346_s14  ;;  %4254 = vst.msk [vmem:[%s6825_s1 + $0x1c4] ss:$8 sm:$0x3] %vm1283_vm0, %v2649_v24  }
  0xf2   :  { %v3134_v21 = vld [vmem:[#allocation0 + $0x683] ss:$8 sm:$0xf]   ;;  %v3127_v26 = vsel %vm2819_vm1, %v3125_v20, %v3123_v14  ;;  %v2655_v27 = vld [vmem:[#allocation0 + $0x728] ss:$2 sm:%s2654_s17]   ;;  %s1358_s17 = smov 3 }
  0xf3   :  { %v3136_v22 = vld [vmem:[#allocation0 + $0x683] ss:$8 sm:$0xf0]   ;;  %4255 = vst.msk [vmem:[%s6825_s1 + $0x1c5] ss:$8 sm:$0x3] %vm1283_vm0, %v2655_v27   ;;  %3128 = vrot.lane.b32.xlu0 %v3127_v26, %s4346_s14 }
  0xf4   :  { %v3145_v25 = vld [vmem:[#allocation0 + $0x703] ss:$8 sm:$0xf]   ;;  %v3138_v29 = vsel %vm2819_vm1, %v3136_v22, %v3134_v21  ;;  %v2661_v30 = vld [vmem:[#allocation0 + $0x730] ss:$2 sm:%s2660_s16]   ;;  %s5427_s16 = smov 3  ;;  %v5595_v21 = vpop.permute.xlu0 %2864  }
  0xf5   :  { %v3147_v28 = vld [vmem:[#allocation0 + $0x703] ss:$8 sm:$0xf0]   ;;  %v2721_v31 = vld [vmem:[#allocation0 + $0x780] ss:$2 sm:%s2720_s3]   ;;  %3139 = vrot.lane.b32.xlu1 %v3138_v29, %s4346_s14  ;;  %s1364_s11 = smov 3 }
  0xf6   :  { %4256 = vst.msk [vmem:[%s6825_s1 + $0x1c6] ss:$8 sm:$0x3] %vm1283_vm0, %v2661_v30   ;;  %4266 = vst.msk [vmem:[%s6825_s1 + $0x1e0] ss:$8 sm:$0x3] %vm1283_vm0, %v2721_v31   ;;  %v3149_v36 = vsel %vm2819_vm1, %v3147_v28, %v3145_v25  ;;  %v5604_v25 = vpop.permute.xlu1 %2875  }
  0xf7   :  { %v2727_v32 = vld [vmem:[#allocation0 + $0x788] ss:$2 sm:%s2726_s2]   ;;  %v2739_v34 = vld [vmem:[#allocation0 + $0x798] ss:$2 sm:%s2738_s9]   ;;  %3150 = vrot.lane.b32.xlu0 %v3149_v36, %s4346_s14  ;;  %s1370_s20 = smov 3  ;;  %s5488_s6 = smov 3 }
  0xf8   :  { %v2733_v33 = vld [vmem:[#allocation0 + $0x790] ss:$2 sm:%s2732_s4]   ;;  %4267 = vst.msk [vmem:[%s6825_s1 + $0x1e1] ss:$8 sm:$0x3] %vm1283_vm0, %v2727_v32   ;;  %s5483_s4 = smov 3  ;;  %v5629_v31 = vpop.permute.xlu0 %2886  }
  0xf9   :  { %4268 = vst.msk [vmem:[%s6825_s1 + $0x1e2] ss:$8 sm:$0x3] %vm1283_vm0, %v2733_v33   ;;  %v2745_v35 = vld [vmem:[#allocation0 + $0x7a0] ss:$2 sm:%s2744_s12]   ;;  %s5490_s8 = smov 3 }
  0xfa   :  { %4269 = vst.msk [vmem:[%s6825_s1 + $0x1e3] ss:$8 sm:$0x3] %vm1283_vm0, %v2739_v34   ;;  %4270 = vst.msk [vmem:[%s6825_s1 + $0x1e4] ss:$8 sm:$0x3] %vm1283_vm0, %v2745_v35  }
  0xfb   :  { %v2751_v37 = vld [vmem:[#allocation0 + $0x7a8] ss:$2 sm:%s2750_s27]   ;;  %v3156_v38 = vld [vmem:[#allocation0 + $0x783] ss:$8 sm:$0xf]   ;;  %s5498_s27 = smov 3 }
  0xfc   :  { %4271 = vst.msk [vmem:[%s6825_s1 + $0x1e5] ss:$8 sm:$0x3] %vm1283_vm0, %v2751_v37   ;;  %v3158_v39 = vld [vmem:[#allocation0 + $0x783] ss:$8 sm:$0xf0]  }
  0xfd   :  { %v2757_v40 = vld [vmem:[#allocation0 + $0x7b0] ss:$2 sm:%s2756_s24]   ;;  %v3160_v41 = vsel %vm2819_vm1, %v3158_v39, %v3156_v38  ;;  %v4016_v46 = vld [vmem:[%s6824_s0 + $0x2c] sm:$0xf]  ;;  %v4017_v47 = vld [vmem:[%s6824_s0 + $0x28] sm:$0xf] }
  0xfe   :  { %4272 = vst.msk [vmem:[%s6825_s1 + $0x1e6] ss:$8 sm:$0x3] %vm1283_vm0, %v2757_v40   ;;  %v4012_v42 = vld [vmem:[%s6824_s0 + $0x3c] sm:$0xf]  ;;  %3161 = vrot.lane.b32.xlu1 %v3160_v41, %s4346_s14  ;;  %s5464_s24 = smov 3  ;;  %v5663_v41 = vpop.permute.xlu1 %2897  }
  0xff   :  { %v4013_v43 = vld [vmem:[%s6824_s0 + $0x38] sm:$0xf]  ;;  %v4014_v44 = vld [vmem:[%s6824_s0 + $0x34] sm:$0xf]  ;;  %1209 = vst [vmem:[#allocation0 + $0x78] sm:$0xf] %v4012_v42 }
 0x100   :  { %1214 = vst [vmem:[#allocation0 + $0x70] sm:$0xf] %v4013_v43  ;;  %1219 = vst [vmem:[#allocation0 + $0x68] sm:$0xf] %v4014_v44  ;;  %v4015_v45 = vld [vmem:[%s6824_s0 + $0x30] sm:$0xf] }
 0x101   :  { %1224 = vst [vmem:[#allocation0 + $0x60] sm:$0xf] %v4015_v45  ;;  %1229 = vst [vmem:[#allocation0 + $0x58] sm:$0xf] %v4016_v46  ;;  %v4018_v48 = vld [vmem:[%s6824_s0 + $0x24] sm:$0xf] }
 0x102   :  { %1234 = vst [vmem:[#allocation0 + $0x50] sm:$0xf] %v4017_v47  ;;  %v3997_v49 = vld [vmem:[%s6824_s0 + $0x78] sm:$0xf]  ;;  %1239 = vst [vmem:[#allocation0 + $0x48] sm:$0xf] %v4018_v48 }
 0x103   :  { %1134 = vst [vmem:[#allocation0 + $0xf0] sm:$0xf] %v3997_v49  ;;  %v3998_v50 = vld [vmem:[%s6824_s0 + $0x74] sm:$0xf]  ;;  %v3999_v51 = vld [vmem:[%s6824_s0 + $0x70] sm:$0xf] }
 0x104   :  { %1139 = vst [vmem:[#allocation0 + $0xe8] sm:$0xf] %v3998_v50  ;;  %1144 = vst [vmem:[#allocation0 + $0xe0] sm:$0xf] %v3999_v51  ;;  %v4000_v52 = vld [vmem:[%s6824_s0 + $0x6c] sm:$0xf] }
 0x105   :  { %v4001_v53 = vld [vmem:[%s6824_s0 + $0x68] sm:$0xf]  ;;  %1149 = vst [vmem:[#allocation0 + $0xd8] sm:$0xf] %v4000_v52  ;;  %v4002_v54 = vld [vmem:[%s6824_s0 + $0x64] sm:$0xf] }
 0x106   :  { %1154 = vst [vmem:[#allocation0 + $0xd0] sm:$0xf] %v4001_v53  ;;  %v3980_v55 = vld [vmem:[%s6824_s0 + $0xbc] sm:$0xf]  ;;  %1159 = vst [vmem:[#allocation0 + $0xc8] sm:$0xf] %v4002_v54 }
 0x107   :  { %1049 = vst [vmem:[#allocation0 + $0x178] sm:$0xf] %v3980_v55  ;;  %v3981_v56 = vld [vmem:[%s6824_s0 + $0xb8] sm:$0xf]  ;;  %v3982_v57 = vld [vmem:[%s6824_s0 + $0xb4] sm:$0xf] }
 0x108   :  { %s5500_s23 = smov 3  ;;  %1054 = vst [vmem:[#allocation0 + $0x170] sm:$0xf] %v3981_v56  ;;  %1059 = vst [vmem:[#allocation0 + $0x168] sm:$0xf] %v3982_v57  ;;  %s1454_s2 = smov 3 }
 0x109   :  { %v3983_v58 = vld [vmem:[%s6824_s0 + $0xb0] sm:$0xf]  ;;  %v3984_v59 = vld [vmem:[%s6824_s0 + $0xac] sm:$0xf]  ;;  %v1371_v0 = vld [vmem:[#allocation0 + $0x78] ss:$2 sm:%s1370_s20]  }
 0x10a   :  { %v1359_v62 = vld [vmem:[#allocation0 + $0x68] ss:$2 sm:%s1358_s17]   ;;  %1064 = vst [vmem:[#allocation0 + $0x160] sm:$0xf] %v3983_v58  ;;  %1069 = vst [vmem:[#allocation0 + $0x158] sm:$0xf] %v3984_v59 }
 0x10b   :  { %v1365_v63 = vld [vmem:[#allocation0 + $0x70] ss:$2 sm:%s1364_s11]   ;;  %v1353_v3 = vld [vmem:[#allocation0 + $0x60] ss:$2 sm:%s5466_s22]   ;;  %s1460_s30 = smov 3  ;;  %s5584_s22 = smov 3 }
 0x10c   :  { %v1341_v1 = vld [vmem:[#allocation0 + $0x50] ss:$2 sm:%s5459_s18]   ;;  %4039 = vst.msk [vmem:[%s6825_s1 + $0x15] ss:$8 sm:$0x3] %vm1283_vm0, %v1359_v62   ;;  %s1538_s20 = smov 3 }
 0x10d   :  { %v1347_v2 = vld [vmem:[#allocation0 + $0x58] ss:$2 sm:%s5464_s24]   ;;  %4040 = vst.msk [vmem:[%s6825_s1 + $0x16] ss:$8 sm:$0x3] %vm1283_vm0, %v1365_v63   ;;  %s1544_s7 = smov 3 }
 0x10e   :  { %4041 = vst.msk [vmem:[%s6825_s1 + $0x17] ss:$8 sm:$0x3] %vm1283_vm0, %v1371_v0   ;;  %v1329_v4 = vld [vmem:[#allocation0 + $0x40] ss:$2 sm:%s5427_s16]   ;;  %s1550_s5 = smov 3 }
 0x10f   :  { %v1335_v5 = vld [vmem:[#allocation0 + $0x48] ss:$2 sm:%s5457_s15]   ;;  %4036 = vst.msk [vmem:[%s6825_s1 + $0x12] ss:$8 sm:$0x3] %vm1283_vm0, %v1341_v1   ;;  %s5593_s15 = smov 3 }
 0x110   :  { %4037 = vst.msk [vmem:[%s6825_s1 + $0x13] ss:$8 sm:$0x3] %vm1283_vm0, %v1347_v2   ;;  %4038 = vst.msk [vmem:[%s6825_s1 + $0x14] ss:$8 sm:$0x3] %vm1283_vm0, %v1353_v3  }
 0x111   :  { %4034 = vst.msk [vmem:[%s6825_s1 + $0x10] ss:$8 sm:$0x3] %vm1283_vm0, %v1329_v4   ;;  %4035 = vst.msk [vmem:[%s6825_s1 + $0x11] ss:$8 sm:$0x3] %vm1283_vm0, %v1335_v5   ;;  %v5754_v5 = vpop.permute.xlu0 %2908  }
 0x112   :  { %v3167_v6 = vld [vmem:[#allocation0 + $0x41] ss:$8 sm:$0xf]   ;;  %v1437_v11 = vld [vmem:[#allocation0 + $0xd0] ss:$2 sm:%s5490_s8]   ;;  %s1556_s9 = smov 3 }
 0x113   :  { %v3169_v7 = vld [vmem:[#allocation0 + $0x41] ss:$8 sm:$0xf0]   ;;  %v1443_v12 = vld [vmem:[#allocation0 + $0xd8] ss:$2 sm:%s5498_s27]   ;;  %s5607_s12 = smov 3 }
 0x114   :  { %v3171_v10 = vsel %vm2819_vm1, %v3169_v7, %v3167_v6  ;;  %v1449_v13 = vld [vmem:[#allocation0 + $0xe0] ss:$2 sm:%s5500_s23]   ;;  %4052 = vst.msk [vmem:[%s6825_s1 + $0x32] ss:$8 sm:$0x3] %vm1283_vm0, %v1437_v11   ;;  %s1562_s26 = smov 3 }
 0x115   :  { %3172 = vrot.lane.b32.xlu0 %v3171_v10, %s4346_s14  ;;  %v1425_v14 = vld [vmem:[#allocation0 + $0xc0] ss:$2 sm:%s5483_s4]   ;;  %4053 = vst.msk [vmem:[%s6825_s1 + $0x33] ss:$8 sm:$0x3] %vm1283_vm0, %v1443_v12   ;;  %s5625_s28 = smov 3 }
 0x116   :  { %v1431_v15 = vld [vmem:[#allocation0 + $0xc8] ss:$2 sm:%s5488_s6]   ;;  %4054 = vst.msk [vmem:[%s6825_s1 + $0x34] ss:$8 sm:$0x3] %vm1283_vm0, %v1449_v13   ;;  %s5627_s21 = smov 3 }
 0x117   :  { %v1455_v16 = vld [vmem:[#allocation0 + $0xe8] ss:$2 sm:%s1454_s2]   ;;  %4050 = vst.msk [vmem:[%s6825_s1 + $0x30] ss:$8 sm:$0x3] %vm1283_vm0, %v1425_v14   ;;  %s5656_s6 = smov 3 }
 0x118   :  { %4051 = vst.msk [vmem:[%s6825_s1 + $0x31] ss:$8 sm:$0x3] %vm1283_vm0, %v1431_v15   ;;  %4055 = vst.msk [vmem:[%s6825_s1 + $0x35] ss:$8 sm:$0x3] %vm1283_vm0, %v1455_v16  }
 0x119   :  { %v1461_v17 = vld [vmem:[#allocation0 + $0xf0] ss:$2 sm:%s1460_s30]   ;;  %v3178_v18 = vld [vmem:[#allocation0 + $0xc1] ss:$8 sm:$0xf]   ;;  %s5658_s8 = smov 3 }
 0x11a   :  { %4056 = vst.msk [vmem:[%s6825_s1 + $0x36] ss:$8 sm:$0x3] %vm1283_vm0, %v1461_v17   ;;  %v3180_v19 = vld [vmem:[#allocation0 + $0xc1] ss:$8 sm:$0xf0]  }
 0x11b   :  { %v3985_v20 = vld [vmem:[%s6824_s0 + $0xa8] sm:$0xf]  ;;  %v3182_v22 = vsel %vm2819_vm1, %v3180_v19, %v3178_v18  ;;  %v3986_v23 = vld [vmem:[%s6824_s0 + $0xa4] sm:$0xf]  ;;  %v3964_v24 = vld [vmem:[%s6824_s0 + $0xfc] sm:$0xf] }
 0x11c   :  { %1074 = vst [vmem:[#allocation0 + $0x150] sm:$0xf] %v3985_v20  ;;  %3183 = vrot.lane.b32.xlu1 %v3182_v22, %s4346_s14  ;;  %1079 = vst [vmem:[#allocation0 + $0x148] sm:$0xf] %v3986_v23  ;;  %v1539_v26 = vld [vmem:[#allocation0 + $0x158] ss:$2 sm:%s1538_s20]  }
 0x11d   :  { %v1545_v27 = vld [vmem:[#allocation0 + $0x160] ss:$2 sm:%s1544_s7]   ;;  %969 = vst [vmem:[#allocation0 + $0x1f8] sm:$0xf] %v3964_v24  ;;  %v1557_v29 = vld [vmem:[#allocation0 + $0x170] ss:$2 sm:%s1556_s9]  }
 0x11e   :  { %4069 = vst.msk [vmem:[%s6825_s1 + $0x53] ss:$8 sm:$0x3] %vm1283_vm0, %v1539_v26   ;;  %4070 = vst.msk [vmem:[%s6825_s1 + $0x54] ss:$8 sm:$0x3] %vm1283_vm0, %v1545_v27   ;;  %v5811_v26 = vpop.permute.xlu1 %2919  }
 0x11f   :  { %v1551_v28 = vld [vmem:[#allocation0 + $0x168] ss:$2 sm:%s1550_s5]   ;;  %4072 = vst.msk [vmem:[%s6825_s1 + $0x56] ss:$8 sm:$0x3] %vm1283_vm0, %v1557_v29   ;;  %s1640_s23 = smov 3 }
 0x120   :  { %4071 = vst.msk [vmem:[%s6825_s1 + $0x55] ss:$8 sm:$0x3] %vm1283_vm0, %v1551_v28   ;;  %v1563_v30 = vld [vmem:[#allocation0 + $0x178] ss:$2 sm:%s1562_s26]   ;;  %s1646_s18 = smov 3 }
 0x121   :  { %4073 = vst.msk [vmem:[%s6825_s1 + $0x57] ss:$8 sm:$0x3] %vm1283_vm0, %v1563_v30   ;;  %v3965_v32 = vld [vmem:[%s6824_s0 + $0xf8] sm:$0xf]  ;;  %s1652_s24 = smov 3 }
 0x122   :  { %v3966_v33 = vld [vmem:[%s6824_s0 + $0xf4] sm:$0xf]  ;;  %v3967_v34 = vld [vmem:[%s6824_s0 + $0xf0] sm:$0xf]  ;;  %974 = vst [vmem:[#allocation0 + $0x1f0] sm:$0xf] %v3965_v32 }
 0x123   :  { %v3191_v35 = vld [vmem:[#allocation0 + $0x141] ss:$8 sm:$0xf0]   ;;  %979 = vst [vmem:[#allocation0 + $0x1e8] sm:$0xf] %v3966_v33  ;;  %s1658_s25 = smov 3 }
 0x124   :  { %984 = vst [vmem:[#allocation0 + $0x1e0] sm:$0xf] %v3967_v34  ;;  %v3968_v36 = vld [vmem:[%s6824_s0 + $0xec] sm:$0xf]  ;;  %v3969_v37 = vld [vmem:[%s6824_s0 + $0xe8] sm:$0xf] }
 0x125   :  { %v3970_v38 = vld [vmem:[%s6824_s0 + $0xe4] sm:$0xf]  ;;  %989 = vst [vmem:[#allocation0 + $0x1d8] sm:$0xf] %v3968_v36  ;;  %994 = vst [vmem:[#allocation0 + $0x1d0] sm:$0xf] %v3969_v37 }
 0x126   :  { %999 = vst [vmem:[#allocation0 + $0x1c8] sm:$0xf] %v3970_v38  ;;  %v3971_v39 = vld [vmem:[%s6824_s0 + $0xe0] sm:$0xf]  ;;  %v3948_v40 = vld [vmem:[%s6824_s0 + $0x13c] sm:$0xf] }
 0x127   :  { %v1533_v42 = vld [vmem:[#allocation0 + $0x150] ss:$2 sm:%s5607_s12]   ;;  %1004 = vst [vmem:[#allocation0 + $0x1c0] sm:$0xf] %v3971_v39  ;;  %s5666_s12 = smov 3  ;;  %s5706_s19 = smov 3 }
 0x128   :  { %889 = vst [vmem:[#allocation0 + $0x278] sm:$0xf] %v3948_v40  ;;  %v3949_v43 = vld [vmem:[%s6824_s0 + $0x138] sm:$0xf]  ;;  %v1521_v44 = vld [vmem:[#allocation0 + $0x140] ss:$2 sm:%s5584_s22]  }
 0x129   :  { %v1527_v45 = vld [vmem:[#allocation0 + $0x148] ss:$2 sm:%s5593_s15]   ;;  %4068 = vst.msk [vmem:[%s6825_s1 + $0x52] ss:$8 sm:$0x3] %vm1283_vm0, %v1533_v42   ;;  %s5708_s22 = smov 3 }
 0x12a   :  { %894 = vst [vmem:[#allocation0 + $0x270] sm:$0xf] %v3949_v43  ;;  %4066 = vst.msk [vmem:[%s6825_s1 + $0x50] ss:$8 sm:$0x3] %vm1283_vm0, %v1521_v44   ;;  %s1724_s16 = smov 3 }
 0x12b   :  { %4067 = vst.msk [vmem:[%s6825_s1 + $0x51] ss:$8 sm:$0x3] %vm1283_vm0, %v1527_v45   ;;  %v3189_v46 = vld [vmem:[#allocation0 + $0x141] ss:$8 sm:$0xf]  }
 0x12c   :  { %v3950_v47 = vld [vmem:[%s6824_s0 + $0x134] sm:$0xf]  ;;  %v3193_v48 = vsel %vm2819_vm1, %v3191_v35, %v3189_v46  ;;  %v1659_v49 = vld [vmem:[#allocation0 + $0x1f8] ss:$2 sm:%s1658_s25]   ;;  %v3951_v50 = vld [vmem:[%s6824_s0 + $0x130] sm:$0xf] }
 0x12d   :  { %899 = vst [vmem:[#allocation0 + $0x268] sm:$0xf] %v3950_v47  ;;  %v3952_v51 = vld [vmem:[%s6824_s0 + $0x12c] sm:$0xf]  ;;  %3194 = vrot.lane.b32.xlu0 %v3193_v48, %s4346_s14  ;;  %904 = vst [vmem:[#allocation0 + $0x260] sm:$0xf] %v3951_v50 }
 0x12e   :  { %4089 = vst.msk [vmem:[%s6825_s1 + $0x77] ss:$8 sm:$0x3] %vm1283_vm0, %v1659_v49   ;;  %909 = vst [vmem:[#allocation0 + $0x258] sm:$0xf] %v3952_v51  ;;  %s1730_s25 = smov 3 }
 0x12f   :  { %v3953_v52 = vld [vmem:[%s6824_s0 + $0x128] sm:$0xf]  ;;  %v3954_v53 = vld [vmem:[%s6824_s0 + $0x124] sm:$0xf]  ;;  %v1653_v56 = vld [vmem:[#allocation0 + $0x1f0] ss:$2 sm:%s1652_s24]  }
 0x130   :  { %v1641_v54 = vld [vmem:[#allocation0 + $0x1e0] ss:$2 sm:%s1640_s23]   ;;  %914 = vst [vmem:[#allocation0 + $0x250] sm:$0xf] %v3953_v52  ;;  %919 = vst [vmem:[#allocation0 + $0x248] sm:$0xf] %v3954_v53  ;;  %v5894_v52 = vpop.permute.xlu0 %2930  }
 0x131   :  { %v1647_v55 = vld [vmem:[#allocation0 + $0x1e8] ss:$2 sm:%s1646_s18]   ;;  %v1635_v59 = vld [vmem:[#allocation0 + $0x1d8] ss:$2 sm:%s5666_s12]   ;;  %s1736_s30 = smov 3  ;;  %s1742_s5 = smov 3 }
 0x132   :  { %v1623_v57 = vld [vmem:[#allocation0 + $0x1c8] ss:$2 sm:%s5656_s6]   ;;  %4086 = vst.msk [vmem:[%s6825_s1 + $0x74] ss:$8 sm:$0x3] %vm1283_vm0, %v1641_v54   ;;  %s1748_s27 = smov 3 }
 0x133   :  { %v1629_v58 = vld [vmem:[#allocation0 + $0x1d0] ss:$2 sm:%s5658_s8]   ;;  %4087 = vst.msk [vmem:[%s6825_s1 + $0x75] ss:$8 sm:$0x3] %vm1283_vm0, %v1647_v55   ;;  %s1754_s29 = smov 3 }
 0x134   :  { %4088 = vst.msk [vmem:[%s6825_s1 + $0x76] ss:$8 sm:$0x3] %vm1283_vm0, %v1653_v56   ;;  %v1611_v62 = vld [vmem:[#allocation0 + $0x1b8] ss:$2 sm:%s5625_s28]   ;;  %s5790_s3 = smov 3 }
 0x135   :  { %v1617_v63 = vld [vmem:[#allocation0 + $0x1c0] ss:$2 sm:%s5627_s21]   ;;  %4083 = vst.msk [vmem:[%s6825_s1 + $0x71] ss:$8 sm:$0x3] %vm1283_vm0, %v1623_v57   ;;  %s5814_s6 = smov 3 }
 0x136   :  { %4084 = vst.msk [vmem:[%s6825_s1 + $0x72] ss:$8 sm:$0x3] %vm1283_vm0, %v1629_v58   ;;  %4085 = vst.msk [vmem:[%s6825_s1 + $0x73] ss:$8 sm:$0x3] %vm1283_vm0, %v1635_v59  }
 0x137   :  { %4081 = vst.msk [vmem:[%s6825_s1 + $0x67] ss:$8 sm:$0x3] %vm1283_vm0, %v1611_v62   ;;  %4082 = vst.msk [vmem:[%s6825_s1 + $0x70] ss:$8 sm:$0x3] %vm1283_vm0, %v1617_v63  }
 0x138   :  { %v3200_v0 = vld [vmem:[#allocation0 + $0x1c1] ss:$8 sm:$0xf]   ;;  %v3932_v3 = vld [vmem:[%s6824_s0 + $0x17c] sm:$0xf]  ;;  %s5816_s8 = smov 3 }
 0x139   :  { %v3202_v1 = vld [vmem:[#allocation0 + $0x1c1] ss:$8 sm:$0xf0]   ;;  %v1743_v6 = vld [vmem:[#allocation0 + $0x268] ss:$2 sm:%s1742_s5]   ;;  %s5799_s5 = smov 3 }
 0x13a   :  { %v3204_v2 = vsel %vm2819_vm1, %v3202_v1, %v3200_v0  ;;  %v3933_v4 = vld [vmem:[%s6824_s0 + $0x178] sm:$0xf]  ;;  %809 = vst [vmem:[#allocation0 + $0x2f8] sm:$0xf] %v3932_v3  ;;  %v3934_v7 = vld [vmem:[%s6824_s0 + $0x174] sm:$0xf] }
 0x13b   :  { %3205 = vrot.lane.b32.xlu1 %v3204_v2, %s4346_s14  ;;  %814 = vst [vmem:[#allocation0 + $0x2f0] sm:$0xf] %v3933_v4  ;;  %v1731_v10 = vld [vmem:[#allocation0 + $0x258] ss:$2 sm:%s1730_s25]   ;;  %819 = vst [vmem:[#allocation0 + $0x2e8] sm:$0xf] %v3934_v7 }
 0x13c   :  { %v1737_v11 = vld [vmem:[#allocation0 + $0x260] ss:$2 sm:%s1736_s30]   ;;  %4103 = vst.msk [vmem:[%s6825_s1 + $0x95] ss:$8 sm:$0x3] %vm1283_vm0, %v1743_v6   ;;  %s5824_s15 = smov 3 }
 0x13d   :  { %v1749_v12 = vld [vmem:[#allocation0 + $0x270] ss:$2 sm:%s1748_s27]   ;;  %v1713_v13 = vld [vmem:[#allocation0 + $0x240] ss:$2 sm:%s5706_s19]   ;;  %s1838_s18 = smov 3  ;;  %s1844_s11 = smov 3 }
 0x13e   :  { %v1719_v14 = vld [vmem:[#allocation0 + $0x248] ss:$2 sm:%s5708_s22]   ;;  %4101 = vst.msk [vmem:[%s6825_s1 + $0x93] ss:$8 sm:$0x3] %vm1283_vm0, %v1731_v10   ;;  %s1850_s10 = smov 3  ;;  %v5963_v10 = vpop.permute.xlu1 %2941  }
 0x13f   :  { %v1725_v15 = vld [vmem:[#allocation0 + $0x250] ss:$2 sm:%s1724_s16]   ;;  %4102 = vst.msk [vmem:[%s6825_s1 + $0x94] ss:$8 sm:$0x3] %vm1283_vm0, %v1737_v11   ;;  %s5853_s12 = smov 3 }
 0x140   :  { %4104 = vst.msk [vmem:[%s6825_s1 + $0x96] ss:$8 sm:$0x3] %vm1283_vm0, %v1749_v12   ;;  %4098 = vst.msk [vmem:[%s6825_s1 + $0x90] ss:$8 sm:$0x3] %vm1283_vm0, %v1713_v13  }
 0x141   :  { %4099 = vst.msk [vmem:[%s6825_s1 + $0x91] ss:$8 sm:$0x3] %vm1283_vm0, %v1719_v14   ;;  %4100 = vst.msk [vmem:[%s6825_s1 + $0x92] ss:$8 sm:$0x3] %vm1283_vm0, %v1725_v15  }
 0x142   :  { %v1755_v16 = vld [vmem:[#allocation0 + $0x278] ss:$2 sm:%s1754_s29]   ;;  %v3211_v17 = vld [vmem:[#allocation0 + $0x241] ss:$8 sm:$0xf]   ;;  %s5855_s23 = smov 3 }
 0x143   :  { %4105 = vst.msk [vmem:[%s6825_s1 + $0x97] ss:$8 sm:$0x3] %vm1283_vm0, %v1755_v16   ;;  %v3213_v18 = vld [vmem:[#allocation0 + $0x241] ss:$8 sm:$0xf0]  }
 0x144   :  { %v3935_v19 = vld [vmem:[%s6824_s0 + $0x170] sm:$0xf]  ;;  %v3215_v20 = vsel %vm2819_vm1, %v3213_v18, %v3211_v17  ;;  %v3936_v22 = vld [vmem:[%s6824_s0 + $0x16c] sm:$0xf]  ;;  %v3937_v23 = vld [vmem:[%s6824_s0 + $0x168] sm:$0xf] }
 0x145   :  { %824 = vst [vmem:[#allocation0 + $0x2e0] sm:$0xf] %v3935_v19  ;;  %v3938_v24 = vld [vmem:[%s6824_s0 + $0x164] sm:$0xf]  ;;  %3216 = vrot.lane.b32.xlu0 %v3215_v20, %s4346_s14  ;;  %829 = vst [vmem:[#allocation0 + $0x2d8] sm:$0xf] %v3936_v22 }
 0x146   :  { %834 = vst [vmem:[#allocation0 + $0x2d0] sm:$0xf] %v3937_v23  ;;  %839 = vst [vmem:[#allocation0 + $0x2c8] sm:$0xf] %v3938_v24  ;;  %v3916_v27 = vld [vmem:[%s6824_s0 + $0x1bc] sm:$0xf] }
 0x147   :  { %v3917_v28 = vld [vmem:[%s6824_s0 + $0x1b8] sm:$0xf]  ;;  %729 = vst [vmem:[#allocation0 + $0x378] sm:$0xf] %v3916_v27  ;;  %v3918_v29 = vld [vmem:[%s6824_s0 + $0x1b4] sm:$0xf] }
 0x148   :  { %734 = vst [vmem:[#allocation0 + $0x370] sm:$0xf] %v3917_v28  ;;  %v3919_v30 = vld [vmem:[%s6824_s0 + $0x1b0] sm:$0xf]  ;;  %739 = vst [vmem:[#allocation0 + $0x368] sm:$0xf] %v3918_v29 }
 0x149   :  { %v1839_v32 = vld [vmem:[#allocation0 + $0x2e8] ss:$2 sm:%s1838_s18]   ;;  %744 = vst [vmem:[#allocation0 + $0x360] sm:$0xf] %v3919_v30  ;;  %v1851_v35 = vld [vmem:[#allocation0 + $0x2f8] ss:$2 sm:%s1850_s10]  }
 0x14a   :  { %v3920_v33 = vld [vmem:[%s6824_s0 + $0x1ac] sm:$0xf]  ;;  %4119 = vst.msk [vmem:[%s6825_s1 + $0xb5] ss:$8 sm:$0x3] %vm1283_vm0, %v1839_v32   ;;  %s5860_s18 = smov 3 }
 0x14b   :  { %v1845_v34 = vld [vmem:[#allocation0 + $0x2f0] ss:$2 sm:%s1844_s11]   ;;  %749 = vst [vmem:[#allocation0 + $0x358] sm:$0xf] %v3920_v33  ;;  %v3921_v36 = vld [vmem:[%s6824_s0 + $0x1a8] sm:$0xf] }
 0x14c   :  { %4120 = vst.msk [vmem:[%s6825_s1 + $0xb6] ss:$8 sm:$0x3] %vm1283_vm0, %v1845_v34   ;;  %4121 = vst.msk [vmem:[%s6825_s1 + $0xb7] ss:$8 sm:$0x3] %vm1283_vm0, %v1851_v35  }
 0x14d   :  { %754 = vst [vmem:[#allocation0 + $0x350] sm:$0xf] %v3921_v36  ;;  %v3922_v37 = vld [vmem:[%s6824_s0 + $0x1a4] sm:$0xf]  ;;  %v3900_v38 = vld [vmem:[%s6824_s0 + $0x1fc] sm:$0xf] }
 0x14e   :  { %759 = vst [vmem:[#allocation0 + $0x348] sm:$0xf] %v3922_v37  ;;  %s1922_s28 = smov 3  ;;  %649 = vst [vmem:[#allocation0 + $0x3f8] sm:$0xf] %v3900_v38  ;;  %s1940_s9 = smov 3 }
 0x14f   :  { %v3901_v39 = vld [vmem:[%s6824_s0 + $0x1f8] sm:$0xf]  ;;  %v3902_v40 = vld [vmem:[%s6824_s0 + $0x1f4] sm:$0xf]  ;;  %v1833_v42 = vld [vmem:[#allocation0 + $0x2e0] ss:$2 sm:%s5824_s15]  }
 0x150   :  { %v3224_v43 = vld [vmem:[#allocation0 + $0x2c1] ss:$8 sm:$0xf0]   ;;  %s1928_s15 = smov 3  ;;  %654 = vst [vmem:[#allocation0 + $0x3f0] sm:$0xf] %v3901_v39 }
 0x151   :  { %659 = vst [vmem:[#allocation0 + $0x3e8] sm:$0xf] %v3902_v40  ;;  %v1809_v44 = vld [vmem:[#allocation0 + $0x2c0] ss:$2 sm:%s5790_s3]   ;;  %v1821_v46 = vld [vmem:[#allocation0 + $0x2d0] ss:$2 sm:%s5814_s6]   ;;  %v6051_v40 = vpop.permute.xlu0 %2952  }
 0x152   :  { %v1815_v45 = vld [vmem:[#allocation0 + $0x2c8] ss:$2 sm:%s5799_s5]   ;;  %4118 = vst.msk [vmem:[%s6825_s1 + $0xb4] ss:$8 sm:$0x3] %vm1283_vm0, %v1833_v42   ;;  %s1946_s13 = smov 3 }
 0x153   :  { %4114 = vst.msk [vmem:[%s6825_s1 + $0xb0] ss:$8 sm:$0x3] %vm1283_vm0, %v1809_v44   ;;  %4115 = vst.msk [vmem:[%s6825_s1 + $0xb1] ss:$8 sm:$0x3] %vm1283_vm0, %v1815_v45  }
 0x154   :  { %4116 = vst.msk [vmem:[%s6825_s1 + $0xb2] ss:$8 sm:$0x3] %vm1283_vm0, %v1821_v46   ;;  %v1827_v47 = vld [vmem:[#allocation0 + $0x2d8] ss:$2 sm:%s5816_s8]   ;;  %s1934_s8 = smov 3 }
 0x155   :  { %v3222_v48 = vld [vmem:[#allocation0 + $0x2c1] ss:$8 sm:$0xf]   ;;  %4117 = vst.msk [vmem:[%s6825_s1 + $0xb3] ss:$8 sm:$0x3] %vm1283_vm0, %v1827_v47  }
 0x156   :  { %v3226_v49 = vsel %vm2819_vm1, %v3224_v43, %v3222_v48  ;;  %v1929_v50 = vld [vmem:[#allocation0 + $0x360] ss:$2 sm:%s1928_s15]   ;;  %v1941_v54 = vld [vmem:[#allocation0 + $0x370] ss:$2 sm:%s1940_s9]   ;;  %s5918_s17 = smov 3  ;;  %s5940_s20 = smov 3 }
 0x157   :  { %v1935_v51 = vld [vmem:[#allocation0 + $0x368] ss:$2 sm:%s1934_s8]   ;;  %3227 = vrot.lane.b32.xlu1 %v3226_v49, %s4346_s14  ;;  %v1923_v53 = vld [vmem:[#allocation0 + $0x358] ss:$2 sm:%s1922_s28]   ;;  %s5953_s4 = smov 3  ;;  %s5955_s26 = smov 3 }
 0x158   :  { %4134 = vst.msk [vmem:[%s6825_s1 + $0xd4] ss:$8 sm:$0x3] %vm1283_vm0, %v1929_v50   ;;  %4135 = vst.msk [vmem:[%s6825_s1 + $0xd5] ss:$8 sm:$0x3] %vm1283_vm0, %v1935_v51  }
 0x159   :  { %v1947_v55 = vld [vmem:[#allocation0 + $0x378] ss:$2 sm:%s1946_s13]   ;;  %4133 = vst.msk [vmem:[%s6825_s1 + $0xd3] ss:$8 sm:$0x3] %vm1283_vm0, %v1923_v53   ;;  %s2024_s28 = smov 3 }
 0x15a   :  { %v1917_v56 = vld [vmem:[#allocation0 + $0x350] ss:$2 sm:%s5860_s18]   ;;  %4136 = vst.msk [vmem:[%s6825_s1 + $0xd6] ss:$8 sm:$0x3] %vm1283_vm0, %v1941_v54   ;;  %s2018_s18 = smov 3  ;;  %v6096_v54 = vpop.permute.xlu1 %2963  }
 0x15b   :  { %4137 = vst.msk [vmem:[%s6825_s1 + $0xd7] ss:$8 sm:$0x3] %vm1283_vm0, %v1947_v55   ;;  %v3235_v57 = vld [vmem:[#allocation0 + $0x341] ss:$8 sm:$0xf0]  }
 0x15c   :  { %v1905_v58 = vld [vmem:[#allocation0 + $0x340] ss:$2 sm:%s5853_s12]   ;;  %4132 = vst.msk [vmem:[%s6825_s1 + $0xd2] ss:$8 sm:$0x3] %vm1283_vm0, %v1917_v56   ;;  %s2030_s11 = smov 3 }
 0x15d   :  { %v1911_v59 = vld [vmem:[#allocation0 + $0x348] ss:$2 sm:%s5855_s23]   ;;  %4130 = vst.msk [vmem:[%s6825_s1 + $0xd0] ss:$8 sm:$0x3] %vm1283_vm0, %v1905_v58   ;;  %s2036_s15 = smov 3 }
 0x15e   :  { %v3903_v62 = vld [vmem:[%s6824_s0 + $0x1f0] sm:$0xf]  ;;  %4131 = vst.msk [vmem:[%s6825_s1 + $0xd1] ss:$8 sm:$0x3] %vm1283_vm0, %v1911_v59   ;;  %s2042_s16 = smov 3 }
 0x15f   :  { %v3233_v63 = vld [vmem:[#allocation0 + $0x341] ss:$8 sm:$0xf]   ;;  %664 = vst [vmem:[#allocation0 + $0x3e0] sm:$0xf] %v3903_v62  ;;  %s5977_s25 = smov 3 }
 0x160   :  { %v3904_v0 = vld [vmem:[%s6824_s0 + $0x1ec] sm:$0xf]  ;;  %v3237_v1 = vsel %vm2819_vm1, %v3235_v57, %v3233_v63  ;;  %v3905_v2 = vld [vmem:[%s6824_s0 + $0x1e8] sm:$0xf]  ;;  %v3906_v3 = vld [vmem:[%s6824_s0 + $0x1e4] sm:$0xf] }
 0x161   :  { %669 = vst [vmem:[#allocation0 + $0x3d8] sm:$0xf] %v3904_v0  ;;  %v3907_v4 = vld [vmem:[%s6824_s0 + $0x1e0] sm:$0xf]  ;;  %3238 = vrot.lane.b32.xlu0 %v3237_v1, %s4346_s14  ;;  %674 = vst [vmem:[#allocation0 + $0x3d0] sm:$0xf] %v3905_v2 }
 0x162   :  { %679 = vst [vmem:[#allocation0 + $0x3c8] sm:$0xf] %v3906_v3  ;;  %684 = vst [vmem:[#allocation0 + $0x3c0] sm:$0xf] %v3907_v4  ;;  %v3884_v6 = vld [vmem:[%s6824_s0 + $0x23c] sm:$0xf] }
 0x163   :  { %v3885_v7 = vld [vmem:[%s6824_s0 + $0x238] sm:$0xf]  ;;  %569 = vst [vmem:[#allocation0 + $0x478] sm:$0xf] %v3884_v6  ;;  %v3886_v11 = vld [vmem:[%s6824_s0 + $0x234] sm:$0xf] }
 0x164   :  { %574 = vst [vmem:[#allocation0 + $0x470] sm:$0xf] %v3885_v7  ;;  %v3887_v12 = vld [vmem:[%s6824_s0 + $0x230] sm:$0xf]  ;;  %579 = vst [vmem:[#allocation0 + $0x468] sm:$0xf] %v3886_v11 }
 0x165   :  { %584 = vst [vmem:[#allocation0 + $0x460] sm:$0xf] %v3887_v12  ;;  %v3888_v13 = vld [vmem:[%s6824_s0 + $0x22c] sm:$0xf]  ;;  %v3889_v14 = vld [vmem:[%s6824_s0 + $0x228] sm:$0xf] }
 0x166   :  { %v2031_v15 = vld [vmem:[#allocation0 + $0x3e8] ss:$2 sm:%s2030_s11]   ;;  %589 = vst [vmem:[#allocation0 + $0x458] sm:$0xf] %v3888_v13  ;;  %594 = vst [vmem:[#allocation0 + $0x450] sm:$0xf] %v3889_v14 }
 0x167   :  { %v2037_v16 = vld [vmem:[#allocation0 + $0x3f0] ss:$2 sm:%s2036_s15]   ;;  %4151 = vst.msk [vmem:[%s6825_s1 + $0xf5] ss:$8 sm:$0x3] %vm1283_vm0, %v2031_v15   ;;  %s5990_s27 = smov 3  ;;  %v6165_v15 = vpop.permute.xlu0 %2974  }
 0x168   :  { %4152 = vst.msk [vmem:[%s6825_s1 + $0xf6] ss:$8 sm:$0x3] %vm1283_vm0, %v2037_v16   ;;  %v2043_v17 = vld [vmem:[#allocation0 + $0x3f8] ss:$2 sm:%s2042_s16]   ;;  %s2108_s29 = smov 3 }
 0x169   :  { %v3890_v18 = vld [vmem:[%s6824_s0 + $0x224] sm:$0xf]  ;;  %4153 = vst.msk [vmem:[%s6825_s1 + $0xf7] ss:$8 sm:$0x3] %vm1283_vm0, %v2043_v17   ;;  %s2120_s24 = smov 3 }
 0x16a   :  { %v2025_v19 = vld [vmem:[#allocation0 + $0x3e0] ss:$2 sm:%s2024_s28]   ;;  %v3246_v20 = vld [vmem:[#allocation0 + $0x3c1] ss:$8 sm:$0xf0]   ;;  %s2114_s28 = smov 3 }
 0x16b   :  { %599 = vst [vmem:[#allocation0 + $0x448] sm:$0xf] %v3890_v18  ;;  %v2019_v22 = vld [vmem:[#allocation0 + $0x3d8] ss:$2 sm:%s2018_s18]   ;;  %s2126_s12 = smov 3  ;;  %s2138_s19 = smov 3 }
 0x16c   :  { %4150 = vst.msk [vmem:[%s6825_s1 + $0xf4] ss:$8 sm:$0x3] %vm1283_vm0, %v2025_v19   ;;  %v3868_v23 = vld [vmem:[%s6824_s0 + $0x27c] sm:$0xf]  ;;  %s6073_s5 = smov 3 }
 0x16d   :  { %v1995_v24 = vld [vmem:[#allocation0 + $0x3b8] ss:$2 sm:%s5918_s17]   ;;  %v2007_v28 = vld [vmem:[#allocation0 + $0x3c8] ss:$2 sm:%s5953_s4]   ;;  %489 = vst [vmem:[#allocation0 + $0x4f8] sm:$0xf] %v3868_v23 }
 0x16e   :  { %v2001_v27 = vld [vmem:[#allocation0 + $0x3c0] ss:$2 sm:%s5940_s20]   ;;  %4149 = vst.msk [vmem:[%s6825_s1 + $0xf3] ss:$8 sm:$0x3] %vm1283_vm0, %v2019_v22   ;;  %s6089_s9 = smov 3 }
 0x16f   :  { %4145 = vst.msk [vmem:[%s6825_s1 + $0xe7] ss:$8 sm:$0x3] %vm1283_vm0, %v1995_v24   ;;  %4146 = vst.msk [vmem:[%s6825_s1 + $0xf0] ss:$8 sm:$0x3] %vm1283_vm0, %v2001_v27  }
 0x170   :  { %4147 = vst.msk [vmem:[%s6825_s1 + $0xf1] ss:$8 sm:$0x3] %vm1283_vm0, %v2007_v28   ;;  %v2013_v29 = vld [vmem:[#allocation0 + $0x3d0] ss:$2 sm:%s5955_s26]   ;;  %s2132_s26 = smov 3 }
 0x171   :  { %v3244_v30 = vld [vmem:[#allocation0 + $0x3c1] ss:$8 sm:$0xf]   ;;  %4148 = vst.msk [vmem:[%s6825_s1 + $0xf2] ss:$8 sm:$0x3] %vm1283_vm0, %v2013_v29  }
 0x172   :  { %v3248_v32 = vsel %vm2819_vm1, %v3246_v20, %v3244_v30  ;;  %v2121_v33 = vld [vmem:[#allocation0 + $0x460] ss:$2 sm:%s2120_s24]   ;;  %v2133_v35 = vld [vmem:[#allocation0 + $0x470] ss:$2 sm:%s2132_s26]   ;;  %s6049_s24 = smov 3  ;;  %s6091_s13 = smov 3 }
 0x173   :  { %v2127_v34 = vld [vmem:[#allocation0 + $0x468] ss:$2 sm:%s2126_s12]   ;;  %3249 = vrot.lane.b32.xlu1 %v3248_v32, %s4346_s14  ;;  %v2115_v37 = vld [vmem:[#allocation0 + $0x458] ss:$2 sm:%s2114_s28]   ;;  %s6098_s22 = smov 3  ;;  %s2222_s28 = smov 3  ;;  %v6207_v32 = vpop.permute.xlu1 %2985  }
 0x174   :  { %v2109_v36 = vld [vmem:[#allocation0 + $0x450] ss:$2 sm:%s2108_s29]   ;;  %4166 = vst.msk [vmem:[%s6825_s1 + $0x114] ss:$8 sm:$0x3] %vm1283_vm0, %v2121_v33   ;;  %s2228_s12 = smov 3  ;;  %v6209_v33 = vpop.permute.xlu0 %2996  }
 0x175   :  { %4167 = vst.msk [vmem:[%s6825_s1 + $0x115] ss:$8 sm:$0x3] %vm1283_vm0, %v2127_v34   ;;  %4168 = vst.msk [vmem:[%s6825_s1 + $0x116] ss:$8 sm:$0x3] %vm1283_vm0, %v2133_v35  }
 0x176   :  { %4164 = vst.msk [vmem:[%s6825_s1 + $0x112] ss:$8 sm:$0x3] %vm1283_vm0, %v2109_v36   ;;  %4165 = vst.msk [vmem:[%s6825_s1 + $0x113] ss:$8 sm:$0x3] %vm1283_vm0, %v2115_v37  }
 0x177   :  { %v2139_v38 = vld [vmem:[#allocation0 + $0x478] ss:$2 sm:%s2138_s19]   ;;  %v3257_v39 = vld [vmem:[#allocation0 + $0x441] ss:$8 sm:$0xf0]   ;;  %s2234_s23 = smov 3 }
 0x178   :  { %v2097_v42 = vld [vmem:[#allocation0 + $0x440] ss:$2 sm:%s5977_s25]   ;;  %4169 = vst.msk [vmem:[%s6825_s1 + $0x117] ss:$8 sm:$0x3] %vm1283_vm0, %v2139_v38   ;;  %s6122_s7 = smov 3 }
 0x179   :  { %v2103_v43 = vld [vmem:[#allocation0 + $0x448] ss:$2 sm:%s5990_s27]   ;;  %v3869_v44 = vld [vmem:[%s6824_s0 + $0x278] sm:$0xf]  ;;  %v3874_v51 = vld [vmem:[%s6824_s0 + $0x264] sm:$0xf] }
 0x17a   :  { %4162 = vst.msk [vmem:[%s6825_s1 + $0x110] ss:$8 sm:$0x3] %vm1283_vm0, %v2097_v42   ;;  %4163 = vst.msk [vmem:[%s6825_s1 + $0x111] ss:$8 sm:$0x3] %vm1283_vm0, %v2103_v43  }
 0x17b   :  { %v3255_v45 = vld [vmem:[#allocation0 + $0x441] ss:$8 sm:$0xf]   ;;  %494 = vst [vmem:[#allocation0 + $0x4f0] sm:$0xf] %v3869_v44  ;;  %s6124_s8 = smov 3 }
 0x17c   :  { %v3870_v46 = vld [vmem:[%s6824_s0 + $0x274] sm:$0xf]  ;;  %v3259_v47 = vsel %vm2819_vm1, %v3257_v39, %v3255_v45  ;;  %v3871_v48 = vld [vmem:[%s6824_s0 + $0x270] sm:$0xf]  ;;  %v3872_v49 = vld [vmem:[%s6824_s0 + $0x26c] sm:$0xf] }
 0x17d   :  { %499 = vst [vmem:[#allocation0 + $0x4e8] sm:$0xf] %v3870_v46  ;;  %v3873_v50 = vld [vmem:[%s6824_s0 + $0x268] sm:$0xf]  ;;  %3260 = vrot.lane.b32.xlu0 %v3259_v47, %s4346_s14  ;;  %504 = vst [vmem:[#allocation0 + $0x4e0] sm:$0xf] %v3871_v48  ;;  %v6238_v46 = vpop.permute.xlu1 %3007   ;;  %v6240_v47 = vpop.permute.xlu0 %3018  }
 0x17e   :  { %509 = vst [vmem:[#allocation0 + $0x4d8] sm:$0xf] %v3872_v49  ;;  %514 = vst [vmem:[#allocation0 + $0x4d0] sm:$0xf] %v3873_v50  ;;  %v3852_v53 = vld [vmem:[%s6824_s0 + $0x2bc] sm:$0xf] }
 0x17f   :  { %519 = vst [vmem:[#allocation0 + $0x4c8] sm:$0xf] %v3874_v51  ;;  %409 = vst [vmem:[#allocation0 + $0x578] sm:$0xf] %v3852_v53  ;;  %v3853_v55 = vld [vmem:[%s6824_s0 + $0x2b8] sm:$0xf] }
 0x180   :  { %v3854_v56 = vld [vmem:[%s6824_s0 + $0x2b4] sm:$0xf]  ;;  %414 = vst [vmem:[#allocation0 + $0x570] sm:$0xf] %v3853_v55  ;;  %v3855_v57 = vld [vmem:[%s6824_s0 + $0x2b0] sm:$0xf] }
 0x181   :  { %419 = vst [vmem:[#allocation0 + $0x568] sm:$0xf] %v3854_v56  ;;  %v3856_v58 = vld [vmem:[%s6824_s0 + $0x2ac] sm:$0xf]  ;;  %v2235_v59 = vld [vmem:[#allocation0 + $0x4f8] ss:$2 sm:%s2234_s23]  }
 0x182   :  { %424 = vst [vmem:[#allocation0 + $0x560] sm:$0xf] %v3855_v57  ;;  %429 = vst [vmem:[#allocation0 + $0x558] sm:$0xf] %v3856_v58  ;;  %v3857_v62 = vld [vmem:[%s6824_s0 + $0x2a8] sm:$0xf] }
 0x183   :  { %v3858_v63 = vld [vmem:[%s6824_s0 + $0x2a4] sm:$0xf]  ;;  %4185 = vst.msk [vmem:[%s6825_s1 + $0x137] ss:$8 sm:$0x3] %vm1283_vm0, %v2235_v59   ;;  %s6132_s18 = smov 3 }
 0x184   :  { %434 = vst [vmem:[#allocation0 + $0x550] sm:$0xf] %v3857_v62  ;;  %439 = vst [vmem:[#allocation0 + $0x548] sm:$0xf] %v3858_v63  ;;  %v3836_v0 = vld [vmem:[%s6824_s0 + $0x2fc] sm:$0xf]  ;;  %v3030_v63 = vpop.permute.xlu1 %3029  }
 0x185   :  { %v3837_v1 = vld [vmem:[%s6824_s0 + $0x2f8] sm:$0xf]  ;;  %s2306_s21 = smov 3  ;;  %329 = vst [vmem:[#allocation0 + $0x5f8] sm:$0xf] %v3836_v0  ;;  %s2312_s23 = smov 3 }
 0x186   :  { %v2229_v2 = vld [vmem:[#allocation0 + $0x4f0] ss:$2 sm:%s2228_s12]   ;;  %334 = vst [vmem:[#allocation0 + $0x5f0] sm:$0xf] %v3837_v1  ;;  %s2318_s11 = smov 3  ;;  %s2324_s6 = smov 3 }
 0x187   :  { %v3838_v3 = vld [vmem:[%s6824_s0 + $0x2f4] sm:$0xf]  ;;  %4184 = vst.msk [vmem:[%s6825_s1 + $0x136] ss:$8 sm:$0x3] %vm1283_vm0, %v2229_v2   ;;  %s2330_s10 = smov 3 }
 0x188   :  { %v2223_v4 = vld [vmem:[#allocation0 + $0x4e8] ss:$2 sm:%s2222_s28]   ;;  %339 = vst [vmem:[#allocation0 + $0x5e8] sm:$0xf] %v3838_v3  ;;  %v2211_v11 = vld [vmem:[#allocation0 + $0x4d8] ss:$2 sm:%s6091_s13]   ;;  %v3041_v3 = vpop.permute.xlu0 %3040  }
 0x189   :  { %v3839_v6 = vld [vmem:[%s6824_s0 + $0x2f0] sm:$0xf]  ;;  %v2217_v12 = vld [vmem:[#allocation0 + $0x4e0] ss:$2 sm:%s6098_s22]   ;;  %s2420_s26 = smov 3  ;;  %s2426_s16 = smov 3 }
 0x18a   :  { %v2205_v7 = vld [vmem:[#allocation0 + $0x4d0] ss:$2 sm:%s6089_s9]   ;;  %4183 = vst.msk [vmem:[%s6825_s1 + $0x135] ss:$8 sm:$0x3] %vm1283_vm0, %v2223_v4   ;;  %s6321_s2 = smov 3 }
 0x18b   :  { %344 = vst [vmem:[#allocation0 + $0x5e0] sm:$0xf] %v3839_v6  ;;  %v2193_v13 = vld [vmem:[#allocation0 + $0x4c0] ss:$2 sm:%s6049_s24]   ;;  %v2301_v27 = vld [vmem:[#allocation0 + $0x550] ss:$2 sm:%s6132_s18]  }
 0x18c   :  { %v2199_v14 = vld [vmem:[#allocation0 + $0x4c8] ss:$2 sm:%s6073_s5]   ;;  %4180 = vst.msk [vmem:[%s6825_s1 + $0x132] ss:$8 sm:$0x3] %vm1283_vm0, %v2205_v7   ;;  %s2402_s18 = smov 3 }
 0x18d   :  { %4181 = vst.msk [vmem:[%s6825_s1 + $0x133] ss:$8 sm:$0x3] %vm1283_vm0, %v2211_v11   ;;  %4182 = vst.msk [vmem:[%s6825_s1 + $0x134] ss:$8 sm:$0x3] %vm1283_vm0, %v2217_v12  }
 0x18e   :  { %4178 = vst.msk [vmem:[%s6825_s1 + $0x130] ss:$8 sm:$0x3] %vm1283_vm0, %v2193_v13   ;;  %4179 = vst.msk [vmem:[%s6825_s1 + $0x131] ss:$8 sm:$0x3] %vm1283_vm0, %v2199_v14  }
 0x18f   :  { %v3266_v16 = vld [vmem:[#allocation0 + $0x4c1] ss:$8 sm:$0xf]   ;;  %v2307_v19 = vld [vmem:[#allocation0 + $0x558] ss:$2 sm:%s2306_s21]   ;;  %s6323_s30 = smov 3 }
 0x190   :  { %v3268_v17 = vld [vmem:[#allocation0 + $0x4c1] ss:$8 sm:$0xf0]   ;;  %v2313_v20 = vld [vmem:[#allocation0 + $0x560] ss:$2 sm:%s2312_s23]   ;;  %2824 = vst.msk [vmem:[%s6825_s1] sm:$0xff] %vm2823_vm2, %v5508_v60  }
 0x191   :  { %v3270_v18 = vsel %vm2819_vm1, %v3268_v17, %v3266_v16  ;;  %v2319_v22 = vld [vmem:[#allocation0 + $0x568] ss:$2 sm:%s2318_s11]   ;;  %4197 = vst.msk [vmem:[%s6825_s1 + $0x153] ss:$8 sm:$0x3] %vm1283_vm0, %v2307_v19   ;;  %s2708_s5 = smov 3 }
 0x192   :  { %3271 = vrot.lane.b32.xlu1 %v3270_v18, %s4346_s14  ;;  %v2289_v23 = vld [vmem:[#allocation0 + $0x540] ss:$2 sm:%s6122_s7]   ;;  %4198 = vst.msk [vmem:[%s6825_s1 + $0x154] ss:$8 sm:$0x3] %vm1283_vm0, %v2313_v20   ;;  %v3052_v18 = vpop.permute.xlu1 %3051   ;;  %s6325_s7 = smov 3 }
 0x193   :  { %v2295_v24 = vld [vmem:[#allocation0 + $0x548] ss:$2 sm:%s6124_s8]   ;;  %4199 = vst.msk [vmem:[%s6825_s1 + $0x155] ss:$8 sm:$0x3] %vm1283_vm0, %v2319_v22   ;;  %s6327_s8 = smov 3 }
 0x194   :  { %4194 = vst.msk [vmem:[%s6825_s1 + $0x150] ss:$8 sm:$0x3] %vm1283_vm0, %v2289_v23   ;;  %4195 = vst.msk [vmem:[%s6825_s1 + $0x151] ss:$8 sm:$0x3] %vm1283_vm0, %v2295_v24  }
 0x195   :  { %4196 = vst.msk [vmem:[%s6825_s1 + $0x152] ss:$8 sm:$0x3] %vm1283_vm0, %v2301_v27   ;;  %v2325_v28 = vld [vmem:[#allocation0 + $0x570] ss:$2 sm:%s2324_s6]   ;;  %s2408_s6 = smov 3 }
 0x196   :  { %v2331_v29 = vld [vmem:[#allocation0 + $0x578] ss:$2 sm:%s2330_s10]   ;;  %v3840_v30 = vld [vmem:[%s6824_s0 + $0x2ec] sm:$0xf]  ;;  %v3841_v37 = vld [vmem:[%s6824_s0 + $0x2e8] sm:$0xf] }
 0x197   :  { %4200 = vst.msk [vmem:[%s6825_s1 + $0x156] ss:$8 sm:$0x3] %vm1283_vm0, %v2325_v28   ;;  %4201 = vst.msk [vmem:[%s6825_s1 + $0x157] ss:$8 sm:$0x3] %vm1283_vm0, %v2331_v29  }
 0x198   :  { %v3277_v34 = vld [vmem:[#allocation0 + $0x541] ss:$8 sm:$0xf]   ;;  %349 = vst [vmem:[#allocation0 + $0x5d8] sm:$0xf] %v3840_v30  ;;  %s2414_s10 = smov 3 }
 0x199   :  { %v3279_v35 = vld [vmem:[#allocation0 + $0x541] ss:$8 sm:$0xf0]   ;;  %v3842_v38 = vld [vmem:[%s6824_s0 + $0x2e4] sm:$0xf]  ;;  %4283 = vst.msk [vmem:[%s6825_s1 + $0x40] sm:$0xff] %vm2823_vm2, %v5510_v61  }
 0x19a   :  { %v3281_v36 = vsel %vm2819_vm1, %v3279_v35, %v3277_v34  ;;  %354 = vst [vmem:[#allocation0 + $0x5d0] sm:$0xf] %v3841_v37  ;;  %359 = vst [vmem:[#allocation0 + $0x5c8] sm:$0xf] %v3842_v38  ;;  %v2409_v39 = vld [vmem:[#allocation0 + $0x5e0] ss:$2 sm:%s2408_s6]  }
 0x19b   :  { %3282 = vrot.lane.b32.xlu0 %v3281_v36, %s4346_s14  ;;  %v2415_v42 = vld [vmem:[#allocation0 + $0x5e8] ss:$2 sm:%s2414_s10]   ;;  %4214 = vst.msk [vmem:[%s6825_s1 + $0x174] ss:$8 sm:$0x3] %vm1283_vm0, %v2409_v39   ;;  %s2714_s22 = smov 3 }
 0x19c   :  { %4215 = vst.msk [vmem:[%s6825_s1 + $0x175] ss:$8 sm:$0x3] %vm1283_vm0, %v2415_v42   ;;  %v2421_v43 = vld [vmem:[#allocation0 + $0x5f0] ss:$2 sm:%s2420_s26]   ;;  %s2696_s10 = smov 3 }
 0x19d   :  { %v2427_v44 = vld [vmem:[#allocation0 + $0x5f8] ss:$2 sm:%s2426_s16]   ;;  %4216 = vst.msk [vmem:[%s6825_s1 + $0x176] ss:$8 sm:$0x3] %vm1283_vm0, %v2421_v43   ;;  %s6319_s16 = smov 3 }
 0x19e   :  { %v3820_v45 = vld [vmem:[%s6824_s0 + $0x33c] sm:$0xf]  ;;  %4217 = vst.msk [vmem:[%s6825_s1 + $0x177] ss:$8 sm:$0x3] %vm1283_vm0, %v2427_v44   ;;  %s2678_s19 = smov 3 }
 0x19f   :  { %249 = vst [vmem:[#allocation0 + $0x678] sm:$0xf] %v3820_v45  ;;  %v3821_v48 = vld [vmem:[%s6824_s0 + $0x338] sm:$0xf]  ;;  %v3822_v50 = vld [vmem:[%s6824_s0 + $0x334] sm:$0xf] }
 0x1a0   :  { %v3290_v49 = vld [vmem:[#allocation0 + $0x5c1] ss:$8 sm:$0xf0]   ;;  %254 = vst [vmem:[#allocation0 + $0x670] sm:$0xf] %v3821_v48  ;;  %4282 = vst.msk [vmem:[%s6825_s1 + $0x20] sm:$0xff] %vm2823_vm2, %v5549_v8  }
 0x1a1   :  { %v3823_v51 = vld [vmem:[%s6824_s0 + $0x330] sm:$0xf]  ;;  %v3824_v53 = vld [vmem:[%s6824_s0 + $0x32c] sm:$0xf]  ;;  %259 = vst [vmem:[#allocation0 + $0x668] sm:$0xf] %v3822_v50 }
 0x1a2   :  { %264 = vst [vmem:[#allocation0 + $0x660] sm:$0xf] %v3823_v51  ;;  %269 = vst [vmem:[#allocation0 + $0x658] sm:$0xf] %v3824_v53  ;;  %v3825_v55 = vld [vmem:[%s6824_s0 + $0x328] sm:$0xf] }
 0x1a3   :  { %v3826_v56 = vld [vmem:[%s6824_s0 + $0x324] sm:$0xf]  ;;  %v3827_v57 = vld [vmem:[%s6824_s0 + $0x320] sm:$0xf]  ;;  %274 = vst [vmem:[#allocation0 + $0x650] sm:$0xf] %v3825_v55 }
 0x1a4   :  { %v2403_v58 = vld [vmem:[#allocation0 + $0x5d8] ss:$2 sm:%s2402_s18]   ;;  %279 = vst [vmem:[#allocation0 + $0x648] sm:$0xf] %v3826_v56  ;;  %284 = vst [vmem:[#allocation0 + $0x640] sm:$0xf] %v3827_v57 }
 0x1a5   :  { %v3805_v59 = vld [vmem:[%s6824_s0 + $0x378] sm:$0xf]  ;;  %v3806_v62 = vld [vmem:[%s6824_s0 + $0x374] sm:$0xf]  ;;  %v3807_v0 = vld [vmem:[%s6824_s0 + $0x370] sm:$0xf] }
 0x1a6   :  { %4213 = vst.msk [vmem:[%s6825_s1 + $0x173] ss:$8 sm:$0x3] %vm1283_vm0, %v2403_v58   ;;  %174 = vst [vmem:[#allocation0 + $0x6f0] sm:$0xf] %v3805_v59  ;;  %s2390_s20 = smov 3 }
 0x1a7   :  { %179 = vst [vmem:[#allocation0 + $0x6e8] sm:$0xf] %v3806_v62  ;;  %v3808_v1 = vld [vmem:[%s6824_s0 + $0x36c] sm:$0xf]  ;;  %v3809_v2 = vld [vmem:[%s6824_s0 + $0x368] sm:$0xf] }
 0x1a8   :  { %v3288_v4 = vld [vmem:[#allocation0 + $0x5c1] ss:$8 sm:$0xf]   ;;  %184 = vst [vmem:[#allocation0 + $0x6e0] sm:$0xf] %v3807_v0  ;;  %4284 = vst.msk [vmem:[%s6825_s1 + $0x60] sm:$0xff] %vm2823_vm2, %v5551_v9  }
 0x1a9   :  { %189 = vst [vmem:[#allocation0 + $0x6d8] sm:$0xf] %v3808_v1  ;;  %194 = vst [vmem:[#allocation0 + $0x6d0] sm:$0xf] %v3809_v2  ;;  %v3810_v6 = vld [vmem:[%s6824_s0 + $0x364] sm:$0xf]  ;;  %v3292_v7 = vsel %vm2819_vm1, %v3290_v49, %v3288_v4 }
 0x1aa   :  { %199 = vst [vmem:[#allocation0 + $0x6c8] sm:$0xf] %v3810_v6  ;;  %v3788_v11 = vld [vmem:[%s6824_s0 + $0x3bc] sm:$0xf]  ;;  %v3789_v12 = vld [vmem:[%s6824_s0 + $0x3b8] sm:$0xf]  ;;  %3293 = vrot.lane.b32.xlu1 %v3292_v7, %s4346_s14 }
 0x1ab   :  { %v3790_v13 = vld [vmem:[%s6824_s0 + $0x3b4] sm:$0xf]  ;;  %89 = vst [vmem:[#allocation0 + $0x778] sm:$0xf] %v3788_v11  ;;  %94 = vst [vmem:[#allocation0 + $0x770] sm:$0xf] %v3789_v12 }
 0x1ac   :  { %99 = vst [vmem:[#allocation0 + $0x768] sm:$0xf] %v3790_v13  ;;  %v3791_v14 = vld [vmem:[%s6824_s0 + $0x3b0] sm:$0xf]  ;;  %v3792_v16 = vld [vmem:[%s6824_s0 + $0x3ac] sm:$0xf] }
 0x1ad   :  { %v3793_v17 = vld [vmem:[%s6824_s0 + $0x3a8] sm:$0xf]  ;;  %104 = vst [vmem:[#allocation0 + $0x760] sm:$0xf] %v3791_v14  ;;  %109 = vst [vmem:[#allocation0 + $0x758] sm:$0xf] %v3792_v16 }
 0x1ae   :  { %114 = vst [vmem:[#allocation0 + $0x750] sm:$0xf] %v3793_v17  ;;  %v3794_v19 = vld [vmem:[%s6824_s0 + $0x3a4] sm:$0xf]  ;;  %v3795_v20 = vld [vmem:[%s6824_s0 + $0x3a0] sm:$0xf] }
 0x1af   :  { %v3301_v22 = vld [vmem:[#allocation0 + $0x641] ss:$8 sm:$0xf0]   ;;  %119 = vst [vmem:[#allocation0 + $0x748] sm:$0xf] %v3794_v19  ;;  %4285 = vst.msk [vmem:[%s6825_s1 + $0x80] sm:$0xff] %vm2823_vm2, %v5595_v21  }
 0x1b0   :  { %124 = vst [vmem:[#allocation0 + $0x740] sm:$0xf] %v3795_v20  ;;  %v3299_v23 = vld [vmem:[#allocation0 + $0x641] ss:$8 sm:$0xf]   ;;  %4286 = vst.msk [vmem:[%s6825_s1 + $0xa0] sm:$0xff] %vm2823_vm2, %v5604_v25  }
 0x1b1   :  { %4287 = vst.msk [vmem:[%s6825_s1 + $0xc0] sm:$0xff] %vm2823_vm2, %v5629_v31   ;;  %4288 = vst.msk [vmem:[%s6825_s1 + $0xe0] sm:$0xff] %vm2823_vm2, %v5663_v41   ;;  %v3303_v60 = vsel %vm2819_vm1, %v3301_v22, %v3299_v23  ;;  %v3772_v61 = vld [vmem:[%s6824_s0 + $0x3fc] sm:$0xf]  ;;  %v3773_v8 = vld [vmem:[%s6824_s0 + $0x3f8] sm:$0xf]  ;;  %v3063_v41 = vpop.permute.xlu0 %3062  }
 0x1b2   :  { %4289 = vst.msk [vmem:[%s6825_s1 + $0x100] sm:$0xff] %vm2823_vm2, %v5754_v5   ;;  %4290 = vst.msk [vmem:[%s6825_s1 + $0x120] sm:$0xff] %vm2823_vm2, %v5811_v26   ;;  %3304 = vrot.lane.b32.xlu0 %v3303_v60, %s4346_s14  ;;  %v3312_v9 = vld [vmem:[#allocation0 + $0x6c1] ss:$8 sm:$0xf0]   ;;  %s2396_s24 = smov 3 }
 0x1b3   :  { %4291 = vst.msk [vmem:[%s6825_s1 + $0x140] sm:$0xff] %vm2823_vm2, %v5894_v52   ;;  %4292 = vst.msk [vmem:[%s6825_s1 + $0x160] sm:$0xff] %vm2823_vm2, %v5963_v10   ;;  %v3774_v21 = vld [vmem:[%s6824_s0 + $0x3f4] sm:$0xf]  ;;  %v3775_v31 = vld [vmem:[%s6824_s0 + $0x3f0] sm:$0xf] }
 0x1b4   :  { %4294 = vst.msk [vmem:[%s6825_s1 + $0x1a0] sm:$0xff] %vm2823_vm2, %v6096_v54   ;;  %4297 = vst.msk [vmem:[%s6825_s1 + $0x8] sm:$0xff] %vm2823_vm2, %v6209_v33   ;;  %v3310_v25 = vld [vmem:[#allocation0 + $0x6c1] ss:$8 sm:$0xf]   ;;  %v3074_v54 = vpop.permute.xlu1 %3073   ;;  %s2480_s15 = smov 3 }
 0x1b5   :  { %4298 = vst.msk [vmem:[%s6825_s1 + $0x28] sm:$0xff] %vm2823_vm2, %v6238_v46   ;;  %4299 = vst.msk [vmem:[%s6825_s1 + $0x48] sm:$0xff] %vm2823_vm2, %v6240_v47   ;;  %v3314_v5 = vsel %vm2819_vm1, %v3312_v9, %v3310_v25  ;;  %v2703_v26 = vld [vmem:[#allocation0 + $0x768] ss:$2 sm:%s6327_s8]   ;;  %v2715_v10 = vld [vmem:[#allocation0 + $0x778] ss:$2 sm:%s2714_s22]   ;;  %v3085_v36 = vpop.permute.xlu0 %3084  }
 0x1b6   :  { %4300 = vst.msk [vmem:[%s6825_s1 + $0x68] sm:$0xff] %vm2823_vm2, %v3030_v63   ;;  %4301 = vst.msk [vmem:[%s6825_s1 + $0x88] sm:$0xff] %vm2823_vm2, %v3041_v3   ;;  %v2709_v52 = vld [vmem:[#allocation0 + $0x770] ss:$2 sm:%s2708_s5]   ;;  %3315 = vrot.lane.b32.xlu1 %v3314_v5, %s4346_s14  ;;  %s2474_s5 = smov 3  ;;  %s2486_s8 = smov 3 }
 0x1b7   :  { %4302 = vst.msk [vmem:[%s6825_s1 + $0xa8] sm:$0xff] %vm2823_vm2, %v3052_v18   ;;  %9 = vst [vmem:[#allocation0 + $0x7f8] sm:$0xf] %v3772_v61  ;;  %v2685_v24 = vld [vmem:[#allocation0 + $0x750] ss:$2 sm:%s6323_s30]   ;;  %s2492_s25 = smov 3 }
 0x1b8   :  { %14 = vst [vmem:[#allocation0 + $0x7f0] sm:$0xf] %v3773_v8  ;;  %19 = vst [vmem:[#allocation0 + $0x7e8] sm:$0xf] %v3774_v21  ;;  %v2691_v27 = vld [vmem:[#allocation0 + $0x758] ss:$2 sm:%s6325_s7]  }
 0x1b9   :  { %24 = vst [vmem:[#allocation0 + $0x7e0] sm:$0xf] %v3775_v31  ;;  %4303 = vst.msk [vmem:[%s6825_s1 + $0xc8] sm:$0xff] %vm2823_vm2, %v3063_v41   ;;  %v2697_v28 = vld [vmem:[#allocation0 + $0x760] ss:$2 sm:%s2696_s10]   ;;  %v3107_v47 = vpop.permute.xlu0 %3106   ;;  %s2498_s23 = smov 3 }
 0x1ba   :  { %4263 = vst.msk [vmem:[%s6825_s1 + $0x1d5] ss:$8 sm:$0x3] %vm1283_vm0, %v2703_v26   ;;  %4264 = vst.msk [vmem:[%s6825_s1 + $0x1d6] ss:$8 sm:$0x3] %vm1283_vm0, %v2709_v52  }
 0x1bb   :  { %4265 = vst.msk [vmem:[%s6825_s1 + $0x1d7] ss:$8 sm:$0x3] %vm1283_vm0, %v2715_v10   ;;  %v2667_v29 = vld [vmem:[#allocation0 + $0x738] ss:$2 sm:%s6319_s16]   ;;  %s2504_s11 = smov 3 }
 0x1bc   :  { %4304 = vst.msk [vmem:[%s6825_s1 + $0xe8] sm:$0xff] %vm2823_vm2, %v3074_v54   ;;  %v2673_v30 = vld [vmem:[#allocation0 + $0x740] ss:$2 sm:%s6321_s2]   ;;  %v3321_v34 = vld [vmem:[#allocation0 + $0x741] ss:$8 sm:$0xf]  }
 0x1bd   :  { %v2679_v33 = vld [vmem:[#allocation0 + $0x748] ss:$2 sm:%s2678_s19]   ;;  %4260 = vst.msk [vmem:[%s6825_s1 + $0x1d2] ss:$8 sm:$0x3] %vm1283_vm0, %v2685_v24   ;;  %v3129_v57 = vpop.permute.xlu0 %3128   ;;  %s2384_s2 = smov 3 }
 0x1be   :  { %4261 = vst.msk [vmem:[%s6825_s1 + $0x1d3] ss:$8 sm:$0x3] %vm1283_vm0, %v2691_v27   ;;  %4262 = vst.msk [vmem:[%s6825_s1 + $0x1d4] ss:$8 sm:$0x3] %vm1283_vm0, %v2697_v28  }
 0x1bf   :  { %4257 = vst.msk [vmem:[%s6825_s1 + $0x1c7] ss:$8 sm:$0x3] %vm1283_vm0, %v2667_v29   ;;  %4258 = vst.msk [vmem:[%s6825_s1 + $0x1d0] ss:$8 sm:$0x3] %vm1283_vm0, %v2673_v30  }
 0x1c0   :  { %4259 = vst.msk [vmem:[%s6825_s1 + $0x1d1] ss:$8 sm:$0x3] %vm1283_vm0, %v2679_v33   ;;  %v3323_v35 = vld [vmem:[#allocation0 + $0x741] ss:$8 sm:$0xf0]  }
 0x1c1   :  { %v3325_v37 = vsel %vm2819_vm1, %v3323_v35, %v3321_v34  ;;  %v3776_v38 = vld [vmem:[%s6824_s0 + $0x3ec] sm:$0xf]  ;;  %v3777_v39 = vld [vmem:[%s6824_s0 + $0x3e8] sm:$0xf]  ;;  %v3778_v42 = vld [vmem:[%s6824_s0 + $0x3e4] sm:$0xf]  ;;  %v3151_v4 = vpop.permute.xlu0 %3150  }
 0x1c2   :  { %4295 = vst.msk [vmem:[%s6825_s1 + $0x1c0] sm:$0xff] %vm2823_vm2, %v6165_v15   ;;  %4305 = vst.msk [vmem:[%s6825_s1 + $0x108] sm:$0xff] %vm2823_vm2, %v3085_v36   ;;  %v3096_v15 = vpop.permute.xlu1 %3095   ;;  %3326 = vrot.lane.b32.xlu0 %v3325_v37, %s4346_s14  ;;  %v3779_v43 = vld [vmem:[%s6824_s0 + $0x3e0] sm:$0xf]  ;;  %s2510_s9 = smov 3  ;;  %s2516_s13 = smov 3 }
 0x1c3   :  { %29 = vst [vmem:[#allocation0 + $0x7d8] sm:$0xf] %v3776_v38  ;;  %34 = vst [vmem:[#allocation0 + $0x7d0] sm:$0xf] %v3777_v39  ;;  %v2385_v13 = vld [vmem:[#allocation0 + $0x5c0] ss:$2 sm:%s2384_s2]  }
 0x1c4   :  { %39 = vst [vmem:[#allocation0 + $0x7c8] sm:$0xf] %v3778_v42  ;;  %v3343_v44 = vld [vmem:[#allocation0 + $0x43] ss:$8 sm:$0xf]   ;;  %4306 = vst.msk [vmem:[%s6825_s1 + $0x128] sm:$0xff] %vm2823_vm2, %v3096_v15  }
 0x1c5   :  { %44 = vst [vmem:[#allocation0 + $0x7c0] sm:$0xf] %v3779_v43  ;;  %v3345_v45 = vld [vmem:[#allocation0 + $0x43] ss:$8 sm:$0xf0]   ;;  %4307 = vst.msk [vmem:[%s6825_s1 + $0x148] sm:$0xff] %vm2823_vm2, %v3107_v47   ;;  %v3173_v37 = vpop.permute.xlu0 %3172  }
 0x1c6   :  { %v3347_v46 = vsel %vm2819_vm1, %v3345_v45, %v3343_v44  ;;  %v3365_v48 = vld [vmem:[#allocation0 + $0x143] ss:$8 sm:$0xf]   ;;  %v3118_v50 = vpop.permute.xlu1 %3117   ;;  %v3334_v51 = vld [vmem:[#allocation0 + $0x7c1] ss:$8 sm:$0xf0]  }
 0x1c7   :  { %v3367_v49 = vld [vmem:[#allocation0 + $0x143] ss:$8 sm:$0xf0]   ;;  %3348 = vrot.lane.b32.xlu0 %v3347_v46, %s4346_s14  ;;  %4308 = vst.msk [vmem:[%s6825_s1 + $0x168] sm:$0xff] %vm2823_vm2, %v3118_v50   ;;  %4311 = vst.msk [vmem:[%s6825_s1 + $0x1c8] sm:$0xff] %vm2823_vm2, %v3151_v4   ;;  %s2576_s3 = smov 3 }
 0x1c8   :  { %v3369_v53 = vsel %vm2819_vm1, %v3367_v49, %v3365_v48  ;;  %v3387_v55 = vld [vmem:[#allocation0 + $0x243] ss:$8 sm:$0xf]   ;;  %4210 = vst.msk [vmem:[%s6825_s1 + $0x170] ss:$8 sm:$0x3] %vm1283_vm0, %v2385_v13  }
 0x1c9   :  { %v3389_v56 = vld [vmem:[#allocation0 + $0x243] ss:$8 sm:$0xf0]   ;;  %v2391_v16 = vld [vmem:[#allocation0 + $0x5c8] ss:$2 sm:%s2390_s20]   ;;  %s2582_s19 = smov 3 }
 0x1ca   :  { %v3354_v58 = vld [vmem:[#allocation0 + $0xc3] ss:$8 sm:$0xf]   ;;  %v3140_v59 = vpop.permute.xlu1 %3139   ;;  %v3391_v1 = vsel %vm2819_vm1, %v3389_v56, %v3387_v55  ;;  %v2397_v17 = vld [vmem:[#allocation0 + $0x5d0] ss:$2 sm:%s2396_s24]   ;;  %s2594_s7 = smov 3 }
 0x1cb   :  { %v3356_v63 = vld [vmem:[#allocation0 + $0xc3] ss:$8 sm:$0xf0]   ;;  %3370 = vrot.lane.b32.xlu0 %v3369_v53, %s4346_s14  ;;  %4310 = vst.msk [vmem:[%s6825_s1 + $0x1a8] sm:$0xff] %vm2823_vm2, %v3140_v59   ;;  %v2475_v18 = vld [vmem:[#allocation0 + $0x638] ss:$2 sm:%s2474_s5]  }
 0x1cc   :  { %v3332_v62 = vld [vmem:[#allocation0 + $0x7c1] ss:$8 sm:$0xf]   ;;  %v3409_v2 = vld [vmem:[#allocation0 + $0x343] ss:$8 sm:$0xf]   ;;  %v3358_v6 = vsel %vm2819_vm1, %v3356_v63, %v3354_v58 }
 0x1cd   :  { %v3336_v0 = vsel %vm2819_vm1, %v3334_v51, %v3332_v62  ;;  %v3411_v3 = vld [vmem:[#allocation0 + $0x343] ss:$8 sm:$0xf0]   ;;  %4211 = vst.msk [vmem:[%s6825_s1 + $0x171] ss:$8 sm:$0x3] %vm1283_vm0, %v2391_v16  }
 0x1ce   :  { %3337 = vrot.lane.b32.xlu1 %v3336_v0, %s4346_s14  ;;  %v3376_v7 = vld [vmem:[#allocation0 + $0x1c3] ss:$8 sm:$0xf]   ;;  %v6537_v11 = vpop.permute.xlu1 %3161   ;;  %v3413_v14 = vsel %vm2819_vm1, %v3411_v3, %v3409_v2  ;;  %4212 = vst.msk [vmem:[%s6825_s1 + $0x172] ss:$8 sm:$0x3] %vm1283_vm0, %v2397_v17  }
 0x1cf   :  { %v3378_v12 = vld [vmem:[#allocation0 + $0x1c3] ss:$8 sm:$0xf0]   ;;  %3392 = vrot.lane.b32.xlu0 %v3391_v1, %s4346_s14  ;;  %4225 = vst.msk [vmem:[%s6825_s1 + $0x187] ss:$8 sm:$0x3] %vm1283_vm0, %v2475_v18  }
 0x1d0   :  { %v3398_v19 = vld [vmem:[#allocation0 + $0x2c3] ss:$8 sm:$0xf]   ;;  %v3380_v60 = vsel %vm2819_vm1, %v3378_v12, %v3376_v7  ;;  %v2481_v61 = vld [vmem:[#allocation0 + $0x640] ss:$2 sm:%s2480_s15]   ;;  %4293 = vst.msk [vmem:[%s6825_s1 + $0x180] sm:$0xff] %vm2823_vm2, %v6051_v40   ;;  %v3195_v7 = vpop.permute.xlu0 %3194  }
 0x1d1   :  { %v3400_v20 = vld [vmem:[#allocation0 + $0x2c3] ss:$8 sm:$0xf0]   ;;  %4309 = vst.msk [vmem:[%s6825_s1 + $0x188] sm:$0xff] %vm2823_vm2, %v3129_v57   ;;  %v2487_v9 = vld [vmem:[#allocation0 + $0x648] ss:$2 sm:%s2486_s8]  }
 0x1d2   :  { %3359 = vrot.lane.b32.xlu1 %v3358_v6, %s4346_s14  ;;  %v3431_v22 = vld [vmem:[#allocation0 + $0x443] ss:$8 sm:$0xf]   ;;  %4226 = vst.msk [vmem:[%s6825_s1 + $0x190] ss:$8 sm:$0x3] %vm1283_vm0, %v2481_v61   ;;  %v3402_v10 = vsel %vm2819_vm1, %v3400_v20, %v3398_v19  ;;  %v3184_v51 = vpop.permute.xlu1 %3183  }
 0x1d3   :  { %v3433_v23 = vld [vmem:[#allocation0 + $0x443] ss:$8 sm:$0xf0]   ;;  %3414 = vrot.lane.b32.xlu0 %v3413_v14, %s4346_s14  ;;  %v2493_v21 = vld [vmem:[#allocation0 + $0x650] ss:$2 sm:%s2492_s25]   ;;  %s2522_s15 = smov 3 }
 0x1d4   :  { %v3453_v40 = vld [vmem:[#allocation0 + $0x543] ss:$8 sm:$0xf]   ;;  %v3435_v25 = vsel %vm2819_vm1, %v3433_v23, %v3431_v22  ;;  %4227 = vst.msk [vmem:[%s6825_s1 + $0x191] ss:$8 sm:$0x3] %vm1283_vm0, %v2487_v9   ;;  %v3217_v13 = vpop.permute.xlu0 %3216  }
 0x1d5   :  { %v3455_v8 = vld [vmem:[#allocation0 + $0x543] ss:$8 sm:$0xf0]   ;;  %4228 = vst.msk [vmem:[%s6825_s1 + $0x192] ss:$8 sm:$0x3] %vm1283_vm0, %v2493_v21  }
 0x1d6   :  { %v2499_v31 = vld [vmem:[#allocation0 + $0x658] ss:$2 sm:%s2498_s23]   ;;  %3381 = vrot.lane.b32.xlu1 %v3380_v60, %s4346_s14  ;;  %v3420_v5 = vld [vmem:[#allocation0 + $0x3c3] ss:$8 sm:$0xf]   ;;  %s2588_s8 = smov 3  ;;  %v3457_v30 = vsel %vm2819_vm1, %v3455_v8, %v3453_v40  ;;  %v3206_v12 = vpop.permute.xlu1 %3205  }
 0x1d7   :  { %v2505_v41 = vld [vmem:[#allocation0 + $0x660] ss:$2 sm:%s2504_s11]   ;;  %4229 = vst.msk [vmem:[%s6825_s1 + $0x193] ss:$8 sm:$0x3] %vm1283_vm0, %v2499_v31   ;;  %3436 = vrot.lane.b32.xlu0 %v3435_v25, %s4346_s14  ;;  %s2600_s27 = smov 3 }
 0x1d8   :  { %4230 = vst.msk [vmem:[%s6825_s1 + $0x194] ss:$8 sm:$0x3] %vm1283_vm0, %v2505_v41   ;;  %v2511_v26 = vld [vmem:[#allocation0 + $0x668] ss:$2 sm:%s2510_s9]   ;;  %s2606_s11 = smov 3  ;;  %v3239_v16 = vpop.permute.xlu0 %3238  }
 0x1d9   :  { %v2517_v52 = vld [vmem:[#allocation0 + $0x670] ss:$2 sm:%s2516_s13]   ;;  %v3422_v54 = vld [vmem:[#allocation0 + $0x3c3] ss:$8 sm:$0xf0]   ;;  %s2612_s17 = smov 3 }
 0x1da   :  { %4231 = vst.msk [vmem:[%s6825_s1 + $0x195] ss:$8 sm:$0x3] %vm1283_vm0, %v2511_v26   ;;  %4232 = vst.msk [vmem:[%s6825_s1 + $0x196] ss:$8 sm:$0x3] %vm1283_vm0, %v2517_v52   ;;  %3403 = vrot.lane.b32.xlu1 %v3402_v10, %s4346_s14  ;;  %v3424_v38 = vsel %vm2819_vm1, %v3422_v54, %v3420_v5  ;;  %v3228_v14 = vpop.permute.xlu1 %3227  }
 0x1db   :  { %v2523_v24 = vld [vmem:[#allocation0 + $0x678] ss:$2 sm:%s2522_s15]   ;;  %v3475_v27 = vld [vmem:[#allocation0 + $0x643] ss:$8 sm:$0xf]   ;;  %s2762_s13 = smov 3  ;;  %3458 = vrot.lane.b32.xlu0 %v3457_v30, %s4346_s14 }
 0x1dc   :  { %4233 = vst.msk [vmem:[%s6825_s1 + $0x197] ss:$8 sm:$0x3] %vm1283_vm0, %v2523_v24   ;;  %v3477_v28 = vld [vmem:[#allocation0 + $0x643] ss:$8 sm:$0xf0]  }
 0x1dd   :  { %v2577_v29 = vld [vmem:[#allocation0 + $0x6c0] ss:$2 sm:%s2576_s3]   ;;  %v2589_v34 = vld [vmem:[#allocation0 + $0x6d0] ss:$2 sm:%s2588_s8]   ;;  %s2768_s24 = smov 3  ;;  %4313 = vst.msk [vmem:[%s6825_s1 + $0x10] sm:$0xff] %vm2823_vm2, %v3173_v37   ;;  %v3479_v44 = vsel %vm2819_vm1, %v3477_v28, %v3475_v27 }
 0x1de   :  { %4242 = vst.msk [vmem:[%s6825_s1 + $0x1b0] ss:$8 sm:$0x3] %vm1283_vm0, %v2577_v29   ;;  %v2583_v33 = vld [vmem:[#allocation0 + $0x6c8] ss:$2 sm:%s2582_s19]   ;;  %3425 = vrot.lane.b32.xlu1 %v3424_v38, %s4346_s14  ;;  %s2774_s10 = smov 3 }
 0x1df   :  { %4243 = vst.msk [vmem:[%s6825_s1 + $0x1b1] ss:$8 sm:$0x3] %vm1283_vm0, %v2583_v33   ;;  %4244 = vst.msk [vmem:[%s6825_s1 + $0x1b2] ss:$8 sm:$0x3] %vm1283_vm0, %v2589_v34   ;;  %3480 = vrot.lane.b32.xlu0 %v3479_v44, %s4346_s14 }
 0x1e0   :  { %v2595_v35 = vld [vmem:[#allocation0 + $0x6d8] ss:$2 sm:%s2594_s7]   ;;  %v2607_v39 = vld [vmem:[#allocation0 + $0x6e8] ss:$2 sm:%s2606_s11]   ;;  %s2780_s26 = smov 3  ;;  %s2786_s8 = smov 3 }
 0x1e1   :  { %v2601_v36 = vld [vmem:[#allocation0 + $0x6e0] ss:$2 sm:%s2600_s27]   ;;  %4245 = vst.msk [vmem:[%s6825_s1 + $0x1b3] ss:$8 sm:$0x3] %vm1283_vm0, %v2595_v35   ;;  %s2792_s25 = smov 3 }
 0x1e2   :  { %4246 = vst.msk [vmem:[%s6825_s1 + $0x1b4] ss:$8 sm:$0x3] %vm1283_vm0, %v2601_v36   ;;  %v2613_v42 = vld [vmem:[#allocation0 + $0x6f0] ss:$2 sm:%s2612_s17]   ;;  %s2798_s23 = smov 3 }
 0x1e3   :  { %v3442_v15 = vld [vmem:[#allocation0 + $0x4c3] ss:$8 sm:$0xf]   ;;  %4247 = vst.msk [vmem:[%s6825_s1 + $0x1b5] ss:$8 sm:$0x3] %vm1283_vm0, %v2607_v39  }
 0x1e4   :  { %v3444_v43 = vld [vmem:[#allocation0 + $0x4c3] ss:$8 sm:$0xf0]   ;;  %4248 = vst.msk [vmem:[%s6825_s1 + $0x1b6] ss:$8 sm:$0x3] %vm1283_vm0, %v2613_v42  }
 0x1e5   :  { %v3497_v45 = vld [vmem:[#allocation0 + $0x743] ss:$8 sm:$0xf]   ;;  %v2763_v49 = vld [vmem:[#allocation0 + $0x7b8] ss:$2 sm:%s2762_s13]   ;;  %v3446_v53 = vsel %vm2819_vm1, %v3444_v43, %v3442_v15  ;;  %4314 = vst.msk [vmem:[%s6825_s1 + $0x30] sm:$0xff] %vm2823_vm2, %v3184_v51   ;;  %v3250_v17 = vpop.permute.xlu1 %3249  }
 0x1e6   :  { %v3499_v46 = vld [vmem:[#allocation0 + $0x743] ss:$8 sm:$0xf0]   ;;  %v2769_v50 = vld [vmem:[#allocation0 + $0x7c0] ss:$2 sm:%s2768_s24]   ;;  %s2804_s11 = smov 3  ;;  %3447 = vrot.lane.b32.xlu1 %v3446_v53, %s4346_s14 }
 0x1e7   :  { %v3464_v47 = vld [vmem:[#allocation0 + $0x5c3] ss:$8 sm:$0xf]   ;;  %4273 = vst.msk [vmem:[%s6825_s1 + $0x1e7] ss:$8 sm:$0x3] %vm1283_vm0, %v2763_v49  }
 0x1e8   :  { %v3466_v48 = vld [vmem:[#allocation0 + $0x5c3] ss:$8 sm:$0xf0]   ;;  %4274 = vst.msk [vmem:[%s6825_s1 + $0x1f0] ss:$8 sm:$0x3] %vm1283_vm0, %v2769_v50  }
 0x1e9   :  { %v2775_v55 = vld [vmem:[#allocation0 + $0x7c8] ss:$2 sm:%s2774_s10]   ;;  %v2787_v57 = vld [vmem:[#allocation0 + $0x7d8] ss:$2 sm:%s2786_s8]   ;;  %4296 = vst.msk [vmem:[%s6825_s1 + $0x1e0] sm:$0xff] %vm2823_vm2, %v6207_v32   ;;  %4312 = vst.msk [vmem:[%s6825_s1 + $0x1e8] sm:$0xff] %vm2823_vm2, %v6537_v11   ;;  %v3501_v32 = vsel %vm2819_vm1, %v3499_v46, %v3497_v45  ;;  %v3468_v63 = vsel %vm2819_vm1, %v3466_v48, %v3464_v47 }
 0x1ea   :  { %v2781_v56 = vld [vmem:[#allocation0 + $0x7d0] ss:$2 sm:%s2780_s26]   ;;  %4275 = vst.msk [vmem:[%s6825_s1 + $0x1f1] ss:$8 sm:$0x3] %vm1283_vm0, %v2775_v55   ;;  %s2810_s22 = smov 3  ;;  %3502 = vrot.lane.b32.xlu0 %v3501_v32, %s4346_s14  ;;  %3469 = vrot.lane.b32.xlu1 %v3468_v63, %s4346_s14 }
 0x1eb   :  { %4276 = vst.msk [vmem:[%s6825_s1 + $0x1f2] ss:$8 sm:$0x3] %vm1283_vm0, %v2781_v56   ;;  %v2793_v58 = vld [vmem:[#allocation0 + $0x7e0] ss:$2 sm:%s2792_s25]  }
 0x1ec   :  { %4277 = vst.msk [vmem:[%s6825_s1 + $0x1f3] ss:$8 sm:$0x3] %vm1283_vm0, %v2787_v57   ;;  %4278 = vst.msk [vmem:[%s6825_s1 + $0x1f4] ss:$8 sm:$0x3] %vm1283_vm0, %v2793_v58  }
 0x1ed   :  { %v2799_v59 = vld [vmem:[#allocation0 + $0x7e8] ss:$2 sm:%s2798_s23]   ;;  %v2811_v0 = vld [vmem:[#allocation0 + $0x7f8] ss:$2 sm:%s2810_s22]   ;;  %4315 = vst.msk [vmem:[%s6825_s1 + $0x50] sm:$0xff] %vm2823_vm2, %v3195_v7   ;;  %4316 = vst.msk [vmem:[%s6825_s1 + $0x70] sm:$0xff] %vm2823_vm2, %v3206_v12  }
 0x1ee   :  { %4279 = vst.msk [vmem:[%s6825_s1 + $0x1f5] ss:$8 sm:$0x3] %vm1283_vm0, %v2799_v59   ;;  %v2805_v62 = vld [vmem:[#allocation0 + $0x7f0] ss:$2 sm:%s2804_s11]  }
 0x1ef   :  { %4280 = vst.msk [vmem:[%s6825_s1 + $0x1f6] ss:$8 sm:$0x3] %vm1283_vm0, %v2805_v62   ;;  %v3486_v1 = vld [vmem:[#allocation0 + $0x6c3] ss:$8 sm:$0xf]   ;;  %v3261_v18 = vpop.permute.xlu0 %3260  }
 0x1f0   :  { %v3488_v2 = vld [vmem:[#allocation0 + $0x6c3] ss:$8 sm:$0xf0]   ;;  %4281 = vst.msk [vmem:[%s6825_s1 + $0x1f7] ss:$8 sm:$0x3] %vm1283_vm0, %v2811_v0  }
 0x1f1   :  { %v3490_v3 = vsel %vm2819_vm1, %v3488_v2, %v3486_v1  ;;  %v3508_v4 = vld [vmem:[#allocation0 + $0x7c3] ss:$8 sm:$0xf]   ;;  %4317 = vst.msk [vmem:[%s6825_s1 + $0x90] sm:$0xff] %vm2823_vm2, %v3217_v13   ;;  %4318 = vst.msk [vmem:[%s6825_s1 + $0xb0] sm:$0xff] %vm2823_vm2, %v3228_v14  }
 0x1f2   :  { %v3510_v6 = vld [vmem:[#allocation0 + $0x7c3] ss:$8 sm:$0xf0]   ;;  %3491 = vrot.lane.b32.xlu1 %v3490_v3, %s4346_s14  ;;  %4319 = vst.msk [vmem:[%s6825_s1 + $0xd0] sm:$0xff] %vm2823_vm2, %v3239_v16   ;;  %4320 = vst.msk [vmem:[%s6825_s1 + $0xf0] sm:$0xff] %vm2823_vm2, %v3250_v17  }
 0x1f3   :  { %v3512_v11 = vsel %vm2819_vm1, %v3510_v6, %v3508_v4  ;;  %4321 = vst.msk [vmem:[%s6825_s1 + $0x110] sm:$0xff] %vm2823_vm2, %v3261_v18  }
 0x1f6   :  { %3513 = vrot.lane.b32.xlu1 %v3512_v11, %s4346_s14 }
 0x204   :  { %v3272_v19 = vpop.permute.xlu1 %3271  }
 0x205   :  { %4322 = vst.msk [vmem:[%s6825_s1 + $0x130] sm:$0xff] %vm2823_vm2, %v3272_v19  }
 0x20d   :  { %v3283_v20 = vpop.permute.xlu0 %3282  }
 0x20e   :  { %4323 = vst.msk [vmem:[%s6825_s1 + $0x150] sm:$0xff] %vm2823_vm2, %v3283_v20  }
 0x21c   :  { %v3294_v22 = vpop.permute.xlu1 %3293  }
 0x21d   :  { %4324 = vst.msk [vmem:[%s6825_s1 + $0x170] sm:$0xff] %vm2823_vm2, %v3294_v22  }
 0x224   :  { %v3305_v23 = vpop.permute.xlu0 %3304  }
 0x225   :  { %4325 = vst.msk [vmem:[%s6825_s1 + $0x190] sm:$0xff] %vm2823_vm2, %v3305_v23  }
 0x228   :  { %v3316_v60 = vpop.permute.xlu1 %3315  }
 0x229   :  { %4326 = vst.msk [vmem:[%s6825_s1 + $0x1b0] sm:$0xff] %vm2823_vm2, %v3316_v60  }
 0x234   :  { %v3327_v61 = vpop.permute.xlu0 %3326  }
 0x235   :  { %4327 = vst.msk [vmem:[%s6825_s1 + $0x1d0] sm:$0xff] %vm2823_vm2, %v3327_v61  }
 0x239   :  { %v3349_v40 = vpop.permute.xlu0 %3348  }
 0x23a   :  { %4329 = vst.msk [vmem:[%s6825_s1 + $0x18] sm:$0xff] %vm2823_vm2, %v3349_v40  }
 0x23d   :  { %v3371_v8 = vpop.permute.xlu0 %3370  }
 0x23e   :  { %4331 = vst.msk [vmem:[%s6825_s1 + $0x58] sm:$0xff] %vm2823_vm2, %v3371_v8  }
 0x240   :  { %v3338_v9 = vpop.permute.xlu1 %3337  }
 0x241   :  { %4328 = vst.msk [vmem:[%s6825_s1 + $0x1f0] sm:$0xff] %vm2823_vm2, %v3338_v9   ;;  %v3393_v21 = vpop.permute.xlu0 %3392  }
 0x242   :  { %4333 = vst.msk [vmem:[%s6825_s1 + $0x98] sm:$0xff] %vm2823_vm2, %v3393_v21  }
 0x244   :  { %v3360_v25 = vpop.permute.xlu1 %3359  }
 0x245   :  { %4330 = vst.msk [vmem:[%s6825_s1 + $0x38] sm:$0xff] %vm2823_vm2, %v3360_v25   ;;  %v3415_v31 = vpop.permute.xlu0 %3414  }
 0x246   :  { %4335 = vst.msk [vmem:[%s6825_s1 + $0xd8] sm:$0xff] %vm2823_vm2, %v3415_v31  }
 0x248   :  { %v3382_v41 = vpop.permute.xlu1 %3381  }
 0x249   :  { %4332 = vst.msk [vmem:[%s6825_s1 + $0x78] sm:$0xff] %vm2823_vm2, %v3382_v41   ;;  %v3437_v5 = vpop.permute.xlu0 %3436  }
 0x24a   :  { %4337 = vst.msk [vmem:[%s6825_s1 + $0x118] sm:$0xff] %vm2823_vm2, %v3437_v5  }
 0x24c   :  { %v3404_v26 = vpop.permute.xlu1 %3403  }
 0x24d   :  { %4334 = vst.msk [vmem:[%s6825_s1 + $0xb8] sm:$0xff] %vm2823_vm2, %v3404_v26   ;;  %v3459_v52 = vpop.permute.xlu0 %3458  }
 0x24e   :  { %4339 = vst.msk [vmem:[%s6825_s1 + $0x158] sm:$0xff] %vm2823_vm2, %v3459_v52  }
 0x250   :  { %v3426_v10 = vpop.permute.xlu1 %3425  }
 0x251   :  { %4336 = vst.msk [vmem:[%s6825_s1 + $0xf8] sm:$0xff] %vm2823_vm2, %v3426_v10   ;;  %v3481_v54 = vpop.permute.xlu0 %3480  }
 0x252   :  { %4341 = vst.msk [vmem:[%s6825_s1 + $0x198] sm:$0xff] %vm2823_vm2, %v3481_v54  }
 0x258   :  { %v3448_v24 = vpop.permute.xlu1 %3447  }
 0x259   :  { %4338 = vst.msk [vmem:[%s6825_s1 + $0x138] sm:$0xff] %vm2823_vm2, %v3448_v24  }
 0x25c   :  { %v3503_v27 = vpop.permute.xlu0 %3502   ;;  %v3470_v28 = vpop.permute.xlu1 %3469  }
 0x25d   :  { %4343 = vst.msk [vmem:[%s6825_s1 + $0x1d8] sm:$0xff] %vm2823_vm2, %v3503_v27   ;;  %4340 = vst.msk [vmem:[%s6825_s1 + $0x178] sm:$0xff] %vm2823_vm2, %v3470_v28  }
 0x264   :  { %v3492_v29 = vpop.permute.xlu1 %3491  }
 0x265   :  { %4342 = vst.msk [vmem:[%s6825_s1 + $0x1b8] sm:$0xff] %vm2823_vm2, %v3492_v29  }
 0x268   :  { %v3514_v30 = vpop.permute.xlu1 %3513  }
 0x269   :  { %4344 = vst.msk [vmem:[%s6825_s1 + $0x1f8] sm:$0xff] %vm2823_vm2, %v3514_v30  }

// kernel: basic_layer_forward.2
= control target key start
LH: loop header
LB: loop body
LE: loop exit
PB: predicated region body
PF: predicated region fallthrough
CT: control target
= control target key end

     0   :  { %s9346_s24 = smov 0   ;;  %s12997_s0 = inlined_call_operand.vmem [shape: f32[512,32], index: 0, kind: input, shape index: {}]   ;;  %s12998_s1 = inlined_call_operand.vmem [shape: bf16[32,64], index: 1, kind: input, shape index: {}]   ;;  %s12999_s2 = inlined_call_operand.vmem [shape: f32[1,64], index: 2, kind: input, shape index: {}]   ;;  %s13000_s3 = inlined_call_operand.vmem [shape: bf16[4,1,32], index: 3, kind: input, shape index: {}]   ;;  %s13001_s4 = inlined_call_operand.vmem [shape: bf16[4,1,128], index: 4, kind: input, shape index: {}]   ;;  %s13002_s5 = inlined_call_operand.vmem [shape: bf16[256,128], index: 5, kind: input, shape index: {}]   ;;  %s13003_s6 = inlined_call_operand.vmem [shape: f32[4,64,256], index: 6, kind: input, shape index: {}]   ;;  %s13004_s7 = inlined_call_operand.vmem [shape: bf16[128,32], index: 7, kind: input, shape index: {}]   ;;  %s13005_s8 = inlined_call_operand.vmem [shape: f32[1,32], index: 8, kind: input, shape index: {}]   ;;  %s13006_s9 = inlined_call_operand.vmem [shape: f32[1,32], index: 9, kind: input, shape index: {}]   ;;  %s13007_s10 = inlined_call_operand.vmem [shape: f32[1,32], index: 10, kind: input, shape index: {}]   ;;  %s13008_s11 = inlined_call_operand.vmem [shape: f32[1,32], index: 11, kind: input, shape index: {}]   ;;  %s13009_s12 = inlined_call_operand.vmem [shape: f32[1,32], index: 12, kind: input, shape index: {}]   ;;  %s13010_s13 = inlined_call_operand.vmem [shape: bf16[32,128], index: 13, kind: input, shape index: {}]   ;;  %s13011_s14 = inlined_call_operand.vmem [shape: f32[1,128], index: 14, kind: input, shape index: {}]   ;;  %s13012_s15 = inlined_call_operand.vmem [shape: bf16[128,32], index: 15, kind: input, shape index: {}]   ;;  %s13013_s16 = inlined_call_operand.vmem [shape: f32[1,32], index: 16, kind: input, shape index: {}]   ;;  %s13014_s17 = inlined_call_operand.vmem [shape: f32[512,32], index: 17, kind: output, shape index: {}]  }
   0x1   :  { %13025 = sst [smem:[#allocation18_spill]] %s12997_s0 }
   0x2   :  { %13026 = sst [smem:[#allocation19_spill]] %s12998_s1 }
   0x3   :  { %13027 = sst [smem:[#allocation20_spill]] %s12999_s2 }
   0x4 LB: > { %s7375_s25 = sadd.s32 4294967295, %s9251_s24   ;;  %p7379_p0 = scmp.ge.s32.totalorder %s9251_s24, 1  ;;  %s9251_s24 = sphi %s9346_s24, %s27_s24  }
   0x5   : > { %p488_p1 = scmp.lt.s32.totalorder %s9251_s24, 3 }
   0x7   : > { %p489_p2 = pnand %p7379_p0, %p488_p1 }
   0x9   : > { %492 = sbr.rel (%p489_p2) target bundleno = 3645 (0xe3d), region = 88 }
   0xe   : > { %s7380_s26 = sshll.u32 %s7375_s25, 5  ;;  %vm585_vm0 = vcmask 261120   ;;  %s13028_s0 = sld [smem:[#allocation18_spill]]  ;;  %vm1273_vm1 = vcmask 257024   ;;  %vm2326_vm2 = vcmask 523264   ;;  %vm2335_vm3 = vcmask 785408  }
   0xf   : > { %p541_p3 = scmp.lt.s32.totalorder %s7380_s26, 63  ;;  %s13029_s1 = sld [smem:[#allocation19_spill]] }
  0x10   : > { %s13030_s2 = sld [smem:[#allocation20_spill]]  ;;  %s13021_s18 = smov 96  }
  0x11   : > { %s13065_s26 = smov (!%p541_p3, %s7380_s26), 63  ;;  %s13019_s29 = smov 64  }
  0x12   : > { %s13016_s27 = sshll.u32 %s13065_s26, 3  ;;  %s13031_s19 = smov 32  }
  0x13   : > { %s13033_s20 = smov 64   ;;  %s13063_s25 = sshll.u32 %s13065_s26, 3 }
  0x14   : > { %s9362_s30 = scalar_lea.vmem %s13028_s0, %s13016_s27  ;;  %s13017_s0 = smov 32  }
  0x15   : > { %v9365_v0 = vld [vmem:[%s9362_s30 + $0x10] sm:$0xff]  ;;  %v9368_v1 = vld [vmem:[%s9362_s30] sm:$0xff]  ;;  %v9371_v2 = vld [vmem:[%s9362_s30 + $0x18] sm:$0xff]  ;;  %s12838_s27 = scalar_lea.vmem %s13014_s17, %s13063_s25 }
  0x16   : > { %v592_v3 = vsel %vm585_vm0, %v9365_v0, 0.0  ;;  %v586_v4 = vsel %vm585_vm0, %v9368_v1, 0.0  ;;  %v595_v5 = vsel %vm585_vm0, %v9371_v2, 0.0  ;;  %v9380_v6 = vld [vmem:[%s9362_s30 + $0x8] sm:$0xff]  ;;  %v715_v7 = vmul.f32 %v9368_v1, %v9368_v1  ;;  %v9388_v9 = vld [vmem:[%s9362_s30 + $0x20] sm:$0xff]  ;;  %v9399_v14 = vld [vmem:[%s9362_s30 + $0x38] sm:$0xff] }
  0x17   : > { %v9385_v8 = vld [vmem:[%s9362_s30 + $0x28] sm:$0xff]  ;;  %593 = vadd.xlane.f32.xlu1 %v592_v3  ;;  %587 = vadd.xlane.f32.xlu0 %v586_v4  ;;  %v589_v10 = vsel %vm585_vm0, %v9380_v6, 0.0  ;;  %v716_v11 = vmul.f32 %v9380_v6, %v9380_v6  ;;  %v718_v12 = vmul.f32 %v9371_v2, %v9371_v2  ;;  %v717_v13 = vmul.f32 %v9365_v0, %v9365_v0  ;;  %v9402_v15 = vld [vmem:[%s9362_s30 + $0x30] sm:$0xff]  ;;  %v8665_v33 = vld [vmem:[%s13029_s1] sm:$0xff]  }
  0x18   : > { %v747_v16 = vsel %vm585_vm0, %v715_v7, 0.0  ;;  %v601_v17 = vsel %vm585_vm0, %v9385_v8, 0.0  ;;  %v598_v18 = vsel %vm585_vm0, %v9388_v9, 0.0  ;;  %v607_v19 = vsel %vm585_vm0, %v9399_v14, 0.0  ;;  %v8664_v32 = vld [vmem:[%s13029_s1 + $0x8] sm:$0xff]   ;;  %v9438_v35 = vld [vmem:[%s9362_s30 + $0x40] sm:$0xff] }
  0x19   : > { %v750_v20 = vsel %vm585_vm0, %v716_v11, 0.0  ;;  %v756_v21 = vsel %vm585_vm0, %v718_v12, 0.0  ;;  %v753_v22 = vsel %vm585_vm0, %v717_v13, 0.0  ;;  %v604_v23 = vsel %vm585_vm0, %v9402_v15, 0.0  ;;  %8389 = vmatprep.subr.bf16.mxu1 %v8664_v32  ;;  %v9435_v34 = vld [vmem:[%s9362_s30 + $0x48] sm:$0xff]  ;;  %v9441_v36 = vld [vmem:[%s9362_s30 + $0x58] sm:$0xff] }
  0x1a   : > { %v720_v24 = vmul.f32 %v9385_v8, %v9385_v8  ;;  %v719_v25 = vmul.f32 %v9388_v9, %v9388_v9  ;;  %v722_v26 = vmul.f32 %v9399_v14, %v9399_v14  ;;  %v721_v27 = vmul.f32 %v9402_v15, %v9402_v15  ;;  %8390 = vmatpush3.bf16.msra.mxu1 %v8664_v32  ;;  %v9448_v39 = vld [vmem:[%s9362_s30 + $0x50] sm:$0xff]  ;;  %v9467_v50 = vld [vmem:[%s9362_s30 + $0x68] sm:$0xff]  ;;  %v9470_v51 = vld [vmem:[%s9362_s30 + $0x60] sm:$0xff] }
  0x1b   : > { %596 = vadd.xlane.f32.xlu1 %v595_v5  ;;  %590 = vadd.xlane.f32.xlu0 %v589_v10  ;;  %v613_v37 = vsel %vm585_vm0, %v9435_v34, 0.0  ;;  %v610_v38 = vsel %vm585_vm0, %v9438_v35, 0.0  ;;  %v619_v40 = vsel %vm585_vm0, %v9441_v36, 0.0  ;;  %v616_v41 = vsel %vm585_vm0, %v9448_v39, 0.0  ;;  %v9477_v54 = vld [vmem:[%s9362_s30 + $0x78] sm:$0xff]  ;;  %v9480_v55 = vld [vmem:[%s9362_s30 + $0x70] sm:$0xff] }
  0x1c   : > { %v762_v28 = vsel %vm585_vm0, %v720_v24, 0.0  ;;  %v759_v29 = vsel %vm585_vm0, %v719_v25, 0.0  ;;  %v768_v30 = vsel %vm585_vm0, %v722_v26, 0.0  ;;  %v765_v31 = vsel %vm585_vm0, %v721_v27, 0.0  ;;  %8391 = vmatprep.subr.bf16.mxu1 %v8665_v33  ;;  %v9499_v5 = vld [vmem:[%s9362_s30 + $0x80] sm:$0xff]  ;;  %v9502_v7 = vld [vmem:[%s9362_s30 + $0x88] sm:$0xff] }
  0x1d   : > { %v724_v42 = vmul.f32 %v9435_v34, %v9435_v34  ;;  %v723_v43 = vmul.f32 %v9438_v35, %v9438_v35  ;;  %v726_v44 = vmul.f32 %v9441_v36, %v9441_v36  ;;  %v725_v45 = vmul.f32 %v9448_v39, %v9448_v39  ;;  %v9509_v12 = vld [vmem:[%s9362_s30 + $0x98] sm:$0xff]  ;;  %v9512_v13 = vld [vmem:[%s9362_s30 + $0x90] sm:$0xff]  ;;  %v9531_v26 = vld [vmem:[%s9362_s30 + $0xa0] sm:$0xff] }
  0x1e   : > { %8392 = vmatpush3.bf16.msra.mxu1 %v8665_v33  ;;  %v625_v52 = vsel %vm585_vm0, %v9467_v50, 0.0  ;;  %v622_v53 = vsel %vm585_vm0, %v9470_v51, 0.0  ;;  %v631_v56 = vsel %vm585_vm0, %v9477_v54, 0.0  ;;  %v628_v57 = vsel %vm585_vm0, %v9480_v55, 0.0  ;;  %v9534_v27 = vld [vmem:[%s9362_s30 + $0xa8] sm:$0xff] }
  0x1f   : > { %751 = vadd.xlane.f32.xlu1 %v750_v20  ;;  %748 = vadd.xlane.f32.xlu0 %v747_v16  ;;  %v774_v46 = vsel %vm585_vm0, %v724_v42, 0.0  ;;  %v771_v47 = vsel %vm585_vm0, %v723_v43, 0.0  ;;  %v780_v48 = vsel %vm585_vm0, %v726_v44, 0.0  ;;  %v777_v49 = vsel %vm585_vm0, %v725_v45, 0.0 }
  0x20   : > { %v728_v58 = vmul.f32 %v9467_v50, %v9467_v50  ;;  %v727_v59 = vmul.f32 %v9470_v51, %v9470_v51  ;;  %v730_v62 = vmul.f32 %v9477_v54, %v9477_v54  ;;  %v729_v63 = vmul.f32 %v9480_v55, %v9480_v55 }
  0x21   : > { %v634_v10 = vsel %vm585_vm0, %v9499_v5, 0.0  ;;  %v637_v11 = vsel %vm585_vm0, %v9502_v7, 0.0  ;;  %v643_v16 = vsel %vm585_vm0, %v9509_v12, 0.0 }
  0x22   : > { %v786_v60 = vsel %vm585_vm0, %v728_v58, 0.0  ;;  %v783_v61 = vsel %vm585_vm0, %v727_v59, 0.0  ;;  %v792_v3 = vsel %vm585_vm0, %v730_v62, 0.0  ;;  %v789_v4 = vsel %vm585_vm0, %v729_v63, 0.0 }
  0x23   : > { %757 = vadd.xlane.f32.xlu1 %v756_v21  ;;  %754 = vadd.xlane.f32.xlu0 %v753_v22  ;;  %v734_v22 = vmul.f32 %v9509_v12, %v9509_v12 }
  0x25   : > { %v804_v24 = vsel %vm585_vm0, %v734_v22, 0.0 }
  0x27   : > { %602 = vadd.xlane.f32.xlu1 %v601_v17  ;;  %599 = vadd.xlane.f32.xlu0 %v598_v18  ;;  %v640_v17 = vsel %vm585_vm0, %v9512_v13, 0.0  ;;  %v732_v18 = vmul.f32 %v9502_v7, %v9502_v7 }
  0x29   : > { %v798_v20 = vsel %vm585_vm0, %v732_v18, 0.0 }
  0x2b   : > { %608 = vadd.xlane.f32.xlu1 %v607_v19  ;;  %605 = vadd.xlane.f32.xlu0 %v604_v23  ;;  %v731_v19 = vmul.f32 %v9499_v5, %v9499_v5  ;;  %v733_v23 = vmul.f32 %v9512_v13, %v9512_v13 }
  0x2d   : > { %v795_v21 = vsel %vm585_vm0, %v731_v19, 0.0  ;;  %v801_v25 = vsel %vm585_vm0, %v733_v23, 0.0 }
  0x2f   : > { %763 = vadd.xlane.f32.xlu1 %v762_v28  ;;  %760 = vadd.xlane.f32.xlu0 %v759_v29  ;;  %v646_v28 = vsel %vm585_vm0, %v9531_v26, 0.0  ;;  %v649_v29 = vsel %vm585_vm0, %v9534_v27, 0.0 }
  0x33   : > { %769 = vadd.xlane.f32.xlu1 %v768_v30  ;;  %766 = vadd.xlane.f32.xlu0 %v765_v31  ;;  %v9541_v30 = vld [vmem:[%s9362_s30 + $0xb8] sm:$0xff]  ;;  %v9544_v31 = vld [vmem:[%s9362_s30 + $0xb0] sm:$0xff] }
  0x34   : > { %v655_v32 = vsel %vm585_vm0, %v9541_v30, 0.0  ;;  %v652_v33 = vsel %vm585_vm0, %v9544_v31, 0.0  ;;  %v738_v42 = vmul.f32 %v9541_v30, %v9541_v30  ;;  %v737_v43 = vmul.f32 %v9544_v31, %v9544_v31 }
  0x36   : > { %v816_v44 = vsel %vm585_vm0, %v738_v42, 0.0  ;;  %v813_v45 = vsel %vm585_vm0, %v737_v43, 0.0 }
  0x37   : > { %614 = vadd.xlane.f32.xlu1 %v613_v37  ;;  %611 = vadd.xlane.f32.xlu0 %v610_v38  ;;  %v736_v37 = vmul.f32 %v9534_v27, %v9534_v27  ;;  %v735_v38 = vmul.f32 %v9531_v26, %v9531_v26 }
  0x3b   : > { %620 = vadd.xlane.f32.xlu1 %v619_v40  ;;  %617 = vadd.xlane.f32.xlu0 %v616_v41  ;;  %v810_v40 = vsel %vm585_vm0, %v736_v37, 0.0  ;;  %v807_v41 = vsel %vm585_vm0, %v735_v38, 0.0 }
  0x3f   : > { %775 = vadd.xlane.f32.xlu1 %v774_v46  ;;  %772 = vadd.xlane.f32.xlu0 %v771_v47  ;;  %v9563_v46 = vld [vmem:[%s9362_s30 + $0xc0] sm:$0xff]  ;;  %v9566_v47 = vld [vmem:[%s9362_s30 + $0xc8] sm:$0xff] }
  0x40   : > { %v740_v58 = vmul.f32 %v9566_v47, %v9566_v47  ;;  %v739_v59 = vmul.f32 %v9563_v46, %v9563_v46 }
  0x42   : > { %v822_v62 = vsel %vm585_vm0, %v740_v58, 0.0  ;;  %v819_v63 = vsel %vm585_vm0, %v739_v59, 0.0 }
  0x43   : > { %781 = vadd.xlane.f32.xlu1 %v780_v48  ;;  %778 = vadd.xlane.f32.xlu0 %v777_v49  ;;  %v658_v48 = vsel %vm585_vm0, %v9563_v46, 0.0  ;;  %v661_v49 = vsel %vm585_vm0, %v9566_v47, 0.0 }
  0x47   : > { %626 = vadd.xlane.f32.xlu1 %v625_v52  ;;  %623 = vadd.xlane.f32.xlu0 %v622_v53  ;;  %v9573_v52 = vld [vmem:[%s9362_s30 + $0xd8] sm:$0xff]  ;;  %v9576_v53 = vld [vmem:[%s9362_s30 + $0xd0] sm:$0xff] }
  0x4b   : > { %632 = vadd.xlane.f32.xlu1 %v631_v56  ;;  %629 = vadd.xlane.f32.xlu0 %v628_v57  ;;  %v667_v56 = vsel %vm585_vm0, %v9573_v52, 0.0  ;;  %v664_v57 = vsel %vm585_vm0, %v9576_v53, 0.0 }
  0x4f   : > { %787 = vadd.xlane.f32.xlu1 %v786_v60  ;;  %784 = vadd.xlane.f32.xlu0 %v783_v61 }
  0x53   : > { %793 = vadd.xlane.f32.xlu1 %v792_v3  ;;  %790 = vadd.xlane.f32.xlu0 %v789_v4  ;;  %v742_v3 = vmul.f32 %v9573_v52, %v9573_v52  ;;  %v741_v4 = vmul.f32 %v9576_v53, %v9576_v53 }
  0x55   : > { %v828_v18 = vsel %vm585_vm0, %v742_v3, 0.0  ;;  %v825_v19 = vsel %vm585_vm0, %v741_v4, 0.0 }
  0x57   : > { %635 = vadd.xlane.f32.xlu1 %v634_v10  ;;  %638 = vadd.xlane.f32.xlu0 %v637_v11 }
  0x5b   : > { %644 = vadd.xlane.f32.xlu1 %v643_v16  ;;  %641 = vadd.xlane.f32.xlu0 %v640_v17 }
  0x5f   : > { %799 = vadd.xlane.f32.xlu1 %v798_v20  ;;  %796 = vadd.xlane.f32.xlu0 %v795_v21  ;;  %v582_v20 = vld [vmem:[%s9362_s30 + $0xe8] sm:$0xff]  ;;  %v581_v21 = vld [vmem:[%s9362_s30 + $0xe0] sm:$0xff] }
  0x63   : > { %805 = vadd.xlane.f32.xlu1 %v804_v24  ;;  %802 = vadd.xlane.f32.xlu0 %v801_v25 }
  0x67   : > { %647 = vadd.xlane.f32.xlu1 %v646_v28  ;;  %650 = vadd.xlane.f32.xlu0 %v649_v29  ;;  %v673_v28 = vsel %vm585_vm0, %v582_v20, 0.0  ;;  %v670_v29 = vsel %vm585_vm0, %v581_v21, 0.0 }
  0x6b   : > { %656 = vadd.xlane.f32.xlu1 %v655_v32  ;;  %653 = vadd.xlane.f32.xlu0 %v652_v33 }
  0x6f   : > { %811 = vadd.xlane.f32.xlu1 %v810_v40  ;;  %808 = vadd.xlane.f32.xlu0 %v807_v41  ;;  %v583_v40 = vld [vmem:[%s9362_s30 + $0xf0] sm:$0xff] }
  0x73   : > { %817 = vadd.xlane.f32.xlu1 %v816_v44  ;;  %814 = vadd.xlane.f32.xlu0 %v813_v45 }
  0x77   : > { %659 = vadd.xlane.f32.xlu1 %v658_v48  ;;  %662 = vadd.xlane.f32.xlu0 %v661_v49  ;;  %v676_v49 = vsel %vm585_vm0, %v583_v40, 0.0 }
  0x7b   : > { %668 = vadd.xlane.f32.xlu1 %v667_v56  ;;  %665 = vadd.xlane.f32.xlu0 %v664_v57 }
  0x7f   : > { %823 = vadd.xlane.f32.xlu1 %v822_v62  ;;  %820 = vadd.xlane.f32.xlu0 %v819_v63 }
  0x83   : > { %829 = vadd.xlane.f32.xlu1 %v828_v18  ;;  %826 = vadd.xlane.f32.xlu0 %v825_v19 }
  0x87   : > { %674 = vadd.xlane.f32.xlu0 %v673_v28  ;;  %671 = vadd.xlane.f32.xlu1 %v670_v29 }
  0x8b   : > { %677 = vadd.xlane.f32.xlu0 %v676_v49  ;;  %v9639_v49 = vld [vmem:[%s13006_s9] ss:$0 sm:$0xff] }
  0xa0   : > { %v594_v60 = vpop.xlane.xlu1 %593  ;;  %v588_v61 = vpop.xlane.xlu0 %587 }
  0xa1   : > { %v9592_v16 = vmul.f32 0.03125, %v588_v61  ;;  %v9600_v22 = vmul.f32 0.03125, %v594_v60 }
  0xa3   : > { %v875_v32 = vmul.f32 %v9592_v16, %v9592_v16  ;;  %v877_v43 = vmul.f32 %v9600_v22, %v9600_v22 }
  0xa4   : > { %v597_v10 = vpop.xlane.xlu1 %596  ;;  %v591_v11 = vpop.xlane.xlu0 %590 }
  0xa5   : > { %v9594_v17 = vmul.f32 0.03125, %v591_v11  ;;  %v9602_v23 = vmul.f32 0.03125, %v597_v10 }
  0xa7   : > { %v876_v33 = vmul.f32 %v9594_v17, %v9594_v17  ;;  %v878_v44 = vmul.f32 %v9602_v23, %v9602_v23 }
  0xa8   : > { %v752_v24 = vpop.xlane.xlu1 %751  ;;  %v749_v25 = vpop.xlane.xlu0 %748 }
  0xa9   : > { %v844_v37 = vmul.f32 0.03125, %v752_v24  ;;  %v843_v38 = vmul.f32 0.03125, %v749_v25 }
  0xab   : > { %v908_v41 = vsub.f32 %v844_v37, %v876_v33  ;;  %v907_v42 = vsub.f32 %v843_v38, %v875_v32 }
  0xac   : > { %v758_v45 = vpop.xlane.xlu1 %757  ;;  %v755_v48 = vpop.xlane.xlu0 %754 }
  0xad   : > { %v972_v56 = vadd.f32 1e-05, %v908_v41  ;;  %v971_v57 = vadd.f32 1e-05, %v907_v42  ;;  %v846_v58 = vmul.f32 0.03125, %v758_v45  ;;  %v845_v59 = vmul.f32 0.03125, %v755_v48 }
  0xae   : > { %v939_v41 = vsub.f32 %v9368_v1, %v9592_v16  ;;  %v940_v42 = vsub.f32 %v9380_v6, %v9594_v17  ;;  %v942_v17 = vsub.f32 %v9371_v2, %v9602_v23 }
  0xaf   : > { %8804 = vrsqrt.f32 %v972_v56  ;;  %v910_v60 = vsub.f32 %v846_v58, %v878_v44  ;;  %v909_v61 = vsub.f32 %v845_v59, %v877_v43 }
  0xb0   : > { %8806 = vrsqrt.f32 %v971_v57  ;;  %v603_v62 = vpop.xlane.xlu1 %602  ;;  %v600_v63 = vpop.xlane.xlu0 %599 }
  0xb1   : > { %v974_v3 = vadd.f32 1e-05, %v910_v60  ;;  %v973_v4 = vadd.f32 1e-05, %v909_v61  ;;  %v9616_v18 = vmul.f32 0.03125, %v603_v62  ;;  %v9618_v19 = vmul.f32 0.03125, %v600_v63 }
  0xb2   : > { %v9646_v62 = vld [vmem:[%s13007_s10] ss:$0 sm:$0xff] }
  0xb3   : > { %8808 = vrsqrt.f32 %v974_v3  ;;  %v880_v28 = vmul.f32 %v9616_v18, %v9616_v18  ;;  %v879_v29 = vmul.f32 %v9618_v19, %v9618_v19  ;;  %v941_v3 = vsub.f32 %v9365_v0, %v9600_v22 }
  0xb4   : > { %8810 = vrsqrt.f32 %v973_v4  ;;  %v609_v10 = vpop.xlane.xlu1 %608  ;;  %v606_v11 = vpop.xlane.xlu0 %605 }
  0xb5   : > { %v9620_v20 = vmul.f32 0.03125, %v609_v10  ;;  %v9622_v21 = vmul.f32 0.03125, %v606_v11 }
  0xb7   : > { %v882_v43 = vmul.f32 %v9620_v20, %v9620_v20  ;;  %v881_v44 = vmul.f32 %v9622_v21, %v9622_v21 }
  0xb8   : > { %v764_v24 = vpop.xlane.xlu1 %763  ;;  %v761_v25 = vpop.xlane.xlu0 %760 }
  0xb9   : > { %v848_v32 = vmul.f32 0.03125, %v764_v24  ;;  %v847_v33 = vmul.f32 0.03125, %v761_v25 }
  0xbb   : > { %v912_v37 = vsub.f32 %v848_v32, %v880_v28  ;;  %v911_v38 = vsub.f32 %v847_v33, %v879_v29 }
  0xbc   : > { %v8805_v40 = vpop.eup %8804  ;;  %v770_v45 = vpop.xlane.xlu1 %769 }
  0xbd   : > { %v767_v48 = vpop.xlane.xlu0 %766  ;;  %v8807_v56 = vpop.eup %8806  ;;  %v976_v57 = vadd.f32 1e-05, %v912_v37  ;;  %v975_v58 = vadd.f32 1e-05, %v911_v38  ;;  %v850_v1 = vmul.f32 0.03125, %v770_v45  ;;  %v1036_v6 = vmul.f32 %v8805_v40, %v940_v42 }
  0xbe   : > { %v849_v16 = vmul.f32 0.03125, %v767_v48  ;;  %v1035_v59 = vmul.f32 %v8807_v56, %v939_v41  ;;  %v943_v48 = vsub.f32 %v9388_v9, %v9618_v19 }
  0xbf   : > { %8812 = vrsqrt.f32 %v976_v57  ;;  %v914_v60 = vsub.f32 %v850_v1, %v882_v43  ;;  %v1075_v10 = vmul.f32 %v9639_v49, %v1036_v6  ;;  %v946_v1 = vsub.f32 %v9399_v14, %v9620_v20 }
  0xc0   : > { %v913_v61 = vsub.f32 %v849_v16, %v881_v44  ;;  %v8809_v63 = vpop.eup %8808  ;;  %8814 = vrsqrt.f32 %v975_v58  ;;  %v1074_v4 = vmul.f32 %v9639_v49, %v1035_v59  ;;  %v944_v44 = vsub.f32 %v9385_v8, %v9616_v18 }
  0xc1   : > { %v8811_v11 = vpop.eup %8810  ;;  %v978_v24 = vadd.f32 1e-05, %v914_v60  ;;  %v1038_v23 = vmul.f32 %v8809_v63, %v942_v17  ;;  %v1114_v28 = vadd.f32 %v9646_v62, %v1075_v10  ;;  %v945_v8 = vsub.f32 %v9402_v15, %v9622_v21 }
  0xc2   : > { %v977_v2 = vadd.f32 1e-05, %v913_v61  ;;  %v1113_v25 = vadd.f32 %v9646_v62, %v1074_v4  ;;  %v1037_v29 = vmul.f32 %v8811_v11, %v941_v3 }
  0xc3   : > { %8816 = vrsqrt.f32 %v978_v24  ;;  %v1077_v32 = vmul.f32 %v9639_v49, %v1038_v23  ;;  %v7802_v33 = vpack.c.bf16 %v1114_v28, %v1114_v28  ;;  %v615_v24 = vpop.xlane.xlu1 %614 }
  0xc4   : > { %8818 = vrsqrt.f32 %v977_v2  ;;  %v1145_v0 = vpack.c.bf16 %v1114_v28, %v1113_v25  ;;  %v7801_v22 = vpack.c.bf16 %v1113_v25, %v1113_v25  ;;  %v1076_v37 = vmul.f32 %v9639_v49, %v1037_v29  ;;  %v612_v2 = vpop.xlane.xlu0 %611 }
  0xc5   : > { %v1116_v38 = vadd.f32 %v9646_v62, %v1077_v32  ;;  %1275 = vst.msk [vmem:[#allocation2 + $0x4] sm:$0xf] %vm1273_vm1, %v7802_v33  ;;  %v9686_v23 = vmul.f32 0.03125, %v615_v24  ;;  %v9688_v25 = vmul.f32 0.03125, %v612_v2 }
  0xc6   : > { %1274 = vst.msk [vmem:[#allocation2] sm:$0xf] %vm1273_vm1, %v7801_v22  ;;  %8393 = vmatprep.mubr.msk.bf16.mxu1 %vm585_vm0, %v1145_v0  ;;  %v1115_v40 = vadd.f32 %v9646_v62, %v1076_v37 }
  0xc7   : > { %v7804_v41 = vpack.c.bf16 %v1116_v38, %v1116_v38  ;;  %v621_v28 = vpop.xlane.xlu1 %620  ;;  %v884_v32 = vmul.f32 %v9686_v23, %v9686_v23  ;;  %v883_v0 = vmul.f32 %v9688_v25, %v9688_v25 }
  0xc8   : > { %v1146_v42 = vpack.c.bf16 %v1116_v38, %v1115_v40  ;;  %v7803_v43 = vpack.c.bf16 %v1115_v40, %v1115_v40  ;;  %v618_v29 = vpop.xlane.xlu0 %617  ;;  %v9694_v22 = vmul.f32 0.03125, %v621_v28 }
  0xc9   : > { %1277 = vst.msk [vmem:[#allocation2 + $0xc] sm:$0xf] %vm1273_vm1, %v7804_v41  ;;  %v9696_v33 = vmul.f32 0.03125, %v618_v29 }
  0xca   : > { %1276 = vst.msk [vmem:[#allocation2 + $0x8] sm:$0xf] %vm1273_vm1, %v7803_v43  ;;  %8394 = vmatmul.mubr.msk.bf16.vlgmr.msra.gmra.mxu1 %vm585_vm0, %v1146_v42  ;;  %v886_v42 = vmul.f32 %v9694_v22, %v9694_v22 }
  0xcb   : > { %v776_v37 = vpop.xlane.xlu1 %775  ;;  %v885_v43 = vmul.f32 %v9696_v33, %v9696_v33 }
  0xcc   : > { %v8813_v45 = vpop.eup %8812  ;;  %v773_v38 = vpop.xlane.xlu0 %772  ;;  %v852_v40 = vmul.f32 0.03125, %v776_v37 }
  0xcd   : > { %v8815_v56 = vpop.eup %8814  ;;  %v1040_v57 = vmul.f32 %v8813_v45, %v944_v44  ;;  %v851_v41 = vmul.f32 0.03125, %v773_v38 }
  0xce   : > { %v1039_v58 = vmul.f32 %v8815_v56, %v943_v48  ;;  %v916_v44 = vsub.f32 %v852_v40, %v884_v32 }
  0xcf   : > { %v1079_v16 = vmul.f32 %v9639_v49, %v1040_v57  ;;  %v915_v45 = vsub.f32 %v851_v41, %v883_v0  ;;  %v782_v48 = vpop.xlane.xlu1 %781 }
  0xd0   : > { %v8817_v59 = vpop.eup %8816  ;;  %v1078_v18 = vmul.f32 %v9639_v49, %v1039_v58  ;;  %v779_v56 = vpop.xlane.xlu0 %778  ;;  %v854_v57 = vmul.f32 0.03125, %v782_v48  ;;  %v948_v48 = vsub.f32 %v9435_v34, %v9686_v23 }
  0xd1   : > { %v8819_v6 = vpop.eup %8818  ;;  %v1118_v17 = vadd.f32 %v9646_v62, %v1079_v16  ;;  %v1042_v60 = vmul.f32 %v8817_v59, %v946_v1  ;;  %v853_v58 = vmul.f32 0.03125, %v779_v56  ;;  %v980_v1 = vadd.f32 1e-05, %v916_v44 }
  0xd2   : > { %v1117_v9 = vadd.f32 %v9646_v62, %v1078_v18  ;;  %v1041_v19 = vmul.f32 %v8819_v6, %v945_v8  ;;  %v979_v16 = vadd.f32 1e-05, %v915_v45  ;;  %v918_v59 = vsub.f32 %v854_v57, %v886_v42 }
  0xd3   : > { %v7806_v61 = vpack.c.bf16 %v1118_v17, %v1118_v17  ;;  %v1081_v63 = vmul.f32 %v9639_v49, %v1042_v60  ;;  %v917_v8 = vsub.f32 %v853_v58, %v885_v43  ;;  %v627_v18 = vpop.xlane.xlu1 %626  ;;  %8820 = vrsqrt.f32 %v980_v1 }
  0xd4   : > { %v1147_v3 = vpack.c.bf16 %v1118_v17, %v1117_v9  ;;  %v7805_v14 = vpack.c.bf16 %v1117_v9, %v1117_v9  ;;  %v1080_v20 = vmul.f32 %v9639_v49, %v1041_v19  ;;  %v624_v6 = vpop.xlane.xlu0 %623  ;;  %v982_v17 = vadd.f32 1e-05, %v918_v59 }
  0xd5   : > { %1279 = vst.msk [vmem:[#allocation2 + $0x14] sm:$0xf] %vm1273_vm1, %v7806_v61  ;;  %v1120_v15 = vadd.f32 %v9646_v62, %v1081_v63  ;;  %v981_v60 = vadd.f32 1e-05, %v917_v8  ;;  %8822 = vrsqrt.f32 %v979_v16  ;;  %v9702_v9 = vmul.f32 0.03125, %v627_v18 }
  0xd6   : > { %1278 = vst.msk [vmem:[#allocation2 + $0x10] sm:$0xf] %vm1273_vm1, %v7805_v14  ;;  %8397 = vmatprep.mubr.msk.bf16.mxu1 %vm585_vm0, %v1147_v3  ;;  %v1119_v21 = vadd.f32 %v9646_v62, %v1080_v20  ;;  %v9704_v19 = vmul.f32 0.03125, %v624_v6  ;;  %8824 = vrsqrt.f32 %v982_v17  ;;  %v947_v56 = vsub.f32 %v9438_v35, %v9688_v25 }
  0xd7   : > { %v7808_v4 = vpack.c.bf16 %v1120_v15, %v1120_v15  ;;  %v633_v61 = vpop.xlane.xlu1 %632  ;;  %8826 = vrsqrt.f32 %v981_v60  ;;  %v888_v3 = vmul.f32 %v9702_v9, %v9702_v9  ;;  %v950_v57 = vsub.f32 %v9441_v36, %v9694_v22 }
  0xd8   : > { %v1148_v10 = vpack.c.bf16 %v1120_v15, %v1119_v21  ;;  %v7807_v11 = vpack.c.bf16 %v1119_v21, %v1119_v21  ;;  %v630_v63 = vpop.xlane.xlu0 %629  ;;  %v887_v14 = vmul.f32 %v9704_v19, %v9704_v19  ;;  %v9710_v20 = vmul.f32 0.03125, %v633_v61 }
  0xd9   : > { %1281 = vst.msk [vmem:[#allocation2 + $0x1c] sm:$0xf] %vm1273_vm1, %v7808_v4  ;;  %v9712_v15 = vmul.f32 0.03125, %v630_v63  ;;  %v949_v59 = vsub.f32 %v9448_v39, %v9696_v33 }
  0xda   : > { %1280 = vst.msk [vmem:[#allocation2 + $0x18] sm:$0xf] %vm1273_vm1, %v7807_v11  ;;  %8398 = vmatmul.mubr.msk.bf16.gmra.mxu1 %vm585_vm0, %v1148_v10  ;;  %v890_v24 = vmul.f32 %v9710_v20, %v9710_v20 }
  0xdb   : > { %v788_v21 = vpop.xlane.xlu1 %787  ;;  %v889_v2 = vmul.f32 %v9712_v15, %v9712_v15 }
  0xdc   : > { %v785_v4 = vpop.xlane.xlu0 %784  ;;  %v856_v10 = vmul.f32 0.03125, %v788_v21  ;;  %v951_v21 = vsub.f32 %v9470_v51, %v9704_v19 }
  0xdd   : > { %v855_v11 = vmul.f32 0.03125, %v785_v4 }
  0xde   : > { %v920_v28 = vsub.f32 %v856_v10, %v888_v3 }
  0xdf   : > { %v919_v29 = vsub.f32 %v855_v11, %v887_v14  ;;  %v794_v32 = vpop.xlane.xlu1 %793 }
  0xe0   : > { %v791_v0 = vpop.xlane.xlu0 %790  ;;  %v984_v37 = vadd.f32 1e-05, %v920_v28  ;;  %v858_v40 = vmul.f32 0.03125, %v794_v32  ;;  %v8821_v42 = vpop.eup %8820 }
  0xe1   : > { %v983_v38 = vadd.f32 1e-05, %v919_v29  ;;  %v857_v41 = vmul.f32 0.03125, %v791_v0  ;;  %v1044_v23 = vmul.f32 %v8821_v42, %v948_v48 }
  0xe2   : > { %v922_v43 = vsub.f32 %v858_v40, %v890_v24  ;;  %v8823_v45 = vpop.eup %8822 }
  0xe3   : > { %v921_v44 = vsub.f32 %v857_v41, %v889_v2  ;;  %8828 = vrsqrt.f32 %v983_v38  ;;  %v636_v58 = vpop.xlane.xlu1 %635  ;;  %v8825_v16 = vpop.eup %8824  ;;  %v1043_v35 = vmul.f32 %v8823_v45, %v947_v56  ;;  %v1083_v33 = vmul.f32 %v9639_v49, %v1044_v23 }
  0xe4   : > { %v639_v1 = vpop.xlane.xlu0 %638  ;;  %8830 = vrsqrt.f32 %v984_v37  ;;  %v986_v8 = vadd.f32 1e-05, %v922_v43  ;;  %v8827_v6 = vpop.eup %8826  ;;  %v9726_v17 = vmul.f32 0.03125, %v636_v58  ;;  %v1046_v60 = vmul.f32 %v8825_v16, %v950_v57 }
  0xe5   : > { %v985_v18 = vadd.f32 1e-05, %v921_v44  ;;  %v9728_v34 = vmul.f32 0.03125, %v639_v1  ;;  %v1045_v22 = vmul.f32 %v8827_v6, %v949_v59  ;;  %v1082_v39 = vmul.f32 %v9639_v49, %v1043_v35 }
  0xe6   : > { %8832 = vrsqrt.f32 %v986_v8  ;;  %v1085_v14 = vmul.f32 %v9639_v49, %v1046_v60  ;;  %v891_v4 = vmul.f32 %v9726_v17, %v9726_v17  ;;  %v1122_v2 = vadd.f32 %v9646_v62, %v1083_v33 }
  0xe7   : > { %8834 = vrsqrt.f32 %v985_v18  ;;  %v645_v36 = vpop.xlane.xlu1 %644  ;;  %v1084_v3 = vmul.f32 %v9639_v49, %v1045_v22  ;;  %v892_v10 = vmul.f32 %v9728_v34, %v9728_v34  ;;  %v1121_v24 = vadd.f32 %v9646_v62, %v1082_v39 }
  0xe8   : > { %v642_v25 = vpop.xlane.xlu0 %641  ;;  %v9730_v61 = vmul.f32 0.03125, %v645_v36  ;;  %v1124_v32 = vadd.f32 %v9646_v62, %v1085_v14  ;;  %v7810_v41 = vpack.c.bf16 %v1122_v2, %v1122_v2  ;;  %v952_v57 = vsub.f32 %v9467_v50, %v9702_v9 }
  0xe9   : > { %v9732_v63 = vmul.f32 0.03125, %v642_v25  ;;  %v1123_v29 = vadd.f32 %v9646_v62, %v1084_v3  ;;  %v1149_v38 = vpack.c.bf16 %v1122_v2, %v1121_v24  ;;  %v7809_v40 = vpack.c.bf16 %v1121_v24, %v1121_v24 }
  0xea   : > { %v894_v0 = vmul.f32 %v9730_v61, %v9730_v61  ;;  %v7812_v48 = vpack.c.bf16 %v1124_v32, %v1124_v32  ;;  %v954_v58 = vsub.f32 %v9477_v54, %v9710_v20  ;;  %1283 = vst.msk [vmem:[#allocation2 + $0x24] sm:$0xf] %vm1273_vm1, %v7810_v41  ;;  %v953_v54 = vsub.f32 %v9480_v55, %v9712_v15 }
  0xeb   : > { %v800_v11 = vpop.xlane.xlu1 %799  ;;  %v893_v51 = vmul.f32 %v9732_v63, %v9732_v63  ;;  %v1150_v42 = vpack.c.bf16 %v1124_v32, %v1123_v29  ;;  %v7811_v45 = vpack.c.bf16 %v1123_v29, %v1123_v29  ;;  %1282 = vst.msk [vmem:[#allocation2 + $0x20] sm:$0xf] %vm1273_vm1, %v7809_v40  ;;  %8401 = vmatprep.mubr.msk.bf16.mxu1 %vm585_vm0, %v1149_v38 }
  0xec   : > { %v797_v28 = vpop.xlane.xlu0 %796  ;;  %v860_v19 = vmul.f32 0.03125, %v800_v11  ;;  %1285 = vst.msk [vmem:[#allocation2 + $0x2c] sm:$0xf] %vm1273_vm1, %v7812_v48 }
  0xed   : > { %v859_v37 = vmul.f32 0.03125, %v797_v28  ;;  %1284 = vst.msk [vmem:[#allocation2 + $0x28] sm:$0xf] %vm1273_vm1, %v7811_v45  ;;  %8402 = vmatmul.mubr.msk.bf16.gmra.mxu1 %vm585_vm0, %v1150_v42 }
  0xee   : > { %v924_v43 = vsub.f32 %v860_v19, %v892_v10 }
  0xef   : > { %v923_v44 = vsub.f32 %v859_v37, %v891_v4  ;;  %v806_v1 = vpop.xlane.xlu1 %805 }
  0xf0   : > { %v8829_v56 = vpop.eup %8828  ;;  %v803_v16 = vpop.xlane.xlu0 %802  ;;  %v988_v8 = vadd.f32 1e-05, %v924_v43  ;;  %v862_v50 = vmul.f32 0.03125, %v806_v1 }
  0xf1   : > { %v8831_v59 = vpop.eup %8830  ;;  %v987_v18 = vadd.f32 1e-05, %v923_v44  ;;  %v861_v9 = vmul.f32 0.03125, %v803_v16  ;;  %v1047_v23 = vmul.f32 %v8829_v56, %v951_v21  ;;  %v956_v44 = vsub.f32 %v9502_v7, %v9728_v34 }
  0xf2   : > { %8836 = vrsqrt.f32 %v988_v8  ;;  %v926_v6 = vsub.f32 %v862_v50, %v894_v0  ;;  %v1048_v60 = vmul.f32 %v8831_v59, %v952_v57  ;;  %v955_v16 = vsub.f32 %v9499_v5, %v9726_v17 }
  0xf3   : > { %v8833_v20 = vpop.eup %8832  ;;  %v925_v35 = vsub.f32 %v861_v9, %v893_v51  ;;  %8838 = vrsqrt.f32 %v987_v18  ;;  %v648_v25 = vpop.xlane.xlu1 %647  ;;  %v1086_v14 = vmul.f32 %v9639_v49, %v1047_v23  ;;  %v958_v9 = vsub.f32 %v9509_v12, %v9730_v61 }
  0xf4   : > { %v8835_v36 = vpop.eup %8834  ;;  %v651_v22 = vpop.xlane.xlu0 %650  ;;  %v1050_v39 = vmul.f32 %v8833_v20, %v954_v58  ;;  %v990_v33 = vadd.f32 1e-05, %v926_v6  ;;  %v1087_v4 = vmul.f32 %v9639_v49, %v1048_v60  ;;  %v9767_v15 = vmul.f32 0.03125, %v648_v25 }
  0xf5   : > { %v989_v3 = vadd.f32 1e-05, %v925_v35  ;;  %v1049_v10 = vmul.f32 %v8835_v36, %v953_v54  ;;  %v9769_v21 = vmul.f32 0.03125, %v651_v22  ;;  %v1125_v11 = vadd.f32 %v9646_v62, %v1086_v14 }
  0xf6   : > { %v1089_v55 = vmul.f32 %v9639_v49, %v1050_v39  ;;  %8840 = vrsqrt.f32 %v990_v33  ;;  %v1126_v24 = vadd.f32 %v9646_v62, %v1087_v4  ;;  %v895_v40 = vmul.f32 %v9767_v15, %v9767_v15 }
  0xf7   : > { %8842 = vrsqrt.f32 %v989_v3  ;;  %v657_v2 = vpop.xlane.xlu1 %656  ;;  %v1088_v29 = vmul.f32 %v9639_v49, %v1049_v10  ;;  %v7813_v51 = vpack.c.bf16 %v1125_v11, %v1125_v11  ;;  %v896_v41 = vmul.f32 %v9769_v21, %v9769_v21 }
  0xf8   : > { %v654_v28 = vpop.xlane.xlu0 %653  ;;  %v1128_v32 = vadd.f32 %v9646_v62, %v1089_v55  ;;  %v1151_v0 = vpack.c.bf16 %v1126_v24, %v1125_v11  ;;  %v7814_v19 = vpack.c.bf16 %v1126_v24, %v1126_v24  ;;  %v9780_v42 = vmul.f32 0.03125, %v657_v2 }
  0xf9   : > { %v1127_v37 = vadd.f32 %v9646_v62, %v1088_v29  ;;  %1286 = vst.msk [vmem:[#allocation2 + $0x30] sm:$0xf] %vm1273_vm1, %v7813_v51  ;;  %v9785_v43 = vmul.f32 0.03125, %v654_v28  ;;  %v957_v36 = vsub.f32 %v9512_v13, %v9732_v63 }
  0xfa   : > { %v7816_v38 = vpack.c.bf16 %v1128_v32, %v1128_v32  ;;  %1287 = vst.msk [vmem:[#allocation2 + $0x34] sm:$0xf] %vm1273_vm1, %v7814_v19  ;;  %8405 = vmatprep.mubr.msk.bf16.mxu1 %vm585_vm0, %v1151_v0  ;;  %v898_v8 = vmul.f32 %v9780_v42, %v9780_v42 }
  0xfb   : > { %v1152_v45 = vpack.c.bf16 %v1128_v32, %v1127_v37  ;;  %v7815_v48 = vpack.c.bf16 %v1127_v37, %v1127_v37  ;;  %v812_v56 = vpop.xlane.xlu1 %811  ;;  %v897_v7 = vmul.f32 %v9785_v43, %v9785_v43 }
  0xfc   : > { %1289 = vst.msk [vmem:[#allocation2 + $0x3c] sm:$0xf] %vm1273_vm1, %v7816_v38  ;;  %v809_v57 = vpop.xlane.xlu0 %808  ;;  %v864_v58 = vmul.f32 0.03125, %v812_v56 }
  0xfd   : > { %v863_v1 = vmul.f32 0.03125, %v809_v57  ;;  %1288 = vst.msk [vmem:[#allocation2 + $0x38] sm:$0xf] %vm1273_vm1, %v7815_v48  ;;  %8406 = vmatmul.mubr.msk.bf16.gmra.mxu1 %vm585_vm0, %v1152_v45 }
  0xfe   : > { %v928_v34 = vsub.f32 %v864_v58, %v896_v41 }
  0xff   : > { %v8837_v59 = vpop.eup %8836  ;;  %v927_v18 = vsub.f32 %v863_v1, %v895_v40  ;;  %v818_v54 = vpop.xlane.xlu1 %817 }
 0x100   : > { %v8839_v50 = vpop.eup %8838  ;;  %v815_v20 = vpop.xlane.xlu0 %814  ;;  %v1052_v5 = vmul.f32 %v8837_v59, %v956_v44  ;;  %v992_v17 = vadd.f32 1e-05, %v928_v34  ;;  %v866_v35 = vmul.f32 0.03125, %v818_v54 }
 0x101   : > { %v991_v6 = vadd.f32 1e-05, %v927_v18  ;;  %v865_v23 = vmul.f32 0.03125, %v815_v20  ;;  %v1051_v25 = vmul.f32 %v8839_v50, %v955_v16 }
 0x102   : > { %v1091_v22 = vmul.f32 %v9639_v49, %v1052_v5  ;;  %v930_v39 = vsub.f32 %v866_v35, %v898_v8  ;;  %8844 = vrsqrt.f32 %v992_v17 }
 0x103   : > { %v8841_v60 = vpop.eup %8840  ;;  %v929_v33 = vsub.f32 %v865_v23, %v897_v7  ;;  %v660_v14 = vpop.xlane.xlu1 %659  ;;  %v1090_v61 = vmul.f32 %v9639_v49, %v1051_v25  ;;  %8846 = vrsqrt.f32 %v991_v6  ;;  %v959_v23 = vsub.f32 %v9531_v26, %v9767_v15 }
 0x104   : > { %v8843_v3 = vpop.eup %8842  ;;  %v663_v12 = vpop.xlane.xlu0 %662  ;;  %v1130_v4 = vadd.f32 %v9646_v62, %v1091_v22  ;;  %v1054_v10 = vmul.f32 %v8841_v60, %v958_v9  ;;  %v994_v55 = vadd.f32 1e-05, %v930_v39  ;;  %v9807_v28 = vmul.f32 0.03125, %v660_v14 }
 0x105   : > { %v993_v11 = vadd.f32 1e-05, %v929_v33  ;;  %v1129_v13 = vadd.f32 %v9646_v62, %v1090_v61  ;;  %v1053_v24 = vmul.f32 %v8843_v3, %v957_v36  ;;  %v9809_v29 = vmul.f32 0.03125, %v663_v12 }
 0x106   : > { %v7818_v63 = vpack.c.bf16 %v1130_v4, %v1130_v4  ;;  %v1093_v2 = vmul.f32 %v9639_v49, %v1054_v10  ;;  %8848 = vrsqrt.f32 %v994_v55  ;;  %v899_v40 = vmul.f32 %v9807_v28, %v9807_v28 }
 0x107   : > { %8850 = vrsqrt.f32 %v993_v11  ;;  %v669_v32 = vpop.xlane.xlu1 %668  ;;  %v1153_v51 = vpack.c.bf16 %v1130_v4, %v1129_v13  ;;  %v7817_v19 = vpack.c.bf16 %v1129_v13, %v1129_v13  ;;  %v1092_v37 = vmul.f32 %v9639_v49, %v1053_v24 }
 0x108   : > { %v666_v0 = vpop.xlane.xlu0 %665  ;;  %1291 = vst.msk [vmem:[#allocation2 + $0x44] sm:$0xf] %vm1273_vm1, %v7818_v63  ;;  %v1132_v38 = vadd.f32 %v9646_v62, %v1093_v2  ;;  %v900_v41 = vmul.f32 %v9809_v29, %v9809_v29  ;;  %v9820_v44 = vmul.f32 0.03125, %v669_v32  ;;  %v960_v36 = vsub.f32 %v9534_v27, %v9769_v21 }
 0x109   : > { %1290 = vst.msk [vmem:[#allocation2 + $0x40] sm:$0xf] %vm1273_vm1, %v7817_v19  ;;  %8409 = vmatprep.mubr.msk.bf16.mxu1 %vm585_vm0, %v1153_v51  ;;  %v9822_v45 = vmul.f32 0.03125, %v666_v0  ;;  %v1131_v57 = vadd.f32 %v9646_v62, %v1092_v37  ;;  %v961_v22 = vsub.f32 %v9544_v31, %v9785_v43  ;;  %v962_v3 = vsub.f32 %v9541_v30, %v9780_v42 }
 0x10a   : > { %v7820_v58 = vpack.c.bf16 %v1132_v38, %v1132_v38  ;;  %v902_v7 = vmul.f32 %v9820_v44, %v9820_v44  ;;  %v963_v19 = vsub.f32 %v9563_v46, %v9807_v28  ;;  %v964_v37 = vsub.f32 %v9566_v47, %v9809_v29  ;;  %v9867_v47 = vld [vmem:[%s13030_s2] ss:$0 sm:$0xff] }
 0x10b   : > { %v824_v48 = vpop.xlane.xlu1 %823  ;;  %v1154_v59 = vpack.c.bf16 %v1132_v38, %v1131_v57  ;;  %v7819_v8 = vpack.c.bf16 %v1131_v57, %v1131_v57  ;;  %v901_v34 = vmul.f32 %v9822_v45, %v9822_v45 }
 0x10c   : > { %v821_v56 = vpop.xlane.xlu0 %820  ;;  %v868_v1 = vmul.f32 0.03125, %v824_v48  ;;  %1293 = vst.msk [vmem:[#allocation2 + $0x4c] sm:$0xf] %vm1273_vm1, %v7820_v58 }
 0x10d   : > { %v867_v16 = vmul.f32 0.03125, %v821_v56  ;;  %1292 = vst.msk [vmem:[#allocation2 + $0x48] sm:$0xf] %vm1273_vm1, %v7819_v8  ;;  %8410 = vmatmul.mubr.msk.bf16.gmra.mxu1 %vm585_vm0, %v1154_v59 }
 0x10e   : > { %v932_v18 = vsub.f32 %v868_v1, %v900_v41  ;;  %v965_v41 = vsub.f32 %v9576_v53, %v9822_v45 }
 0x10f   : > { %v931_v50 = vsub.f32 %v867_v16, %v899_v40  ;;  %v830_v9 = vpop.xlane.xlu1 %829  ;;  %v8845_v20 = vpop.eup %8844  ;;  %v966_v40 = vsub.f32 %v9573_v52, %v9820_v44 }
 0x110   : > { %v827_v54 = vpop.xlane.xlu0 %826  ;;  %v996_v5 = vadd.f32 1e-05, %v932_v18  ;;  %v870_v17 = vmul.f32 0.03125, %v830_v9  ;;  %v8847_v35 = vpop.eup %8846  ;;  %v1056_v26 = vmul.f32 %v8845_v20, %v960_v36 }
 0x111   : > { %v869_v6 = vmul.f32 0.03125, %v827_v54  ;;  %v995_v25 = vadd.f32 1e-05, %v931_v50  ;;  %v1055_v4 = vmul.f32 %v8847_v35, %v959_v23 }
 0x112   : > { %v934_v60 = vsub.f32 %v870_v17, %v902_v7  ;;  %8852 = vrsqrt.f32 %v996_v5  ;;  %v1095_v31 = vmul.f32 %v9639_v49, %v1056_v26 }
 0x113   : > { %v933_v39 = vsub.f32 %v869_v6, %v901_v34  ;;  %v8849_v33 = vpop.eup %8848  ;;  %8854 = vrsqrt.f32 %v995_v25  ;;  %v1094_v27 = vmul.f32 %v9639_v49, %v1055_v4 }
 0x114   : > { %v8851_v14 = vpop.eup %8850  ;;  %v998_v12 = vadd.f32 1e-05, %v934_v60  ;;  %v1058_v21 = vmul.f32 %v8849_v33, %v962_v3  ;;  %v1134_v30 = vadd.f32 %v9646_v62, %v1095_v31 }
 0x115   : > { %v997_v61 = vadd.f32 1e-05, %v933_v39  ;;  %v1057_v15 = vmul.f32 %v8851_v14, %v961_v22  ;;  %v1133_v10 = vadd.f32 %v9646_v62, %v1094_v27 }
 0x116   : > { %8856 = vrsqrt.f32 %v998_v12  ;;  %v1097_v42 = vmul.f32 %v9639_v49, %v1058_v21  ;;  %v7822_v63 = vpack.c.bf16 %v1134_v30, %v1134_v30  ;;  %v9905_v21 = vld [vmem:[%s9362_s30 + $0xe0] sm:$0xff] }
 0x117   : > { %8858 = vrsqrt.f32 %v997_v61  ;;  %v1096_v43 = vmul.f32 %v9639_v49, %v1057_v15  ;;  %v1155_v11 = vpack.c.bf16 %v1134_v30, %v1133_v10  ;;  %v7821_v13 = vpack.c.bf16 %v1133_v10, %v1133_v10  ;;  %v9911_v30 = vld [vmem:[%s9362_s30 + $0xf0] sm:$0xff] }
 0x118   : > { %v1136_v24 = vadd.f32 %v9646_v62, %v1097_v42  ;;  %1295 = vst.msk [vmem:[#allocation2 + $0x54] sm:$0xf] %vm1273_vm1, %v7822_v63  ;;  %v745_v42 = vmul.f32 %v9911_v30, %v9911_v30  ;;  %v9923_v63 = vld [vmem:[%s9362_s30 + $0xe8] sm:$0xff] }
 0x119   : > { %v1135_v55 = vadd.f32 %v9646_v62, %v1096_v43  ;;  %1294 = vst.msk [vmem:[#allocation2 + $0x50] sm:$0xf] %vm1273_vm1, %v7821_v13  ;;  %8413 = vmatprep.mubr.msk.bf16.mxu1 %vm585_vm0, %v1155_v11  ;;  %v743_v43 = vmul.f32 %v9905_v21, %v9905_v21 }
 0x11a   : > { %v7824_v0 = vpack.c.bf16 %v1136_v24, %v1136_v24  ;;  %v837_v11 = vsel %vm585_vm0, %v745_v42, 0.0 }
 0x11b   : > { %v7823_v2 = vpack.c.bf16 %v1135_v55, %v1135_v55  ;;  %v1156_v32 = vpack.c.bf16 %v1136_v24, %v1135_v55  ;;  %v831_v10 = vsel %vm585_vm0, %v743_v43, 0.0  ;;  %v9916_v55 = vld [vmem:[%s9362_s30 + $0xf8] sm:$0xff]  ;;  %v744_v24 = vmul.f32 %v9923_v63, %v9923_v63 }
 0x11c   : > { %1297 = vst.msk [vmem:[#allocation2 + $0x5c] sm:$0xf] %vm1273_vm1, %v7824_v0  ;;  %v679_v13 = vsel %vm585_vm0, %v9916_v55, 0.0  ;;  %v746_v0 = vmul.f32 %v9916_v55, %v9916_v55 }
 0x11d   : > { %1296 = vst.msk [vmem:[#allocation2 + $0x58] sm:$0xf] %vm1273_vm1, %v7823_v2  ;;  %8414 = vmatmul.mubr.msk.bf16.gmra.mxu1 %vm585_vm0, %v1156_v32  ;;  %v9927_v2 = vpop.xlane.xlu0 %674  ;;  %v834_v32 = vsel %vm585_vm0, %v744_v24, 0.0 }
 0x11f   : > { %v8853_v51 = vpop.eup %8852 }
 0x120   : > { %v8855_v38 = vpop.eup %8854  ;;  %v1060_v58 = vmul.f32 %v8853_v51, %v964_v37  ;;  %v9935_v37 = vpop.xlane.xlu1 %671 }
 0x121   : > { %v1059_v57 = vmul.f32 %v8855_v38, %v963_v19  ;;  %v9932_v51 = vpop.xlane.xlu0 %677  ;;  %v840_v19 = vsel %vm585_vm0, %v746_v0, 0.0 }
 0x122   : > { %v1099_v46 = vmul.f32 %v9639_v49, %v1060_v58 }
 0x123   : > { %v8857_v48 = vpop.eup %8856  ;;  %v1098_v59 = vmul.f32 %v9639_v49, %v1059_v57 }
 0x124   : > { %v8859_v56 = vpop.eup %8858  ;;  %v1062_v16 = vmul.f32 %v8857_v48, %v966_v40  ;;  %v1138_v29 = vadd.f32 %v9646_v62, %v1099_v46 }
 0x125   : > { %v1061_v1 = vmul.f32 %v8859_v56, %v965_v41  ;;  %v1137_v53 = vadd.f32 %v9646_v62, %v1098_v59  ;;  %v1862_v56 = vlaneseq  ;;  %v7470_v59 = vld [vmem:[%s13000_s3 + $0x1] sm:$0x1] }
 0x126   : > { %v1101_v28 = vmul.f32 %v9639_v49, %v1062_v16  ;;  %v7826_v50 = vpack.c.bf16 %v1138_v29, %v1138_v29  ;;  %v7474_v16 = vld [vmem:[%s13000_s3 + $0x3] sm:$0x1] }
 0x127   : > { %v1100_v52 = vmul.f32 %v9639_v49, %v1061_v1  ;;  %v1157_v34 = vpack.c.bf16 %v1138_v29, %v1137_v53  ;;  %v7825_v18 = vpack.c.bf16 %v1137_v53, %v1137_v53  ;;  %v1863_v57 = vshrl.u32 %v1862_v56, 7 }
 0x128   : > { %v1140_v8 = vadd.f32 %v9646_v62, %v1101_v28  ;;  %1299 = vst.msk [vmem:[#allocation2 + $0x64] sm:$0xf] %vm1273_vm1, %v7826_v50  ;;  %v1858_v28 = vld [vmem:[%s13000_s3] sm:$0x1] }
 0x129   : > { %v1139_v45 = vadd.f32 %v9646_v62, %v1100_v52  ;;  %1298 = vst.msk [vmem:[#allocation2 + $0x60] sm:$0xf] %vm1273_vm1, %v7825_v18  ;;  %8417 = vmatprep.mubr.msk.bf16.mxu1 %vm585_vm0, %v1157_v34  ;;  %v7472_v52 = vld [vmem:[%s13000_s3 + $0x2] sm:$0x1]  ;;  %v9955_v29 = vsub.s32 0, %v1863_v57 }
 0x12a   : > { %v7828_v5 = vpack.c.bf16 %v1140_v8, %v1140_v8 }
 0x12b   : > { %v1158_v54 = vpack.c.bf16 %v1140_v8, %v1139_v45  ;;  %v7827_v20 = vpack.c.bf16 %v1139_v45, %v1139_v45  ;;  %v1881_v45 = vpack.i.b16 %v7470_v59, %v7470_v59 }
 0x12c   : > { %1301 = vst.msk [vmem:[#allocation2 + $0x6c] sm:$0xf] %vm1273_vm1, %v7828_v5 }
 0x12d   : > { %1300 = vst.msk [vmem:[#allocation2 + $0x68] sm:$0xf] %vm1273_vm1, %v7827_v20  ;;  %8418 = vmatmul.mubr.msk.bf16.gmra.mxu1 %vm585_vm0, %v1158_v54  ;;  %v1860_v54 = vpack.i.b16 %v1858_v28, %v1858_v28 }
 0x18a   : > { %v8395_v44 = vpop.f32.mrf.mxu1 }
 0x18b   : > { %v1420_v7 = vadd.f32 %v8395_v44, %v9867_v47  ;;  %v1923_v44 = vpack.i.b16 %v7474_v16, %v7474_v16 }
 0x18c   : > { %v1411_v9 = vpop.f32.mrf.mxu1 }
 0x18d   : > { %v7835_v17 = vpack.c.bf16 %v1420_v7, %v1420_v7  ;;  %v1412_v49 = vadd.f32 %v9867_v47, %v1411_v9  ;;  %v1902_v9 = vpack.i.b16 %v7472_v52, %v7472_v52 }
 0x18e   : > { %v8396_v6 = vpop.f32.mrf.mxu1 }
 0x18f   : > { %1668 = vst.msk [vmem:[#allocation3 + $0x8] sm:$0xf] %vm1273_vm1, %v7835_v17  ;;  %v7833_v62 = vpack.c.bf16 %v1412_v49, %v1412_v49  ;;  %v1423_v35 = vadd.f32 %v8396_v6, %v9867_v47  ;;  %1702 = vrot.lane.b32.xlu0 %v7835_v17, %s13021_s18 }
 0x190   : > { %v1414_v23 = vpop.f32.mrf.mxu1 }
 0x191   : > { %1666 = vst.msk [vmem:[#allocation3] sm:$0xf] %vm1273_vm1, %v7833_v62  ;;  %v7836_v36 = vpack.c.bf16 %v1423_v35, %v1423_v35  ;;  %v1415_v25 = vadd.f32 %v9867_v47, %v1414_v23  ;;  %v1886_v35 = vrot.slane %v1881_v45, %v9955_v29  ;;  %v1907_v23 = vrot.slane %v1902_v9, %v9955_v29 }
 0x193   : > { %1669 = vst.msk [vmem:[#allocation3 + $0xc] sm:$0xf] %vm1273_vm1, %v7836_v36  ;;  %v7834_v22 = vpack.c.bf16 %v1415_v25, %v1415_v25  ;;  %1704 = vrot.lane.b32.xlu1 %v7836_v36, %s13021_s18  ;;  %1698 = vrot.lane.b32.xlu0 %v7833_v62, %s13021_s18  ;;  %v1928_v62 = vrot.slane %v1923_v44, %v9955_v29 }
 0x194   : > { %v1865_v36 = vrot.slane %v1860_v54, %v9955_v29 }
 0x195   : > { %1667 = vst.msk [vmem:[#allocation3 + $0x4] sm:$0xf] %vm1273_vm1, %v7834_v22 }
 0x197   : > { %1700 = vrot.lane.b32.xlu1 %v7834_v22, %s13021_s18 }
 0x19a   : > { %v8399_v60 = vpop.f32.mrf.mxu1 }
 0x19b   : > { %v1436_v39 = vadd.f32 %v8399_v60, %v9867_v47  ;;  %v9978_v60 = vcombine.low %v1928_v62, %v1928_v62 }
 0x19c   : > { %v1427_v33 = vpop.f32.mrf.mxu1 }
 0x19d   : > { %v7839_v3 = vpack.c.bf16 %v1436_v39, %v1436_v39  ;;  %v1428_v14 = vadd.f32 %v9867_v47, %v1427_v33  ;;  %v9980_v39 = vcombine.low %v1886_v35, %v1886_v35 }
 0x19e   : > { %v8400_v12 = vpop.f32.mrf.mxu1 }
 0x19f   : > { %1672 = vst.msk [vmem:[#allocation3 + $0x18] sm:$0xf] %vm1273_vm1, %v7839_v3  ;;  %v7837_v61 = vpack.c.bf16 %v1428_v14, %v1428_v14  ;;  %v1439_v4 = vadd.f32 %v8400_v12, %v9867_v47  ;;  %1710 = vrot.lane.b32.xlu0 %v7839_v3, %s13021_s18  ;;  %v9982_v3 = vcombine.low %v1907_v23, %v1907_v23 }
 0x1a0   : > { %v1430_v26 = vpop.f32.mrf.mxu1  ;;  %v9984_v14 = vcombine.low %v1865_v36, %v1865_v36 }
 0x1a1   : > { %1670 = vst.msk [vmem:[#allocation3 + $0x10] sm:$0xf] %vm1273_vm1, %v7837_v61  ;;  %v7840_v15 = vpack.c.bf16 %v1439_v4, %v1439_v4  ;;  %v1431_v27 = vadd.f32 %v9867_v47, %v1430_v26 }
 0x1a3   : > { %1673 = vst.msk [vmem:[#allocation3 + $0x1c] sm:$0xf] %vm1273_vm1, %v7840_v15  ;;  %v7838_v31 = vpack.c.bf16 %v1431_v27, %v1431_v27  ;;  %1712 = vrot.lane.b32.xlu1 %v7840_v15, %s13021_s18  ;;  %1706 = vrot.lane.b32.xlu0 %v7837_v61, %s13021_s18 }
 0x1a5   : > { %1671 = vst.msk [vmem:[#allocation3 + $0x14] sm:$0xf] %vm1273_vm1, %v7838_v31 }
 0x1ad   : > { %v8403_v58 = vpop.f32.mrf.mxu1 }
 0x1ae   : > { %v1452_v46 = vadd.f32 %v8403_v58, %v9867_v47 }
 0x1af   : > { %v1443_v53 = vpop.f32.mrf.mxu1 }
 0x1b0   : > { %v7843_v8 = vpack.c.bf16 %v1452_v46, %v1452_v46  ;;  %v1444_v7 = vadd.f32 %v9867_v47, %v1443_v53 }
 0x1b1   : > { %v8404_v34 = vpop.f32.mrf.mxu1 }
 0x1b2   : > { %v1455_v20 = vadd.f32 %v8404_v34, %v9867_v47  ;;  %1676 = vst.msk [vmem:[#allocation3 + $0x28] sm:$0xf] %vm1273_vm1, %v7843_v8  ;;  %v9962_v5 = vpack.c.bf16 %v1444_v7, %v1444_v7 }
 0x1b3   : > { %v1446_v17 = vpop.f32.mrf.mxu1 }
 0x1b4   : > { %v7844_v49 = vpack.c.bf16 %v1455_v20, %v1455_v20  ;;  %v1447_v6 = vadd.f32 %v9867_v47, %v1446_v17  ;;  %1674 = vst.msk [vmem:[#allocation3 + $0x20] sm:$0xf] %vm1273_vm1, %v9962_v5 }
 0x1b6   : > { %1677 = vst.msk [vmem:[#allocation3 + $0x2c] sm:$0xf] %vm1273_vm1, %v7844_v49  ;;  %v9973_v25 = vpack.c.bf16 %v1447_v6, %v1447_v6 }
 0x1b8   : > { %1675 = vst.msk [vmem:[#allocation3 + $0x24] sm:$0xf] %vm1273_vm1, %v9973_v25 }
 0x1bd   : > { %v8407_v15 = vpop.f32.mrf.mxu1 }
 0x1bf   : > { %v1459_v24 = vpop.f32.mrf.mxu1 }
 0x1c2   : > { %832 = vadd.xlane.f32.xlu0 %v831_v10 }
 0x1c6   : > { %838 = vadd.xlane.f32.xlu0 %v837_v11 }
 0x1c7   : > { %680 = vadd.xlane.f32.xlu1 %v679_v13  ;;  %v1468_v13 = vadd.f32 %v8407_v15, %v9867_v47 }
 0x1d8   : > { %1708 = vrot.lane.b32.xlu1 %v7838_v31, %s13021_s18 }
 0x1dc   : > { %1718 = vrot.lane.b32.xlu0 %v7843_v8, %s13021_s18 }
 0x1fc   : > { %835 = vadd.xlane.f32.xlu1 %v834_v32 }
 0x200   : > { %841 = vadd.xlane.f32.xlu1 %v840_v19  ;;  %v1460_v19 = vadd.f32 %v9867_v47, %v1459_v24 }
 0x201   : > { %v1703_v38 = vpop.permute.xlu0 %1702 }
 0x202   : > { %1796 = vst.msk [vmem:[#allocation4 + $0x8] sm:$0xf] %vm1273_vm1, %v1703_v38 }
 0x205   : > { %v1705_v40 = vpop.permute.xlu1 %1704  ;;  %v1699_v41 = vpop.permute.xlu0 %1698 }
 0x206   : > { %1797 = vst.msk [vmem:[#allocation4 + $0xc] sm:$0xf] %vm1273_vm1, %v1705_v40  ;;  %1794 = vst.msk [vmem:[#allocation4] sm:$0xf] %vm1273_vm1, %v1699_v41  ;;  %v7847_v40 = vpack.c.bf16 %v1468_v13, %v1468_v13  ;;  %v8408_v41 = vpop.f32.mrf.mxu1 }
 0x207   : > { %v1471_v56 = vadd.f32 %v8408_v41, %v9867_v47 }
 0x208   : > { %1680 = vst.msk [vmem:[#allocation3 + $0x38] sm:$0xf] %vm1273_vm1, %v7847_v40  ;;  %v1462_v57 = vpop.f32.mrf.mxu1  ;;  %1726 = vrot.lane.b32.xlu0 %v7847_v40, %s13021_s18 }
 0x209   : > { %v1701_v48 = vpop.permute.xlu1 %1700  ;;  %v7848_v58 = vpack.c.bf16 %v1471_v56, %v1471_v56 }
 0x20a   : > { %1795 = vst.msk [vmem:[#allocation4 + $0x4] sm:$0xf] %vm1273_vm1, %v1701_v48  ;;  %v7845_v48 = vpack.c.bf16 %v1460_v19, %v1460_v19  ;;  %v8411_v59 = vpop.f32.mrf.mxu1 }
 0x20b   : > { %1681 = vst.msk [vmem:[#allocation3 + $0x3c] sm:$0xf] %vm1273_vm1, %v7848_v58  ;;  %v1484_v46 = vadd.f32 %v8411_v59, %v9867_v47 }
 0x20c   : > { %1678 = vst.msk [vmem:[#allocation3 + $0x30] sm:$0xf] %vm1273_vm1, %v7845_v48  ;;  %v1475_v52 = vpop.f32.mrf.mxu1 }
 0x20d   : > { %v10013_v28 = vpack.c.bf16 %v1484_v46, %v1484_v46  ;;  %v1476_v53 = vadd.f32 %v9867_v47, %v1475_v52  ;;  %v10075_v46 = vld [vmem:[#allocation4 + $0xc] sm:$0xf] }
 0x20e   : > { %v8412_v44 = vpop.f32.mrf.mxu1 }
 0x20f   : > { %1684 = vst.msk [vmem:[#allocation3 + $0x48] sm:$0xf] %vm1273_vm1, %v10013_v28  ;;  %v10018_v45 = vpack.c.bf16 %v1476_v53, %v1476_v53  ;;  %v1487_v8 = vadd.f32 %v8412_v44, %v9867_v47  ;;  %v10079_v44 = vld [vmem:[#allocation4 + $0x8] sm:$0xf] }
 0x210   : > { %v1478_v7 = vpop.f32.mrf.mxu1 }
 0x211   : > { %v1711_v1 = vpop.permute.xlu0 %1710  ;;  %1720 = vrot.lane.b32.xlu1 %v7844_v49, %s13021_s18  ;;  %1682 = vst.msk [vmem:[#allocation3 + $0x40] sm:$0xf] %vm1273_vm1, %v10018_v45  ;;  %v10023_v34 = vpack.c.bf16 %v1487_v8, %v1487_v8  ;;  %v1936_v8 = vmul.bf16 %v9978_v60, %v10075_v46 }
 0x212   : > { %1800 = vst.msk [vmem:[#allocation4 + $0x18] sm:$0xf] %vm1273_vm1, %v1711_v1  ;;  %v1463_v1 = vadd.f32 %v9867_v47, %v1462_v57  ;;  %v8415_v9 = vpop.f32.mrf.mxu1 }
 0x213   : > { %1685 = vst.msk [vmem:[#allocation3 + $0x4c] sm:$0xf] %vm1273_vm1, %v10023_v34  ;;  %v1500_v54 = vadd.f32 %v8415_v9, %v9867_v47 }
 0x214   : > { %v7846_v16 = vpack.c.bf16 %v1463_v1, %v1463_v1  ;;  %v1491_v20 = vpop.f32.mrf.mxu1 }
 0x215   : > { %v1713_v18 = vpop.permute.xlu1 %1712  ;;  %v1707_v50 = vpop.permute.xlu0 %1706  ;;  %1722 = vrot.lane.b32.xlu1 %v7845_v48, %s13021_s18  ;;  %v10033_v17 = vpack.c.bf16 %v1500_v54, %v1500_v54  ;;  %v1492_v49 = vadd.f32 %v9867_v47, %v1491_v20 }
 0x216   : > { %1801 = vst.msk [vmem:[#allocation4 + $0x1c] sm:$0xf] %vm1273_vm1, %v1713_v18  ;;  %1798 = vst.msk [vmem:[#allocation4 + $0x10] sm:$0xf] %vm1273_vm1, %v1707_v50  ;;  %v1479_v18 = vadd.f32 %v9867_v47, %v1478_v7  ;;  %v8416_v6 = vpop.f32.mrf.mxu1 }
 0x217   : > { %1679 = vst.msk [vmem:[#allocation3 + $0x34] sm:$0xf] %vm1273_vm1, %v7846_v16  ;;  %1688 = vst.msk [vmem:[#allocation3 + $0x58] sm:$0xf] %vm1273_vm1, %v10033_v17  ;;  %v10038_v62 = vpack.c.bf16 %v1492_v49, %v1492_v49  ;;  %v1503_v35 = vadd.f32 %v8416_v6, %v9867_v47 }
 0x218   : > { %v10028_v50 = vpack.c.bf16 %v1479_v18, %v1479_v18  ;;  %v1494_v23 = vpop.f32.mrf.mxu1 }
 0x219   : > { %v1856_v22 = vld [vmem:[#allocation4 + $0x18] sm:$0xf]  ;;  %1728 = vrot.lane.b32.xlu1 %v7848_v58, %s13021_s18  ;;  %1686 = vst.msk [vmem:[#allocation3 + $0x50] sm:$0xf] %vm1273_vm1, %v10038_v62  ;;  %v10043_v36 = vpack.c.bf16 %v1503_v35, %v1503_v35 }
 0x21a   : > { %v1939_v12 = vmul.bf16 %v9978_v60, %v1856_v22  ;;  %v1897_v4 = vmul.bf16 %v9980_v39, %v1856_v22  ;;  %v1918_v27 = vmul.bf16 %v9982_v3, %v1856_v22  ;;  %v1876_v43 = vmul.bf16 %v9984_v14, %v1856_v22  ;;  %1683 = vst.msk [vmem:[#allocation3 + $0x44] sm:$0xf] %vm1273_vm1, %v10028_v50 }
 0x21b   : > { %v1495_v22 = vadd.f32 %v9867_v47, %v1494_v23  ;;  %1689 = vst.msk [vmem:[#allocation3 + $0x5c] sm:$0xf] %vm1273_vm1, %v10043_v36  ;;  %v1935_v23 = vmul.bf16 %v9978_v60, %v10079_v44 }
 0x21d   : > { %v1857_v33 = vld [vmem:[#allocation4 + $0x1c] sm:$0xf]  ;;  %1724 = vrot.lane.b32.xlu1 %v7846_v16, %s13021_s18  ;;  %v1854_v52 = vld [vmem:[#allocation4 + $0x10] sm:$0xf] }
 0x21e   : > { %v1940_v61 = vmul.bf16 %v9978_v60, %v1857_v33  ;;  %v1898_v26 = vmul.bf16 %v9980_v39, %v1857_v33  ;;  %v1919_v31 = vmul.bf16 %v9982_v3, %v1857_v33  ;;  %v1877_v10 = vmul.bf16 %v9984_v14, %v1857_v33 }
 0x21f   : > { %v711_v33 = vmul.f32 0.03125, %v9935_v37  ;;  %v1937_v7 = vmul.bf16 %v9978_v60, %v1854_v52  ;;  %v1895_v9 = vmul.bf16 %v9980_v39, %v1854_v52 }
 0x220   : > { %v7491_v42 = vcombine.low %v1939_v12, %v1940_v61  ;;  %v7483_v11 = vcombine.low %v1897_v4, %v1898_v26  ;;  %v9995_v32 = vcombine.low %v1918_v27, %v1919_v31  ;;  %v9997_v0 = vcombine.low %v1876_v43, %v1877_v10  ;;  %v8419_v43 = vpop.f32.mrf.mxu1 }
 0x221   : > { %v10049_v12 = vpack.c.bf16 %v1495_v22, %v1495_v22  ;;  %v713_v4 = vmul.f32 0.03125, %v9932_v51  ;;  %v903_v26 = vmul.f32 %v711_v33, %v711_v33  ;;  %v1516_v13 = vadd.f32 %v8419_v43, %v9867_v47 }
 0x222   : > { %8621 = vmatprep.subr.msk.bf16.mxu1 %vm585_vm0, %v7491_v42  ;;  %v2091_v38 = vsel %vm585_vm0, %v7483_v11, 0  ;;  %v1507_v24 = vpop.f32.mrf.mxu1  ;;  %v967_v20 = vsub.f32 %v9905_v21, %v711_v33  ;;  %v10100_v21 = vld [vmem:[%s13006_s9] ss:$0 sm:$0xff] }
 0x223   : > { %7884 = vmatpush3.bf16.xpose.msra.mxu1 %v2091_v38  ;;  %1687 = vst.msk [vmem:[#allocation3 + $0x54] sm:$0xf] %vm1273_vm1, %v10049_v12  ;;  %v905_v10 = vmul.f32 %v713_v4, %v713_v4  ;;  %v10057_v38 = vpack.c.bf16 %v1516_v13, %v1516_v13  ;;  %v1508_v40 = vadd.f32 %v9867_v47, %v1507_v24 }
 0x224   : > { %v8420_v51 = vpop.f32.mrf.mxu1 }
 0x225   : > { %1692 = vst.msk [vmem:[#allocation3 + $0x68] sm:$0xf] %vm1273_vm1, %v10057_v38  ;;  %v10062_v56 = vpack.c.bf16 %v1508_v40, %v1508_v40  ;;  %v1519_v57 = vadd.f32 %v8420_v51, %v9867_v47 }
 0x226   : > { %v1510_v58 = vpop.f32.mrf.mxu1 }
 0x227   : > { %1690 = vst.msk [vmem:[#allocation3 + $0x60] sm:$0xf] %vm1273_vm1, %v10062_v56  ;;  %v10068_v1 = vpack.c.bf16 %v1519_v57, %v1519_v57  ;;  %v1511_v16 = vadd.f32 %v9867_v47, %v1510_v58 }
 0x229   : > { %1693 = vst.msk [vmem:[#allocation3 + $0x6c] sm:$0xf] %vm1273_vm1, %v10068_v1  ;;  %v10073_v59 = vpack.c.bf16 %v1511_v16, %v1511_v16 }
 0x22b   : > { %1691 = vst.msk [vmem:[#allocation3 + $0x64] sm:$0xf] %vm1273_vm1, %v10073_v59 }
 0x24b   : > { %v833_v61 = vpop.xlane.xlu0 %832 }
 0x24c   : > { %v871_v15 = vmul.f32 0.03125, %v833_v61 }
 0x24e   : > { %v935_v27 = vsub.f32 %v871_v15, %v903_v26  ;;  %v7489_v26 = vcombine.low %v1935_v23, %v1936_v8  ;;  %v1894_v15 = vmul.bf16 %v9980_v39, %v10075_v46 }
 0x24f   : > { %v839_v31 = vpop.xlane.xlu0 %838 }
 0x250   : > { %v999_v42 = vadd.f32 1e-05, %v935_v27  ;;  %v873_v11 = vmul.f32 0.03125, %v839_v31  ;;  %v10054_v37 = vpop.xlane.xlu1 %680  ;;  %v969_v27 = vsub.f32 %v9911_v30, %v713_v4  ;;  %v10095_v31 = vld [vmem:[#allocation4 + $0x4] sm:$0xf] }
 0x251   : > { %v10111_v30 = vld [vmem:[%s13007_s10] ss:$0 sm:$0xff]  ;;  %v1934_v24 = vmul.bf16 %v9978_v60, %v10095_v31  ;;  %v1892_v58 = vmul.bf16 %v9980_v39, %v10095_v31 }
 0x252   : > { %8860 = vrsqrt.f32 %v999_v42  ;;  %v937_v19 = vsub.f32 %v873_v11, %v905_v10  ;;  %v1893_v10 = vmul.bf16 %v9980_v39, %v10079_v44  ;;  %v10106_v42 = vld [vmem:[#allocation4] sm:$0xf] }
 0x253   : > { %v1933_v51 = vmul.bf16 %v9978_v60, %v10106_v42 }
 0x254   : > { %v1001_v41 = vadd.f32 1e-05, %v937_v19  ;;  %v1709_v48 = vpop.permute.xlu1 %1708  ;;  %v7481_v13 = vcombine.low %v1893_v10, %v1894_v15  ;;  %v1913_v15 = vmul.bf16 %v9982_v3, %v10095_v31 }
 0x255   : > { %1799 = vst.msk [vmem:[#allocation4 + $0x14] sm:$0xf] %vm1273_vm1, %v1709_v48  ;;  %v7488_v57 = vcombine.low %v1933_v51, %v1934_v24 }
 0x256   : > { %8862 = vrsqrt.f32 %v1001_v41  ;;  %v2085_v48 = vsel %vm585_vm0, %v7481_v13, 0 }
 0x25c   : > { %v1855_v53 = vld [vmem:[#allocation4 + $0x14] sm:$0xf] }
 0x25d   : > { %v1938_v18 = vmul.bf16 %v9978_v60, %v1855_v53  ;;  %v1896_v54 = vmul.bf16 %v9980_v39, %v1855_v53  ;;  %v1891_v60 = vmul.bf16 %v9980_v39, %v10106_v42  ;;  %v1874_v39 = vmul.bf16 %v9984_v14, %v1854_v52 }
 0x25f   : > { %v8861_v49 = vpop.eup %8860  ;;  %v7490_v6 = vcombine.low %v1937_v7, %v1938_v18  ;;  %v7482_v35 = vcombine.low %v1895_v9, %v1896_v54  ;;  %v7480_v8 = vcombine.low %v1891_v60, %v1892_v58  ;;  %v1917_v18 = vmul.bf16 %v9982_v3, %v1855_v53 }
 0x260   : > { %v1063_v22 = vmul.f32 %v8861_v49, %v967_v20  ;;  %v1916_v9 = vmul.bf16 %v9982_v3, %v1854_v52  ;;  %v2079_v54 = vsel %vm585_vm0, %v9997_v0, 0  ;;  %v1875_v49 = vmul.bf16 %v9984_v14, %v1855_v53 }
 0x261   : > { %8622 = vmatprep.subr.msk.bf16.mxu1 %vm585_vm0, %v7490_v6  ;;  %v2088_v61 = vsel %vm585_vm0, %v7482_v35, 0  ;;  %v2082_v7 = vsel %vm585_vm0, %v7480_v8, 0  ;;  %v1915_v35 = vmul.bf16 %v9982_v3, %v10075_v46  ;;  %v1873_v0 = vmul.bf16 %v9984_v14, %v10075_v46 }
 0x262   : > { %7886 = vmatpush3.bf16.xpose.msra.mxu1 %v2088_v61  ;;  %v1102_v33 = vmul.f32 %v10100_v21, %v1063_v22  ;;  %v7486_v20 = vcombine.low %v1916_v9, %v1917_v18  ;;  %v7478_v6 = vcombine.low %v1874_v39, %v1875_v49  ;;  %v712_v53 = vmul.f32 0.03125, %v9927_v2  ;;  %v1719_v2 = vpop.permute.xlu0 %1718  ;;  %v7535_v9 = vld [vmem:[%s13000_s3 + $0x2] sm:$0x1] }
 0x263   : > { %v8863_v43 = vpop.eup %8862  ;;  %8623 = vmatprep.subr.msk.bf16.mxu1 %vm585_vm0, %v7489_v26  ;;  %v1872_v52 = vmul.bf16 %v9984_v14, %v10079_v44  ;;  %v1912_v46 = vmul.bf16 %v9982_v3, %v10106_v42  ;;  %1804 = vst.msk [vmem:[#allocation4 + $0x28] sm:$0xf] %vm1273_vm1, %v1719_v2 }
 0x264   : > { %v10114_v4 = vadd.f32 %v10111_v30, %v1102_v33  ;;  %v1065_v11 = vmul.f32 %v8863_v43, %v969_v27  ;;  %v2076_v23 = vsel %vm585_vm0, %v7478_v6, 0  ;;  %v904_v27 = vmul.f32 %v712_v53, %v712_v53 }
 0x265   : > { %v7477_v26 = vcombine.low %v1872_v52, %v1873_v0  ;;  %v714_v33 = vmul.f32 0.03125, %v10054_v37  ;;  %v7484_v24 = vcombine.low %v1912_v46, %v1913_v15 }
 0x266   : > { %v7829_v19 = vpack.c.bf16 %v10114_v4, %v10114_v4  ;;  %v1104_v40 = vmul.f32 %v10100_v21, %v1065_v11 }
 0x267   : > { %v2073_v13 = vsel %vm585_vm0, %v7477_v26, 0  ;;  %v970_v49 = vsub.f32 %v9916_v55, %v714_v33 }
 0x268   : > { %1302 = vst.msk [vmem:[#allocation2 + $0x70] sm:$0xf] %vm1273_vm1, %v7829_v19  ;;  %v10125_v41 = vadd.f32 %v10111_v30, %v1104_v40  ;;  %v906_v19 = vmul.f32 %v714_v33, %v714_v33 }
 0x26a   : > { %7888 = vmatpush3.bf16.xpose.msra.mxu1 %v2085_v48  ;;  %v7831_v16 = vpack.c.bf16 %v10125_v41, %v10125_v41 }
 0x26b   : > { %8624 = vmatprep.subr.msk.bf16.mxu1 %vm585_vm0, %v7488_v57 }
 0x26c   : > { %1304 = vst.msk [vmem:[#allocation2 + $0x78] sm:$0xf] %vm1273_vm1, %v7831_v16 }
 0x272   : > { %7890 = vmatpush3.bf16.xpose.msra.mxu1 %v2082_v7  ;;  %v7533_v7 = vld [vmem:[%s13000_s3 + $0x1] sm:$0x1] }
 0x273   : > { %8625 = vmatprep.subr.msk.bf16.mxu1 %vm585_vm0, %v9995_v32  ;;  %v1914_v32 = vmul.bf16 %v9982_v3, %v10079_v44  ;;  %v1871_v44 = vmul.bf16 %v9984_v14, %v10095_v31  ;;  %v1870_v3 = vmul.bf16 %v9984_v14, %v10106_v42  ;;  %v8670_v31 = vld [vmem:[%s13002_s5 + $0x78] sm:$0xff]   ;;  %v968_v14 = vsub.f32 %v9923_v63, %v712_v53 }
 0x274   : > { %v2899_v39 = vpack.i.b16 %v7533_v7, %v7533_v7  ;;  %v8678_v7 = vld [vmem:[%s13002_s5 + $0x58] sm:$0xff]  }
 0x275   : > { %v7485_v22 = vcombine.low %v1914_v32, %v1915_v35  ;;  %v7476_v48 = vcombine.low %v1870_v3, %v1871_v44  ;;  %v2919_v35 = vpack.i.b16 %v7535_v9, %v7535_v9  ;;  %v8679_v9 = vld [vmem:[%s13002_s5 + $0x18] sm:$0xff]  }
 0x276   : > { %v2904_v55 = vrot.slane %v2899_v39, %v9955_v29  ;;  %v8682_v39 = vld [vmem:[%s13002_s5 + $0x48] sm:$0xff]  }
 0x277   : > { %v2070_v16 = vsel %vm585_vm0, %v7476_v48, 0  ;;  %v2924_v26 = vrot.slane %v2919_v35, %v9955_v29  ;;  %v8672_v48 = vld [vmem:[%s13002_s5 + $0x70] sm:$0xff]   ;;  %v8683_v35 = vld [vmem:[%s13002_s5 + $0x8] sm:$0xff]  }
 0x278   : > { %v10204_v46 = vcombine.low %v2904_v55, %v2904_v55 }
 0x279   : > { %v10206_v2 = vcombine.low %v2924_v26, %v2924_v26 }
 0x27a   : > { %7892 = vmatpush3.bf16.xpose.msra.mxu1 %v2079_v54  ;;  %v1727_v60 = vpop.permute.xlu0 %1726  ;;  %v2877_v54 = vld [vmem:[%s13000_s3] sm:$0x1] }
 0x27b   : > { %8626 = vmatprep.subr.msk.bf16.mxu1 %vm585_vm0, %v7486_v20  ;;  %1808 = vst.msk [vmem:[#allocation4 + $0x38] sm:$0xf] %vm1273_vm1, %v1727_v60  ;;  %v2879_v32 = vpack.i.b16 %v2877_v54, %v2877_v54  ;;  %v8676_v60 = vld [vmem:[%s13002_s5 + $0x60] sm:$0xff]   ;;  %v8680_v54 = vld [vmem:[%s13002_s5 + $0x50] sm:$0xff]  }
 0x27d   : > { %v2884_v15 = vrot.slane %v2879_v32, %v9955_v29  ;;  %v8684_v32 = vld [vmem:[%s13002_s5 + $0x40] sm:$0xff]  }
 0x282   : > { %7894 = vmatpush3.bf16.xpose.msra.mxu1 %v2076_v23  ;;  %v10199_v33 = vld [vmem:[#allocation4 + $0x38] sm:$0xf] }
 0x283   : > { %8627 = vmatprep.subr.msk.bf16.mxu1 %vm585_vm0, %v7485_v22 }
 0x285   : > { %v836_v61 = vpop.xlane.xlu1 %835 }
 0x286   : > { %v872_v43 = vmul.f32 0.03125, %v836_v61 }
 0x288   : > { %v936_v10 = vsub.f32 %v872_v43, %v904_v27 }
 0x289   : > { %v842_v11 = vpop.xlane.xlu1 %841 }
 0x28a   : > { %v1000_v40 = vadd.f32 1e-05, %v936_v10  ;;  %v874_v51 = vmul.f32 0.03125, %v842_v11  ;;  %7896 = vmatpush3.bf16.xpose.msra.mxu1 %v2073_v13  ;;  %v8666_v10 = vld [vmem:[#allocation3] sm:$0xff]   ;;  %v10208_v11 = vcombine.low %v2884_v15, %v2884_v15 }
 0x28b   : > { %8628 = vmatprep.subr.msk.bf16.mxu1 %vm585_vm0, %v7484_v24 }
 0x28c   : > { %8864 = vrsqrt.f32 %v1000_v40  ;;  %v938_v37 = vsub.f32 %v874_v51, %v906_v19  ;;  %v2895_v44 = vmul.bf16 %v10208_v11, %v10199_v33 }
 0x28d   : > { %v1721_v57 = vpop.permute.xlu1 %1720 }
 0x28e   : > { %v1002_v58 = vadd.f32 1e-05, %v938_v37  ;;  %1805 = vst.msk [vmem:[#allocation4 + $0x2c] sm:$0xf] %vm1273_vm1, %v1721_v57  ;;  %v8671_v37 = vld [vmem:[%s13002_s5 + $0x38] sm:$0xff]   ;;  %v8667_v57 = vld [vmem:[#allocation3 + $0x8] sm:$0xff]  }
 0x290   : > { %8866 = vrsqrt.f32 %v1002_v58  ;;  %v8673_v58 = vld [vmem:[%s13002_s5 + $0x30] sm:$0xff]  }
 0x291   : > { %v1723_v8 = vpop.permute.xlu1 %1722 }
 0x292   : > { %7898 = vmatpush3.bf16.xpose.msra.mxu1 %v2070_v16  ;;  %1806 = vst.msk [vmem:[#allocation4 + $0x30] sm:$0xf] %vm1273_vm1, %v1723_v8  ;;  %v8675_v16 = vld [vmem:[%s13002_s5 + $0x28] sm:$0xff]   ;;  %v8668_v8 = vld [vmem:[#allocation3 + $0x10] sm:$0xff]  }
 0x293   : > { %7947 = vmatprep.subr.bf16.mxu1 %v8670_v31  ;;  %v8674_v31 = vld [vmem:[%s13002_s5 + $0x68] sm:$0xff]  }
 0x295   : > { %v1729_v20 = vpop.permute.xlu1 %1728 }
 0x296   : > { %1809 = vst.msk [vmem:[#allocation4 + $0x3c] sm:$0xf] %vm1273_vm1, %v1729_v20  ;;  %v8669_v20 = vld [vmem:[#allocation3 + $0x18] sm:$0xff]  }
 0x299   : > { %v8865_v42 = vpop.eup %8864  ;;  %v1725_v0 = vpop.permute.xlu1 %1724 }
 0x29a   : > { %v1064_v18 = vmul.f32 %v8865_v42, %v968_v14  ;;  %1807 = vst.msk [vmem:[#allocation4 + $0x34] sm:$0xf] %vm1273_vm1, %v1725_v0  ;;  %v8677_v14 = vld [vmem:[%s13002_s5 + $0x20] sm:$0xff]  }
 0x29b   : > { %v7537_v42 = vld [vmem:[%s13000_s3 + $0x3] sm:$0x1] }
 0x29c   : > { %v1103_v63 = vmul.f32 %v10100_v21, %v1064_v18  ;;  %v2939_v18 = vpack.i.b16 %v7537_v42, %v7537_v42  ;;  %v8685_v0 = vld [vmem:[%s13002_s5] sm:$0xff]   ;;  %v2026_v42 = vld [vmem:[%s13003_s6 + $0x28] sm:$0xff] }
 0x29d   : > { %v8867_v6 = vpop.eup %8866 }
 0x29e   : > { %v1142_v23 = vadd.f32 %v10111_v30, %v1103_v63  ;;  %v1066_v22 = vmul.f32 %v8867_v6, %v970_v49  ;;  %v2944_v49 = vrot.slane %v2939_v18, %v9955_v29  ;;  %v8681_v63 = vld [vmem:[%s13002_s5 + $0x10] sm:$0xff]  }
 0x2a0   : > { %v1159_v53 = vpack.c.bf16 %v1142_v23, %v10114_v4  ;;  %v7830_v52 = vpack.c.bf16 %v1142_v23, %v1142_v23  ;;  %v1105_v61 = vmul.f32 %v10100_v21, %v1066_v22  ;;  %v10201_v4 = vld [vmem:[#allocation4 + $0x3c] sm:$0xf]  ;;  %v10277_v6 = vcombine.low %v2944_v49, %v2944_v49 }
 0x2a1   : > { %v2916_v13 = vmul.bf16 %v10204_v46, %v10201_v4  ;;  %v2936_v24 = vmul.bf16 %v10206_v2, %v10201_v4  ;;  %v2896_v40 = vmul.bf16 %v10208_v11, %v10201_v4 }
 0x2a2   : > { %1303 = vst.msk [vmem:[#allocation2 + $0x74] sm:$0xf] %vm1273_vm1, %v7830_v52  ;;  %8421 = vmatprep.mubr.msk.bf16.mxu1 %vm585_vm0, %v1159_v53  ;;  %v1144_v27 = vadd.f32 %v10111_v30, %v1105_v61  ;;  %v2915_v30 = vmul.bf16 %v10204_v46, %v10199_v33  ;;  %v2955_v23 = vmul.bf16 %v10277_v6, %v10199_v33 }
 0x2a3   : > { %v10229_v3 = vcombine.low %v2895_v44, %v2896_v40  ;;  %v2956_v22 = vmul.bf16 %v10277_v6, %v10201_v4 }
 0x2a4   : > { %v1160_v21 = vpack.c.bf16 %v1144_v27, %v10125_v41  ;;  %v7832_v43 = vpack.c.bf16 %v1144_v27, %v1144_v27  ;;  %v2935_v41 = vmul.bf16 %v10206_v2, %v10199_v33  ;;  %v10223_v19 = vcombine.low %v2915_v30, %v2916_v13  ;;  %v2021_v30 = vld [vmem:[%s13003_s6] sm:$0xff] }
 0x2a5   : > { %v7554_v53 = vcombine.low %v2955_v23, %v2956_v22 }
 0x2a6   : > { %1305 = vst.msk [vmem:[#allocation2 + $0x7c] sm:$0xf] %vm1273_vm1, %v7832_v43  ;;  %8422 = vmatmul.mubr.msk.bf16.gmra.mxu1 %vm585_vm0, %v1160_v21  ;;  %v10227_v51 = vcombine.low %v2935_v41, %v2936_v24  ;;  %v2022_v41 = vld [vmem:[%s13003_s6 + $0x8] sm:$0xff] }
 0x2a7   : > { %7899 = vmatprep.mubr.msk.bf16.mxu1 %vm585_vm0, %v8666_v10 }
 0x2ae   : > { %7900 = vmatmul.mubr.msk.bf16.vlgmr.msra.gmra.mxu1 %vm585_vm0, %v8666_v10 }
 0x2af   : > { %7901 = vmatprep.mubr.msk.bf16.mxu1 %vm585_vm0, %v8667_v57  ;;  %7948 = vmatpush3.bf16.msra.mxu1 %v8671_v37  ;;  %v2023_v37 = vld [vmem:[%s13003_s6 + $0x10] sm:$0xff] }
 0x2b0   : > { %7949 = vmatprep.subr.bf16.mxu1 %v8672_v48 }
 0x2b3   : > { %7950 = vmatpush3.bf16.msra.mxu1 %v8673_v58 }
 0x2b4   : > { %7951 = vmatprep.subr.bf16.mxu1 %v8674_v31 }
 0x2b6   : > { %7902 = vmatmul.mubr.msk.bf16.gmra.mxu1 %vm585_vm0, %v8667_v57  ;;  %v2024_v57 = vld [vmem:[%s13003_s6 + $0x18] sm:$0xff] }
 0x2b7   : > { %7903 = vmatprep.mubr.msk.bf16.mxu1 %vm585_vm0, %v8668_v8  ;;  %7952 = vmatpush3.bf16.msra.mxu1 %v8675_v16 }
 0x2b8   : > { %7953 = vmatprep.subr.bf16.mxu1 %v8676_v60 }
 0x2bb   : > { %7954 = vmatpush3.bf16.msra.mxu1 %v8677_v14 }
 0x2bc   : > { %7955 = vmatprep.subr.bf16.mxu1 %v8678_v7 }
 0x2be   : > { %7904 = vmatmul.mubr.msk.bf16.gmra.mxu1 %vm585_vm0, %v8668_v8  ;;  %v2025_v8 = vld [vmem:[%s13003_s6 + $0x20] sm:$0xff] }
 0x2bf   : > { %7905 = vmatprep.mubr.msk.bf16.mxu1 %vm585_vm0, %v8669_v20  ;;  %7956 = vmatpush3.bf16.msra.mxu1 %v8679_v9 }
 0x2c0   : > { %7957 = vmatprep.subr.bf16.mxu1 %v8680_v54 }
 0x2c3   : > { %7958 = vmatpush3.bf16.msra.mxu1 %v8681_v63  ;;  %v2028_v63 = vld [vmem:[%s13003_s6 + $0x38] sm:$0xff] }
 0x2c4   : > { %7959 = vmatprep.subr.bf16.mxu1 %v8682_v39 }
 0x2c6   : > { %7906 = vmatmul.mubr.msk.bf16.gmra.mxu1 %vm585_vm0, %v8669_v20  ;;  %v2027_v20 = vld [vmem:[%s13003_s6 + $0x30] sm:$0xff] }
 0x2c7   : > { %7960 = vmatpush3.bf16.msra.mxu1 %v8683_v35 }
 0x2c8   : > { %7961 = vmatprep.subr.bf16.mxu1 %v8684_v32 }
 0x2cb   : > { %7962 = vmatpush3.bf16.msra.mxu1 %v8685_v0 }
 0x2cc   : > { %8629 = vmatprep.subr.msk.bf16.mxu1 %vm585_vm0, %v7554_v53 }
 0x366   : > { %v8423_v52 = vpop.f32.mrf.mxu1 }
 0x367   : > { %v1532_v61 = vadd.f32 %v8423_v52, %v9867_v47 }
 0x368   : > { %v1523_v55 = vpop.f32.mrf.mxu1 }
 0x369   : > { %v10295_v26 = vpack.c.bf16 %v1532_v61, %v1532_v61  ;;  %v1524_v15 = vadd.f32 %v9867_v47, %v1523_v55 }
 0x36a   : > { %v8424_v27 = vpop.f32.mrf.mxu1 }
 0x36b   : > { %1696 = vst.msk [vmem:[#allocation3 + $0x78] sm:$0xf] %vm1273_vm1, %v10295_v26  ;;  %v10300_v33 = vpack.c.bf16 %v1524_v15, %v1524_v15  ;;  %v1535_v4 = vadd.f32 %v8424_v27, %v9867_v47  ;;  %v2030_v15 = vld [vmem:[%s13003_s6 + $0x48] sm:$0xff] }
 0x36c   : > { %v1526_v21 = vpop.f32.mrf.mxu1 }
 0x36d   : > { %1694 = vst.msk [vmem:[#allocation3 + $0x70] sm:$0xf] %vm1273_vm1, %v10300_v33  ;;  %v10305_v43 = vpack.c.bf16 %v1535_v4, %v1535_v4  ;;  %v1527_v10 = vadd.f32 %v9867_v47, %v1526_v21  ;;  %v2029_v4 = vld [vmem:[%s13003_s6 + $0x40] sm:$0xff] }
 0x36e   : > { %v2151_v13 = vpop.f32.mrf.mxu1 }
 0x36f   : > { %1697 = vst.msk [vmem:[#allocation3 + $0x7c] sm:$0xf] %vm1273_vm1, %v10305_v43  ;;  %v10316_v24 = vpack.c.bf16 %v1527_v10, %v1527_v10  ;;  %v10320_v40 = vadd.f32 %v2151_v13, %v2021_v30  ;;  %v2031_v13 = vld [vmem:[%s13003_s6 + $0x50] sm:$0xff] }
 0x370   : > { %v2153_v44 = vpop.f32.mrf.mxu1 }
 0x371   : > { %1695 = vst.msk [vmem:[#allocation3 + $0x74] sm:$0xf] %vm1273_vm1, %v10316_v24  ;;  %v10322_v47 = vadd.f32 %v2153_v44, %v2022_v41  ;;  %v2033_v41 = vld [vmem:[%s13003_s6 + $0x60] sm:$0xff] }
 0x372   : > { %v2155_v48 = vpop.f32.mrf.mxu1 }
 0x373   : > { %v2190_v58 = vmax.f32 %v10320_v40, %v10322_v47  ;;  %v10332_v16 = vadd.f32 %v2155_v48, %v2023_v37 }
 0x374   : > { %v2157_v31 = vpop.f32.mrf.mxu1 }
 0x375   : > { %v10334_v60 = vadd.f32 %v2157_v31, %v2024_v57  ;;  %2191 = vmax.xlane.f32.xlu0 %v2190_v58  ;;  %v2036_v57 = vld [vmem:[%s13003_s6 + $0x78] sm:$0xff] }
 0x376   : > { %v2161_v14 = vpop.f32.mrf.mxu1 }
 0x377   : > { %v2193_v7 = vmax.f32 %v10332_v16, %v10334_v60  ;;  %v10344_v9 = vadd.f32 %v2161_v14, %v2025_v8  ;;  %v2035_v14 = vld [vmem:[%s13003_s6 + $0x70] sm:$0xff] }
 0x378   : > { %v2163_v18 = vpop.f32.mrf.mxu1 }
 0x379   : > { %v10346_v54 = vadd.f32 %v2163_v18, %v2026_v42  ;;  %2194 = vmax.xlane.f32.xlu1 %v2193_v7 }
 0x37a   : > { %v2165_v49 = vpop.f32.mrf.mxu1 }
 0x37b   : > { %v2196_v39 = vmax.f32 %v10344_v9, %v10346_v54  ;;  %v10356_v32 = vadd.f32 %v2165_v49, %v2027_v20 }
 0x37c   : > { %v2167_v35 = vpop.f32.mrf.mxu1 }
 0x37d   : > { %v10358_v23 = vadd.f32 %v2167_v35, %v2028_v63  ;;  %2197 = vmax.xlane.f32.xlu0 %v2196_v39  ;;  %v10414_v63 = vld [vmem:[#allocation2 + $0x18] sm:$0xff]   ;;  %v10420_v39 = vld [vmem:[#allocation2 + $0x10] sm:$0xff]   ;;  %v10430_v35 = vld [vmem:[#allocation2 + $0x8] sm:$0xff]  }
 0x37e   : > { %v2171_v0 = vpop.f32.mrf.mxu1 }
 0x37f   : > { %v2199_v22 = vmax.f32 %v10356_v32, %v10358_v23  ;;  %v10380_v30 = vadd.f32 %v2171_v0, %v2029_v4  ;;  %v10446_v0 = vld [vmem:[#allocation2 + $0x38] sm:$0xff]  }
 0x380   : > { %v2173_v53 = vpop.f32.mrf.mxu1 }
 0x381   : > { %2200 = vmax.xlane.f32.xlu1 %v2199_v22  ;;  %v10372_v21 = vadd.f32 %v2173_v53, %v2030_v15  ;;  %v10436_v22 = vld [vmem:[#allocation2] sm:$0xff]   ;;  %v10452_v53 = vld [vmem:[#allocation2 + $0x30] sm:$0xff]  }
 0x382   : > { %v2175_v52 = vpop.f32.mrf.mxu1 }
 0x383   : > { %v2202_v48 = vmax.f32 %v10380_v30, %v10372_v21  ;;  %v10397_v31 = vadd.f32 %v2175_v52, %v2031_v13  ;;  %v10462_v52 = vld [vmem:[#allocation2 + $0x28] sm:$0xff]  }
 0x384   : > { %v2177_v61 = vpop.f32.mrf.mxu1 }
 0x386   : > { %v2181_v55 = vpop.f32.mrf.mxu1 }
 0x387   : > { %v10399_v8 = vadd.f32 %v2181_v55, %v2033_v41 }
 0x388   : > { %v2183_v27 = vpop.f32.mrf.mxu1 }
 0x38a   : > { %v2185_v10 = vpop.f32.mrf.mxu1 }
 0x38b   : > { %v10410_v20 = vadd.f32 %v2185_v10, %v2035_v14 }
 0x38c   : > { %v2187_v58 = vpop.f32.mrf.mxu1 }
 0x38d   : > { %v10404_v42 = vadd.f32 %v2187_v58, %v2036_v57 }
 0x38f   : > { %v2211_v49 = vmax.f32 %v10410_v20, %v10404_v42 }
 0x392   : > { %1716 = vrot.lane.b32.xlu1 %v9973_v25, %s13021_s18  ;;  %v2034_v25 = vld [vmem:[%s13003_s6 + $0x68] sm:$0xff] }
 0x393   : > { %1714 = vrot.lane.b32.xlu0 %v9962_v5, %s13021_s18  ;;  %v2032_v5 = vld [vmem:[%s13003_s6 + $0x58] sm:$0xff]  ;;  %v10390_v37 = vadd.f32 %v2183_v27, %v2034_v25 }
 0x394   : > { %v10388_v44 = vadd.f32 %v2177_v61, %v2032_v5  ;;  %v10468_v61 = vld [vmem:[#allocation2 + $0x20] sm:$0xff]  }
 0x395   : > { %v2208_v18 = vmax.f32 %v10399_v8, %v10390_v37 }
 0x396   : > { %v2205_v7 = vmax.f32 %v10397_v31, %v10388_v44 }
 0x3b2   : > { %2203 = vmax.xlane.f32.xlu0 %v2202_v48 }
 0x3b6   : > { %2206 = vmax.xlane.f32.xlu1 %v2205_v7  ;;  %2209 = vmax.xlane.f32.xlu0 %v2208_v18 }
 0x3ba   : > { %2212 = vmax.xlane.f32.xlu0 %v2211_v49 }
 0x3c7   : > { %2304 = vrot.lane.b32.xlu1 %v10414_v63, %s13019_s29 }
 0x3cb   : > { %2312 = vrot.lane.b32.xlu1 %v10414_v63, %s13021_s18 }
 0x3cf   : > { %2294 = vrot.lane.b32.xlu1 %v10420_v39, %s13017_s0 }
 0x3d0   : > { %2296 = vrot.lane.b32.xlu0 %v10414_v63, %s13017_s0 }
 0x3d3   : > { %2310 = vrot.lane.b32.xlu1 %v10420_v39, %s13021_s18 }
 0x3d4   : > { %2302 = vrot.lane.b32.xlu0 %v10420_v39, %s13019_s29 }
 0x3d7   : > { %2300 = vrot.lane.b32.xlu1 %v10430_v35, %s13019_s29 }
 0x3d8   : > { %2292 = vrot.lane.b32.xlu0 %v10430_v35, %s13017_s0 }
 0x3db   : > { %2290 = vrot.lane.b32.xlu1 %v10436_v22, %s13017_s0 }
 0x3dc   : > { %2308 = vrot.lane.b32.xlu0 %v10430_v35, %s13021_s18 }
 0x3df   : > { %2306 = vrot.lane.b32.xlu1 %v10436_v22, %s13021_s18 }
 0x3e0   : > { %2298 = vrot.lane.b32.xlu0 %v10436_v22, %s13019_s29 }
 0x3e3   : > { %3321 = vrot.lane.b32.xlu1 %v10446_v0, %s13019_s29 }
 0x3e4   : > { %3313 = vrot.lane.b32.xlu0 %v10446_v0, %s13017_s0 }
 0x3e7   : > { %3311 = vrot.lane.b32.xlu1 %v10452_v53, %s13017_s0 }
 0x3e8   : > { %3329 = vrot.lane.b32.xlu0 %v10446_v0, %s13021_s18 }
 0x3eb   : > { %3327 = vrot.lane.b32.xlu1 %v10452_v53, %s13021_s18 }
 0x3ec   : > { %3319 = vrot.lane.b32.xlu0 %v10452_v53, %s13019_s29 }
 0x3ef   : > { %3317 = vrot.lane.b32.xlu1 %v10462_v52, %s13019_s29 }
 0x3f0   : > { %3309 = vrot.lane.b32.xlu0 %v10462_v52, %s13017_s0 }
 0x3f3   : > { %3307 = vrot.lane.b32.xlu1 %v10468_v61, %s13017_s0  ;;  %s13032_s0 = smov 96  }
 0x3f4   : > { %3325 = vrot.lane.b32.xlu0 %v10462_v52, %s13021_s18 }
 0x3fe   : > { %v2192_v55 = vpop.xlane.xlu0 %2191 }
 0x3ff   : > { %v2214_v15 = vsub.f32 %v10320_v40, %v2192_v55  ;;  %v2215_v27 = vsub.f32 %v10322_v47, %v2192_v55 }
 0x401   : > { %v2230_v4 = vmul.f32 1.442695, %v2214_v15  ;;  %v2232_v5 = vmul.f32 1.442695, %v2215_v27  ;;  %v10486_v27 = vld [vmem:[#allocation4 + $0x34] sm:$0xf] }
 0x402   : > { %v2195_v25 = vpop.xlane.xlu1 %2194 }
 0x403   : > { %v2216_v10 = vsub.f32 %v10332_v16, %v2195_v25  ;;  %v2217_v13 = vsub.f32 %v10334_v60, %v2195_v25  ;;  %8868 = vpow2.f32 %v2230_v4 }
 0x404   : > { %8870 = vpow2.f32 %v2232_v5 }
 0x405   : > { %v2234_v41 = vmul.f32 1.442695, %v2216_v10  ;;  %v2236_v48 = vmul.f32 1.442695, %v2217_v13  ;;  %v2954_v10 = vmul.bf16 %v10277_v6, %v10486_v27 }
 0x406   : > { %v2198_v57 = vpop.xlane.xlu0 %2197 }
 0x407   : > { %8872 = vpow2.f32 %v2234_v41  ;;  %v2218_v58 = vsub.f32 %v10344_v9, %v2198_v57  ;;  %v2219_v14 = vsub.f32 %v10346_v54, %v2198_v57  ;;  %v10484_v54 = vld [vmem:[#allocation4 + $0x30] sm:$0xf]  ;;  %v3108_v41 = vsel %vm585_vm0, %v10223_v19, 0 }
 0x408   : > { %8874 = vpow2.f32 %v2236_v48  ;;  %v2953_v25 = vmul.bf16 %v10277_v6, %v10484_v54  ;;  %v2913_v57 = vmul.bf16 %v10204_v46, %v10484_v54 }
 0x409   : > { %v2238_v40 = vmul.f32 1.442695, %v2218_v58  ;;  %v2240_v47 = vmul.f32 1.442695, %v2219_v14  ;;  %v2914_v58 = vmul.bf16 %v10204_v46, %v10486_v27 }
 0x40a   : > { %v2201_v7 = vpop.xlane.xlu1 %2200  ;;  %v1715_v18 = vpop.permute.xlu0 %1714  ;;  %v7553_v48 = vcombine.low %v2953_v25, %v2954_v10 }
 0x40b   : > { %v2220_v49 = vsub.f32 %v10356_v32, %v2201_v7  ;;  %v2221_v16 = vsub.f32 %v10358_v23, %v2201_v7  ;;  %1802 = vst.msk [vmem:[#allocation4 + $0x20] sm:$0xf] %vm1273_vm1, %v1715_v18  ;;  %8876 = vpow2.f32 %v2238_v40  ;;  %v10501_v40 = vld [vmem:[#allocation4 + $0x28] sm:$0xf]  ;;  %v7545_v19 = vcombine.low %v2913_v57, %v2914_v58 }
 0x40c   : > { %8878 = vpow2.f32 %v2240_v47  ;;  %v10503_v47 = vld [vmem:[#allocation4 + $0x2c] sm:$0xf] }
 0x40d   : > { %v2242_v60 = vmul.f32 1.442695, %v2220_v49  ;;  %v2244_v55 = vmul.f32 1.442695, %v2221_v16 }
 0x40e   : > { %v1717_v15 = vpop.permute.xlu1 %1716 }
 0x40f   : > { %8880 = vpow2.f32 %v2242_v60  ;;  %1803 = vst.msk [vmem:[#allocation4 + $0x24] sm:$0xf] %vm1273_vm1, %v1717_v15  ;;  %v2951_v60 = vmul.bf16 %v10277_v6, %v10501_v40 }
 0x410   : > { %8882 = vpow2.f32 %v2244_v55  ;;  %v8869_v9 = vpop.eup %8868  ;;  %v2952_v55 = vmul.bf16 %v10277_v6, %v10503_v47 }
 0x411   : > { %v8871_v4 = vpop.eup %8870 }
 0x412   : > { %v10524_v10 = vld [vmem:[#allocation4 + $0x20] sm:$0xf] }
 0x414   : > { %v8873_v32 = vpop.eup %8872 }
 0x415   : > { %v8875_v5 = vpop.eup %8874  ;;  %v10488_v23 = vpack.c.bf16 %v8873_v32, %v8869_v9  ;;  %v3105_v9 = vsel %vm585_vm0, %v7545_v19, 0  ;;  %v2911_v32 = vmul.bf16 %v10204_v46, %v10501_v40  ;;  %v2934_v19 = vmul.bf16 %v10206_v2, %v10486_v27 }
 0x416   : > { %v2263_v13 = vpack.c.bf16 %v8875_v5, %v8871_v4  ;;  %v7552_v4 = vcombine.low %v2951_v60, %v2952_v55  ;;  %v2912_v5 = vmul.bf16 %v10204_v46, %v10503_v47  ;;  %v10521_v25 = vld [vmem:[#allocation4 + $0x24] sm:$0xf]  ;;  %v3096_v60 = vsel %vm585_vm0, %v10229_v3, 0 }
 0x417   : > { %v2932_v3 = vmul.bf16 %v10206_v2, %v10503_v47 }
 0x418   : > { %2431 = vmatprep.mubr.bf16.mxu0 %v2263_v13  ;;  %2624 = vmatprep.mubr.bf16.mxu1 %v2263_v13  ;;  %v8877_v14 = vpop.eup %8876  ;;  %v7544_v13 = vcombine.low %v2911_v32, %v2912_v5 }
 0x419   : > { %2625 = vmatmul.mubr.bf16.vlgmr.msra.gmra.mxu1 %v10488_v23  ;;  %v8879_v7 = vpop.eup %8878 }
 0x41a   : > { %8000 = vmatpush3.bf16.xpose.msra.mxu1 %v3108_v41  ;;  %v2950_v41 = vmul.bf16 %v10277_v6, %v10521_v25  ;;  %v3102_v57 = vsel %vm585_vm0, %v7544_v13, 0  ;;  %v2931_v13 = vmul.bf16 %v10206_v2, %v10501_v40 }
 0x41b   : > { %8630 = vmatprep.subr.msk.bf16.mxu1 %vm585_vm0, %v7553_v48  ;;  %v2949_v48 = vmul.bf16 %v10277_v6, %v10524_v10  ;;  %v2933_v6 = vmul.bf16 %v10206_v2, %v10484_v54 }
 0x41c   : > { %v8881_v18 = vpop.eup %8880 }
 0x41d   : > { %v8883_v49 = vpop.eup %8882  ;;  %v10506_v16 = vpack.c.bf16 %v8881_v18, %v8877_v14  ;;  %v7551_v58 = vcombine.low %v2949_v48, %v2950_v41  ;;  %v2910_v14 = vmul.bf16 %v10204_v46, %v10521_v25  ;;  %v7549_v55 = vcombine.low %v2933_v6, %v2934_v19 }
 0x41e   : > { %v10512_v15 = vpack.c.bf16 %v8883_v49, %v8879_v7  ;;  %v2909_v7 = vmul.bf16 %v10204_v46, %v10524_v10  ;;  %v2893_v46 = vmul.bf16 %v10208_v11, %v10484_v54 }
 0x420   : > { %2632 = vmatprep.mubr.bf16.mxu1 %v10512_v15  ;;  %v7543_v18 = vcombine.low %v2909_v7, %v2910_v14  ;;  %v7506_v14 = vld [vmem:[%s13001_s4 + $0x3] sm:$0x1]  ;;  %v7504_v7 = vld [vmem:[%s13001_s4 + $0x1] sm:$0x1] }
 0x421   : > { %2633 = vmatmul.mubr.bf16.gmra.mxu1 %v10506_v16 }
 0x422   : > { %8002 = vmatpush3.bf16.xpose.msra.mxu1 %v3105_v9  ;;  %v3099_v49 = vsel %vm585_vm0, %v7543_v18, 0  ;;  %v2894_v9 = vmul.bf16 %v10208_v11, %v10486_v27  ;;  %v2891_v27 = vmul.bf16 %v10208_v11, %v10501_v40  ;;  %v7548_v40 = vcombine.low %v2931_v13, %v2932_v3 }
 0x423   : > { %8631 = vmatprep.subr.msk.bf16.mxu1 %vm585_vm0, %v7552_v4  ;;  %v2929_v3 = vmul.bf16 %v10206_v2, %v10524_v10 }
 0x424   : > { %v7541_v5 = vcombine.low %v2893_v46, %v2894_v9 }
 0x42a   : > { %8004 = vmatpush3.bf16.xpose.msra.mxu1 %v3102_v57 }
 0x42b   : > { %8632 = vmatprep.subr.msk.bf16.mxu1 %vm585_vm0, %v7551_v58  ;;  %v2892_v58 = vmul.bf16 %v10208_v11, %v10503_v47 }
 0x42d   : > { %v7540_v19 = vcombine.low %v2891_v27, %v2892_v58 }
 0x432   : > { %8006 = vmatpush3.bf16.xpose.msra.mxu1 %v3099_v49  ;;  %v3093_v49 = vsel %vm585_vm0, %v7541_v5, 0 }
 0x433   : > { %8633 = vmatprep.subr.msk.bf16.mxu1 %vm585_vm0, %v10227_v51 }
 0x43a   : > { %8008 = vmatpush3.bf16.xpose.msra.mxu1 %v3096_v60  ;;  %v2389_v60 = vpack.i.b16 %v7506_v14, %v7506_v14 }
 0x43b   : > { %8634 = vmatprep.subr.msk.bf16.mxu1 %vm585_vm0, %v7549_v55  ;;  %v2204_v51 = vpop.xlane.xlu0 %2203  ;;  %v2363_v55 = vpack.i.b16 %v7504_v7, %v7504_v7  ;;  %v2889_v7 = vmul.bf16 %v10208_v11, %v10524_v10 }
 0x43c   : > { %v2222_v4 = vsub.f32 %v10380_v30, %v2204_v51  ;;  %v2223_v32 = vsub.f32 %v10372_v21, %v2204_v51  ;;  %v2930_v51 = vmul.bf16 %v10206_v2, %v10521_v25  ;;  %v2890_v2 = vmul.bf16 %v10208_v11, %v10521_v25 }
 0x43e   : > { %v2246_v41 = vmul.f32 1.442695, %v2222_v4  ;;  %v2248_v54 = vmul.f32 1.442695, %v2223_v32 }
 0x43f   : > { %v2207_v48 = vpop.xlane.xlu1 %2206  ;;  %v2210_v57 = vpop.xlane.xlu0 %2209 }
 0x440   : > { %v2224_v30 = vsub.f32 %v10397_v31, %v2207_v48  ;;  %v2225_v21 = vsub.f32 %v10388_v44, %v2207_v48  ;;  %v2227_v18 = vsub.f32 %v10390_v37, %v2210_v57  ;;  %8884 = vpow2.f32 %v2246_v41 }
 0x441   : > { %8886 = vpow2.f32 %v2248_v54  ;;  %v2226_v4 = vsub.f32 %v10399_v8, %v2210_v57  ;;  %v10579_v41 = vrot.slane %v2389_v60, %v9955_v29  ;;  %v3090_v8 = vsel %vm585_vm0, %v7540_v19, 0 }
 0x442   : > { %v2250_v6 = vmul.f32 1.442695, %v2224_v30  ;;  %v2252_v47 = vmul.f32 1.442695, %v2225_v21  ;;  %8010 = vmatpush3.bf16.xpose.msra.mxu1 %v3093_v49  ;;  %v2256_v46 = vmul.f32 1.442695, %v2227_v18  ;;  %v7547_v57 = vcombine.low %v2929_v3, %v2930_v51 }
 0x443   : > { %8635 = vmatprep.subr.msk.bf16.mxu1 %vm585_vm0, %v7548_v40  ;;  %v2305_v44 = vpop.permute.xlu1 %2304  ;;  %v2213_v31 = vpop.xlane.xlu0 %2212  ;;  %v2254_v27 = vmul.f32 1.442695, %v2226_v4  ;;  %v7539_v18 = vcombine.low %v2889_v7, %v2890_v2 }
 0x444   : > { %8888 = vpow2.f32 %v2250_v6  ;;  %v2228_v9 = vsub.f32 %v10410_v20, %v2213_v31  ;;  %v2229_v37 = vsub.f32 %v10404_v42, %v2213_v31  ;;  %v10582_v20 = vrot.slane %v2363_v55, %v9955_v29 }
 0x445   : > { %8890 = vpow2.f32 %v2252_v47  ;;  %v3087_v60 = vsel %vm585_vm0, %v7539_v18, 0 }
 0x446   : > { %v2260_v32 = vmul.f32 1.442695, %v2229_v37  ;;  %8892 = vpow2.f32 %v2256_v46  ;;  %v2258_v42 = vmul.f32 1.442695, %v2228_v9 }
 0x447   : > { %v2313_v5 = vpop.permute.xlu1 %2312  ;;  %v2297_v13 = vpop.permute.xlu0 %2296 }
 0x448   : > { %v2325_v54 = vsel %vm585_vm0, %v10414_v63, %v2297_v13  ;;  %8894 = vpow2.f32 %v2260_v32  ;;  %v7505_v32 = vld [vmem:[%s13001_s4 + $0x2] sm:$0x1] }
 0x449   : > { %v2334_v48 = vsel %vm2326_vm2, %v2325_v54, %v2305_v44  ;;  %8896 = vpow2.f32 %v2258_v42 }
 0x44a   : > { %8012 = vmatpush3.bf16.xpose.msra.mxu1 %v3090_v8  ;;  %v10591_v58 = vsel %vm2335_vm3, %v2334_v48, %v2313_v5  ;;  %8898 = vpow2.f32 %v2254_v27  ;;  %v2376_v48 = vpack.i.b16 %v7505_v32, %v7505_v32  ;;  %v8701_v32 = vld [vmem:[%s13004_s7 + $0x20] sm:$0xff]  }
 0x44b   : > { %8636 = vmatprep.subr.msk.bf16.mxu1 %vm585_vm0, %v7547_v57  ;;  %v2295_v30 = vpop.permute.xlu1 %2294  ;;  %v2303_v21 = vpop.permute.xlu0 %2302  ;;  %v2398_v63 = vmul.bf16 %v10579_v41, %v10591_v58  ;;  %v2372_v14 = vmul.bf16 %v10582_v20, %v10591_v58  ;;  %v2348_v57 = vld [vmem:[%s13001_s4] sm:$0x1] }
 0x44c   : > { %v2322_v25 = vsel %vm585_vm0, %v10420_v39, %v2295_v30 }
 0x44d   : > { %7907 = vmatprep.subr.bf16.mxu0 %v2398_v63  ;;  %v8885_v49 = vpop.eup %8884  ;;  %v2332_v40 = vsel %vm2326_vm2, %v2322_v25, %v2303_v21  ;;  %v2350_v21 = vpack.i.b16 %v2348_v57, %v2348_v57  ;;  %v2381_v25 = vrot.slane %v2376_v48, %v9955_v29 }
 0x44e   : > { %7908 = vmatpush3.bf16.msra.mxu0 %v2372_v14  ;;  %v8887_v44 = vpop.eup %8886 }
 0x44f   : > { %v2311_v6 = vpop.permute.xlu1 %2310  ;;  %v2293_v47 = vpop.permute.xlu0 %2292 }
 0x450   : > { %v2343_v31 = vsel %vm2335_vm3, %v2332_v40, %v2311_v6  ;;  %v2319_v46 = vsel %vm585_vm0, %v10430_v35, %v2293_v47  ;;  %v8694_v40 = vld [vmem:[#allocation3 + $0x20] sm:$0xff]   ;;  %v2355_v47 = vrot.slane %v2350_v21, %v9955_v29 }
 0x451   : > { %v8889_v19 = vpop.eup %8888  ;;  %v2397_v11 = vmul.bf16 %v10579_v41, %v2343_v31  ;;  %v2371_v10 = vmul.bf16 %v10582_v20, %v2343_v31 }
 0x452   : > { %v8891_v39 = vpop.eup %8890  ;;  %8014 = vmatpush3.bf16.xpose.msra.mxu1 %v3087_v60  ;;  %v10607_v55 = vpack.c.bf16 %v8889_v19, %v8885_v49  ;;  %v2359_v19 = vmul.bf16 %v2355_v47, %v10591_v58  ;;  %v2384_v60 = vmul.bf16 %v2381_v25, %v2343_v31 }
 0x453   : > { %v2301_v9 = vpop.permute.xlu1 %2300  ;;  %7909 = vmatprep.subr.bf16.mxu0 %v2397_v11  ;;  %v2309_v37 = vpop.permute.xlu0 %2308  ;;  %v10611_v51 = vpack.c.bf16 %v8891_v39, %v8887_v44  ;;  %v2385_v44 = vmul.bf16 %v2381_v25, %v10591_v58  ;;  %v8695_v11 = vld [vmem:[#allocation3 + $0x28] sm:$0xff]   ;;  %v8697_v58 = vld [vmem:[%s13004_s7 + $0x38] sm:$0xff]  }
 0x454   : > { %v2330_v4 = vsel %vm2326_vm2, %v2319_v46, %v2301_v9  ;;  %7910 = vmatpush3.bf16.msra.mxu0 %v2371_v10  ;;  %v8893_v5 = vpop.eup %8892  ;;  %v8696_v46 = vld [vmem:[#allocation3 + $0x30] sm:$0xff]  }
 0x455   : > { %v2340_v13 = vsel %vm2335_vm3, %v2330_v4, %v2309_v37  ;;  %2640 = vmatprep.mubr.bf16.mxu1 %v10611_v51  ;;  %v8895_v3 = vpop.eup %8894  ;;  %v8698_v37 = vld [vmem:[#allocation3 + $0x38] sm:$0xff]   ;;  %v8700_v4 = vld [vmem:[%s13004_s7 + $0x28] sm:$0xff]  }
 0x456   : > { %2641 = vmatmul.mubr.bf16.gmra.mxu1 %v10607_v55  ;;  %v2396_v35 = vmul.bf16 %v10579_v41, %v2340_v13  ;;  %v2370_v42 = vmul.bf16 %v10582_v20, %v2340_v13  ;;  %v10622_v8 = vpack.c.bf16 %v8895_v3, %v8893_v5  ;;  %v8897_v30 = vpop.eup %8896  ;;  %v2357_v10 = vmul.bf16 %v2355_v47, %v2340_v13 }
 0x457   : > { %v2291_v54 = vpop.permute.xlu1 %2290  ;;  %v2299_v27 = vpop.permute.xlu0 %2298 }
 0x458   : > { %v2316_v2 = vsel %vm585_vm0, %v10436_v22, %v2291_v54  ;;  %7911 = vmatprep.subr.bf16.mxu0 %v2396_v35  ;;  %2648 = vmatprep.mubr.bf16.mxu1 %v10622_v8  ;;  %v8899_v63 = vpop.eup %8898  ;;  %v8705_v54 = vld [vmem:[%s13004_s7] sm:$0xff]  }
 0x459   : > { %7912 = vmatpush3.bf16.msra.mxu0 %v2370_v42  ;;  %v2328_v14 = vsel %vm2326_vm2, %v2316_v2, %v2299_v27  ;;  %v10633_v49 = vpack.c.bf16 %v8897_v30, %v8899_v63 }
 0x45b   : > { %v2307_v7 = vpop.permute.xlu1 %2306  ;;  %v3314_v5 = vpop.permute.xlu0 %3313 }
 0x45c   : > { %v2337_v18 = vsel %vm2335_vm3, %v2328_v14, %v2307_v7  ;;  %v3342_v35 = vsel %vm585_vm0, %v10446_v0, %v3314_v5 }
 0x45d   : > { %v2395_v22 = vmul.bf16 %v10579_v41, %v2337_v18  ;;  %v2369_v6 = vmul.bf16 %v10582_v20, %v2337_v18  ;;  %v2358_v41 = vmul.bf16 %v2355_v47, %v2343_v31  ;;  %v2383_v20 = vmul.bf16 %v2381_v25, %v2340_v13  ;;  %v8699_v31 = vld [vmem:[%s13004_s7 + $0x30] sm:$0xff]  }
 0x45e   : > { %2649 = vmatmul.mubr.bf16.gmra.mxu1 %v10633_v49  ;;  %v2382_v39 = vmul.bf16 %v2381_v25, %v2337_v18  ;;  %v2356_v9 = vmul.bf16 %v2355_v47, %v2337_v18 }
 0x45f   : > { %8015 = vmatprep.mubr.msk.bf16.mxu1 %vm585_vm0, %v8694_v40  ;;  %7913 = vmatprep.subr.bf16.mxu0 %v2395_v22  ;;  %v3322_v13 = vpop.permute.xlu1 %3321  ;;  %v3330_v42 = vpop.permute.xlu0 %3329 }
 0x460   : > { %7914 = vmatpush3.bf16.msra.mxu0 %v2369_v6 }
 0x461   : > { %7915 = vmatprep.subr.bf16.mxu0 %v2385_v44 }
 0x464   : > { %7916 = vmatpush3.bf16.msra.mxu0 %v2359_v19 }
 0x465   : > { %7917 = vmatprep.subr.bf16.mxu0 %v2384_v60 }
 0x466   : > { %8016 = vmatmul.mubr.msk.bf16.vlgmr.msra.gmra.mxu1 %vm585_vm0, %v8694_v40 }
 0x467   : > { %8017 = vmatprep.mubr.msk.bf16.mxu1 %vm585_vm0, %v8695_v11 }
 0x468   : > { %7918 = vmatpush3.bf16.msra.mxu0 %v2358_v41 }
 0x469   : > { %7919 = vmatprep.subr.bf16.mxu0 %v2383_v20  ;;  %v7556_v20 = vld [vmem:[%s13003_s6 + $0x88] sm:$0xff] }
 0x46c   : > { %7920 = vmatpush3.bf16.msra.mxu0 %v2357_v10 }
 0x46d   : > { %7921 = vmatprep.subr.bf16.mxu0 %v2382_v39 }
 0x46e   : > { %8018 = vmatmul.mubr.msk.bf16.gmra.mxu1 %vm585_vm0, %v8695_v11  ;;  %v7555_v11 = vld [vmem:[%s13003_s6 + $0x80] sm:$0xff] }
 0x46f   : > { %8019 = vmatprep.mubr.msk.bf16.mxu1 %vm585_vm0, %v8696_v46 }
 0x470   : > { %7922 = vmatpush3.bf16.msra.mxu0 %v2356_v9 }
 0x471   : > { %8425 = vmatprep.subr.bf16.mxu0 %v8697_v58 }
 0x473   : > { %2432 = vmatmul.mubr.bf16.vlgmr.msra.gmra.mxu0 %v10488_v23  ;;  %v8702_v23 = vld [vmem:[%s13004_s7 + $0x18] sm:$0xff]  }
 0x474   : > { %2439 = vmatprep.mubr.bf16.mxu0 %v10512_v15  ;;  %8426 = vmatpush3.bf16.msra.mxu0 %v8697_v58  ;;  %v8703_v15 = vld [vmem:[%s13004_s7 + $0x10] sm:$0xff]  }
 0x475   : > { %8427 = vmatprep.subr.bf16.mxu0 %v8699_v31 }
 0x476   : > { %8020 = vmatmul.mubr.msk.bf16.gmra.mxu1 %vm585_vm0, %v8696_v46 }
 0x477   : > { %8021 = vmatprep.mubr.msk.bf16.mxu1 %vm585_vm0, %v8698_v37 }
 0x478   : > { %8428 = vmatpush3.bf16.msra.mxu0 %v8699_v31  ;;  %v7557_v31 = vld [vmem:[%s13003_s6 + $0x90] sm:$0xff] }
 0x479   : > { %8429 = vmatprep.subr.bf16.mxu0 %v8700_v4 }
 0x47b   : > { %2440 = vmatmul.mubr.bf16.gmra.mxu0 %v10506_v16  ;;  %v7585_v16 = vld [vmem:[%s13001_s4 + $0x3] sm:$0x1] }
 0x47c   : > { %2447 = vmatprep.mubr.bf16.mxu0 %v10611_v51  ;;  %8430 = vmatpush3.bf16.msra.mxu0 %v8700_v4  ;;  %v8704_v51 = vld [vmem:[%s13004_s7 + $0x8] sm:$0xff]   ;;  %v3401_v3 = vpack.i.b16 %v7585_v16, %v7585_v16  ;;  %v7558_v4 = vld [vmem:[%s13003_s6 + $0x98] sm:$0xff] }
 0x47d   : > { %8431 = vmatprep.subr.bf16.mxu0 %v8701_v32 }
 0x47e   : > { %8022 = vmatmul.mubr.msk.bf16.gmra.mxu1 %vm585_vm0, %v8698_v37 }
 0x480   : > { %8432 = vmatpush3.bf16.msra.mxu0 %v8701_v32 }
 0x481   : > { %8433 = vmatprep.subr.bf16.mxu0 %v8702_v23 }
 0x483   : > { %2448 = vmatmul.mubr.bf16.gmra.mxu0 %v10607_v55  ;;  %v3350_v55 = vsel %vm2326_vm2, %v3342_v35, %v3322_v13  ;;  %v7559_v13 = vld [vmem:[%s13003_s6 + $0xa0] sm:$0xff]  ;;  %v7560_v35 = vld [vmem:[%s13003_s6 + $0xa8] sm:$0xff] }
 0x484   : > { %2455 = vmatprep.mubr.bf16.mxu0 %v10622_v8  ;;  %8434 = vmatpush3.bf16.msra.mxu0 %v8702_v23  ;;  %v10687_v8 = vrot.slane %v3401_v3, %v9955_v29  ;;  %v10690_v48 = vsel %vm2335_vm3, %v3350_v55, %v3330_v42 }
 0x485   : > { %8435 = vmatprep.subr.bf16.mxu0 %v8703_v15 }
 0x486   : > { %v3410_v0 = vmul.bf16 %v10687_v8, %v10690_v48 }
 0x488   : > { %8436 = vmatpush3.bf16.msra.mxu0 %v8703_v15 }
 0x489   : > { %8437 = vmatprep.subr.bf16.mxu0 %v8704_v51 }
 0x48b   : > { %2456 = vmatmul.mubr.bf16.gmra.mxu0 %v10633_v49 }
 0x48c   : > { %8438 = vmatpush3.bf16.msra.mxu0 %v8704_v51 }
 0x48d   : > { %8439 = vmatprep.subr.bf16.mxu0 %v8705_v54 }
 0x490   : > { %8440 = vmatpush3.bf16.msra.mxu0 %v8705_v54 }
 0x491   : > { %8023 = vmatprep.subr.bf16.mxu0 %v3410_v0 }
 0x4d9   : > { %v7963_v57 = vpop.f32.mrf.mxu1 }
 0x4db   : > { %v7964_v2 = vpop.f32.mrf.mxu1 }
 0x4dc   : > { %v7965_v19 = vadd.f32 %v7964_v2, %v7963_v57 }
 0x4dd   : > { %v7966_v27 = vpop.f32.mrf.mxu1 }
 0x4de   : > { %v2657_v39 = vmax.f32 %v7965_v19, 1e-30 }
 0x4df   : > { %v7967_v30 = vpop.f32.mrf.mxu1 }
 0x4e0   : > { %v7968_v60 = vadd.f32 %v7967_v30, %v7966_v27  ;;  %8900 = vrcp.f32 %v2657_v39  ;;  %v7561_v27 = vld [vmem:[%s13003_s6 + $0xb0] sm:$0xff] }
 0x4e1   : > { %v7969_v21 = vpop.f32.mrf.mxu1 }
 0x4e2   : > { %v2658_v9 = vmax.f32 %v7968_v60, 1e-30 }
 0x4e3   : > { %v7970_v63 = vpop.f32.mrf.mxu1 }
 0x4e4   : > { %v7971_v15 = vadd.f32 %v7970_v63, %v7969_v21  ;;  %8902 = vrcp.f32 %v2658_v9  ;;  %v7562_v21 = vld [vmem:[%s13003_s6 + $0xb8] sm:$0xff] }
 0x4e5   : > { %v7972_v14 = vpop.f32.mrf.mxu1 }
 0x4e6   : > { %v2659_v54 = vmax.f32 %v7971_v15, 1e-30 }
 0x4e7   : > { %v7973_v7 = vpop.f32.mrf.mxu1 }
 0x4e8   : > { %v7974_v51 = vadd.f32 %v7973_v7, %v7972_v14  ;;  %8904 = vrcp.f32 %v2659_v54 }
 0x4ea   : > { %v2660_v2 = vmax.f32 %v7974_v51, 1e-30 }
 0x4ec   : > { %8906 = vrcp.f32 %v2660_v2 }
 0x516   : > { %v7975_v25 = vpop.f32.mrf.mxu1 }
 0x518   : > { %v7976_v18 = vpop.f32.mrf.mxu1 }
 0x519   : > { %v7977_v19 = vadd.f32 %v7976_v18, %v7975_v25 }
 0x51a   : > { %v7978_v49 = vpop.f32.mrf.mxu1 }
 0x51c   : > { %v7979_v40 = vpop.f32.mrf.mxu1 }
 0x51e   : > { %v10694_v22 = vpop.f32.mrf.mxu1 }
 0x520   : > { %v10696_v6 = vpop.f32.mrf.mxu1 }
 0x522   : > { %v10698_v47 = vpop.f32.mrf.mxu1 }
 0x524   : > { %v10700_v44 = vpop.f32.mrf.mxu1 }
 0x526   : > { %v3168_v41 = vpop.f32.mrf.mxu1 }
 0x527   : > { %v10708_v46 = vadd.f32 %v7555_v11, %v3168_v41 }
 0x528   : > { %v3170_v10 = vpop.f32.mrf.mxu1 }
 0x529   : > { %v10710_v58 = vadd.f32 %v7556_v20, %v3170_v10  ;;  %v7980_v20 = vadd.f32 %v7979_v40, %v7978_v49  ;;  %v3312_v10 = vpop.permute.xlu1 %3311 }
 0x52a   : > { %v3172_v37 = vpop.f32.mrf.mxu1 }
 0x52b   : > { %v3207_v32 = vmax.f32 %v10708_v46, %v10710_v58  ;;  %v10720_v5 = vadd.f32 %v7557_v31, %v3172_v37  ;;  %v2661_v37 = vmax.f32 %v7977_v19, 1e-30  ;;  %v2662_v25 = vmax.f32 %v7980_v20, 1e-30 }
 0x52c   : > { %v3174_v23 = vpop.f32.mrf.mxu1 }
 0x52d   : > { %v10722_v16 = vadd.f32 %v7558_v4, %v3174_v23  ;;  %3208 = vmax.xlane.f32.xlu0 %v3207_v32  ;;  %v8901_v32 = vpop.eup %8900  ;;  %v3320_v23 = vpop.permute.xlu0 %3319  ;;  %8908 = vrcp.f32 %v2661_v37 }
 0x52e   : > { %v3178_v3 = vpop.f32.mrf.mxu1  ;;  %v8903_v15 = vpop.eup %8902  ;;  %8910 = vrcp.f32 %v2662_v25 }
 0x52f   : > { %v3210_v55 = vmax.f32 %v10720_v5, %v10722_v16  ;;  %v10732_v0 = vadd.f32 %v7559_v13, %v3178_v3  ;;  %v7583_v13 = vld [vmem:[%s13001_s4 + $0x1] sm:$0x1]  ;;  %v3328_v3 = vpop.permute.xlu1 %3327  ;;  %v8905_v19 = vpop.eup %8904 }
 0x530   : > { %v3180_v42 = vpop.f32.mrf.mxu1  ;;  %v3377_v2 = vpack.i.b16 %v7583_v13, %v7583_v13 }
 0x531   : > { %v10734_v57 = vadd.f32 %v7560_v35, %v3180_v42  ;;  %3211 = vmax.xlane.f32.xlu1 %v3210_v55  ;;  %v7983_v35 = vadd.f32 %v10696_v6, %v10694_v22  ;;  %v7986_v42 = vadd.f32 %v10700_v44, %v10698_v47  ;;  %v8907_v22 = vpop.eup %8906 }
 0x532   : > { %v3182_v30 = vpop.f32.mrf.mxu1  ;;  %v10760_v6 = vrot.slane %v3377_v2, %v9955_v29 }
 0x533   : > { %v3213_v63 = vmax.f32 %v10732_v0, %v10734_v57  ;;  %v7923_v14 = vpop.f32.mrf.mxu0  ;;  %v10744_v60 = vadd.f32 %v7561_v27, %v3182_v30  ;;  %v3310_v30 = vpop.permute.xlu0 %3309 }
 0x534   : > { %v3184_v7 = vpop.f32.mrf.mxu1 }
 0x535   : > { %v10746_v11 = vadd.f32 %v7562_v21, %v3184_v7  ;;  %3214 = vmax.xlane.f32.xlu0 %v3213_v63  ;;  %v7924_v41 = vpop.f32.mrf.mxu0  ;;  %v3339_v63 = vsel %vm585_vm0, %v10452_v53, %v3312_v10  ;;  %v3336_v53 = vsel %vm585_vm0, %v10462_v52, %v3310_v30 }
 0x536   : > { %v7925_v31 = vadd.f32 %v7924_v41, %v7923_v14  ;;  %v2663_v14 = vmax.f32 %v7983_v35, 1e-30  ;;  %v2664_v41 = vmax.f32 %v7986_v42, 1e-30  ;;  %v3348_v44 = vsel %vm2326_vm2, %v3339_v63, %v3320_v23 }
 0x537   : > { %v3216_v39 = vmax.f32 %v10744_v60, %v10746_v11  ;;  %v7926_v9 = vpop.f32.mrf.mxu0  ;;  %v10764_v37 = vsel %vm2335_vm3, %v3348_v44, %v3328_v3 }
 0x538   : > { %v2673_v49 = vmul.f32 %v8901_v32, %v7925_v31  ;;  %8912 = vrcp.f32 %v2663_v14  ;;  %v3326_v32 = vpop.permute.xlu0 %3325  ;;  %v3385_v35 = vmul.bf16 %v10760_v6, %v10764_v37 }
 0x539   : > { %3217 = vmax.xlane.f32.xlu1 %v3216_v39  ;;  %v7927_v4 = vpop.f32.mrf.mxu0  ;;  %v3318_v39 = vpop.permute.xlu1 %3317  ;;  %8914 = vrcp.f32 %v2664_v41 }
 0x53a   : > { %v7928_v18 = vadd.f32 %v7927_v4, %v7926_v9  ;;  %v3346_v4 = vsel %vm2326_vm2, %v3336_v53, %v3318_v39 }
 0x53b   : > { %v7929_v51 = vpop.f32.mrf.mxu0  ;;  %v10774_v13 = vsel %vm2335_vm3, %v3346_v4, %v3326_v32  ;;  %v7563_v32 = vld [vmem:[%s13003_s6 + $0xc0] sm:$0xff] }
 0x53c   : > { %v2674_v40 = vmul.f32 %v8903_v15, %v7928_v18  ;;  %v3386_v18 = vmul.bf16 %v10760_v6, %v10690_v48  ;;  %v3408_v2 = vmul.bf16 %v10687_v8, %v10774_v13  ;;  %v3384_v63 = vmul.bf16 %v10760_v6, %v10774_v13 }
 0x53d   : > { %v7930_v55 = vpop.f32.mrf.mxu0 }
 0x53e   : > { %v2681_v54 = vpack.c.bf16 %v2674_v40, %v2673_v49  ;;  %v7931_v21 = vadd.f32 %v7930_v55, %v7929_v51  ;;  %v3409_v51 = vmul.bf16 %v10687_v8, %v10764_v37  ;;  %v8909_v49 = vpop.eup %8908 }
 0x53f   : > { %v7932_v27 = vpop.f32.mrf.mxu0  ;;  %v8911_v3 = vpop.eup %8910 }
 0x540   : > { %8441 = vmatprep.mubr.bf16.mxu0 %v2681_v54  ;;  %v2675_v9 = vmul.f32 %v8905_v19, %v7931_v21 }
 0x541   : > { %v7933_v7 = vpop.f32.mrf.mxu0 }
 0x542   : > { %v7934_v20 = vadd.f32 %v7933_v7, %v7932_v27  ;;  %v3188_v27 = vpop.f32.mrf.mxu1 }
 0x543   : > { %v7935_v47 = vpop.f32.mrf.mxu0 }
 0x544   : > { %v2676_v31 = vmul.f32 %v8907_v22, %v7934_v20  ;;  %v3190_v19 = vpop.f32.mrf.mxu1 }
 0x545   : > { %v7936_v10 = vpop.f32.mrf.mxu0  ;;  %v8913_v41 = vpop.eup %8912 }
 0x546   : > { %v2682_v25 = vpack.c.bf16 %v2676_v31, %v2675_v9  ;;  %v7937_v23 = vadd.f32 %v7936_v10, %v7935_v47  ;;  %v8915_v22 = vpop.eup %8914  ;;  %v3192_v44 = vpop.f32.mrf.mxu1  ;;  %v7564_v10 = vld [vmem:[%s13003_s6 + $0xc8] sm:$0xff] }
 0x547   : > { %v7938_v15 = vpop.f32.mrf.mxu0 }
 0x548   : > { %8442 = vmatmul.mubr.bf16.vlgmr.msra.gmra.mxu0 %v2682_v25  ;;  %v2677_v42 = vmul.f32 %v8909_v49, %v7937_v23  ;;  %v3194_v31 = vpop.f32.mrf.mxu1  ;;  %v10792_v25 = vadd.f32 %v7564_v10, %v3190_v19  ;;  %v7567_v49 = vld [vmem:[%s13003_s6 + $0xe0] sm:$0xff]  ;;  %v8715_v19 = vld [vmem:[%s13004_s7 + $0x38] sm:$0xff]  }
 0x549   : > { %8024 = vmatpush3.bf16.msra.mxu0 %v3386_v18  ;;  %v7939_v52 = vpop.f32.mrf.mxu0  ;;  %v7566_v18 = vld [vmem:[%s13003_s6 + $0xd8] sm:$0xff]  ;;  %8449 = vmatprep.subr.bf16.mxu1 %v8715_v19 }
 0x54a   : > { %3323 = vrot.lane.b32.xlu1 %v10468_v61, %s13021_s18  ;;  %v7940_v40 = vadd.f32 %v7939_v52, %v7938_v15  ;;  %8025 = vmatprep.subr.bf16.mxu0 %v3409_v51  ;;  %v3198_v53 = vpop.f32.mrf.mxu1  ;;  %v7568_v15 = vld [vmem:[%s13003_s6 + $0xe8] sm:$0xff]  ;;  %v10800_v51 = vadd.f32 %v7563_v32, %v3188_v27  ;;  %v7565_v52 = vld [vmem:[%s13003_s6 + $0xd0] sm:$0xff]  ;;  %v3363_v32 = vld [vmem:[%s13001_s4] sm:$0x1] }
 0x54b   : > { %3315 = vrot.lane.b32.xlu0 %v10468_v61, %s13019_s29  ;;  %v7941_v55 = vpop.f32.mrf.mxu0  ;;  %v7569_v27 = vld [vmem:[%s13003_s6 + $0xf0] sm:$0xff]  ;;  %8450 = vmatpush3.bf16.msra.mxu1 %v8715_v19 }
 0x54c   : > { %v2678_v54 = vmul.f32 %v8911_v3, %v7940_v40  ;;  %v3200_v4 = vpop.f32.mrf.mxu1  ;;  %v3219_v40 = vmax.f32 %v10800_v51, %v10792_v25  ;;  %v10810_v3 = vadd.f32 %v7566_v18, %v3194_v31 }
 0x54d   : > { %8026 = vmatpush3.bf16.msra.mxu0 %v3385_v35  ;;  %v7942_v30 = vpop.f32.mrf.mxu0  ;;  %v10812_v35 = vadd.f32 %v7568_v15, %v3200_v4  ;;  %v7584_v4 = vld [vmem:[%s13001_s4 + $0x2] sm:$0x1] }
 0x54e   : > { %8027 = vmatprep.subr.bf16.mxu0 %v3408_v2  ;;  %v2683_v21 = vpack.c.bf16 %v2678_v54, %v2677_v42  ;;  %v7943_v7 = vadd.f32 %v7942_v30, %v7941_v55  ;;  %v3202_v23 = vpop.f32.mrf.mxu1  ;;  %v7570_v55 = vld [vmem:[%s13003_s6 + $0xf8] sm:$0xff]  ;;  %v10817_v54 = vadd.f32 %v7565_v52, %v3192_v44  ;;  %v10819_v2 = vadd.f32 %v7567_v49, %v3198_v53  ;;  %v9193_v49 = vld [vmem:[#allocation2 + $0x20] sm:$0xff]  }
 0x54f   : > { %v7944_v14 = vpop.f32.mrf.mxu0  ;;  %v3389_v15 = vpack.i.b16 %v7584_v4, %v7584_v4  ;;  %v3365_v52 = vpack.i.b16 %v3363_v32, %v3363_v32  ;;  %v8711_v4 = vld [vmem:[%s13002_s5 + $0x38] sm:$0xff]  }
 0x550   : > { %8445 = vmatprep.mubr.bf16.mxu0 %v2683_v21  ;;  %v2679_v39 = vmul.f32 %v8913_v41, %v7943_v7  ;;  %v3204_v42 = vpop.f32.mrf.mxu1  ;;  %v3222_v30 = vmax.f32 %v10817_v54, %v10810_v3  ;;  %v3225_v21 = vmax.f32 %v10819_v2, %v10812_v35  ;;  %v8721_v41 = vld [vmem:[%s13004_s7 + $0x28] sm:$0xff]  }
 0x551   : > { %8028 = vmatpush3.bf16.msra.mxu0 %v3384_v63  ;;  %v7945_v61 = vpop.f32.mrf.mxu0  ;;  %v10828_v63 = vadd.f32 %v7570_v55, %v3204_v42 }
 0x552   : > { %v7946_v20 = vadd.f32 %v7945_v61, %v7944_v14  ;;  %v10830_v14 = vadd.f32 %v7569_v27, %v3202_v23  ;;  %v8718_v61 = vld [vmem:[%s13004_s7 + $0x30] sm:$0xff]  }
 0x553   : > { %8451 = vmatprep.subr.bf16.mxu1 %v8718_v61 }
 0x554   : > { %v2680_v47 = vmul.f32 %v8915_v22, %v7946_v20  ;;  %v3228_v7 = vmax.f32 %v10830_v14, %v10828_v63  ;;  %8452 = vmatpush3.bf16.msra.mxu1 %v8718_v61  ;;  %v8724_v20 = vld [vmem:[%s13004_s7 + $0x20] sm:$0xff]   ;;  %v8727_v22 = vld [vmem:[%s13004_s7 + $0x18] sm:$0xff]  }
 0x555   : > { %8453 = vmatprep.subr.bf16.mxu1 %v8721_v41 }
 0x556   : > { %v2684_v9 = vpack.c.bf16 %v2680_v47, %v2679_v39 }
 0x558   : > { %8446 = vmatmul.mubr.bf16.gmra.mxu0 %v2684_v9  ;;  %8454 = vmatpush3.bf16.msra.mxu1 %v8721_v41  ;;  %v3370_v41 = vrot.slane %v3365_v52, %v9955_v29 }
 0x559   : > { %8455 = vmatprep.subr.bf16.mxu1 %v8724_v20 }
 0x55c   : > { %8456 = vmatpush3.bf16.msra.mxu1 %v8724_v20 }
 0x55d   : > { %8457 = vmatprep.subr.bf16.mxu1 %v8727_v22 }
 0x560   : > { %8458 = vmatpush3.bf16.msra.mxu1 %v8727_v22 }
 0x56a   : > { %3220 = vmax.xlane.f32.xlu0 %v3219_v40 }
 0x56e   : > { %3223 = vmax.xlane.f32.xlu1 %v3222_v30  ;;  %3226 = vmax.xlane.f32.xlu0 %v3225_v21  ;;  %v3394_v30 = vrot.slane %v3389_v15, %v9955_v29 }
 0x572   : > { %3229 = vmax.xlane.f32.xlu0 %v3228_v7 }
 0x57f   : > { %1744 = vrot.lane.b32.xlu1 %v10043_v36, %s13021_s18  ;;  %v10896_v36 = vld [vmem:[#allocation2 + $0x40] sm:$0xff]  }
 0x583   : > { %1738 = vrot.lane.b32.xlu1 %v10038_v62, %s13021_s18  ;;  %v8730_v62 = vld [vmem:[%s13004_s7 + $0x10] sm:$0xff]  }
 0x584   : > { %8459 = vmatprep.subr.bf16.mxu1 %v8730_v62 }
 0x585   : > { %8460 = vmatpush3.bf16.msra.mxu1 %v8730_v62 }
 0x587   : > { %1740 = vrot.lane.b32.xlu1 %v10049_v12, %s13021_s18  ;;  %v3308_v12 = vpop.permute.xlu1 %3307 }
 0x588   : > { %1742 = vrot.lane.b32.xlu0 %v10033_v17, %s13021_s18  ;;  %v8732_v17 = vld [vmem:[%s13004_s7 + $0x8] sm:$0xff]  }
 0x589   : > { %8461 = vmatprep.subr.bf16.mxu1 %v8732_v17 }
 0x58a   : > { %8462 = vmatpush3.bf16.msra.mxu1 %v8732_v17 }
 0x58b   : > { %1736 = vrot.lane.b32.xlu1 %v10023_v34, %s13021_s18  ;;  %v10871_v34 = vld [vmem:[#allocation2 + $0x58] sm:$0xff]  }
 0x58c   : > { %1734 = vrot.lane.b32.xlu0 %v10013_v28, %s13021_s18  ;;  %v8733_v28 = vld [vmem:[%s13004_s7] sm:$0xff]  }
 0x58d   : > { %8463 = vmatprep.subr.bf16.mxu1 %v8733_v28 }
 0x58e   : > { %8464 = vmatpush3.bf16.msra.mxu1 %v8733_v28  ;;  %v3374_v28 = vmul.bf16 %v3370_v41, %v10690_v48 }
 0x58f   : > { %1732 = vrot.lane.b32.xlu1 %v10028_v50, %s13021_s18  ;;  %v10880_v50 = vld [vmem:[#allocation2 + $0x50] sm:$0xff]  }
 0x590   : > { %1730 = vrot.lane.b32.xlu0 %v10018_v45, %s13021_s18  ;;  %v10890_v45 = vld [vmem:[#allocation2 + $0x48] sm:$0xff]  }
 0x593   : > { %4333 = vrot.lane.b32.xlu1 %v10871_v34, %s13019_s29 }
 0x594   : > { %4325 = vrot.lane.b32.xlu0 %v10871_v34, %s13031_s19 }
 0x597   : > { %4323 = vrot.lane.b32.xlu1 %v10880_v50, %s13031_s19 }
 0x598   : > { %4341 = vrot.lane.b32.xlu0 %v10871_v34, %s13021_s18 }
 0x59b   : > { %4339 = vrot.lane.b32.xlu1 %v10880_v50, %s13021_s18 }
 0x59c   : > { %4331 = vrot.lane.b32.xlu0 %v10880_v50, %s13019_s29 }
 0x59f   : > { %4329 = vrot.lane.b32.xlu1 %v10890_v45, %s13019_s29 }
 0x5a0   : > { %4321 = vrot.lane.b32.xlu0 %v10890_v45, %s13031_s19 }
 0x5a3   : > { %4319 = vrot.lane.b32.xlu1 %v10896_v36, %s13031_s19 }
 0x5a4   : > { %4337 = vrot.lane.b32.xlu0 %v10890_v45, %s13021_s18 }
 0x5b6   : > { %v3209_v39 = vpop.xlane.xlu0 %3208 }
 0x5b7   : > { %v3232_v47 = vsub.f32 %v10710_v58, %v3209_v39  ;;  %v3231_v55 = vsub.f32 %v10708_v46, %v3209_v39  ;;  %v3398_v46 = vmul.bf16 %v3394_v30, %v10690_v48  ;;  %v3372_v48 = vmul.bf16 %v3370_v41, %v10774_v13 }
 0x5b9   : > { %v3249_v9 = vmul.f32 1.442695, %v3232_v47 }
 0x5ba   : > { %v3212_v44 = vpop.xlane.xlu1 %3211 }
 0x5bb   : > { %v3234_v31 = vsub.f32 %v10722_v16, %v3212_v44  ;;  %8916 = vpow2.f32 %v3249_v9  ;;  %v3233_v58 = vsub.f32 %v10720_v5, %v3212_v44  ;;  %v3333_v16 = vsel %vm585_vm0, %v9193_v49, %v3308_v12  ;;  %v8710_v9 = vld [vmem:[%s13002_s5 + $0x78] sm:$0xff]  }
 0x5bc   : > { %v3397_v12 = vmul.bf16 %v3394_v30, %v10764_v37  ;;  %v3396_v44 = vmul.bf16 %v3394_v30, %v10774_v13  ;;  %v8712_v13 = vld [vmem:[%s13002_s5 + $0x70] sm:$0xff]  }
 0x5bd   : > { %v3253_v53 = vmul.f32 1.442695, %v3234_v31  ;;  %v3251_v19 = vmul.f32 1.442695, %v3233_v58  ;;  %v8714_v58 = vld [vmem:[%s13002_s5 + $0x68] sm:$0xff]  }
 0x5be   : > { %v3215_v10 = vpop.xlane.xlu0 %3214 }
 0x5bf   : > { %8918 = vpow2.f32 %v3253_v53  ;;  %v3236_v21 = vsub.f32 %v10734_v57, %v3215_v10 }
 0x5c0   : > { %8920 = vpow2.f32 %v3251_v19  ;;  %v8726_v19 = vld [vmem:[%s13002_s5 + $0x48] sm:$0xff]  }
 0x5c1   : > { %v3257_v22 = vmul.f32 1.442695, %v3236_v21  ;;  %v8723_v21 = vld [vmem:[%s13002_s5 + $0x50] sm:$0xff]  }
 0x5c2   : > { %v3218_v18 = vpop.xlane.xlu1 %3217  ;;  %v3316_v23 = vpop.permute.xlu0 %3315 }
 0x5c3   : > { %v3238_v40 = vsub.f32 %v10746_v11, %v3218_v18  ;;  %v3344_v42 = vsel %vm2326_vm2, %v3333_v16, %v3316_v23  ;;  %v3247_v11 = vmul.f32 1.442695, %v3231_v55  ;;  %v3237_v57 = vsub.f32 %v10744_v60, %v3218_v18  ;;  %v8713_v23 = vld [vmem:[%s13002_s5 + $0x30] sm:$0xff]   ;;  %v8716_v16 = vld [vmem:[%s13002_s5 + $0x28] sm:$0xff]   ;;  %v8717_v55 = vld [vmem:[%s13002_s5 + $0x60] sm:$0xff]  }
 0x5c4   : > { %v3373_v60 = vmul.bf16 %v3370_v41, %v10764_v37 }
 0x5c5   : > { %v3261_v20 = vmul.f32 1.442695, %v3238_v40  ;;  %v3259_v39 = vmul.f32 1.442695, %v3237_v57 }
 0x5c6   : > { %v3324_v27 = vpop.permute.xlu1 %3323 }
 0x5c7   : > { %v3352_v7 = vsel %vm2335_vm3, %v3344_v42, %v3324_v27  ;;  %8922 = vpow2.f32 %v3261_v20  ;;  %v8719_v42 = vld [vmem:[%s13002_s5 + $0x20] sm:$0xff]   ;;  %v8720_v27 = vld [vmem:[%s13002_s5 + $0x58] sm:$0xff]  }
 0x5c8   : > { %v3383_v5 = vmul.bf16 %v10760_v6, %v3352_v7  ;;  %v3407_v61 = vmul.bf16 %v10687_v8, %v3352_v7  ;;  %v8917_v62 = vpop.eup %8916  ;;  %8924 = vpow2.f32 %v3247_v11  ;;  %v3235_v8 = vsub.f32 %v10732_v0, %v3215_v10  ;;  %v8729_v11 = vld [vmem:[%s13002_s5 + $0x40] sm:$0xff]  }
 0x5c9   : > { %8926 = vpow2.f32 %v3257_v22  ;;  %v3395_v0 = vmul.bf16 %v3394_v30, %v3352_v7  ;;  %v3371_v53 = vmul.bf16 %v3370_v41, %v3352_v7  ;;  %v8722_v30 = vld [vmem:[%s13002_s5 + $0x18] sm:$0xff]   ;;  %v8725_v7 = vld [vmem:[%s13002_s5 + $0x10] sm:$0xff]  }
 0x5ca   : > { %8029 = vmatprep.subr.bf16.mxu0 %v3407_v61  ;;  %v3255_v47 = vmul.f32 1.442695, %v3235_v8  ;;  %8928 = vpow2.f32 %v3259_v39  ;;  %v8728_v61 = vld [vmem:[%s13002_s5 + $0x8] sm:$0xff]  }
 0x5cb   : > { %8030 = vmatpush3.bf16.msra.mxu0 %v3383_v5 }
 0x5cc   : > { %8031 = vmatprep.subr.bf16.mxu0 %v3398_v46  ;;  %v8919_v17 = vpop.eup %8918  ;;  %8930 = vpow2.f32 %v3255_v47 }
 0x5cd   : > { %v10925_v6 = vpack.c.bf16 %v8919_v17, %v8917_v62  ;;  %v8921_v31 = vpop.eup %8920  ;;  %v8731_v17 = vld [vmem:[%s13002_s5] sm:$0xff]  }
 0x5cf   : > { %8032 = vmatpush3.bf16.msra.mxu0 %v3374_v28  ;;  %3443 = vmatprep.mubr.bf16.mxu0 %v10925_v6 }
 0x5d0   : > { %8033 = vmatprep.subr.bf16.mxu0 %v3397_v12 }
 0x5d3   : > { %8034 = vmatpush3.bf16.msra.mxu0 %v3373_v60 }
 0x5d4   : > { %8035 = vmatprep.subr.bf16.mxu0 %v3396_v44  ;;  %v8923_v10 = vpop.eup %8922 }
 0x5d5   : > { %v8925_v37 = vpop.eup %8924 }
 0x5d6   : > { %v8927_v32 = vpop.eup %8926  ;;  %v10938_v18 = vpack.c.bf16 %v8921_v31, %v8925_v37 }
 0x5d7   : > { %8036 = vmatpush3.bf16.msra.mxu0 %v3372_v48  ;;  %v10943_v15 = vpack.c.bf16 %v8923_v10, %v8927_v32  ;;  %v8929_v52 = vpop.eup %8928  ;;  %v1828_v32 = vld [vmem:[%s9362_s30 + $0x10] sm:$0xff] }
 0x5d8   : > { %8037 = vmatprep.subr.bf16.mxu0 %v3395_v0 }
 0x5d9   : > { %v8931_v49 = vpop.eup %8930 }
 0x5da   : > { %v10956_v40 = vpack.c.bf16 %v8929_v52, %v8931_v49  ;;  %v7664_v49 = vld [vmem:[%s13001_s4 + $0x3] sm:$0x1] }
 0x5db   : > { %8038 = vmatpush3.bf16.msra.mxu0 %v3371_v53 }
 0x5dc   : > { %8063 = vmatprep.subr.bf16.mxu0 %v8710_v9 }
 0x5de   : > { %3444 = vmatmul.mubr.bf16.vlgmr.msra.gmra.mxu0 %v10938_v18 }
 0x5df   : > { %3451 = vmatprep.mubr.bf16.mxu0 %v10943_v15  ;;  %8064 = vmatpush3.bf16.msra.mxu0 %v8711_v4 }
 0x5e0   : > { %8065 = vmatprep.subr.bf16.mxu0 %v8712_v13 }
 0x5e3   : > { %8066 = vmatpush3.bf16.msra.mxu0 %v8713_v23 }
 0x5e4   : > { %8067 = vmatprep.subr.bf16.mxu0 %v8714_v58 }
 0x5e6   : > { %3452 = vmatmul.mubr.bf16.gmra.mxu0 %v10956_v40 }
 0x5e7   : > { %8068 = vmatpush3.bf16.msra.mxu0 %v8716_v16 }
 0x5e8   : > { %8069 = vmatprep.subr.bf16.mxu0 %v8717_v55 }
 0x5eb   : > { %8070 = vmatpush3.bf16.msra.mxu0 %v8719_v42  ;;  %v11021_v42 = vld [vmem:[%s13005_s8] ss:$0 sm:$0xff] }
 0x5ec   : > { %8071 = vmatprep.subr.bf16.mxu0 %v8720_v27  ;;  %v1826_v27 = vld [vmem:[%s9362_s30] sm:$0xff] }
 0x5ef   : > { %8072 = vmatpush3.bf16.msra.mxu0 %v8722_v30 }
 0x5f0   : > { %8073 = vmatprep.subr.bf16.mxu0 %v8723_v21 }
 0x5f3   : > { %v3221_v5 = vpop.xlane.xlu0 %3220  ;;  %8074 = vmatpush3.bf16.msra.mxu0 %v8725_v7 }
 0x5f4   : > { %v3239_v41 = vsub.f32 %v10800_v51, %v3221_v5  ;;  %v3240_v20 = vsub.f32 %v10792_v25, %v3221_v5  ;;  %8075 = vmatprep.subr.bf16.mxu0 %v8726_v19  ;;  %v7616_v25 = vld [vmem:[%s13000_s3 + $0x3] sm:$0x1]  ;;  %v7612_v5 = vld [vmem:[%s13000_s3 + $0x1] sm:$0x1] }
 0x5f5   : > { %v3951_v44 = vpack.i.b16 %v7616_v25, %v7616_v25 }
 0x5f6   : > { %v3263_v46 = vmul.f32 1.442695, %v3239_v41  ;;  %v3265_v22 = vmul.f32 1.442695, %v3240_v20 }
 0x5f7   : > { %v3224_v62 = vpop.xlane.xlu1 %3223  ;;  %v3227_v57 = vpop.xlane.xlu0 %3226  ;;  %8076 = vmatpush3.bf16.msra.mxu0 %v8728_v61  ;;  %v3956_v10 = vrot.slane %v3951_v44, %v9955_v29 }
 0x5f8   : > { %v3241_v28 = vsub.f32 %v10817_v54, %v3224_v62  ;;  %v3242_v51 = vsub.f32 %v10810_v3, %v3224_v62  ;;  %8077 = vmatprep.subr.bf16.mxu0 %v8729_v11  ;;  %v3244_v8 = vsub.f32 %v10812_v35, %v3227_v57  ;;  %8932 = vpow2.f32 %v3263_v46  ;;  %v1829_v11 = vld [vmem:[%s9362_s30 + $0x18] sm:$0xff] }
 0x5f9   : > { %8934 = vpow2.f32 %v3265_v22  ;;  %v3243_v0 = vsub.f32 %v10819_v2, %v3227_v57  ;;  %v11006_v2 = vcombine.low %v3956_v10, %v3956_v10  ;;  %v4413_v22 = vpack.i.b16 %v7664_v49, %v7664_v49  ;;  %v1832_v49 = vld [vmem:[%s9362_s30 + $0x30] sm:$0xff] }
 0x5fa   : > { %v3267_v12 = vmul.f32 1.442695, %v3241_v28  ;;  %v3269_v39 = vmul.f32 1.442695, %v3242_v51  ;;  %v3273_v48 = vmul.f32 1.442695, %v3244_v8 }
 0x5fb   : > { %v1745_v60 = vpop.permute.xlu1 %1744  ;;  %v3230_v47 = vpop.xlane.xlu0 %3229  ;;  %8078 = vmatpush3.bf16.msra.mxu0 %v8731_v17  ;;  %v3271_v37 = vmul.f32 1.442695, %v3243_v0  ;;  %v1827_v8 = vld [vmem:[%s9362_s30 + $0x8] sm:$0xff] }
 0x5fc   : > { %8936 = vpow2.f32 %v3267_v12  ;;  %1817 = vst.msk [vmem:[#allocation4 + $0x5c] sm:$0xf] %vm1273_vm1, %v1745_v60  ;;  %v3245_v3 = vsub.f32 %v10830_v14, %v3230_v47  ;;  %v3246_v54 = vsub.f32 %v10828_v63, %v3230_v47  ;;  %v3911_v12 = vpack.i.b16 %v7612_v5, %v7612_v5 }
 0x5fd   : > { %8938 = vpow2.f32 %v3269_v39 }
 0x5fe   : > { %v3277_v35 = vmul.f32 1.442695, %v3246_v54  ;;  %8940 = vpow2.f32 %v3273_v48  ;;  %v3275_v53 = vmul.f32 1.442695, %v3245_v3  ;;  %v11045_v3 = vrot.slane %v4413_v22, %v9955_v29 }
 0x5ff   : > { %v1739_v9 = vpop.permute.xlu1 %1738  ;;  %v1743_v31 = vpop.permute.xlu0 %1742 }
 0x600   : > { %1814 = vst.msk [vmem:[#allocation4 + $0x50] sm:$0xf] %vm1273_vm1, %v1739_v9  ;;  %1816 = vst.msk [vmem:[#allocation4 + $0x58] sm:$0xf] %vm1273_vm1, %v1743_v31  ;;  %8942 = vpow2.f32 %v3277_v35 }
 0x601   : > { %8944 = vpow2.f32 %v3275_v53 }
 0x602   : > { %8946 = vpow2.f32 %v3271_v37  ;;  %v3916_v37 = vrot.slane %v3911_v12, %v9955_v29 }
 0x603   : > { %v1741_v14 = vpop.permute.xlu1 %1740  ;;  %v1735_v4 = vpop.permute.xlu0 %1734  ;;  %v11008_v63 = vld [vmem:[#allocation4 + $0x5c] sm:$0xf] }
 0x604   : > { %1815 = vst.msk [vmem:[#allocation4 + $0x54] sm:$0xf] %vm1273_vm1, %v1741_v14  ;;  %1812 = vst.msk [vmem:[#allocation4 + $0x48] sm:$0xf] %vm1273_vm1, %v1735_v4  ;;  %v3968_v21 = vmul.bf16 %v11006_v2, %v11008_v63 }
 0x605   : > { %v8933_v13 = vpop.eup %8932 }
 0x606   : > { %v8935_v16 = vpop.eup %8934 }
 0x607   : > { %v1737_v23 = vpop.permute.xlu1 %1736  ;;  %v1731_v58 = vpop.permute.xlu0 %1730  ;;  %v11011_v52 = vld [vmem:[#allocation4 + $0x58] sm:$0xf] }
 0x608   : > { %1813 = vst.msk [vmem:[#allocation4 + $0x4c] sm:$0xf] %vm1273_vm1, %v1737_v23  ;;  %1810 = vst.msk [vmem:[#allocation4 + $0x40] sm:$0xf] %vm1273_vm1, %v1731_v58  ;;  %v8443_v55 = vpop.f32.mrf.mxu0  ;;  %v3967_v30 = vmul.bf16 %v11006_v2, %v11011_v52  ;;  %v11066_v58 = vcombine.low %v3916_v37, %v3916_v37 }
 0x609   : > { %v8937_v7 = vpop.eup %8936  ;;  %v2816_v19 = vadd.f32 %v8443_v55, %v1828_v32 }
 0x60a   : > { %v8939_v61 = vpop.eup %8938  ;;  %v2783_v41 = vpop.f32.mrf.mxu0  ;;  %v7633_v20 = vcombine.low %v3967_v30, %v3968_v21  ;;  %v11032_v46 = vpack.c.bf16 %v8937_v7, %v8933_v13  ;;  %v1830_v30 = vld [vmem:[%s9362_s30 + $0x20] sm:$0xff]  ;;  %v3928_v21 = vmul.bf16 %v11066_v58, %v11008_v63 }
 0x60b   : > { %v2831_v62 = vadd.f32 %v11021_v42, %v2816_v19  ;;  %v1733_v57 = vpop.permute.xlu1 %1732  ;;  %v2814_v17 = vadd.f32 %v2783_v41, %v1826_v27  ;;  %v4326_v28 = vpop.permute.xlu0 %4325  ;;  %v11035_v51 = vpack.c.bf16 %v8939_v61, %v8935_v16  ;;  %v3927_v16 = vmul.bf16 %v11066_v58, %v11011_v52  ;;  %v11073_v55 = vld [vmem:[#allocation4 + $0x54] sm:$0xf]  ;;  %v11078_v19 = vld [vmem:[#allocation4 + $0x50] sm:$0xf]  ;;  %v1833_v61 = vld [vmem:[%s9362_s30 + $0x38] sm:$0xff] }
 0x60c   : > { %1811 = vst.msk [vmem:[#allocation4 + $0x44] sm:$0xf] %vm1273_vm1, %v1733_v57  ;;  %8637 = vmatprep.subr.msk.bf16.mxu0 %vm585_vm0, %v7633_v20  ;;  %v8444_v25 = vpop.f32.mrf.mxu0  ;;  %v8941_v39 = vpop.eup %8940  ;;  %v4354_v54 = vsel %vm585_vm0, %v10871_v34, %v4326_v28  ;;  %v3966_v20 = vmul.bf16 %v11006_v2, %v11073_v55  ;;  %v1831_v57 = vld [vmem:[%s9362_s30 + $0x28] sm:$0xff] }
 0x60d   : > { %2839 = vst.msk [vmem:[#allocation5 + $0x10] sm:$0xff] %vm585_vm0, %v2831_v62  ;;  %v2829_v60 = vadd.f32 %v11021_v42, %v2814_v17  ;;  %3459 = vmatprep.mubr.bf16.mxu0 %v11035_v51  ;;  %v2817_v47 = vadd.f32 %v8444_v25, %v1829_v11  ;;  %v8943_v44 = vpop.eup %8942  ;;  %v7625_v41 = vcombine.low %v3927_v16, %v3928_v21 }
 0x60e   : > { %3460 = vmatmul.mubr.bf16.gmra.mxu0 %v11032_v46  ;;  %v2786_v48 = vpop.f32.mrf.mxu0  ;;  %v11051_v53 = vpack.c.bf16 %v8943_v44, %v8941_v39  ;;  %v8945_v14 = vpop.eup %8944  ;;  %v3965_v62 = vmul.bf16 %v11006_v2, %v11078_v19  ;;  %v3926_v39 = vmul.bf16 %v11066_v58, %v11073_v55 }
 0x60f   : > { %2837 = vst.msk [vmem:[#allocation5] sm:$0xff] %vm585_vm0, %v2829_v60  ;;  %v2832_v0 = vadd.f32 %v11021_v42, %v2817_v47  ;;  %v4334_v35 = vpop.permute.xlu1 %4333  ;;  %v2815_v9 = vadd.f32 %v2786_v48, %v1827_v8  ;;  %v4342_v31 = vpop.permute.xlu0 %4341  ;;  %v4120_v25 = vsel %vm585_vm0, %v7625_v41, 0  ;;  %v11096_v44 = vld [vmem:[#allocation4 + $0x4c] sm:$0xf] }
 0x610   : > { %v4362_v10 = vsel %vm2326_vm2, %v4354_v54, %v4334_v35  ;;  %3467 = vmatprep.mubr.bf16.mxu0 %v11051_v53  ;;  %v8947_v13 = vpop.eup %8946  ;;  %v7632_v8 = vcombine.low %v3965_v62, %v3966_v20  ;;  %v11103_v54 = vld [vmem:[#allocation4 + $0x48] sm:$0xf]  ;;  %v3964_v35 = vmul.bf16 %v11006_v2, %v11096_v44  ;;  %v3924_v37 = vmul.bf16 %v11066_v58, %v11096_v44 }
 0x611   : > { %2840 = vst.msk [vmem:[#allocation5 + $0x18] sm:$0xff] %vm585_vm0, %v2832_v0  ;;  %v2830_v4 = vadd.f32 %v11021_v42, %v2815_v9  ;;  %v11058_v34 = vsel %vm2335_vm3, %v4362_v10, %v4342_v31  ;;  %v11064_v23 = vpack.c.bf16 %v8945_v14, %v8947_v13  ;;  %v7614_v9 = vld [vmem:[%s13000_s3 + $0x2] sm:$0x1] }
 0x612   : > { %v4422_v32 = vmul.bf16 %v11045_v3, %v11058_v34  ;;  %v3881_v13 = vld [vmem:[#allocation4 + $0x40] sm:$0xf] }
 0x613   : > { %2838 = vst.msk [vmem:[#allocation5 + $0x8] sm:$0xff] %vm585_vm0, %v2830_v4  ;;  %v3882_v14 = vld [vmem:[#allocation4 + $0x44] sm:$0xf]  ;;  %v3923_v4 = vmul.bf16 %v11066_v58, %v11103_v54 }
 0x614   : > { %8139 = vmatprep.subr.bf16.mxu1 %v4422_v32  ;;  %v3931_v32 = vpack.i.b16 %v7614_v9, %v7614_v9  ;;  %v3962_v16 = vmul.bf16 %v11006_v2, %v3882_v14 }
 0x616   : > { %3468 = vmatmul.mubr.bf16.gmra.mxu0 %v11064_v23 }
 0x617   : > { %3636 = vmatprep.mubr.bf16.mxu0 %v10925_v6 }
 0x618   : > { %v8447_v27 = vpop.f32.mrf.mxu0 }
 0x619   : > { %v2820_v7 = vadd.f32 %v8447_v27, %v1832_v49  ;;  %v7623_v49 = vcombine.low %v3923_v4, %v3924_v37  ;;  %v3961_v27 = vmul.bf16 %v11006_v2, %v3881_v13 }
 0x61a   : > { %v2799_v5 = vpop.f32.mrf.mxu0 }
 0x61b   : > { %v2835_v11 = vadd.f32 %v11021_v42, %v2820_v7  ;;  %v2818_v22 = vadd.f32 %v2799_v5, %v1830_v30  ;;  %v3936_v30 = vrot.slane %v3931_v32, %v9955_v29  ;;  %v4114_v21 = vsel %vm585_vm0, %v7623_v49, 0  ;;  %v8737_v32 = vld [vmem:[#allocation3 + $0x58] sm:$0xff]  }
 0x61c   : > { %v8448_v6 = vpop.f32.mrf.mxu0  ;;  %v7630_v7 = vcombine.low %v3961_v27, %v3962_v16  ;;  %v3922_v5 = vmul.bf16 %v11066_v58, %v3882_v14 }
 0x61d   : > { %2843 = vst.msk [vmem:[#allocation5 + $0x30] sm:$0xff] %vm585_vm0, %v2835_v11  ;;  %v2833_v17 = vadd.f32 %v11021_v42, %v2818_v22  ;;  %v2821_v28 = vadd.f32 %v8448_v6, %v1833_v61  ;;  %v3921_v61 = vmul.bf16 %v11066_v58, %v3881_v13  ;;  %v7615_v41 = vcombine.low %v3936_v30, %v3936_v30  ;;  %v8734_v6 = vld [vmem:[#allocation3 + $0x40] sm:$0xff]  }
 0x61e   : > { %3637 = vmatmul.mubr.bf16.vlgmr.msra.gmra.mxu0 %v10938_v18  ;;  %v2802_v12 = vpop.f32.mrf.mxu0  ;;  %v3925_v18 = vmul.bf16 %v11066_v58, %v11078_v19 }
 0x61f   : > { %2841 = vst.msk [vmem:[#allocation5 + $0x20] sm:$0xff] %vm585_vm0, %v2833_v17  ;;  %v2836_v60 = vadd.f32 %v11021_v42, %v2821_v28  ;;  %8116 = vmatpush3.bf16.xpose.msra.mxu0 %v4120_v25  ;;  %3644 = vmatprep.mubr.bf16.mxu0 %v10943_v15  ;;  %v2819_v47 = vadd.f32 %v2802_v12, %v1831_v57 }
 0x620   : > { %8638 = vmatprep.subr.msk.bf16.mxu0 %vm585_vm0, %v7632_v8  ;;  %v7624_v0 = vcombine.low %v3925_v18, %v3926_v39  ;;  %v3963_v15 = vmul.bf16 %v11006_v2, %v11103_v54  ;;  %v7622_v20 = vcombine.low %v3921_v61, %v3922_v5  ;;  %v3947_v11 = vmul.bf16 %v7615_v41, %v11011_v52 }
 0x621   : > { %2844 = vst.msk [vmem:[#allocation5 + $0x38] sm:$0xff] %vm585_vm0, %v2836_v60  ;;  %v2834_v48 = vadd.f32 %v11021_v42, %v2819_v47  ;;  %v3946_v28 = vmul.bf16 %v7615_v41, %v11073_v55  ;;  %v3945_v25 = vmul.bf16 %v7615_v41, %v11078_v19  ;;  %v3944_v60 = vmul.bf16 %v7615_v41, %v11096_v44 }
 0x622   : > { %v4117_v31 = vsel %vm585_vm0, %v7624_v0, 0  ;;  %v7631_v10 = vcombine.low %v3963_v15, %v3964_v35  ;;  %v4111_v62 = vsel %vm585_vm0, %v7622_v20, 0  ;;  %v3942_v35 = vmul.bf16 %v7615_v41, %v3882_v14 }
 0x623   : > { %2842 = vst.msk [vmem:[#allocation5 + $0x28] sm:$0xff] %vm585_vm0, %v2834_v48  ;;  %v3941_v15 = vmul.bf16 %v7615_v41, %v3881_v13 }
 0x625   : > { %v7626_v9 = vcombine.low %v3941_v15, %v3942_v35 }
 0x626   : > { %3645 = vmatmul.mubr.bf16.gmra.mxu0 %v10956_v40  ;;  %v3889_v40 = vld [vmem:[%s13000_s3] sm:$0x1] }
 0x627   : > { %8118 = vmatpush3.bf16.xpose.msra.mxu0 %v4117_v31  ;;  %3652 = vmatprep.mubr.bf16.mxu0 %v11035_v51  ;;  %v3891_v51 = vpack.i.b16 %v3889_v40, %v3889_v40 }
 0x628   : > { %8639 = vmatprep.subr.msk.bf16.mxu0 %vm585_vm0, %v7631_v10 }
 0x629   : > { %v3896_v2 = vrot.slane %v3891_v51, %v9955_v29 }
 0x62b   : > { %v7611_v22 = vcombine.low %v3896_v2, %v3896_v2 }
 0x62d   : > { %v3908_v58 = vmul.bf16 %v7611_v22, %v11008_v63  ;;  %v3906_v12 = vmul.bf16 %v7611_v22, %v11073_v55  ;;  %v3904_v48 = vmul.bf16 %v7611_v22, %v11096_v44  ;;  %v3903_v55 = vmul.bf16 %v7611_v22, %v11103_v54  ;;  %v8735_v44 = vld [vmem:[#allocation3 + $0x48] sm:$0xff]  }
 0x62e   : > { %3653 = vmatmul.mubr.bf16.gmra.mxu0 %v11032_v46  ;;  %v3948_v46 = vmul.bf16 %v7615_v41, %v11008_v63  ;;  %v3943_v63 = vmul.bf16 %v7615_v41, %v11103_v54  ;;  %v3902_v31 = vmul.bf16 %v7611_v22, %v3882_v14  ;;  %v3901_v10 = vmul.bf16 %v7611_v22, %v3881_v13  ;;  %v8736_v54 = vld [vmem:[#allocation3 + $0x50] sm:$0xff]  }
 0x62f   : > { %8120 = vmatpush3.bf16.xpose.msra.mxu0 %v4114_v21  ;;  %3660 = vmatprep.mubr.bf16.mxu0 %v11051_v53  ;;  %v3907_v53 = vmul.bf16 %v7611_v22, %v11011_v52  ;;  %v3905_v52 = vmul.bf16 %v7611_v22, %v11078_v19  ;;  %v7619_v0 = vcombine.low %v3903_v55, %v3904_v48  ;;  %v4324_v48 = vpop.permute.xlu1 %4323 }
 0x630   : > { %8640 = vmatprep.subr.msk.bf16.mxu0 %vm585_vm0, %v7630_v7  ;;  %v7629_v57 = vcombine.low %v3947_v11, %v3948_v46  ;;  %v7627_v18 = vcombine.low %v3943_v63, %v3944_v60  ;;  %v7618_v37 = vcombine.low %v3901_v10, %v3902_v31 }
 0x631   : > { %v7621_v17 = vcombine.low %v3907_v53, %v3908_v58  ;;  %v7620_v39 = vcombine.low %v3905_v52, %v3906_v12  ;;  %v4102_v19 = vsel %vm585_vm0, %v7619_v0, 0 }
 0x632   : > { %v4099_v4 = vsel %vm585_vm0, %v7618_v37, 0 }
 0x633   : > { %v4108_v8 = vsel %vm585_vm0, %v7621_v17, 0  ;;  %v4105_v47 = vsel %vm585_vm0, %v7620_v39, 0 }
 0x636   : > { %3661 = vmatmul.mubr.bf16.gmra.mxu0 %v11064_v23  ;;  %v7628_v23 = vcombine.low %v3945_v25, %v3946_v28 }
 0x637   : > { %8122 = vmatpush3.bf16.xpose.msra.mxu0 %v4111_v62  ;;  %8131 = vmatprep.mubr.msk.bf16.mxu0 %vm585_vm0, %v8734_v6 }
 0x638   : > { %8641 = vmatprep.subr.msk.bf16.mxu0 %vm585_vm0, %v7629_v57 }
 0x63f   : > { %8124 = vmatpush3.bf16.xpose.msra.mxu0 %v4108_v8 }
 0x640   : > { %8642 = vmatprep.subr.msk.bf16.mxu0 %vm585_vm0, %v7628_v23 }
 0x647   : > { %8126 = vmatpush3.bf16.xpose.msra.mxu0 %v4105_v47 }
 0x648   : > { %8643 = vmatprep.subr.msk.bf16.mxu0 %vm585_vm0, %v7627_v18 }
 0x64f   : > { %8128 = vmatpush3.bf16.xpose.msra.mxu0 %v4102_v19  ;;  %v4332_v19 = vpop.permute.xlu0 %4331 }
 0x650   : > { %8644 = vmatprep.subr.msk.bf16.mxu0 %vm585_vm0, %v7626_v9 }
 0x657   : > { %8130 = vmatpush3.bf16.xpose.msra.mxu0 %v4099_v4 }
 0x65e   : > { %8132 = vmatmul.mubr.msk.bf16.vlgmr.msra.gmra.mxu0 %vm585_vm0, %v8734_v6 }
 0x65f   : > { %8133 = vmatprep.mubr.msk.bf16.mxu0 %vm585_vm0, %v8735_v44 }
 0x666   : > { %8134 = vmatmul.mubr.msk.bf16.gmra.mxu0 %vm585_vm0, %v8735_v44  ;;  %v7662_v44 = vld [vmem:[%s13001_s4 + $0x1] sm:$0x1] }
 0x667   : > { %8135 = vmatprep.mubr.msk.bf16.mxu0 %vm585_vm0, %v8736_v54 }
 0x66e   : > { %8136 = vmatmul.mubr.msk.bf16.gmra.mxu0 %vm585_vm0, %v8736_v54 }
 0x66f   : > { %8137 = vmatprep.mubr.msk.bf16.mxu0 %vm585_vm0, %v8737_v32 }
 0x676   : > { %8138 = vmatmul.mubr.msk.bf16.gmra.mxu0 %vm585_vm0, %v8737_v32 }
 0x69e   : > { %v8039_v14 = vpop.f32.mrf.mxu0 }
 0x6a0   : > { %v8040_v13 = vpop.f32.mrf.mxu0 }
 0x6a1   : > { %v8041_v9 = vadd.f32 %v8040_v13, %v8039_v14  ;;  %v4351_v14 = vsel %vm585_vm0, %v10880_v50, %v4324_v48  ;;  %v4322_v13 = vpop.permute.xlu0 %4321 }
 0x6a2   : > { %v8042_v40 = vpop.f32.mrf.mxu0 }
 0x6a4   : > { %v8043_v49 = vpop.f32.mrf.mxu0 }
 0x6a5   : > { %v8044_v31 = vadd.f32 %v8043_v49, %v8042_v40 }
 0x6a6   : > { %v11164_v16 = vpop.f32.mrf.mxu0 }
 0x6a8   : > { %v11166_v27 = vpop.f32.mrf.mxu0 }
 0x6aa   : > { %v11168_v30 = vpop.f32.mrf.mxu0 }
 0x6ac   : > { %v8049_v51 = vpop.f32.mrf.mxu0 }
 0x6ce   : > { %v11170_v21 = vpop.f32.mrf.mxu0 }
 0x6d0   : > { %v11172_v7 = vpop.f32.mrf.mxu0 }
 0x6d2   : > { %v11174_v5 = vpop.f32.mrf.mxu0 }
 0x6d4   : > { %v11176_v61 = vpop.f32.mrf.mxu0 }
 0x6d6   : > { %v11178_v41 = vpop.f32.mrf.mxu0 }
 0x6d8   : > { %v11180_v2 = vpop.f32.mrf.mxu0 }
 0x6da   : > { %v11182_v20 = vpop.f32.mrf.mxu0 }
 0x6dc   : > { %v11184_v11 = vpop.f32.mrf.mxu0 }
 0x6de   : > { %v8079_v46 = vpop.f32.mrf.mxu0 }
 0x6e0   : > { %v8080_v22 = vpop.f32.mrf.mxu0 }
 0x6e1   : > { %v8081_v6 = vadd.f32 %v8080_v22, %v8079_v46  ;;  %v4340_v22 = vpop.permute.xlu1 %4339 }
 0x6e2   : > { %v8082_v62 = vpop.f32.mrf.mxu0 }
 0x6e3   : > { %v3669_v57 = vmax.f32 %v8081_v6, 1e-30 }
 0x6e4   : > { %v8083_v53 = vpop.f32.mrf.mxu0 }
 0x6e5   : > { %v8084_v58 = vadd.f32 %v8083_v53, %v8082_v62  ;;  %8948 = vrcp.f32 %v3669_v57  ;;  %v4389_v53 = vpack.i.b16 %v7662_v44, %v7662_v44 }
 0x6e6   : > { %v8085_v17 = vpop.f32.mrf.mxu0 }
 0x6e7   : > { %v3670_v28 = vmax.f32 %v8084_v58, 1e-30 }
 0x6e8   : > { %v8086_v25 = vpop.f32.mrf.mxu0 }
 0x6e9   : > { %8950 = vrcp.f32 %v3670_v28  ;;  %v8087_v8 = vadd.f32 %v8086_v25, %v8085_v17  ;;  %v8047_v28 = vadd.f32 %v11166_v27, %v11164_v16  ;;  %v8050_v25 = vadd.f32 %v8049_v51, %v11168_v30  ;;  %v4338_v30 = vpop.permute.xlu0 %4337 }
 0x6ea   : > { %v8088_v23 = vpop.f32.mrf.mxu0  ;;  %v4348_v16 = vsel %vm585_vm0, %v10890_v45, %v4322_v13  ;;  %v8053_v45 = vadd.f32 %v11172_v7, %v11170_v21  ;;  %v8059_v7 = vadd.f32 %v11180_v2, %v11178_v41  ;;  %v7636_v2 = vld [vmem:[%s13003_s6 + $0x110] sm:$0xff] }
 0x6eb   : > { %v3671_v12 = vmax.f32 %v8087_v8, 1e-30 }
 0x6ec   : > { %v8089_v52 = vpop.f32.mrf.mxu0 }
 0x6ed   : > { %v8090_v39 = vadd.f32 %v8089_v52, %v8088_v23  ;;  %8952 = vrcp.f32 %v3671_v12  ;;  %v11195_v12 = vrot.slane %v4389_v53, %v9955_v29  ;;  %v4360_v52 = vsel %vm2326_vm2, %v4351_v14, %v4332_v19 }
 0x6ee   : > { %v8091_v60 = vpop.f32.mrf.mxu0 }
 0x6ef   : > { %v3672_v63 = vmax.f32 %v8090_v39, 1e-30  ;;  %v4330_v39 = vpop.permute.xlu1 %4329 }
 0x6f0   : > { %v8092_v47 = vpop.f32.mrf.mxu0  ;;  %v4358_v27 = vsel %vm2326_vm2, %v4348_v16, %v4330_v39 }
 0x6f1   : > { %8954 = vrcp.f32 %v3672_v63  ;;  %v8093_v18 = vadd.f32 %v8092_v47, %v8091_v60  ;;  %v11199_v47 = vsel %vm2335_vm3, %v4360_v52, %v4340_v22  ;;  %v7640_v52 = vld [vmem:[%s13003_s6 + $0x130] sm:$0xff] }
 0x6f2   : > { %v8094_v55 = vpop.f32.mrf.mxu0  ;;  %v8949_v35 = vpop.eup %8948  ;;  %v4421_v48 = vmul.bf16 %v11045_v3, %v11199_v47  ;;  %v4397_v19 = vmul.bf16 %v11195_v12, %v11199_v47 }
 0x6f3   : > { %v3673_v0 = vmax.f32 %v8093_v18, 1e-30  ;;  %v3685_v32 = vmul.f32 %v8949_v35, %v8041_v9  ;;  %v4398_v18 = vmul.bf16 %v11195_v12, %v11058_v34  ;;  %v8056_v35 = vadd.f32 %v11176_v61, %v11174_v5 }
 0x6f4   : > { %v8095_v15 = vpop.f32.mrf.mxu0  ;;  %v8062_v5 = vadd.f32 %v11184_v11, %v11182_v20  ;;  %v7637_v11 = vld [vmem:[%s13003_s6 + $0x118] sm:$0xff] }
 0x6f5   : > { %v8096_v10 = vadd.f32 %v8095_v15, %v8094_v55  ;;  %8956 = vrcp.f32 %v3673_v0  ;;  %v11209_v0 = vsel %vm2335_vm3, %v4358_v27, %v4338_v30 }
 0x6f6   : > { %v8951_v37 = vpop.eup %8950  ;;  %v8097_v4 = vpop.f32.mrf.mxu0  ;;  %v4420_v9 = vmul.bf16 %v11045_v3, %v11209_v0 }
 0x6f7   : > { %v3674_v54 = vmax.f32 %v8096_v10, 1e-30  ;;  %v3686_v46 = vmul.f32 %v8951_v37, %v8044_v31 }
 0x6f8   : > { %v8098_v6 = vpop.f32.mrf.mxu0 }
 0x6f9   : > { %8958 = vrcp.f32 %v3674_v54  ;;  %v8099_v62 = vadd.f32 %v8098_v6, %v8097_v4  ;;  %v3693_v57 = vpack.c.bf16 %v3686_v46, %v3685_v32  ;;  %v4396_v4 = vmul.bf16 %v11195_v12, %v11209_v0  ;;  %v7634_v46 = vld [vmem:[%s13003_s6 + $0x100] sm:$0xff]  ;;  %v7635_v6 = vld [vmem:[%s13003_s6 + $0x108] sm:$0xff] }
 0x6fa   : > { %v8100_v58 = vpop.f32.mrf.mxu0  ;;  %v8953_v49 = vpop.eup %8952 }
 0x6fb   : > { %v3675_v40 = vmax.f32 %v8099_v62, 1e-30  ;;  %8465 = vmatprep.mubr.bf16.mxu1 %v3693_v57  ;;  %v3687_v60 = vmul.f32 %v8953_v49, %v8047_v28 }
 0x6fc   : > { %v8101_v17 = vpop.f32.mrf.mxu0 }
 0x6fd   : > { %v8102_v8 = vadd.f32 %v8101_v17, %v8100_v58  ;;  %8960 = vrcp.f32 %v3675_v40  ;;  %v7638_v40 = vld [vmem:[%s13003_s6 + $0x120] sm:$0xff]  ;;  %v7639_v17 = vld [vmem:[%s13003_s6 + $0x128] sm:$0xff] }
 0x6fe   : > { %v8955_v23 = vpop.eup %8954 }
 0x6ff   : > { %v3676_v50 = vmax.f32 %v8102_v8, 1e-30  ;;  %v3688_v63 = vmul.f32 %v8955_v23, %v8050_v25 }
 0x701   : > { %8962 = vrcp.f32 %v3676_v50  ;;  %v3694_v51 = vpack.c.bf16 %v3688_v63, %v3687_v60  ;;  %v7641_v50 = vld [vmem:[%s13003_s6 + $0x138] sm:$0xff] }
 0x702   : > { %v8957_v55 = vpop.eup %8956 }
 0x703   : > { %8466 = vmatmul.mubr.bf16.vlgmr.msra.gmra.mxu1 %v3694_v51  ;;  %v3689_v31 = vmul.f32 %v8957_v55, %v8053_v45 }
 0x704   : > { %8140 = vmatpush3.bf16.msra.mxu1 %v4398_v18 }
 0x705   : > { %8141 = vmatprep.subr.bf16.mxu1 %v4421_v48 }
 0x706   : > { %v8959_v15 = vpop.eup %8958 }
 0x707   : > { %v3690_v10 = vmul.f32 %v8959_v15, %v8056_v35  ;;  %v7643_v35 = vld [vmem:[%s13003_s6 + $0x148] sm:$0xff] }
 0x708   : > { %8142 = vmatpush3.bf16.msra.mxu1 %v4397_v19  ;;  %v7642_v19 = vld [vmem:[%s13003_s6 + $0x140] sm:$0xff] }
 0x709   : > { %8143 = vmatprep.subr.bf16.mxu1 %v4420_v9  ;;  %v3695_v37 = vpack.c.bf16 %v3690_v10, %v3689_v31  ;;  %v7647_v31 = vld [vmem:[%s13003_s6 + $0x168] sm:$0xff] }
 0x70a   : > { %v8961_v21 = vpop.eup %8960 }
 0x70b   : > { %8469 = vmatprep.mubr.bf16.mxu1 %v3695_v37  ;;  %v3691_v44 = vmul.f32 %v8961_v21, %v8059_v7  ;;  %v7646_v21 = vld [vmem:[%s13003_s6 + $0x160] sm:$0xff] }
 0x70c   : > { %8144 = vmatpush3.bf16.msra.mxu1 %v4396_v4  ;;  %v7644_v4 = vld [vmem:[%s13003_s6 + $0x150] sm:$0xff] }
 0x70e   : > { %v8963_v61 = vpop.eup %8962 }
 0x70f   : > { %v3692_v54 = vmul.f32 %v8963_v61, %v8062_v5 }
 0x711   : > { %v3696_v32 = vpack.c.bf16 %v3692_v54, %v3691_v44  ;;  %v7649_v44 = vld [vmem:[%s13003_s6 + $0x178] sm:$0xff] }
 0x713   : > { %8470 = vmatmul.mubr.bf16.gmra.mxu1 %v3696_v32 }
 0x71e   : > { %v4180_v22 = vpop.f32.mrf.mxu0 }
 0x71f   : > { %v11231_v57 = vadd.f32 %v7634_v46, %v4180_v22  ;;  %v7648_v22 = vld [vmem:[%s13003_s6 + $0x170] sm:$0xff] }
 0x720   : > { %v4182_v62 = vpop.f32.mrf.mxu0 }
 0x721   : > { %v11233_v41 = vadd.f32 %v7635_v6, %v4182_v62 }
 0x722   : > { %v4184_v20 = vpop.f32.mrf.mxu0 }
 0x723   : > { %v4219_v53 = vmax.f32 %v11231_v57, %v11233_v41  ;;  %v11243_v14 = vadd.f32 %v7636_v2, %v4184_v20 }
 0x724   : > { %v4186_v58 = vpop.f32.mrf.mxu0 }
 0x725   : > { %v11245_v13 = vadd.f32 %v7637_v11, %v4186_v58  ;;  %4220 = vmax.xlane.f32.xlu0 %v4219_v53  ;;  %v8746_v53 = vld [vmem:[%s13004_s7 + $0x38] sm:$0xff]   ;;  %v8749_v58 = vld [vmem:[%s13004_s7 + $0x30] sm:$0xff]  }
 0x726   : > { %v4190_v49 = vpop.f32.mrf.mxu0  ;;  %8473 = vmatprep.subr.bf16.mxu0 %v8746_v53 }
 0x727   : > { %v4222_v28 = vmax.f32 %v11243_v14, %v11245_v13  ;;  %v11255_v8 = vadd.f32 %v7638_v40, %v4190_v49  ;;  %8474 = vmatpush3.bf16.msra.mxu0 %v8746_v53  ;;  %v8752_v40 = vld [vmem:[%s13004_s7 + $0x28] sm:$0xff]   ;;  %v8755_v49 = vld [vmem:[%s13004_s7 + $0x20] sm:$0xff]  }
 0x728   : > { %v4192_v25 = vpop.f32.mrf.mxu0  ;;  %8475 = vmatprep.subr.bf16.mxu0 %v8749_v58 }
 0x729   : > { %v11257_v23 = vadd.f32 %v7639_v17, %v4192_v25  ;;  %4223 = vmax.xlane.f32.xlu1 %v4222_v28 }
 0x72a   : > { %v4194_v39 = vpop.f32.mrf.mxu0 }
 0x72b   : > { %v4225_v60 = vmax.f32 %v11255_v8, %v11257_v23  ;;  %v11267_v16 = vadd.f32 %v7640_v52, %v4194_v39  ;;  %8476 = vmatpush3.bf16.msra.mxu0 %v8749_v58 }
 0x72c   : > { %v4196_v63 = vpop.f32.mrf.mxu0  ;;  %8477 = vmatprep.subr.bf16.mxu0 %v8752_v40 }
 0x72d   : > { %v11269_v27 = vadd.f32 %v7641_v50, %v4196_v63  ;;  %4226 = vmax.xlane.f32.xlu0 %v4225_v60  ;;  %v7663_v63 = vld [vmem:[%s13001_s4 + $0x2] sm:$0x1] }
 0x72e   : > { %v4200_v51 = vpop.f32.mrf.mxu0 }
 0x72f   : > { %v4228_v30 = vmax.f32 %v11267_v16, %v11269_v27  ;;  %v11291_v37 = vadd.f32 %v7642_v19, %v4200_v51  ;;  %8478 = vmatpush3.bf16.msra.mxu0 %v8752_v40 }
 0x730   : > { %v4202_v18 = vpop.f32.mrf.mxu0  ;;  %8479 = vmatprep.subr.bf16.mxu0 %v8755_v49 }
 0x731   : > { %4229 = vmax.xlane.f32.xlu1 %v4228_v30  ;;  %v11283_v9 = vadd.f32 %v7643_v35, %v4202_v18  ;;  %v4375_v30 = vld [vmem:[%s13001_s4] sm:$0x1]  ;;  %v4401_v18 = vpack.i.b16 %v7663_v63, %v7663_v63 }
 0x732   : > { %v4204_v48 = vpop.f32.mrf.mxu0 }
 0x733   : > { %v4231_v7 = vmax.f32 %v11291_v37, %v11283_v9  ;;  %v11308_v32 = vadd.f32 %v7644_v4, %v4204_v48  ;;  %8480 = vmatpush3.bf16.msra.mxu0 %v8755_v49  ;;  %v2848_v49 = vld [vmem:[%s9362_s30 + $0x58] sm:$0xff] }
 0x734   : > { %v4206_v55 = vpop.f32.mrf.mxu0 }
 0x736   : > { %v4210_v45 = vpop.f32.mrf.mxu0 }
 0x737   : > { %v11310_v46 = vadd.f32 %v7646_v21, %v4210_v45  ;;  %v9194_v45 = vld [vmem:[#allocation2 + $0x40] sm:$0xff]  }
 0x738   : > { %v4212_v15 = vpop.f32.mrf.mxu0 }
 0x739   : > { %v11303_v61 = vadd.f32 %v7647_v31, %v4212_v15  ;;  %v4406_v31 = vrot.slane %v4401_v18, %v9955_v29 }
 0x73a   : > { %v4214_v10 = vpop.f32.mrf.mxu0 }
 0x73b   : > { %v4237_v62 = vmax.f32 %v11310_v46, %v11303_v61  ;;  %v11321_v20 = vadd.f32 %v7648_v22, %v4214_v10  ;;  %v4410_v22 = vmul.bf16 %v4406_v31, %v11058_v34  ;;  %v4408_v63 = vmul.bf16 %v4406_v31, %v11209_v0 }
 0x73c   : > { %v4216_v54 = vpop.f32.mrf.mxu0 }
 0x73d   : > { %v11319_v2 = vadd.f32 %v7649_v44, %v4216_v54  ;;  %v2847_v54 = vld [vmem:[%s9362_s30 + $0x50] sm:$0xff] }
 0x73f   : > { %v4240_v11 = vmax.f32 %v11321_v20, %v11319_v2 }
 0x742   : > { %4335 = vrot.lane.b32.xlu1 %v10896_v36, %s13032_s0 }
 0x743   : > { %4327 = vrot.lane.b32.xlu0 %v10896_v36, %s13033_s20  ;;  %v7645_v36 = vld [vmem:[%s13003_s6 + $0x158] sm:$0xff] }
 0x744   : > { %v11301_v5 = vadd.f32 %v7645_v36, %v4206_v55 }
 0x746   : > { %v4234_v6 = vmax.f32 %v11308_v32, %v11301_v5 }
 0x762   : > { %4232 = vmax.xlane.f32.xlu0 %v4231_v7 }
 0x766   : > { %4235 = vmax.xlane.f32.xlu1 %v4234_v6  ;;  %4238 = vmax.xlane.f32.xlu0 %v4237_v62  ;;  %v2845_v62 = vld [vmem:[%s9362_s30 + $0x40] sm:$0xff] }
 0x76a   : > { %4241 = vmax.xlane.f32.xlu0 %v4240_v11 }
 0x777   : > { %1760 = vrot.lane.b32.xlu1 %v10305_v43, %s13032_s0  ;;  %v8758_v43 = vld [vmem:[%s13004_s7 + $0x18] sm:$0xff]  }
 0x778   : > { %8481 = vmatprep.subr.bf16.mxu0 %v8758_v43 }
 0x779   : > { %8482 = vmatpush3.bf16.msra.mxu0 %v8758_v43  ;;  %v4409_v43 = vmul.bf16 %v4406_v31, %v11199_v47 }
 0x77b   : > { %1754 = vrot.lane.b32.xlu1 %v10300_v33, %s13032_s0  ;;  %v8761_v33 = vld [vmem:[%s13004_s7 + $0x10] sm:$0xff]  }
 0x77c   : > { %8483 = vmatprep.subr.bf16.mxu0 %v8761_v33 }
 0x77d   : > { %8484 = vmatpush3.bf16.msra.mxu0 %v8761_v33 }
 0x77f   : > { %1756 = vrot.lane.b32.xlu1 %v10316_v24, %s13032_s0  ;;  %v4320_v24 = vpop.permute.xlu1 %4319 }
 0x780   : > { %1758 = vrot.lane.b32.xlu0 %v10295_v26, %s13032_s0  ;;  %v8763_v26 = vld [vmem:[%s13004_s7 + $0x8] sm:$0xff]   ;;  %v4345_v35 = vsel %vm585_vm0, %v9194_v45, %v4320_v24 }
 0x781   : > { %8485 = vmatprep.subr.bf16.mxu0 %v8763_v26 }
 0x782   : > { %8486 = vmatpush3.bf16.msra.mxu0 %v8763_v26 }
 0x783   : > { %1752 = vrot.lane.b32.xlu1 %v10068_v1, %s13032_s0  ;;  %v11362_v1 = vld [vmem:[#allocation2 + $0x78] sm:$0xff]  }
 0x784   : > { %1750 = vrot.lane.b32.xlu0 %v10057_v38, %s13032_s0  ;;  %v8764_v38 = vld [vmem:[%s13004_s7] sm:$0xff]  }
 0x785   : > { %8487 = vmatprep.subr.bf16.mxu0 %v8764_v38 }
 0x786   : > { %8488 = vmatpush3.bf16.msra.mxu0 %v8764_v38 }
 0x787   : > { %1748 = vrot.lane.b32.xlu1 %v10073_v59, %s13032_s0  ;;  %v11371_v59 = vld [vmem:[#allocation2 + $0x70] sm:$0xff]  }
 0x788   : > { %1746 = vrot.lane.b32.xlu0 %v10062_v56, %s13032_s0  ;;  %v11381_v56 = vld [vmem:[#allocation2 + $0x68] sm:$0xff]  }
 0x78b   : > { %5345 = vrot.lane.b32.xlu1 %v11362_v1, %s13033_s20 }
 0x78c   : > { %5337 = vrot.lane.b32.xlu0 %v11362_v1, %s13031_s19 }
 0x78f   : > { %5343 = vrot.lane.b32.xlu1 %v11371_v59, %s13033_s20 }
 0x790   : > { %5353 = vrot.lane.b32.xlu0 %v11362_v1, %s13032_s0 }
 0x793   : > { %5351 = vrot.lane.b32.xlu1 %v11371_v59, %s13032_s0 }
 0x794   : > { %5335 = vrot.lane.b32.xlu0 %v11371_v59, %s13031_s19 }
 0x797   : > { %5341 = vrot.lane.b32.xlu1 %v11381_v56, %s13033_s20 }
 0x798   : > { %5333 = vrot.lane.b32.xlu0 %v11381_v56, %s13031_s19 }
 0x79c   : > { %5349 = vrot.lane.b32.xlu0 %v11381_v56, %s13032_s0 }
 0x7ae   : > { %v4221_v17 = vpop.xlane.xlu0 %4220 }
 0x7af   : > { %v4244_v28 = vsub.f32 %v11233_v41, %v4221_v17  ;;  %v4243_v41 = vsub.f32 %v11231_v57, %v4221_v17  ;;  %v2846_v17 = vld [vmem:[%s9362_s30 + $0x48] sm:$0xff] }
 0x7b1   : > { %v4261_v52 = vmul.f32 1.442695, %v4244_v28  ;;  %v4259_v10 = vmul.f32 1.442695, %v4243_v41  ;;  %v8741_v41 = vld [vmem:[%s13002_s5 + $0x78] sm:$0xff]  }
 0x7b2   : > { %v4224_v25 = vpop.xlane.xlu1 %4223 }
 0x7b3   : > { %v4246_v39 = vsub.f32 %v11245_v13, %v4224_v25  ;;  %8964 = vpow2.f32 %v4261_v52  ;;  %v4245_v55 = vsub.f32 %v11243_v14, %v4224_v25  ;;  %v4377_v13 = vpack.i.b16 %v4375_v30, %v4375_v30 }
 0x7b5   : > { %v4265_v50 = vmul.f32 1.442695, %v4246_v39  ;;  %v4263_v14 = vmul.f32 1.442695, %v4245_v55 }
 0x7b6   : > { %v4227_v60 = vpop.xlane.xlu0 %4226 }
 0x7b7   : > { %8966 = vpow2.f32 %v4265_v50  ;;  %v4248_v4 = vsub.f32 %v11257_v23, %v4227_v60  ;;  %v4247_v33 = vsub.f32 %v11255_v8, %v4227_v60 }
 0x7b8   : > { %8968 = vpow2.f32 %v4259_v10  ;;  %v8743_v10 = vld [vmem:[%s13002_s5 + $0x70] sm:$0xff]  }
 0x7b9   : > { %v4269_v23 = vmul.f32 1.442695, %v4248_v4  ;;  %8970 = vpow2.f32 %v4263_v14  ;;  %v4267_v39 = vmul.f32 1.442695, %v4247_v33  ;;  %v2852_v14 = vld [vmem:[%s9362_s30 + $0x78] sm:$0xff]  ;;  %v8750_v33 = vld [vmem:[%s13002_s5 + $0x20] sm:$0xff]  }
 0x7ba   : > { %v4230_v51 = vpop.xlane.xlu1 %4229  ;;  %v4328_v48 = vpop.permute.xlu0 %4327 }
 0x7bb   : > { %v4250_v15 = vsub.f32 %v11269_v27, %v4230_v51  ;;  %v4356_v19 = vsel %vm2326_vm2, %v4345_v35, %v4328_v48  ;;  %v4382_v27 = vrot.slane %v4377_v13, %v9955_v29  ;;  %v2851_v13 = vld [vmem:[%s9362_s30 + $0x70] sm:$0xff]  ;;  %v2849_v35 = vld [vmem:[%s9362_s30 + $0x60] sm:$0xff] }
 0x7bd   : > { %v4273_v44 = vmul.f32 1.442695, %v4250_v15  ;;  %v4386_v58 = vmul.bf16 %v4382_v27, %v11058_v34  ;;  %v4385_v8 = vmul.bf16 %v4382_v27, %v11199_v47  ;;  %v4384_v47 = vmul.bf16 %v4382_v27, %v11209_v0  ;;  %v8742_v15 = vld [vmem:[%s13002_s5 + $0x38] sm:$0xff]  }
 0x7be   : > { %v4336_v36 = vpop.permute.xlu1 %4335 }
 0x7bf   : > { %v11405_v57 = vsel %vm2335_vm3, %v4356_v19, %v4336_v36  ;;  %8972 = vpow2.f32 %v4273_v44  ;;  %v2850_v44 = vld [vmem:[%s9362_s30 + $0x68] sm:$0xff] }
 0x7c0   : > { %v4395_v21 = vmul.bf16 %v11195_v12, %v11405_v57  ;;  %v4419_v7 = vmul.bf16 %v11045_v3, %v11405_v57  ;;  %v8965_v11 = vpop.eup %8964  ;;  %v4249_v12 = vsub.f32 %v11267_v16, %v4230_v51  ;;  %8974 = vpow2.f32 %v4269_v23 }
 0x7c1   : > { %v4407_v51 = vmul.bf16 %v4406_v31, %v11405_v57  ;;  %v4383_v55 = vmul.bf16 %v4382_v27, %v11405_v57 }
 0x7c2   : > { %8145 = vmatprep.subr.bf16.mxu1 %v4419_v7  ;;  %v4271_v28 = vmul.f32 1.442695, %v4249_v12  ;;  %v9195_v12 = vld [vmem:[%s13005_s8] ss:$0 sm:$0xff] }
 0x7c3   : > { %8146 = vmatpush3.bf16.msra.mxu1 %v4395_v21  ;;  %v8467_v6 = vpop.f32.mrf.mxu1 }
 0x7c4   : > { %v3828_v53 = vadd.f32 %v8467_v6, %v2847_v54  ;;  %8147 = vmatprep.subr.bf16.mxu1 %v4410_v22  ;;  %v8967_v3 = vpop.eup %8966  ;;  %8976 = vpow2.f32 %v4271_v28  ;;  %v8744_v54 = vld [vmem:[%s13002_s5 + $0x30] sm:$0xff]   ;;  %v8745_v6 = vld [vmem:[%s13002_s5 + $0x68] sm:$0xff]  }
 0x7c5   : > { %v3795_v40 = vpop.f32.mrf.mxu1  ;;  %v11421_v24 = vpack.c.bf16 %v8967_v3, %v8965_v11  ;;  %8978 = vpow2.f32 %v4267_v39  ;;  %v8969_v18 = vpop.eup %8968  ;;  %v8757_v28 = vld [vmem:[%s13002_s5 + $0x48] sm:$0xff]   ;;  %v8760_v39 = vld [vmem:[%s13002_s5 + $0x40] sm:$0xff]  }
 0x7c6   : > { %v3843_v26 = vadd.f32 %v11021_v42, %v3828_v53  ;;  %v3826_v38 = vadd.f32 %v3795_v40, %v2845_v62  ;;  %v8971_v48 = vpop.eup %8970 }
 0x7c7   : > { %8148 = vmatpush3.bf16.msra.mxu1 %v4386_v58  ;;  %v8468_v16 = vpop.f32.mrf.mxu1  ;;  %4455 = vmatprep.mubr.bf16.mxu1 %v11421_v24  ;;  %v11445_v31 = vpack.c.bf16 %v8971_v48, %v8969_v18 }
 0x7c8   : > { %3851 = vst.msk [vmem:[#allocation5 + $0x50] sm:$0xff] %vm585_vm0, %v3843_v26  ;;  %v3841_v34 = vadd.f32 %v11021_v42, %v3826_v38  ;;  %v3829_v25 = vadd.f32 %v8468_v16, %v2848_v49  ;;  %8149 = vmatprep.subr.bf16.mxu1 %v4409_v43  ;;  %v8748_v43 = vld [vmem:[%s13002_s5 + $0x60] sm:$0xff]   ;;  %v8751_v26 = vld [vmem:[%s13002_s5 + $0x58] sm:$0xff]   ;;  %v8754_v16 = vld [vmem:[%s13002_s5 + $0x50] sm:$0xff]  }
 0x7c9   : > { %v3798_v52 = vpop.f32.mrf.mxu1  ;;  %v8753_v38 = vld [vmem:[%s13002_s5 + $0x18] sm:$0xff]  }
 0x7ca   : > { %3849 = vst.msk [vmem:[#allocation5 + $0x40] sm:$0xff] %vm585_vm0, %v3841_v34  ;;  %v3844_v50 = vadd.f32 %v11021_v42, %v3829_v25  ;;  %v3827_v60 = vadd.f32 %v3798_v52, %v2846_v17  ;;  %v8756_v17 = vld [vmem:[%s13002_s5 + $0x10] sm:$0xff]   ;;  %v8759_v25 = vld [vmem:[%s13002_s5 + $0x8] sm:$0xff]  }
 0x7cb   : > { %8150 = vmatpush3.bf16.msra.mxu1 %v4385_v8 }
 0x7cc   : > { %3852 = vst.msk [vmem:[#allocation5 + $0x58] sm:$0xff] %vm585_vm0, %v3844_v50  ;;  %v3842_v30 = vadd.f32 %v11021_v42, %v3827_v60  ;;  %8151 = vmatprep.subr.bf16.mxu1 %v4408_v63  ;;  %v8973_v45 = vpop.eup %8972 }
 0x7cd   : > { %v8975_v19 = vpop.eup %8974 }
 0x7ce   : > { %3850 = vst.msk [vmem:[#allocation5 + $0x48] sm:$0xff] %vm585_vm0, %v3842_v30  ;;  %v11450_v57 = vpack.c.bf16 %v8973_v45, %v8975_v19 }
 0x7cf   : > { %8152 = vmatpush3.bf16.msra.mxu1 %v4384_v47  ;;  %v8762_v47 = vld [vmem:[%s13002_s5] sm:$0xff]  }
 0x7d0   : > { %8153 = vmatprep.subr.bf16.mxu1 %v4407_v51 }
 0x7d1   : > { %v8977_v62 = vpop.eup %8976 }
 0x7d2   : > { %v8979_v58 = vpop.eup %8978 }
 0x7d3   : > { %8154 = vmatpush3.bf16.msra.mxu1 %v4383_v55  ;;  %v8471_v0 = vpop.f32.mrf.mxu1  ;;  %v11473_v49 = vpack.c.bf16 %v8977_v62, %v8979_v58 }
 0x7d4   : > { %v3832_v36 = vadd.f32 %v8471_v0, %v2851_v13  ;;  %8179 = vmatprep.subr.bf16.mxu1 %v8741_v41 }
 0x7d5   : > { %v3811_v4 = vpop.f32.mrf.mxu1 }
 0x7d6   : > { %v3847_v21 = vadd.f32 %v11021_v42, %v3832_v36  ;;  %v3830_v7 = vadd.f32 %v3811_v4, %v2849_v35  ;;  %4456 = vmatmul.mubr.bf16.vlgmr.msra.gmra.mxu1 %v11445_v31 }
 0x7d7   : > { %4463 = vmatprep.mubr.bf16.mxu1 %v11450_v57  ;;  %v8472_v27 = vpop.f32.mrf.mxu1  ;;  %8180 = vmatpush3.bf16.msra.mxu1 %v8742_v15 }
 0x7d8   : > { %3855 = vst.msk [vmem:[#allocation5 + $0x70] sm:$0xff] %vm585_vm0, %v3847_v21  ;;  %v3845_v22 = vadd.f32 %v11021_v42, %v3830_v7  ;;  %v3833_v23 = vadd.f32 %v8472_v27, %v2852_v14  ;;  %8181 = vmatprep.subr.bf16.mxu1 %v8743_v10  ;;  %v8747_v42 = vld [vmem:[%s13002_s5 + $0x28] sm:$0xff]  }
 0x7d9   : > { %v3814_v11 = vpop.f32.mrf.mxu1 }
 0x7da   : > { %3853 = vst.msk [vmem:[#allocation5 + $0x60] sm:$0xff] %vm585_vm0, %v3845_v22  ;;  %v3848_v53 = vadd.f32 %v9195_v12, %v3833_v23  ;;  %v3831_v3 = vadd.f32 %v3814_v11, %v2850_v44  ;;  %v7691_v11 = vld [vmem:[%s13000_s3 + $0x1] sm:$0x1] }
 0x7db   : > { %8182 = vmatpush3.bf16.msra.mxu1 %v8744_v54  ;;  %v7743_v54 = vld [vmem:[%s13001_s4 + $0x3] sm:$0x1] }
 0x7dc   : > { %3856 = vst.msk [vmem:[#allocation5 + $0x78] sm:$0xff] %vm585_vm0, %v3848_v53  ;;  %v3846_v40 = vadd.f32 %v9195_v12, %v3831_v3  ;;  %8183 = vmatprep.subr.bf16.mxu1 %v8745_v6  ;;  %v5425_v58 = vpack.i.b16 %v7743_v54, %v7743_v54 }
 0x7de   : > { %3854 = vst.msk [vmem:[#allocation5 + $0x68] sm:$0xff] %vm585_vm0, %v3846_v40  ;;  %4464 = vmatmul.mubr.bf16.gmra.mxu1 %v11473_v49 }
 0x7df   : > { %8184 = vmatpush3.bf16.msra.mxu1 %v8747_v42 }
 0x7e0   : > { %8185 = vmatprep.subr.bf16.mxu1 %v8748_v43 }
 0x7e3   : > { %8186 = vmatpush3.bf16.msra.mxu1 %v8750_v33  ;;  %v4923_v33 = vpack.i.b16 %v7691_v11, %v7691_v11 }
 0x7e4   : > { %8187 = vmatprep.subr.bf16.mxu1 %v8751_v26 }
 0x7e7   : > { %8188 = vmatpush3.bf16.msra.mxu1 %v8753_v38 }
 0x7e8   : > { %8189 = vmatprep.subr.bf16.mxu1 %v8754_v16  ;;  %v11548_v16 = vrot.slane %v5425_v58, %v9955_v29 }
 0x7eb   : > { %v4233_v34 = vpop.xlane.xlu0 %4232  ;;  %8190 = vmatpush3.bf16.msra.mxu1 %v8756_v17 }
 0x7ec   : > { %v4251_v8 = vsub.f32 %v11291_v37, %v4233_v34  ;;  %v4252_v52 = vsub.f32 %v11283_v9, %v4233_v34  ;;  %8191 = vmatprep.subr.bf16.mxu1 %v8757_v28  ;;  %v7695_v9 = vld [vmem:[%s13000_s3 + $0x3] sm:$0x1] }
 0x7ed   : > { %v4963_v45 = vpack.i.b16 %v7695_v9, %v7695_v9 }
 0x7ee   : > { %v4275_v50 = vmul.f32 1.442695, %v4251_v8  ;;  %v4277_v60 = vmul.f32 1.442695, %v4252_v52  ;;  %v4928_v52 = vrot.slane %v4923_v33, %v9955_v29 }
 0x7ef   : > { %v4236_v63 = vpop.xlane.xlu1 %4235  ;;  %v4239_v30 = vpop.xlane.xlu0 %4238  ;;  %8192 = vmatpush3.bf16.msra.mxu1 %v8759_v25  ;;  %v4968_v10 = vrot.slane %v4963_v45, %v9955_v29 }
 0x7f0   : > { %v4253_v51 = vsub.f32 %v11308_v32, %v4236_v63  ;;  %v4254_v37 = vsub.f32 %v11301_v5, %v4236_v63  ;;  %8193 = vmatprep.subr.bf16.mxu1 %v8760_v39  ;;  %v4256_v18 = vsub.f32 %v11303_v61, %v4239_v30  ;;  %8980 = vpow2.f32 %v4275_v50 }
 0x7f1   : > { %8982 = vpow2.f32 %v4277_v60  ;;  %v4255_v35 = vsub.f32 %v11310_v46, %v4239_v30  ;;  %v11524_v46 = vcombine.low %v4968_v10, %v4968_v10 }
 0x7f2   : > { %v4279_v41 = vmul.f32 1.442695, %v4253_v51  ;;  %v4281_v48 = vmul.f32 1.442695, %v4254_v37  ;;  %v4285_v0 = vmul.f32 1.442695, %v4256_v18 }
 0x7f3   : > { %v1761_v55 = vpop.permute.xlu1 %1760  ;;  %v4242_v13 = vpop.xlane.xlu0 %4241  ;;  %8194 = vmatpush3.bf16.msra.mxu1 %v8762_v47  ;;  %v4283_v4 = vmul.f32 1.442695, %v4255_v35  ;;  %v7692_v47 = vcombine.low %v4928_v52, %v4928_v52 }
 0x7f4   : > { %8984 = vpow2.f32 %v4279_v41  ;;  %1825 = vst.msk [vmem:[#allocation4 + $0x7c] sm:$0xf] %vm1273_vm1, %v1761_v55  ;;  %v4257_v5 = vsub.f32 %v11321_v20, %v4242_v13  ;;  %v4258_v32 = vsub.f32 %v11319_v2, %v4242_v13 }
 0x7f5   : > { %8986 = vpow2.f32 %v4281_v48 }
 0x7f6   : > { %v4289_v61 = vmul.f32 1.442695, %v4258_v32  ;;  %8988 = vpow2.f32 %v4285_v0  ;;  %v4287_v36 = vmul.f32 1.442695, %v4257_v5 }
 0x7f7   : > { %v1755_v15 = vpop.permute.xlu1 %1754  ;;  %v1759_v19 = vpop.permute.xlu0 %1758 }
 0x7f8   : > { %1822 = vst.msk [vmem:[#allocation4 + $0x70] sm:$0xf] %vm1273_vm1, %v1755_v15  ;;  %1824 = vst.msk [vmem:[#allocation4 + $0x78] sm:$0xf] %vm1273_vm1, %v1759_v19  ;;  %8990 = vpow2.f32 %v4289_v61  ;;  %v7693_v61 = vld [vmem:[%s13000_s3 + $0x2] sm:$0x1] }
 0x7f9   : > { %8992 = vpow2.f32 %v4287_v36 }
 0x7fa   : > { %8994 = vpow2.f32 %v4283_v4  ;;  %v4943_v4 = vpack.i.b16 %v7693_v61, %v7693_v61 }
 0x7fb   : > { %v1757_v14 = vpop.permute.xlu1 %1756  ;;  %v1751_v20 = vpop.permute.xlu0 %1750  ;;  %v11526_v2 = vld [vmem:[#allocation4 + $0x7c] sm:$0xf] }
 0x7fc   : > { %1823 = vst.msk [vmem:[#allocation4 + $0x74] sm:$0xf] %vm1273_vm1, %v1757_v14  ;;  %1820 = vst.msk [vmem:[#allocation4 + $0x68] sm:$0xf] %vm1273_vm1, %v1751_v20  ;;  %v4980_v6 = vmul.bf16 %v11524_v46, %v11526_v2  ;;  %v4940_v37 = vmul.bf16 %v7692_v47, %v11526_v2  ;;  %v4901_v20 = vld [vmem:[%s13000_s3] sm:$0x1] }
 0x7fd   : > { %v8981_v21 = vpop.eup %8980  ;;  %v4903_v54 = vpack.i.b16 %v4901_v20, %v4901_v20 }
 0x7fe   : > { %v8983_v22 = vpop.eup %8982 }
 0x7ff   : > { %v1753_v7 = vpop.permute.xlu1 %1752  ;;  %v1747_v27 = vpop.permute.xlu0 %1746  ;;  %v11528_v44 = vld [vmem:[#allocation4 + $0x78] sm:$0xf]  ;;  %v11564_v9 = vld [vmem:[#allocation4 + $0x70] sm:$0xf] }
 0x800   : > { %1821 = vst.msk [vmem:[#allocation4 + $0x6c] sm:$0xf] %vm1273_vm1, %v1753_v7  ;;  %1818 = vst.msk [vmem:[#allocation4 + $0x60] sm:$0xf] %vm1273_vm1, %v1747_v27  ;;  %v4979_v23 = vmul.bf16 %v11524_v46, %v11528_v44  ;;  %v4977_v48 = vmul.bf16 %v11524_v46, %v11564_v9  ;;  %v4937_v0 = vmul.bf16 %v7692_v47, %v11564_v9 }
 0x801   : > { %v8985_v62 = vpop.eup %8984  ;;  %v4948_v27 = vrot.slane %v4943_v4, %v9955_v29 }
 0x802   : > { %v8987_v12 = vpop.eup %8986  ;;  %v7712_v53 = vcombine.low %v4979_v23, %v4980_v6  ;;  %v11542_v3 = vpack.c.bf16 %v8985_v62, %v8981_v21 }
 0x803   : > { %v1749_v42 = vpop.permute.xlu1 %1748  ;;  %v5338_v40 = vpop.permute.xlu0 %5337  ;;  %v4296_v43 = vpack.c.bf16 %v8987_v12, %v8983_v22  ;;  %v11561_v51 = vld [vmem:[#allocation4 + $0x74] sm:$0xf]  ;;  %v11578_v5 = vld [vmem:[#allocation4 + $0x68] sm:$0xf]  ;;  %v7694_v11 = vcombine.low %v4948_v27, %v4948_v27  ;;  %v4908_v12 = vrot.slane %v4903_v54, %v9955_v29 }
 0x804   : > { %1819 = vst.msk [vmem:[#allocation4 + $0x64] sm:$0xf] %vm1273_vm1, %v1749_v42  ;;  %8645 = vmatprep.subr.msk.bf16.mxu1 %vm585_vm0, %v7712_v53  ;;  %v8989_v26 = vpop.eup %8988  ;;  %v5366_v17 = vsel %vm585_vm0, %v11362_v1, %v5338_v40  ;;  %v4939_v1 = vmul.bf16 %v7692_v47, %v11528_v44  ;;  %v4978_v41 = vmul.bf16 %v11524_v46, %v11561_v51  ;;  %v8765_v40 = vld [vmem:[#allocation3 + $0x60] sm:$0xff]  }
 0x805   : > { %4471 = vmatprep.mubr.bf16.mxu1 %v4296_v43  ;;  %v8991_v38 = vpop.eup %8990  ;;  %v4975_v35 = vmul.bf16 %v11524_v46, %v11578_v5  ;;  %v4935_v10 = vmul.bf16 %v7692_v47, %v11578_v5  ;;  %v4960_v58 = vmul.bf16 %v7694_v11, %v11526_v2  ;;  %v7690_v42 = vcombine.low %v4908_v12, %v4908_v12 }
 0x806   : > { %4472 = vmatmul.mubr.bf16.gmra.mxu1 %v11542_v3  ;;  %v4298_v25 = vpack.c.bf16 %v8991_v38, %v8989_v26  ;;  %v8993_v39 = vpop.eup %8992  ;;  %v7704_v18 = vcombine.low %v4939_v1, %v4940_v37  ;;  %v7711_v13 = vcombine.low %v4977_v48, %v4978_v41 }
 0x807   : > { %v5346_v28 = vpop.permute.xlu1 %5345  ;;  %v5354_v34 = vpop.permute.xlu0 %5353  ;;  %v11574_v45 = vld [vmem:[#allocation4 + $0x6c] sm:$0xf]  ;;  %v4893_v14 = vld [vmem:[#allocation4 + $0x60] sm:$0xf]  ;;  %v4919_v33 = vmul.bf16 %v7690_v42, %v11528_v44  ;;  %v4920_v26 = vmul.bf16 %v7690_v42, %v11526_v2  ;;  %v4955_v2 = vmul.bf16 %v7694_v11, %v11578_v5 }
 0x808   : > { %v5374_v8 = vsel %vm2326_vm2, %v5366_v17, %v5346_v28  ;;  %4479 = vmatprep.mubr.bf16.mxu1 %v4298_v25  ;;  %v8995_v63 = vpop.eup %8994  ;;  %v5132_v55 = vsel %vm585_vm0, %v7704_v18, 0  ;;  %v4936_v19 = vmul.bf16 %v7692_v47, %v11574_v45  ;;  %v4973_v7 = vmul.bf16 %v11524_v46, %v4893_v14 }
 0x809   : > { %v11555_v50 = vsel %vm2335_vm3, %v5374_v8, %v5354_v34  ;;  %v4297_v30 = vpack.c.bf16 %v8993_v39, %v8995_v63  ;;  %v4933_v62 = vmul.bf16 %v7692_v47, %v4893_v14  ;;  %v7700_v38 = vcombine.low %v4919_v33, %v4920_v26 }
 0x80a   : > { %v5434_v60 = vmul.bf16 %v11548_v16, %v11555_v50  ;;  %v7702_v21 = vcombine.low %v4935_v10, %v4936_v19  ;;  %v4958_v17 = vmul.bf16 %v7694_v11, %v11561_v51  ;;  %v4957_v28 = vmul.bf16 %v7694_v11, %v11564_v9 }
 0x80b   : > { %v4894_v36 = vld [vmem:[#allocation4 + $0x64] sm:$0xf]  ;;  %v5120_v34 = vsel %vm585_vm0, %v7700_v38, 0  ;;  %v4918_v8 = vmul.bf16 %v7690_v42, %v11561_v51  ;;  %v4956_v39 = vmul.bf16 %v7694_v11, %v11574_v45  ;;  %v4953_v37 = vmul.bf16 %v7694_v11, %v4893_v14 }
 0x80c   : > { %8255 = vmatprep.subr.bf16.mxu0 %v5434_v60  ;;  %v5126_v22 = vsel %vm585_vm0, %v7702_v21, 0  ;;  %v4934_v6 = vmul.bf16 %v7692_v47, %v4894_v36  ;;  %v4914_v41 = vmul.bf16 %v7690_v42, %v4894_v36  ;;  %v4913_v48 = vmul.bf16 %v7690_v42, %v4893_v14 }
 0x80d   : > { %v7706_v63 = vcombine.low %v4955_v2, %v4956_v39 }
 0x80e   : > { %4480 = vmatmul.mubr.bf16.gmra.mxu1 %v4297_v30  ;;  %v7701_v53 = vcombine.low %v4933_v62, %v4934_v6 }
 0x80f   : > { %4648 = vmatprep.mubr.bf16.mxu1 %v11421_v24  ;;  %v4938_v24 = vmul.bf16 %v7692_v47, %v11561_v51  ;;  %v4915_v47 = vmul.bf16 %v7690_v42, %v11578_v5  ;;  %v4954_v51 = vmul.bf16 %v7694_v11, %v4894_v36 }
 0x811   : > { %v7703_v32 = vcombine.low %v4937_v0, %v4938_v24  ;;  %v7705_v18 = vcombine.low %v4953_v37, %v4954_v51  ;;  %v8766_v24 = vld [vmem:[#allocation3 + $0x68] sm:$0xff]   ;;  %v8768_v0 = vld [vmem:[#allocation3 + $0x78] sm:$0xff]  }
 0x816   : > { %4649 = vmatmul.mubr.bf16.vlgmr.msra.gmra.mxu1 %v11445_v31  ;;  %v4976_v31 = vmul.bf16 %v11524_v46, %v11574_v45 }
 0x817   : > { %8232 = vmatpush3.bf16.xpose.msra.mxu1 %v5132_v55  ;;  %4656 = vmatprep.mubr.bf16.mxu1 %v11450_v57  ;;  %v5129_v57 = vsel %vm585_vm0, %v7703_v32, 0  ;;  %v7697_v55 = vcombine.low %v4913_v48, %v4914_v41 }
 0x818   : > { %8646 = vmatprep.subr.msk.bf16.mxu1 %vm585_vm0, %v7711_v13  ;;  %v7710_v15 = vcombine.low %v4975_v35, %v4976_v31 }
 0x819   : > { %v5111_v13 = vsel %vm585_vm0, %v7697_v55, 0 }
 0x81e   : > { %4657 = vmatmul.mubr.bf16.gmra.mxu1 %v11473_v49  ;;  %v4974_v49 = vmul.bf16 %v11524_v46, %v4894_v36  ;;  %v4959_v46 = vmul.bf16 %v7694_v11, %v11528_v44  ;;  %v4917_v44 = vmul.bf16 %v7690_v42, %v11564_v9 }
 0x81f   : > { %8234 = vmatpush3.bf16.xpose.msra.mxu1 %v5129_v57  ;;  %4664 = vmatprep.mubr.bf16.mxu1 %v4296_v43 }
 0x820   : > { %8647 = vmatprep.subr.msk.bf16.mxu1 %vm585_vm0, %v7710_v15  ;;  %v7709_v23 = vcombine.low %v4973_v7, %v4974_v49  ;;  %v7708_v43 = vcombine.low %v4959_v46, %v4960_v58  ;;  %v7699_v52 = vcombine.low %v4917_v44, %v4918_v8 }
 0x822   : > { %v5117_v60 = vsel %vm585_vm0, %v7699_v52, 0  ;;  %v5336_v52 = vpop.permute.xlu0 %5335 }
 0x826   : > { %4665 = vmatmul.mubr.bf16.gmra.mxu1 %v11542_v3  ;;  %v5123_v3 = vsel %vm585_vm0, %v7701_v53, 0 }
 0x827   : > { %8236 = vmatpush3.bf16.xpose.msra.mxu1 %v5126_v22  ;;  %4672 = vmatprep.mubr.bf16.mxu1 %v4298_v25  ;;  %v7707_v25 = vcombine.low %v4957_v28, %v4958_v17  ;;  %v5344_v28 = vpop.permute.xlu1 %5343 }
 0x828   : > { %8648 = vmatprep.subr.msk.bf16.mxu1 %vm585_vm0, %v7709_v23 }
 0x82e   : > { %4673 = vmatmul.mubr.bf16.gmra.mxu1 %v4297_v30  ;;  %v4916_v30 = vmul.bf16 %v7690_v42, %v11574_v45  ;;  %v8767_v45 = vld [vmem:[#allocation3 + $0x70] sm:$0xff]  }
 0x82f   : > { %8238 = vmatpush3.bf16.xpose.msra.mxu1 %v5123_v3  ;;  %8247 = vmatprep.mubr.msk.bf16.mxu1 %vm585_vm0, %v8765_v40 }
 0x830   : > { %8649 = vmatprep.subr.msk.bf16.mxu1 %vm585_vm0, %v7708_v43  ;;  %v7698_v1 = vcombine.low %v4915_v47, %v4916_v30  ;;  %v7741_v47 = vld [vmem:[%s13001_s4 + $0x1] sm:$0x1] }
 0x831   : > { %v5401_v55 = vpack.i.b16 %v7741_v47, %v7741_v47 }
 0x832   : > { %v5114_v9 = vsel %vm585_vm0, %v7698_v1, 0 }
 0x837   : > { %8240 = vmatpush3.bf16.xpose.msra.mxu1 %v5120_v34 }
 0x838   : > { %8650 = vmatprep.subr.msk.bf16.mxu1 %vm585_vm0, %v7707_v25 }
 0x83f   : > { %8242 = vmatpush3.bf16.xpose.msra.mxu1 %v5117_v60 }
 0x840   : > { %8651 = vmatprep.subr.msk.bf16.mxu1 %vm585_vm0, %v7706_v63 }
 0x847   : > { %8244 = vmatpush3.bf16.xpose.msra.mxu1 %v5114_v9  ;;  %v5352_v9 = vpop.permute.xlu1 %5351 }
 0x848   : > { %8652 = vmatprep.subr.msk.bf16.mxu1 %vm585_vm0, %v7705_v18 }
 0x84f   : > { %8246 = vmatpush3.bf16.xpose.msra.mxu1 %v5111_v13 }
 0x856   : > { %8248 = vmatmul.mubr.msk.bf16.vlgmr.msra.gmra.mxu1 %vm585_vm0, %v8765_v40 }
 0x857   : > { %8249 = vmatprep.mubr.msk.bf16.mxu1 %vm585_vm0, %v8766_v24 }
 0x85e   : > { %8250 = vmatmul.mubr.msk.bf16.gmra.mxu1 %vm585_vm0, %v8766_v24  ;;  %v5363_v24 = vsel %vm585_vm0, %v11371_v59, %v5336_v52 }
 0x85f   : > { %8251 = vmatprep.mubr.msk.bf16.mxu1 %vm585_vm0, %v8767_v45 }
 0x866   : > { %8252 = vmatmul.mubr.msk.bf16.gmra.mxu1 %vm585_vm0, %v8767_v45  ;;  %v5334_v45 = vpop.permute.xlu0 %5333 }
 0x867   : > { %8253 = vmatprep.mubr.msk.bf16.mxu1 %vm585_vm0, %v8768_v0 }
 0x86e   : > { %8254 = vmatmul.mubr.msk.bf16.gmra.mxu1 %vm585_vm0, %v8768_v0 }
 0x896   : > { %v8155_v5 = vpop.f32.mrf.mxu1 }
 0x898   : > { %v8156_v32 = vpop.f32.mrf.mxu1 }
 0x899   : > { %v8157_v39 = vadd.f32 %v8156_v32, %v8155_v5 }
 0x89a   : > { %v8158_v31 = vpop.f32.mrf.mxu1 }
 0x89c   : > { %v8159_v35 = vpop.f32.mrf.mxu1 }
 0x89d   : > { %v8160_v2 = vadd.f32 %v8159_v35, %v8158_v31 }
 0x89e   : > { %v11631_v61 = vpop.f32.mrf.mxu1 }
 0x8a0   : > { %v11633_v57 = vpop.f32.mrf.mxu1 }
 0x8a1   : > { %v8163_v31 = vadd.f32 %v11633_v57, %v11631_v61  ;;  %v5360_v61 = vsel %vm585_vm0, %v11381_v56, %v5334_v45  ;;  %v7720_v45 = vld [vmem:[%s13003_s6 + $0x1b8] sm:$0xff] }
 0x8a2   : > { %v11635_v15 = vpop.f32.mrf.mxu1 }
 0x8a4   : > { %v8165_v19 = vpop.f32.mrf.mxu1 }
 0x8a5   : > { %v8166_v35 = vadd.f32 %v8165_v19, %v11635_v15  ;;  %v5350_v15 = vpop.permute.xlu0 %5349 }
 0x8c6   : > { %v11637_v36 = vpop.f32.mrf.mxu1 }
 0x8c8   : > { %v11639_v10 = vpop.f32.mrf.mxu1 }
 0x8c9   : > { %v8169_v56 = vadd.f32 %v11639_v10, %v11637_v36 }
 0x8ca   : > { %v11641_v4 = vpop.f32.mrf.mxu1 }
 0x8cc   : > { %v11643_v14 = vpop.f32.mrf.mxu1 }
 0x8ce   : > { %v11645_v20 = vpop.f32.mrf.mxu1 }
 0x8d0   : > { %v11647_v21 = vpop.f32.mrf.mxu1 }
 0x8d1   : > { %v8175_v10 = vadd.f32 %v11647_v21, %v11645_v20  ;;  %v7715_v21 = vld [vmem:[%s13003_s6 + $0x190] sm:$0xff] }
 0x8d2   : > { %v11649_v49 = vpop.f32.mrf.mxu1 }
 0x8d4   : > { %v11651_v7 = vpop.f32.mrf.mxu1 }
 0x8d6   : > { %v8195_v27 = vpop.f32.mrf.mxu1 }
 0x8d8   : > { %v8196_v54 = vpop.f32.mrf.mxu1 }
 0x8d9   : > { %v8197_v22 = vadd.f32 %v8196_v54, %v8195_v27 }
 0x8da   : > { %v8198_v23 = vpop.f32.mrf.mxu1 }
 0x8db   : > { %v4681_v6 = vmax.f32 %v8197_v22, 1e-30  ;;  %v11662_v22 = vrot.slane %v5401_v55, %v9955_v29 }
 0x8dc   : > { %v8199_v62 = vpop.f32.mrf.mxu1 }
 0x8dd   : > { %v8200_v11 = vadd.f32 %v8199_v62, %v8198_v23  ;;  %8996 = vrcp.f32 %v4681_v6  ;;  %v5372_v23 = vsel %vm2326_vm2, %v5363_v24, %v5344_v28  ;;  %v5342_v6 = vpop.permute.xlu1 %5341 }
 0x8de   : > { %v8201_v12 = vpop.f32.mrf.mxu1  ;;  %v5370_v57 = vsel %vm2326_vm2, %v5360_v61, %v5342_v6  ;;  %v7724_v61 = vld [vmem:[%s13003_s6 + $0x1d8] sm:$0xff] }
 0x8df   : > { %v4682_v53 = vmax.f32 %v8200_v11, 1e-30 }
 0x8e0   : > { %v8202_v46 = vpop.f32.mrf.mxu1 }
 0x8e1   : > { %8998 = vrcp.f32 %v4682_v53  ;;  %v8203_v58 = vadd.f32 %v8202_v46, %v8201_v12  ;;  %v11666_v12 = vsel %vm2335_vm3, %v5372_v23, %v5352_v9  ;;  %v5410_v53 = vmul.bf16 %v11662_v22, %v11555_v50  ;;  %v7718_v9 = vld [vmem:[%s13003_s6 + $0x1a8] sm:$0xff] }
 0x8e2   : > { %v8204_v42 = vpop.f32.mrf.mxu1  ;;  %v5433_v46 = vmul.bf16 %v11548_v16, %v11666_v12 }
 0x8e3   : > { %v4683_v40 = vmax.f32 %v8203_v58, 1e-30 }
 0x8e4   : > { %v8205_v3 = vpop.f32.mrf.mxu1 }
 0x8e5   : > { %v8206_v43 = vadd.f32 %v8205_v3, %v8204_v42  ;;  %9000 = vrcp.f32 %v4683_v40  ;;  %v11676_v42 = vsel %vm2335_vm3, %v5370_v57, %v5350_v15  ;;  %v8172_v40 = vadd.f32 %v11643_v14, %v11641_v4  ;;  %v7721_v15 = vld [vmem:[%s13003_s6 + $0x1c0] sm:$0xff] }
 0x8e6   : > { %v8207_v33 = vpop.f32.mrf.mxu1  ;;  %v5408_v28 = vmul.bf16 %v11662_v22, %v11676_v42  ;;  %v8178_v4 = vadd.f32 %v11651_v7, %v11649_v49  ;;  %v7716_v7 = vld [vmem:[%s13003_s6 + $0x198] sm:$0xff] }
 0x8e7   : > { %v4684_v26 = vmax.f32 %v8206_v43, 1e-30  ;;  %v5409_v43 = vmul.bf16 %v11662_v22, %v11666_v12 }
 0x8e8   : > { %v8208_v38 = vpop.f32.mrf.mxu1 }
 0x8e9   : > { %9002 = vrcp.f32 %v4684_v26  ;;  %v8209_v17 = vadd.f32 %v8208_v38, %v8207_v33  ;;  %v5432_v33 = vmul.bf16 %v11548_v16, %v11676_v42 }
 0x8ea   : > { %v8210_v34 = vpop.f32.mrf.mxu1  ;;  %v8997_v8 = vpop.eup %8996 }
 0x8eb   : > { %v4685_v25 = vmax.f32 %v8209_v17, 1e-30  ;;  %v4697_v51 = vmul.f32 %v8997_v8, %v8157_v39  ;;  %v7714_v39 = vld [vmem:[%s13003_s6 + $0x188] sm:$0xff] }
 0x8ec   : > { %v8211_v44 = vpop.f32.mrf.mxu1 }
 0x8ed   : > { %v8212_v60 = vadd.f32 %v8211_v44, %v8210_v34  ;;  %9004 = vrcp.f32 %v4685_v25  ;;  %v7713_v44 = vld [vmem:[%s13003_s6 + $0x180] sm:$0xff] }
 0x8ee   : > { %v8999_v63 = vpop.eup %8998  ;;  %v8213_v30 = vpop.f32.mrf.mxu1 }
 0x8ef   : > { %v4686_v1 = vmax.f32 %v8212_v60, 1e-30  ;;  %v4698_v37 = vmul.f32 %v8999_v63, %v8160_v2 }
 0x8f0   : > { %v8214_v18 = vpop.f32.mrf.mxu1 }
 0x8f1   : > { %9006 = vrcp.f32 %v4686_v1  ;;  %v8215_v41 = vadd.f32 %v8214_v18, %v8213_v30  ;;  %v4705_v48 = vpack.c.bf16 %v4698_v37, %v4697_v51  ;;  %v7717_v51 = vld [vmem:[%s13003_s6 + $0x1a0] sm:$0xff] }
 0x8f2   : > { %v8216_v13 = vpop.f32.mrf.mxu1  ;;  %v9001_v5 = vpop.eup %9000 }
 0x8f3   : > { %v4687_v0 = vmax.f32 %v8215_v41, 1e-30  ;;  %8489 = vmatprep.mubr.bf16.mxu0 %v4705_v48  ;;  %v4699_v62 = vmul.f32 %v9001_v5, %v8163_v31 }
 0x8f4   : > { %v8217_v32 = vpop.f32.mrf.mxu1 }
 0x8f5   : > { %v8218_v27 = vadd.f32 %v8217_v32, %v8216_v13  ;;  %9008 = vrcp.f32 %v4687_v0  ;;  %v7719_v13 = vld [vmem:[%s13003_s6 + $0x1b0] sm:$0xff] }
 0x8f6   : > { %v9003_v54 = vpop.eup %9002 }
 0x8f7   : > { %v4688_v59 = vmax.f32 %v8218_v27, 1e-30  ;;  %v4700_v11 = vmul.f32 %v9003_v54, %v8166_v35  ;;  %v11740_v27 = vld [vmem:[#allocation2 + $0x60] sm:$0xff]  }
 0x8f9   : > { %9010 = vrcp.f32 %v4688_v59  ;;  %v4706_v19 = vpack.c.bf16 %v4700_v11, %v4699_v62  ;;  %v7722_v11 = vld [vmem:[%s13003_s6 + $0x1c8] sm:$0xff] }
 0x8fa   : > { %v9005_v58 = vpop.eup %9004 }
 0x8fb   : > { %8490 = vmatmul.mubr.bf16.vlgmr.msra.gmra.mxu0 %v4706_v19  ;;  %v4701_v26 = vmul.f32 %v9005_v58, %v8169_v56  ;;  %v7723_v19 = vld [vmem:[%s13003_s6 + $0x1d0] sm:$0xff]  ;;  %v7726_v58 = vld [vmem:[%s13003_s6 + $0x1e8] sm:$0xff] }
 0x8fc   : > { %8256 = vmatpush3.bf16.msra.mxu0 %v5410_v53 }
 0x8fd   : > { %8257 = vmatprep.subr.bf16.mxu0 %v5433_v46 }
 0x8fe   : > { %v9007_v3 = vpop.eup %9006 }
 0x8ff   : > { %v4702_v38 = vmul.f32 %v9007_v3, %v8172_v40 }
 0x900   : > { %8258 = vmatpush3.bf16.msra.mxu0 %v5409_v43  ;;  %v7725_v43 = vld [vmem:[%s13003_s6 + $0x1e0] sm:$0xff] }
 0x901   : > { %8259 = vmatprep.subr.bf16.mxu0 %v5432_v33  ;;  %v4707_v17 = vpack.c.bf16 %v4702_v38, %v4701_v26 }
 0x902   : > { %v9009_v36 = vpop.eup %9008 }
 0x903   : > { %8493 = vmatprep.mubr.bf16.mxu0 %v4707_v17  ;;  %v4703_v34 = vmul.f32 %v9009_v36, %v8175_v10  ;;  %v7728_v17 = vld [vmem:[%s13003_s6 + $0x1f8] sm:$0xff]  ;;  %v11785_v10 = vld [vmem:[#allocation5 + $0x8] sm:$0xff] }
 0x904   : > { %8260 = vmatpush3.bf16.msra.mxu0 %v5408_v28 }
 0x906   : > { %v9011_v14 = vpop.eup %9010 }
 0x907   : > { %v4704_v25 = vmul.f32 %v9011_v14, %v8178_v4  ;;  %v7727_v4 = vld [vmem:[%s13003_s6 + $0x1f0] sm:$0xff] }
 0x909   : > { %v4708_v8 = vpack.c.bf16 %v4704_v25, %v4703_v34  ;;  %v5916_v25 = vsel %vm585_vm0, %v11785_v10, 0.0 }
 0x90b   : > { %8494 = vmatmul.mubr.bf16.gmra.mxu0 %v4708_v8 }
 0x916   : > { %v5192_v52 = vpop.f32.mrf.mxu1 }
 0x917   : > { %v11698_v60 = vadd.f32 %v7713_v44, %v5192_v52  ;;  %v11798_v44 = vld [vmem:[#allocation5 + $0x18] sm:$0xff] }
 0x918   : > { %v5194_v2 = vpop.f32.mrf.mxu1 }
 0x919   : > { %v11700_v20 = vadd.f32 %v7714_v39, %v5194_v2  ;;  %v5922_v39 = vsel %vm585_vm0, %v11798_v44, 0.0  ;;  %v6042_v2 = vmul.f32 %v11785_v10, %v11785_v10 }
 0x91a   : > { %v5196_v49 = vpop.f32.mrf.mxu1 }
 0x91b   : > { %v5231_v63 = vmax.f32 %v11698_v60, %v11700_v20  ;;  %v11710_v47 = vadd.f32 %v7715_v21, %v5196_v49  ;;  %v11806_v21 = vld [vmem:[#allocation5] sm:$0xff] }
 0x91c   : > { %v5198_v30 = vpop.f32.mrf.mxu1  ;;  %v5913_v49 = vsel %vm585_vm0, %v11806_v21, 0.0 }
 0x91d   : > { %v11712_v1 = vadd.f32 %v7716_v7, %v5198_v30  ;;  %5232 = vmax.xlane.f32.xlu1 %v5231_v63  ;;  %v6076_v7 = vsel %vm585_vm0, %v6042_v2, 0.0  ;;  %v6044_v63 = vmul.f32 %v11798_v44, %v11798_v44  ;;  %v11813_v30 = vld [vmem:[#allocation5 + $0x10] sm:$0xff] }
 0x91e   : > { %v5202_v37 = vpop.f32.mrf.mxu1 }
 0x91f   : > { %v5234_v18 = vmax.f32 %v11710_v47, %v11712_v1  ;;  %v11722_v48 = vadd.f32 %v7717_v51, %v5202_v37  ;;  %v5919_v51 = vsel %vm585_vm0, %v11813_v30, 0.0  ;;  %v6082_v37 = vsel %vm585_vm0, %v6044_v63, 0.0 }
 0x920   : > { %v5204_v41 = vpop.f32.mrf.mxu1 }
 0x921   : > { %v11724_v55 = vadd.f32 %v7718_v9, %v5204_v41  ;;  %5235 = vmax.xlane.f32.xlu0 %v5234_v18  ;;  %v6041_v9 = vmul.f32 %v11806_v21, %v11806_v21  ;;  %v11820_v18 = vld [vmem:[#allocation5 + $0x28] sm:$0xff] }
 0x922   : > { %v5206_v24 = vpop.f32.mrf.mxu1 }
 0x923   : > { %v5237_v0 = vmax.f32 %v11722_v48, %v11724_v55  ;;  %v11734_v32 = vadd.f32 %v7719_v13, %v5206_v24  ;;  %v6073_v41 = vsel %vm585_vm0, %v6041_v9, 0.0  ;;  %v5928_v13 = vsel %vm585_vm0, %v11820_v18, 0.0  ;;  %v5896_v9 = vld [vmem:[#allocation5 + $0x78] sm:$0xff] }
 0x924   : > { %v5208_v5 = vpop.f32.mrf.mxu1  ;;  %v6043_v24 = vmul.f32 %v11813_v30, %v11813_v30 }
 0x925   : > { %v11736_v31 = vadd.f32 %v7720_v45, %v5208_v5  ;;  %5238 = vmax.xlane.f32.xlu1 %v5237_v0  ;;  %v11827_v45 = vld [vmem:[#allocation5 + $0x38] sm:$0xff] }
 0x926   : > { %v5212_v54 = vpop.f32.mrf.mxu1  ;;  %v6079_v0 = vsel %vm585_vm0, %v6043_v24, 0.0  ;;  %v5934_v5 = vsel %vm585_vm0, %v11827_v45, 0.0 }
 0x927   : > { %v5240_v35 = vmax.f32 %v11734_v32, %v11736_v31  ;;  %v11767_v40 = vadd.f32 %v7721_v15, %v5212_v54  ;;  %v11834_v54 = vld [vmem:[#allocation5 + $0x20] sm:$0xff]  ;;  %v11848_v15 = vld [vmem:[#allocation5 + $0x48] sm:$0xff] }
 0x928   : > { %v5214_v23 = vpop.f32.mrf.mxu1 }
 0x929   : > { %5241 = vmax.xlane.f32.xlu0 %v5240_v35  ;;  %v11760_v53 = vadd.f32 %v7722_v11, %v5214_v23  ;;  %v6046_v35 = vmul.f32 %v11820_v18, %v11820_v18  ;;  %v5925_v23 = vsel %vm585_vm0, %v11834_v54, 0.0 }
 0x92a   : > { %v5216_v6 = vpop.f32.mrf.mxu1 }
 0x92b   : > { %v11769_v3 = vadd.f32 %v7723_v19, %v5216_v6  ;;  %v5243_v33 = vmax.f32 %v11767_v40, %v11760_v53  ;;  %v6088_v6 = vsel %vm585_vm0, %v6046_v35, 0.0 }
 0x92c   : > { %v5218_v59 = vpop.f32.mrf.mxu1 }
 0x92d   : > { %v11762_v46 = vadd.f32 %v7724_v61, %v5218_v59  ;;  %v6048_v59 = vmul.f32 %v11827_v45, %v11827_v45 }
 0x92e   : > { %v5222_v62 = vpop.f32.mrf.mxu1 }
 0x92f   : > { %v5246_v26 = vmax.f32 %v11769_v3, %v11762_v46  ;;  %v11783_v36 = vadd.f32 %v7725_v43, %v5222_v62  ;;  %v11841_v62 = vld [vmem:[#allocation5 + $0x30] sm:$0xff]  ;;  %v6094_v61 = vsel %vm585_vm0, %v6048_v59, 0.0  ;;  %v5892_v43 = vld [vmem:[#allocation5 + $0x58] sm:$0xff] }
 0x930   : > { %v5224_v57 = vpop.f32.mrf.mxu1  ;;  %v5931_v11 = vsel %vm585_vm0, %v11841_v62, 0.0 }
 0x931   : > { %v11778_v38 = vadd.f32 %v7726_v58, %v5224_v57  ;;  %v6045_v57 = vmul.f32 %v11834_v54, %v11834_v54  ;;  %v5940_v58 = vsel %vm585_vm0, %v11848_v15, 0.0 }
 0x932   : > { %v5226_v56 = vpop.f32.mrf.mxu1 }
 0x933   : > { %v5249_v14 = vmax.f32 %v11783_v36, %v11778_v38  ;;  %v11796_v8 = vadd.f32 %v7727_v4, %v5226_v56  ;;  %v6085_v19 = vsel %vm585_vm0, %v6045_v57, 0.0  ;;  %v6047_v56 = vmul.f32 %v11841_v62, %v11841_v62 }
 0x934   : > { %v5228_v28 = vpop.f32.mrf.mxu1 }
 0x935   : > { %v11792_v34 = vadd.f32 %v7728_v17, %v5228_v28  ;;  %v6050_v17 = vmul.f32 %v11848_v15, %v11848_v15  ;;  %v5889_v28 = vld [vmem:[#allocation5 + $0x40] sm:$0xff] }
 0x936   : > { %5339 = vrot.lane.b32.xlu1 %v11740_v27, %s13033_s20  ;;  %v5937_v4 = vsel %vm585_vm0, %v5889_v28, 0.0 }
 0x937   : > { %v5252_v52 = vmax.f32 %v11796_v8, %v11792_v34 }
 0x93a   : > { %5347 = vrot.lane.b32.xlu1 %v11740_v27, %s13032_s0 }
 0x93f   : > { %5331 = vrot.lane.b32.xlu0 %v11740_v27, %s13031_s19 }
 0x95e   : > { %5244 = vmax.xlane.f32.xlu0 %v5243_v33  ;;  %5247 = vmax.xlane.f32.xlu1 %v5246_v26  ;;  %v6091_v33 = vsel %vm585_vm0, %v6047_v56, 0.0  ;;  %v5946_v26 = vsel %vm585_vm0, %v5892_v43, 0.0 }
 0x962   : > { %5250 = vmax.xlane.f32.xlu0 %v5249_v14  ;;  %5917 = vadd.xlane.f32.xlu1 %v5916_v25  ;;  %v6100_v14 = vsel %vm585_vm0, %v6050_v17, 0.0  ;;  %v6052_v25 = vmul.f32 %v5892_v43, %v5892_v43 }
 0x964   : > { %v6106_v2 = vsel %vm585_vm0, %v6052_v25, 0.0 }
 0x966   : > { %5253 = vmax.xlane.f32.xlu0 %v5252_v52  ;;  %5923 = vadd.xlane.f32.xlu1 %v5922_v39  ;;  %v5891_v52 = vld [vmem:[#allocation5 + $0x50] sm:$0xff] }
 0x967   : > { %v5943_v39 = vsel %vm585_vm0, %v5891_v52, 0.0 }
 0x96a   : > { %5914 = vadd.xlane.f32.xlu0 %v5913_v49  ;;  %6077 = vadd.xlane.f32.xlu1 %v6076_v7  ;;  %v6049_v49 = vmul.f32 %v5889_v28, %v5889_v28  ;;  %v5894_v7 = vld [vmem:[#allocation5 + $0x68] sm:$0xff] }
 0x96b   : > { %v6054_v24 = vmul.f32 %v5894_v7, %v5894_v7 }
 0x96c   : > { %v6097_v63 = vsel %vm585_vm0, %v6049_v49, 0.0 }
 0x96d   : > { %v6112_v35 = vsel %vm585_vm0, %v6054_v24, 0.0 }
 0x96e   : > { %5920 = vadd.xlane.f32.xlu0 %v5919_v51  ;;  %6083 = vadd.xlane.f32.xlu1 %v6082_v37  ;;  %v5952_v51 = vsel %vm585_vm0, %v5894_v7, 0.0  ;;  %v6051_v37 = vmul.f32 %v5891_v52, %v5891_v52 }
 0x972   : > { %6074 = vadd.xlane.f32.xlu0 %v6073_v41  ;;  %5929 = vadd.xlane.f32.xlu1 %v5928_v13  ;;  %v6103_v41 = vsel %vm585_vm0, %v6051_v37, 0.0  ;;  %v5958_v13 = vsel %vm585_vm0, %v5896_v9, 0.0 }
 0x976   : > { %6080 = vadd.xlane.f32.xlu0 %v6079_v0  ;;  %5935 = vadd.xlane.f32.xlu1 %v5934_v5  ;;  %v5893_v0 = vld [vmem:[#allocation5 + $0x60] sm:$0xff] }
 0x977   : > { %v5949_v5 = vsel %vm585_vm0, %v5893_v0, 0.0 }
 0x97a   : > { %5926 = vadd.xlane.f32.xlu0 %v5925_v23  ;;  %6089 = vadd.xlane.f32.xlu1 %v6088_v6  ;;  %v6056_v23 = vmul.f32 %v5896_v9, %v5896_v9  ;;  %v5895_v6 = vld [vmem:[#allocation5 + $0x70] sm:$0xff] }
 0x97b   : > { %v5955_v59 = vsel %vm585_vm0, %v5895_v6, 0.0 }
 0x97e   : > { %5932 = vadd.xlane.f32.xlu0 %v5931_v11  ;;  %6095 = vadd.xlane.f32.xlu1 %v6094_v61  ;;  %v6118_v11 = vsel %vm585_vm0, %v6056_v23, 0.0  ;;  %v6053_v61 = vmul.f32 %v5893_v0, %v5893_v0  ;;  %v3857_v23 = vld [vmem:[%s9362_s30 + $0x80] sm:$0xff] }
 0x980   : > { %v6109_v57 = vsel %vm585_vm0, %v6053_v61, 0.0 }
 0x982   : > { %6086 = vadd.xlane.f32.xlu0 %v6085_v19  ;;  %5941 = vadd.xlane.f32.xlu1 %v5940_v58  ;;  %v6055_v19 = vmul.f32 %v5895_v6, %v5895_v6 }
 0x984   : > { %v6115_v58 = vsel %vm585_vm0, %v6055_v19, 0.0 }
 0x986   : > { %6092 = vadd.xlane.f32.xlu0 %v6091_v33  ;;  %5947 = vadd.xlane.f32.xlu1 %v5946_v26 }
 0x98a   : > { %5938 = vadd.xlane.f32.xlu0 %v5937_v4  ;;  %6101 = vadd.xlane.f32.xlu1 %v6100_v14  ;;  %v7742_v14 = vld [vmem:[%s13001_s4 + $0x2] sm:$0x1] }
 0x98e   : > { %5944 = vadd.xlane.f32.xlu0 %v5943_v39  ;;  %6107 = vadd.xlane.f32.xlu1 %v6106_v2  ;;  %v5413_v39 = vpack.i.b16 %v7742_v14, %v7742_v14 }
 0x992   : > { %6098 = vadd.xlane.f32.xlu0 %v6097_v63  ;;  %5953 = vadd.xlane.f32.xlu1 %v5952_v51 }
 0x996   : > { %6104 = vadd.xlane.f32.xlu0 %v6103_v41  ;;  %5959 = vadd.xlane.f32.xlu1 %v5958_v13  ;;  %v11890_v41 = vrot.slane %v5413_v39, %v9955_v29 }
 0x99a   : > { %5950 = vadd.xlane.f32.xlu0 %v5949_v5  ;;  %6113 = vadd.xlane.f32.xlu1 %v6112_v35 }
 0x99e   : > { %5956 = vadd.xlane.f32.xlu0 %v5955_v59  ;;  %6119 = vadd.xlane.f32.xlu1 %v6118_v11 }
 0x9a2   : > { %6110 = vadd.xlane.f32.xlu0 %v6109_v57  ;;  %v3860_v57 = vld [vmem:[%s9362_s30 + $0x98] sm:$0xff] }
 0x9a6   : > { %6116 = vadd.xlane.f32.xlu0 %v6115_v58  ;;  %v5233_v56 = vpop.xlane.xlu1 %5232 }
 0x9a7   : > { %v5256_v43 = vsub.f32 %v11700_v20, %v5233_v56  ;;  %v5387_v20 = vld [vmem:[%s13001_s4] sm:$0x1]  ;;  %v5255_v51 = vsub.f32 %v11698_v60, %v5233_v56 }
 0x9a8   : > { %v5389_v49 = vpack.i.b16 %v5387_v20, %v5387_v20 }
 0x9a9   : > { %v5273_v26 = vmul.f32 1.442695, %v5256_v43  ;;  %v5271_v59 = vmul.f32 1.442695, %v5255_v51  ;;  %v3863_v51 = vld [vmem:[%s9362_s30 + $0xb0] sm:$0xff] }
 0x9aa   : > { %v5236_v33 = vpop.xlane.xlu0 %5235 }
 0x9ab   : > { %v5258_v17 = vsub.f32 %v11712_v1, %v5236_v33  ;;  %9012 = vpow2.f32 %v5273_v26  ;;  %v5257_v2 = vsub.f32 %v11710_v47, %v5236_v33 }
 0x9ad   : > { %v5277_v28 = vmul.f32 1.442695, %v5258_v17  ;;  %v5275_v13 = vmul.f32 1.442695, %v5257_v2  ;;  %v3858_v17 = vld [vmem:[%s9362_s30 + $0x88] sm:$0xff] }
 0x9ae   : > { %v11875_v4 = vpop.xlane.xlu1 %5238 }
 0x9af   : > { %9014 = vpow2.f32 %v5277_v28  ;;  %v5260_v47 = vsub.f32 %v11724_v55, %v11875_v4  ;;  %v11908_v55 = vld [vmem:[%s13005_s8] ss:$0 sm:$0xff]  ;;  %v5421_v28 = vmul.bf16 %v11890_v41, %v11666_v12  ;;  %v5259_v14 = vsub.f32 %v11722_v48, %v11875_v4 }
 0x9b0   : > { %9016 = vpow2.f32 %v5275_v13  ;;  %v8770_v13 = vld [vmem:[%s13002_s5 + $0x78] sm:$0xff]  }
 0x9b1   : > { %v5279_v4 = vmul.f32 1.442695, %v5259_v14 }
 0x9b2   : > { %v5340_v25 = vpop.permute.xlu1 %5339  ;;  %v5242_v52 = vpop.xlane.xlu0 %5241 }
 0x9b3   : > { %v5262_v7 = vsub.f32 %v11736_v31, %v5242_v52  ;;  %v3859_v31 = vld [vmem:[%s9362_s30 + $0x90] sm:$0xff]  ;;  %v5261_v19 = vsub.f32 %v11734_v32, %v5242_v52 }
 0x9b5   : > { %v5285_v5 = vmul.f32 1.442695, %v5262_v7  ;;  %v5283_v52 = vmul.f32 1.442695, %v5261_v19 }
 0x9b6   : > { %v5332_v1 = vpop.permute.xlu0 %5331  ;;  %v5348_v37 = vpop.permute.xlu1 %5347 }
 0x9b7   : > { %v5357_v63 = vsel %vm585_vm0, %v11740_v27, %v5332_v1  ;;  %v11903_v27 = vrot.slane %v5389_v49, %v9955_v29  ;;  %v5281_v29 = vmul.f32 1.442695, %v5260_v47  ;;  %9018 = vpow2.f32 %v5285_v5 }
 0x9b8   : > { %v5368_v9 = vsel %vm2326_vm2, %v5357_v63, %v5340_v25  ;;  %v9013_v6 = vpop.eup %9012  ;;  %9020 = vpow2.f32 %v5271_v59  ;;  %v5420_v1 = vmul.bf16 %v11890_v41, %v11676_v42 }
 0x9b9   : > { %v11895_v24 = vsel %vm2335_vm3, %v5368_v9, %v5348_v37  ;;  %v5398_v33 = vmul.bf16 %v11903_v27, %v11555_v50  ;;  %9022 = vpow2.f32 %v5281_v29  ;;  %v5397_v48 = vmul.bf16 %v11903_v27, %v11666_v12 }
 0x9ba   : > { %v5431_v0 = vmul.bf16 %v11548_v16, %v11895_v24  ;;  %v5407_v60 = vmul.bf16 %v11662_v22, %v11895_v24  ;;  %v5422_v16 = vmul.bf16 %v11890_v41, %v11555_v50  ;;  %9024 = vpow2.f32 %v5283_v52 }
 0x9bb   : > { %v8491_v35 = vpop.f32.mrf.mxu0  ;;  %v5396_v49 = vmul.bf16 %v11903_v27, %v11676_v42  ;;  %9026 = vpow2.f32 %v5279_v4  ;;  %v5419_v63 = vmul.bf16 %v11890_v41, %v11895_v24  ;;  %v5395_v42 = vmul.bf16 %v11903_v27, %v11895_v24 }
 0x9bc   : > { %v4840_v11 = vadd.f32 %v8491_v35, %v3859_v31  ;;  %8261 = vmatprep.subr.bf16.mxu0 %v5431_v0  ;;  %v9015_v22 = vpop.eup %9014  ;;  %v3861_v31 = vld [vmem:[%s9362_s30 + $0xa0] sm:$0xff] }
 0x9bd   : > { %8262 = vmatpush3.bf16.msra.mxu0 %v5407_v60  ;;  %v4807_v61 = vpop.f32.mrf.mxu0  ;;  %v11916_v43 = vpack.c.bf16 %v9015_v22, %v9013_v6  ;;  %v9017_v9 = vpop.eup %9016 }
 0x9be   : > { %v4855_v58 = vadd.f32 %v11908_v55, %v4840_v11  ;;  %v4838_v56 = vadd.f32 %v4807_v61, %v3857_v23  ;;  %8263 = vmatprep.subr.bf16.mxu0 %v5422_v16  ;;  %v3864_v11 = vld [vmem:[%s9362_s30 + $0xb8] sm:$0xff] }
 0x9bf   : > { %v8492_v26 = vpop.f32.mrf.mxu0  ;;  %5467 = vmatprep.mubr.bf16.mxu0 %v11916_v43  ;;  %v8771_v61 = vld [vmem:[%s13002_s5 + $0x38] sm:$0xff]  }
 0x9c0   : > { %4863 = vst.msk [vmem:[#allocation5 + $0x90] sm:$0xff] %vm585_vm0, %v4855_v58  ;;  %v4853_v32 = vadd.f32 %v11908_v55, %v4838_v56  ;;  %v4841_v25 = vadd.f32 %v8492_v26, %v3860_v57  ;;  %v3862_v58 = vld [vmem:[%s9362_s30 + $0xa8] sm:$0xff]  ;;  %v8772_v56 = vld [vmem:[%s13002_s5 + $0x70] sm:$0xff]  }
 0x9c1   : > { %8264 = vmatpush3.bf16.msra.mxu0 %v5398_v33  ;;  %v4810_v50 = vpop.f32.mrf.mxu0 }
 0x9c2   : > { %4861 = vst.msk [vmem:[#allocation5 + $0x80] sm:$0xff] %vm585_vm0, %v4853_v32  ;;  %v4856_v20 = vadd.f32 %v11908_v55, %v4841_v25  ;;  %v4839_v39 = vadd.f32 %v4810_v50, %v3858_v17  ;;  %8265 = vmatprep.subr.bf16.mxu0 %v5421_v28 }
 0x9c4   : > { %4864 = vst.msk [vmem:[#allocation5 + $0x98] sm:$0xff] %vm585_vm0, %v4856_v20  ;;  %v4854_v2 = vadd.f32 %v11908_v55, %v4839_v39  ;;  %v9019_v60 = vpop.eup %9018  ;;  %v8773_v20 = vld [vmem:[%s13002_s5 + $0x30] sm:$0xff]  }
 0x9c5   : > { %8266 = vmatpush3.bf16.msra.mxu0 %v5397_v48  ;;  %v9021_v6 = vpop.eup %9020  ;;  %v8774_v48 = vld [vmem:[%s13002_s5 + $0x68] sm:$0xff]  }
 0x9c6   : > { %4862 = vst.msk [vmem:[#allocation5 + $0x88] sm:$0xff] %vm585_vm0, %v4854_v2  ;;  %8267 = vmatprep.subr.bf16.mxu0 %v5420_v1  ;;  %v9023_v16 = vpop.eup %9022  ;;  %v11953_v24 = vpack.c.bf16 %v9017_v9, %v9021_v6 }
 0x9c7   : > { %v5899_v7 = vld [vmem:[#allocation5 + $0x90] sm:$0xff]  ;;  %v11958_v19 = vpack.c.bf16 %v9019_v60, %v9023_v16  ;;  %v9025_v39 = vpop.eup %9024 }
 0x9c8   : > { %v5967_v12 = vsel %vm585_vm0, %v5899_v7, 0.0  ;;  %v6059_v23 = vmul.f32 %v5899_v7, %v5899_v7  ;;  %v9027_v1 = vpop.eup %9026 }
 0x9c9   : > { %8268 = vmatpush3.bf16.msra.mxu0 %v5396_v49  ;;  %5968 = vadd.xlane.f32.xlu0 %v5967_v12  ;;  %v5897_v37 = vld [vmem:[#allocation5 + $0x80] sm:$0xff]  ;;  %v11983_v12 = vpack.c.bf16 %v9025_v39, %v9027_v1 }
 0x9ca   : > { %8269 = vmatprep.subr.bf16.mxu0 %v5419_v63  ;;  %v5961_v41 = vsel %vm585_vm0, %v5897_v37, 0.0  ;;  %v6127_v17 = vsel %vm585_vm0, %v6059_v23, 0.0  ;;  %v6057_v28 = vmul.f32 %v5897_v37, %v5897_v37  ;;  %v8775_v63 = vld [vmem:[%s13002_s5 + $0x28] sm:$0xff]   ;;  %v8780_v23 = vld [vmem:[%s13002_s5 + $0x50] sm:$0xff]  }
 0x9cb   : > { %v8495_v47 = vpop.f32.mrf.mxu0  ;;  %v5900_v0 = vld [vmem:[#allocation5 + $0x98] sm:$0xff] }
 0x9cc   : > { %v4844_v5 = vadd.f32 %v8495_v47, %v3863_v51  ;;  %v5970_v35 = vsel %vm585_vm0, %v5900_v0, 0.0  ;;  %v6060_v25 = vmul.f32 %v5900_v0, %v5900_v0  ;;  %v6121_v2 = vsel %vm585_vm0, %v6057_v28, 0.0  ;;  %v8777_v47 = vld [vmem:[%s13002_s5 + $0x20] sm:$0xff]  }
 0x9cd   : > { %8270 = vmatpush3.bf16.msra.mxu0 %v5395_v42  ;;  %v4823_v59 = vpop.f32.mrf.mxu0  ;;  %5962 = vadd.xlane.f32.xlu0 %v5961_v41  ;;  %v5898_v27 = vld [vmem:[#allocation5 + $0x88] sm:$0xff] }
 0x9ce   : > { %v4859_v22 = vadd.f32 %v11908_v55, %v4844_v5  ;;  %v4842_v29 = vadd.f32 %v4823_v59, %v3861_v31  ;;  %5971 = vadd.xlane.f32.xlu1 %v5970_v35  ;;  %8295 = vmatprep.subr.bf16.mxu0 %v8770_v13  ;;  %v5964_v32 = vsel %vm585_vm0, %v5898_v27, 0.0  ;;  %v6130_v49 = vsel %vm585_vm0, %v6060_v25, 0.0  ;;  %v8778_v31 = vld [vmem:[%s13002_s5 + $0x58] sm:$0xff]  }
 0x9cf   : > { %v8496_v57 = vpop.f32.mrf.mxu0  ;;  %v6058_v7 = vmul.f32 %v5898_v27, %v5898_v27  ;;  %v8779_v35 = vld [vmem:[%s13002_s5 + $0x18] sm:$0xff]  }
 0x9d0   : > { %4867 = vst.msk [vmem:[#allocation5 + $0xb0] sm:$0xff] %vm585_vm0, %v4859_v22  ;;  %v4857_v33 = vadd.f32 %v11908_v55, %v4842_v29  ;;  %v4845_v26 = vadd.f32 %v8496_v57, %v3864_v11  ;;  %5468 = vmatmul.mubr.bf16.vlgmr.msra.gmra.mxu0 %v11953_v24  ;;  %v8781_v22 = vld [vmem:[%s13002_s5 + $0x10] sm:$0xff]   ;;  %v8782_v29 = vld [vmem:[%s13002_s5 + $0x48] sm:$0xff]  }
 0x9d1   : > { %5475 = vmatprep.mubr.bf16.mxu0 %v11958_v19  ;;  %v4826_v14 = vpop.f32.mrf.mxu0  ;;  %6128 = vadd.xlane.f32.xlu0 %v6127_v17  ;;  %v6124_v9 = vsel %vm585_vm0, %v6058_v7, 0.0 }
 0x9d2   : > { %4865 = vst.msk [vmem:[#allocation5 + $0xa0] sm:$0xff] %vm585_vm0, %v4857_v33  ;;  %v4860_v50 = vadd.f32 %v11908_v55, %v4845_v26  ;;  %v4843_v52 = vadd.f32 %v4826_v14, %v3862_v58  ;;  %5965 = vadd.xlane.f32.xlu1 %v5964_v32  ;;  %8296 = vmatpush3.bf16.msra.mxu0 %v8771_v61  ;;  %v8783_v58 = vld [vmem:[%s13002_s5 + $0x8] sm:$0xff]   ;;  %v8784_v26 = vld [vmem:[%s13002_s5 + $0x40] sm:$0xff]  }
 0x9d3   : > { %8297 = vmatprep.subr.bf16.mxu0 %v8772_v56 }
 0x9d4   : > { %4868 = vst.msk [vmem:[#allocation5 + $0xb8] sm:$0xff] %vm585_vm0, %v4860_v50  ;;  %v4858_v4 = vadd.f32 %v11908_v55, %v4843_v52  ;;  %v8776_v55 = vld [vmem:[%s13002_s5 + $0x60] sm:$0xff]  }
 0x9d5   : > { %6122 = vadd.xlane.f32.xlu0 %v6121_v2  ;;  %v8785_v50 = vld [vmem:[%s13002_s5] sm:$0xff]  }
 0x9d6   : > { %4866 = vst.msk [vmem:[#allocation5 + $0xa8] sm:$0xff] %vm585_vm0, %v4858_v4  ;;  %6131 = vadd.xlane.f32.xlu1 %v6130_v49  ;;  %8298 = vmatpush3.bf16.msra.mxu0 %v8773_v20 }
 0x9d7   : > { %v5903_v51 = vld [vmem:[#allocation5 + $0xb0] sm:$0xff]  ;;  %8299 = vmatprep.subr.bf16.mxu0 %v8774_v48 }
 0x9d8   : > { %5476 = vmatmul.mubr.bf16.gmra.mxu0 %v11983_v12  ;;  %v5979_v37 = vsel %vm585_vm0, %v5903_v51, 0.0  ;;  %v6063_v5 = vmul.f32 %v5903_v51, %v5903_v51 }
 0x9d9   : > { %5980 = vadd.xlane.f32.xlu0 %v5979_v37  ;;  %v5901_v13 = vld [vmem:[#allocation5 + $0xa0] sm:$0xff] }
 0x9da   : > { %6125 = vadd.xlane.f32.xlu1 %v6124_v9  ;;  %8300 = vmatpush3.bf16.msra.mxu0 %v8775_v63  ;;  %v5973_v0 = vsel %vm585_vm0, %v5901_v13, 0.0  ;;  %v6139_v6 = vsel %vm585_vm0, %v6063_v5, 0.0  ;;  %v6061_v59 = vmul.f32 %v5901_v13, %v5901_v13  ;;  %v8792_v5 = vld [vmem:[%s13004_s7 + $0x8] sm:$0xff]  }
 0x9db   : > { %v5904_v42 = vld [vmem:[#allocation5 + $0xb8] sm:$0xff]  ;;  %8301 = vmatprep.subr.bf16.mxu0 %v8776_v55 }
 0x9dc   : > { %v5982_v60 = vsel %vm585_vm0, %v5904_v42, 0.0  ;;  %v6064_v16 = vmul.f32 %v5904_v42, %v5904_v42  ;;  %v6133_v27 = vsel %vm585_vm0, %v6061_v59, 0.0 }
 0x9dd   : > { %5974 = vadd.xlane.f32.xlu0 %v5973_v0  ;;  %v12002_v41 = vld [vmem:[#allocation5 + $0xa8] sm:$0xff]  ;;  %v8786_v0 = vld [vmem:[%s13004_s7 + $0x38] sm:$0xff]  }
 0x9de   : > { %5983 = vadd.xlane.f32.xlu1 %v5982_v60  ;;  %13034 = vst [vmem:[#allocation6_spill] sm:$0xff] %v12002_v41  ;;  %8302 = vmatpush3.bf16.msra.mxu0 %v8777_v47  ;;  %v5976_v11 = vsel %vm585_vm0, %v12002_v41, 0.0  ;;  %v6142_v61 = vsel %vm585_vm0, %v6064_v16, 0.0  ;;  %v6062_v57 = vmul.f32 %v12002_v41, %v12002_v41  ;;  %v8791_v60 = vld [vmem:[%s13004_s7 + $0x10] sm:$0xff]  }
 0x9df   : > { %8303 = vmatprep.subr.bf16.mxu0 %v8778_v31 }
 0x9e0   : > { %v6136_v25 = vsel %vm585_vm0, %v6062_v57, 0.0 }
 0x9e1   : > { %6140 = vadd.xlane.f32.xlu0 %v6139_v6 }
 0x9e2   : > { %5977 = vadd.xlane.f32.xlu1 %v5976_v11  ;;  %8304 = vmatpush3.bf16.msra.mxu0 %v8779_v35  ;;  %v8793_v35 = vld [vmem:[%s13004_s7] sm:$0xff]  }
 0x9e3   : > { %8305 = vmatprep.subr.bf16.mxu0 %v8780_v23 }
 0x9e5   : > { %6134 = vadd.xlane.f32.xlu0 %v6133_v27 }
 0x9e6   : > { %6143 = vadd.xlane.f32.xlu1 %v6142_v61  ;;  %8306 = vmatpush3.bf16.msra.mxu0 %v8781_v22  ;;  %v12072_v22 = vld [vmem:[%s13010_s13 + $0x8] sm:$0xff]  }
 0x9e7   : > { %v5248_v56 = vpop.xlane.xlu1 %5247  ;;  %v5245_v33 = vpop.xlane.xlu0 %5244  ;;  %8307 = vmatprep.subr.bf16.mxu0 %v8782_v29 }
 0x9e8   : > { %v5265_v17 = vsub.f32 %v11769_v3, %v5248_v56  ;;  %v5266_v28 = vsub.f32 %v11762_v46, %v5248_v56  ;;  %v5263_v14 = vsub.f32 %v11767_v40, %v5245_v33  ;;  %v5264_v32 = vsub.f32 %v11760_v53, %v5245_v33 }
 0x9ea   : > { %v5291_v52 = vmul.f32 1.442695, %v5265_v17  ;;  %v5293_v20 = vmul.f32 1.442695, %v5266_v28  ;;  %v5287_v39 = vmul.f32 1.442695, %v5263_v14  ;;  %6137 = vadd.xlane.f32.xlu1 %v6136_v25  ;;  %8308 = vmatpush3.bf16.msra.mxu0 %v8783_v58 }
 0x9eb   : > { %v5289_v48 = vmul.f32 1.442695, %v5264_v32  ;;  %v5251_v4 = vpop.xlane.xlu0 %5250  ;;  %8309 = vmatprep.subr.bf16.mxu0 %v8784_v26  ;;  %v5918_v23 = vpop.xlane.xlu1 %5917 }
 0x9ec   : > { %9028 = vpow2.f32 %v5291_v52  ;;  %v5268_v46 = vsub.f32 %v11778_v38, %v5251_v4  ;;  %v5267_v53 = vsub.f32 %v11783_v36, %v5251_v4 }
 0x9ed   : > { %9030 = vpow2.f32 %v5293_v20 }
 0x9ee   : > { %9032 = vpow2.f32 %v5287_v39  ;;  %8310 = vmatpush3.bf16.msra.mxu0 %v8785_v50  ;;  %v5297_v40 = vmul.f32 1.442695, %v5268_v46  ;;  %v5295_v49 = vmul.f32 1.442695, %v5267_v53 }
 0x9ef   : > { %9034 = vpow2.f32 %v5289_v48  ;;  %v5254_v3 = vpop.xlane.xlu0 %5253  ;;  %8497 = vmatprep.subr.bf16.mxu0 %v8786_v0  ;;  %v5924_v59 = vpop.xlane.xlu1 %5923 }
 0x9f0   : > { %v5269_v2 = vsub.f32 %v11796_v8, %v5254_v3  ;;  %v5270_v1 = vsub.f32 %v11792_v34, %v5254_v3  ;;  %9036 = vpow2.f32 %v5297_v40 }
 0x9f2   : > { %v5299_v7 = vmul.f32 1.442695, %v5269_v2  ;;  %v5301_v63 = vmul.f32 1.442695, %v5270_v1 }
 0x9f3   : > { %v5915_v6 = vpop.xlane.xlu0 %5914  ;;  %v6078_v16 = vpop.xlane.xlu1 %6077 }
 0x9f4   : > { %9038 = vpow2.f32 %v5299_v7 }
 0x9f5   : > { %9040 = vpow2.f32 %v5301_v63 }
 0x9f6   : > { %9042 = vpow2.f32 %v5295_v49 }
 0x9f7   : > { %v5921_v11 = vpop.xlane.xlu0 %5920  ;;  %v6084_v27 = vpop.xlane.xlu1 %6083 }
 0x9f9   : > { %v9029_v38 = vpop.eup %9028 }
 0x9fa   : > { %v9031_v51 = vpop.eup %9030 }
 0x9fb   : > { %v9033_v55 = vpop.eup %9032  ;;  %v6075_v29 = vpop.xlane.xlu0 %6074 }
 0x9fc   : > { %v9035_v37 = vpop.eup %9034  ;;  %v5307_v36 = vpack.c.bf16 %v9029_v38, %v9033_v55  ;;  %v12075_v57 = vpop.xlane.xlu1 %5929  ;;  %v6169_v41 = vmul.f32 0.03125, %v6075_v29 }
 0x9fd   : > { %v5308_v9 = vpack.c.bf16 %v9031_v51, %v9035_v37  ;;  %v9037_v13 = vpop.eup %9036 }
 0x9ff   : > { %5483 = vmatprep.mubr.bf16.mxu0 %v5308_v9  ;;  %v6081_v61 = vpop.xlane.xlu0 %6080 }
 0xa00   : > { %5484 = vmatmul.mubr.bf16.gmra.mxu0 %v5307_v36  ;;  %v12079_v56 = vpop.xlane.xlu1 %5935 }
 0xa01   : > { %v9039_v47 = vpop.eup %9038 }
 0xa02   : > { %v9041_v8 = vpop.eup %9040 }
 0xa03   : > { %v9043_v42 = vpop.eup %9042  ;;  %v5310_v34 = vpack.c.bf16 %v9041_v8, %v9037_v13  ;;  %v12077_v58 = vpop.xlane.xlu0 %5926  ;;  %v6170_v13 = vmul.f32 0.03125, %v6078_v16 }
 0xa04   : > { %v5309_v31 = vpack.c.bf16 %v9039_v47, %v9043_v42  ;;  %v12083_v26 = vpop.xlane.xlu1 %6089 }
 0xa05   : > { %5491 = vmatprep.mubr.bf16.mxu0 %v5310_v34 }
 0xa07   : > { %v12081_v33 = vpop.xlane.xlu0 %5932 }
 0xa08   : > { %5492 = vmatmul.mubr.bf16.gmra.mxu0 %v5309_v31  ;;  %v12089_v14 = vpop.xlane.xlu1 %6095 }
 0xa09   : > { %5660 = vmatprep.mubr.bf16.mxu0 %v11916_v43  ;;  %v8787_v43 = vld [vmem:[%s13004_s7 + $0x30] sm:$0xff]  }
 0xa0b   : > { %v12085_v17 = vpop.xlane.xlu0 %6086 }
 0xa0c   : > { %v12095_v50 = vpop.xlane.xlu1 %5941 }
 0xa0f   : > { %v12091_v32 = vpop.xlane.xlu0 %6092 }
 0xa10   : > { %5661 = vmatmul.mubr.bf16.vlgmr.msra.gmra.mxu0 %v11953_v24  ;;  %v8788_v24 = vld [vmem:[%s13004_s7 + $0x28] sm:$0xff]   ;;  %v12103_v48 = vpop.xlane.xlu1 %5947 }
 0xa11   : > { %5668 = vmatprep.mubr.bf16.mxu0 %v11958_v19  ;;  %8498 = vmatpush3.bf16.msra.mxu0 %v8786_v0  ;;  %v8789_v19 = vld [vmem:[%s13004_s7 + $0x20] sm:$0xff]  }
 0xa12   : > { %8499 = vmatprep.subr.bf16.mxu0 %v8787_v43 }
 0xa13   : > { %v12099_v20 = vpop.xlane.xlu0 %5938 }
 0xa14   : > { %v12109_v53 = vpop.xlane.xlu1 %6101 }
 0xa15   : > { %8500 = vmatpush3.bf16.msra.mxu0 %v8787_v43 }
 0xa16   : > { %8501 = vmatprep.subr.bf16.mxu0 %v8788_v24 }
 0xa17   : > { %v12105_v4 = vpop.xlane.xlu0 %5944 }
 0xa18   : > { %5669 = vmatmul.mubr.bf16.gmra.mxu0 %v11983_v12  ;;  %v8790_v12 = vld [vmem:[%s13004_s7 + $0x18] sm:$0xff]   ;;  %v12117_v1 = vpop.xlane.xlu1 %6107 }
 0xa19   : > { %5676 = vmatprep.mubr.bf16.mxu0 %v5308_v9  ;;  %8502 = vmatpush3.bf16.msra.mxu0 %v8788_v24  ;;  %v6172_v24 = vmul.f32 0.03125, %v6084_v27 }
 0xa1a   : > { %8503 = vmatprep.subr.bf16.mxu0 %v8789_v19 }
 0xa1b   : > { %v12113_v3 = vpop.xlane.xlu0 %6098 }
 0xa1c   : > { %v12125_v38 = vpop.xlane.xlu1 %5953 }
 0xa1d   : > { %8504 = vmatpush3.bf16.msra.mxu0 %v8789_v19 }
 0xa1e   : > { %8505 = vmatprep.subr.bf16.mxu0 %v8790_v12 }
 0xa1f   : > { %v12119_v49 = vpop.xlane.xlu0 %6104 }
 0xa20   : > { %5677 = vmatmul.mubr.bf16.gmra.mxu0 %v5307_v36  ;;  %v12133_v36 = vmul.f32 0.03125, %v5918_v23  ;;  %v12137_v47 = vpop.xlane.xlu1 %5959 }
 0xa21   : > { %5684 = vmatprep.mubr.bf16.mxu0 %v5310_v34  ;;  %8506 = vmatpush3.bf16.msra.mxu0 %v8790_v12  ;;  %13037 = vst [vmem:[#allocation9_spill] sm:$0xff] %v12137_v47  ;;  %v12165_v47 = vmul.f32 0.03125, %v5921_v11 }
 0xa22   : > { %8507 = vmatprep.subr.bf16.mxu0 %v8791_v60  ;;  %v6202_v42 = vmul.f32 %v12133_v36, %v12133_v36 }
 0xa23   : > { %v12129_v55 = vpop.xlane.xlu0 %5950 }
 0xa24   : > { %v6234_v43 = vsub.f32 %v6170_v13, %v6202_v42  ;;  %v12151_v12 = vpop.xlane.xlu1 %6113 }
 0xa25   : > { %8508 = vmatpush3.bf16.msra.mxu0 %v8791_v60 }
 0xa26   : > { %8509 = vmatprep.subr.bf16.mxu0 %v8792_v5  ;;  %v6298_v23 = vadd.f32 1e-05, %v6234_v43 }
 0xa27   : > { %v12143_v34 = vpop.xlane.xlu0 %5956 }
 0xa28   : > { %5685 = vmatmul.mubr.bf16.gmra.mxu0 %v5309_v31  ;;  %13039 = vst [vmem:[#allocation11_spill] sm:$0xff] %v12143_v34  ;;  %v12145_v31 = vmul.f32 0.03125, %v5924_v59  ;;  %9044 = vrsqrt.f32 %v6298_v23  ;;  %v12163_v42 = vpop.xlane.xlu1 %6119  ;;  %v6203_v23 = vmul.f32 %v12165_v47, %v12165_v47 }
 0xa29   : > { %8510 = vmatpush3.bf16.msra.mxu0 %v8792_v5  ;;  %v12155_v5 = vmul.f32 0.03125, %v5915_v6  ;;  %13043 = vst [vmem:[#allocation15_spill] sm:$0xff] %v12163_v42 }
 0xa2a   : > { %8511 = vmatprep.subr.bf16.mxu0 %v8793_v35  ;;  %v6204_v60 = vmul.f32 %v12145_v31, %v12145_v31 }
 0xa2b   : > { %v12159_v16 = vpop.xlane.xlu0 %6110  ;;  %v6201_v27 = vmul.f32 %v12155_v5, %v12155_v5 }
 0xa2c   : > { %v6236_v59 = vsub.f32 %v6172_v24, %v6204_v60 }
 0xa2d   : > { %8512 = vmatpush3.bf16.msra.mxu0 %v8793_v35  ;;  %v6233_v6 = vsub.f32 %v6169_v41, %v6201_v27 }
 0xa2e   : > { %8521 = vmatprep.subr.bf16.mxu0 %v12072_v22 }
 0xa57   : > { %v12169_v29 = vpop.xlane.xlu1 %5971 }
 0xa90   : > { %v12087_v28 = vpop.f32.mrf.mxu0 }
 0xa92   : > { %v12093_v25 = vpop.f32.mrf.mxu0 }
 0xa94   : > { %v12097_v52 = vpop.f32.mrf.mxu0 }
 0xa96   : > { %v12101_v39 = vpop.f32.mrf.mxu0 }
 0xa98   : > { %v12107_v46 = vpop.f32.mrf.mxu0 }
 0xa9a   : > { %v12111_v40 = vpop.f32.mrf.mxu0 }
 0xa9c   : > { %v12115_v2 = vpop.f32.mrf.mxu0 }
 0xa9e   : > { %v12121_v7 = vpop.f32.mrf.mxu0 }
 0xac0   : > { %v12123_v63 = vpop.f32.mrf.mxu0 }
 0xac2   : > { %v12127_v51 = vpop.f32.mrf.mxu0 }
 0xac4   : > { %v12131_v37 = vpop.f32.mrf.mxu0 }
 0xac5   : > { %13035 = vst [vmem:[#allocation7_spill] sm:$0xff] %v12131_v37  ;;  %v6297_v37 = vadd.f32 1e-05, %v6233_v6 }
 0xac6   : > { %v12135_v9 = vpop.f32.mrf.mxu0 }
 0xac7   : > { %13036 = vst [vmem:[#allocation8_spill] sm:$0xff] %v12135_v9  ;;  %v6171_v9 = vmul.f32 0.03125, %v6081_v61  ;;  %v12176_v61 = vmul.f32 0.03125, %v12075_v57  ;;  %v9045_v57 = vpop.eup %9044 }
 0xac8   : > { %v12139_v8 = vpop.f32.mrf.mxu0 }
 0xac9   : > { %13038 = vst [vmem:[#allocation10_spill] sm:$0xff] %v12139_v8  ;;  %v6235_v41 = vsub.f32 %v6171_v9, %v6203_v23  ;;  %v6176_v23 = vmul.f32 0.03125, %v12089_v14 }
 0xaca   : > { %v12147_v0 = vpop.f32.mrf.mxu0 }
 0xacb   : > { %13040 = vst [vmem:[#allocation12_spill] sm:$0xff] %v12147_v0  ;;  %v6300_v0 = vadd.f32 1e-05, %v6236_v59  ;;  %v6299_v6 = vadd.f32 1e-05, %v6235_v41  ;;  %v6266_v41 = vsub.f32 %v11785_v10, %v12133_v36 }
 0xacc   : > { %v12149_v19 = vpop.f32.mrf.mxu0  ;;  %v12206_v10 = vld [vmem:[%s13008_s11] ss:$0 sm:$0xff] }
 0xacd   : > { %13041 = vst [vmem:[#allocation13_spill] sm:$0xff] %v12149_v19  ;;  %9046 = vrsqrt.f32 %v6300_v0 }
 0xace   : > { %v12157_v35 = vpop.f32.mrf.mxu0 }
 0xacf   : > { %13042 = vst [vmem:[#allocation14_spill] sm:$0xff] %v12157_v35  ;;  %v12167_v35 = vpop.xlane.xlu0 %6116 }
 0xad0   : > { %v8311_v8 = vpop.f32.mrf.mxu0 }
 0xad2   : > { %v8312_v13 = vpop.f32.mrf.mxu0 }
 0xad3   : > { %v8313_v19 = vadd.f32 %v8312_v13, %v8311_v8  ;;  %v12173_v8 = vpop.xlane.xlu0 %5968  ;;  %v12181_v13 = vmul.f32 0.03125, %v12079_v56 }
 0xad4   : > { %v8314_v34 = vpop.f32.mrf.mxu0  ;;  %13044 = vst [vmem:[#allocation16_spill] sm:$0xff] %v12173_v8  ;;  %v6268_v8 = vsub.f32 %v11798_v44, %v12145_v31 }
 0xad5   : > { %v5693_v43 = vmax.f32 %v8313_v19, 1e-30 }
 0xad6   : > { %v8315_v24 = vpop.f32.mrf.mxu0 }
 0xad7   : > { %v8316_v60 = vadd.f32 %v8315_v24, %v8314_v34  ;;  %9048 = vrcp.f32 %v5693_v43  ;;  %v12178_v34 = vpop.xlane.xlu1 %5965  ;;  %v6174_v24 = vmul.f32 0.03125, %v12083_v26  ;;  %v12185_v43 = vmul.f32 0.03125, %v12077_v58 }
 0xad8   : > { %v8317_v42 = vpop.f32.mrf.mxu0  ;;  %v6208_v58 = vmul.f32 %v12181_v13, %v12181_v13 }
 0xad9   : > { %v5694_v11 = vmax.f32 %v8316_v60, 1e-30  ;;  %v12187_v60 = vpop.xlane.xlu0 %5962 }
 0xada   : > { %v8318_v59 = vpop.f32.mrf.mxu0  ;;  %v6240_v36 = vsub.f32 %v6176_v23, %v6208_v58  ;;  %v8276_v58 = vadd.f32 %v12101_v39, %v12097_v52 }
 0xadb   : > { %9050 = vrcp.f32 %v5694_v11  ;;  %v8319_v27 = vadd.f32 %v8318_v59, %v8317_v42  ;;  %v6173_v11 = vmul.f32 0.03125, %v12085_v17  ;;  %v6362_v17 = vmul.f32 %v9045_v57, %v6266_v41 }
 0xadc   : > { %9052 = vrsqrt.f32 %v6297_v37  ;;  %v8320_v19 = vpop.f32.mrf.mxu0  ;;  %v6206_v37 = vmul.f32 %v12176_v61, %v12176_v61  ;;  %v6304_v41 = vadd.f32 1e-05, %v6240_v36 }
 0xadd   : > { %v5695_v0 = vmax.f32 %v8319_v27, 1e-30  ;;  %v6205_v27 = vmul.f32 %v12185_v43, %v12185_v43 }
 0xade   : > { %v8321_v9 = vpop.f32.mrf.mxu0  ;;  %v6238_v59 = vsub.f32 %v6174_v24, %v6206_v37  ;;  %v9047_v24 = vpop.eup %9046 }
 0xadf   : > { %v8322_v42 = vadd.f32 %v8321_v9, %v8320_v19  ;;  %9054 = vrcp.f32 %v5695_v0  ;;  %v12199_v9 = vpop.xlane.xlu1 %6131  ;;  %v6237_v0 = vsub.f32 %v6173_v11, %v6205_v27  ;;  %v6364_v57 = vmul.f32 %v9047_v24, %v6268_v8 }
 0xae0   : > { %v8323_v56 = vpop.f32.mrf.mxu0  ;;  %9056 = vrsqrt.f32 %v6299_v6  ;;  %v6302_v23 = vadd.f32 1e-05, %v6238_v59  ;;  %v12229_v59 = vmul.f32 0.03125, %v12095_v50  ;;  %v6175_v50 = vmul.f32 0.03125, %v12091_v32 }
 0xae1   : > { %v5696_v26 = vmax.f32 %v8322_v42, 1e-30  ;;  %v6265_v42 = vsub.f32 %v11806_v21, %v12155_v5  ;;  %v8273_v5 = vadd.f32 %v12093_v25, %v12087_v28  ;;  %v6301_v11 = vadd.f32 1e-05, %v6237_v0 }
 0xae2   : > { %v8324_v19 = vpop.f32.mrf.mxu0  ;;  %v6403_v32 = vmul.f32 %v12206_v10, %v6364_v57 }
 0xae3   : > { %9058 = vrcp.f32 %v5696_v26  ;;  %v8325_v14 = vadd.f32 %v8324_v19, %v8323_v56  ;;  %v12214_v56 = vpop.xlane.xlu0 %6128  ;;  %v12221_v26 = vmul.f32 0.03125, %v12081_v33  ;;  %v6401_v19 = vmul.f32 %v12206_v10, %v6362_v17  ;;  %v12236_v28 = vpop.xlane.xlu1 %6125 }
 0xae4   : > { %v8326_v6 = vpop.f32.mrf.mxu0  ;;  %13045 = vst [vmem:[#allocation17_spill] sm:$0xff] %v12214_v56  ;;  %v9049_v31 = vpop.eup %9048  ;;  %v12234_v56 = vld [vmem:[%s13009_s12] ss:$0 sm:$0xff]  ;;  %v12242_v17 = vmul.f32 0.03125, %v12099_v20  ;;  %v6210_v20 = vmul.f32 %v12229_v59, %v12229_v59 }
 0xae5   : > { %v5697_v44 = vmax.f32 %v8325_v14, 1e-30  ;;  %v5709_v52 = vmul.f32 %v9049_v31, %v8273_v5  ;;  %v6207_v8 = vmul.f32 %v12221_v26, %v12221_v26  ;;  %v6271_v0 = vsub.f32 %v11841_v62, %v12221_v26 }
 0xae6   : > { %v8327_v21 = vpop.f32.mrf.mxu0  ;;  %v6177_v31 = vmul.f32 0.03125, %v12113_v3  ;;  %v12250_v5 = vadd.f32 %v12234_v56, %v6401_v19  ;;  %v6178_v3 = vmul.f32 0.03125, %v12109_v53  ;;  %v6180_v53 = vmul.f32 0.03125, %v12117_v1 }
 0xae7   : > { %v8328_v27 = vadd.f32 %v8327_v21, %v8326_v6  ;;  %9060 = vrcp.f32 %v5697_v44  ;;  %v12246_v6 = vpop.xlane.xlu0 %6122 }
 0xae8   : > { %v9051_v14 = vpop.eup %9050  ;;  %v8329_v37 = vpop.f32.mrf.mxu0  ;;  %9062 = vrsqrt.f32 %v6302_v23 }
 0xae9   : > { %v9053_v33 = vpop.eup %9052  ;;  %v5698_v25 = vmax.f32 %v8328_v27, 1e-30  ;;  %v5710_v39 = vmul.f32 %v9051_v14, %v8276_v58 }
 0xaea   : > { %v8330_v36 = vpop.f32.mrf.mxu0  ;;  %v6361_v21 = vmul.f32 %v9053_v33, %v6265_v42  ;;  %v6209_v42 = vmul.f32 %v12242_v17, %v12242_v17  ;;  %v12263_v33 = vpop.xlane.xlu1 %5983 }
 0xaeb   : > { %9064 = vrcp.f32 %v5698_v25  ;;  %v8331_v24 = vadd.f32 %v8330_v36, %v8329_v37  ;;  %v5717_v44 = vpack.c.bf16 %v5710_v39, %v5709_v52  ;;  %v12256_v37 = vmul.f32 0.03125, %v12103_v48  ;;  %v12274_v36 = vpop.xlane.xlu0 %5980 }
 0xaec   : > { %9066 = vrsqrt.f32 %v6304_v41  ;;  %v8332_v23 = vpop.f32.mrf.mxu0  ;;  %v9055_v27 = vpop.eup %9054  ;;  %v6239_v41 = vsub.f32 %v6175_v50, %v6207_v8  ;;  %v8282_v48 = vadd.f32 %v12121_v7, %v12115_v2  ;;  %v12271_v39 = vmul.f32 0.03125, %v12105_v4 }
 0xaed   : > { %9068 = vrsqrt.f32 %v6301_v11  ;;  %v5699_v58 = vmax.f32 %v8331_v24, 1e-30  ;;  %8513 = vmatprep.mubr.bf16.mxu0 %v5717_v44  ;;  %v9057_v14 = vpop.eup %9056  ;;  %v8279_v11 = vadd.f32 %v12111_v40, %v12107_v46  ;;  %v6241_v8 = vsub.f32 %v6177_v31, %v6209_v42 }
 0xaee   : > { %v8333_v19 = vpop.f32.mrf.mxu0  ;;  %v6400_v50 = vmul.f32 %v12206_v10, %v6361_v21  ;;  %v6212_v46 = vmul.f32 %v12256_v37, %v12256_v37  ;;  %v6303_v40 = vadd.f32 1e-05, %v6239_v41  ;;  %v6242_v2 = vsub.f32 %v6178_v3, %v6210_v20  ;;  %v8795_v21 = vld [vmem:[%s13010_s13] sm:$0xff]   ;;  %v12295_v41 = vld [vmem:[#allocation5 + $0x58] sm:$0xff]  ;;  %v12301_v3 = vpop.xlane.xlu1 %5977 }
 0xaef   : > { %v8334_v25 = vadd.f32 %v8333_v19, %v8332_v23  ;;  %v5711_v24 = vmul.f32 %v9055_v27, %v8279_v11  ;;  %9070 = vrcp.f32 %v5699_v58  ;;  %v12279_v7 = vmul.f32 0.03125, %v12129_v55 }
 0xaf0   : > { %v9059_v52 = vpop.eup %9058  ;;  %v13046_v4 = vsub.f32 %v11813_v30, %v12165_v47  ;;  %v6179_v31 = vmul.f32 0.03125, %v12119_v49  ;;  %v12289_v58 = vadd.f32 %v12234_v56, %v6403_v32  ;;  %v12292_v20 = vmul.f32 0.03125, %v12125_v38 }
 0xaf1   : > { %v5712_v44 = vmul.f32 %v9059_v52, %v8282_v48  ;;  %v5700_v57 = vmax.f32 %v8334_v25, 1e-30  ;;  %v6305_v55 = vadd.f32 1e-05, %v6241_v8  ;;  %v6181_v27 = vmul.f32 0.03125, %v12159_v16  ;;  %v12311_v48 = vpop.xlane.xlu0 %5974  ;;  %v13047_v52 = vld [vmem:[#allocation7_spill] sm:$0xff] }
 0xaf2   : > { %v6363_v1 = vmul.f32 %v9057_v14, %v13046_v4  ;;  %v6276_v30 = vsub.f32 %v12295_v41, %v12256_v37  ;;  %v6244_v49 = vsub.f32 %v6180_v53, %v6212_v46  ;;  %v6211_v47 = vmul.f32 %v12271_v39, %v12271_v39  ;;  %v13048_v53 = vld [vmem:[#allocation8_spill] sm:$0xff] }
 0xaf3   : > { %9072 = vrcp.f32 %v5700_v57  ;;  %v5718_v23 = vpack.c.bf16 %v5712_v44, %v5711_v24  ;;  %v12304_v32 = vadd.f32 %v12234_v56, %v6400_v50  ;;  %v6306_v42 = vadd.f32 1e-05, %v6242_v2  ;;  %v13049_v2 = vld [vmem:[#allocation11_spill] sm:$0xff] }
 0xaf4   : > { %v9061_v38 = vpop.eup %9060  ;;  %9074 = vrsqrt.f32 %v6303_v40  ;;  %v6182_v16 = vmul.f32 0.03125, %v12151_v12  ;;  %v6213_v19 = vmul.f32 %v12279_v7, %v12279_v7  ;;  %v6402_v57 = vmul.f32 %v12206_v10, %v6363_v1  ;;  %v12317_v12 = vld [vmem:[#allocation5 + $0x40] sm:$0xff] }
 0xaf5   : > { %8514 = vmatmul.mubr.bf16.vlgmr.msra.gmra.mxu0 %v5718_v23  ;;  %v9063_v14 = vpop.eup %9062  ;;  %v6243_v11 = vsub.f32 %v6179_v31, %v6211_v47  ;;  %v8285_v25 = vadd.f32 %v12127_v51, %v12123_v63  ;;  %v8288_v8 = vadd.f32 %v13048_v53, %v13047_v52  ;;  %v6273_v24 = vsub.f32 %v12317_v12, %v12242_v17  ;;  %v13050_v31 = vld [vmem:[#allocation9_spill] sm:$0xff] }
 0xaf6   : > { %8522 = vmatpush3.bf16.msra.mxu0 %v12072_v22  ;;  %v6214_v22 = vmul.f32 %v12292_v20, %v12292_v20  ;;  %9076 = vrsqrt.f32 %v6305_v55  ;;  %v6245_v44 = vsub.f32 %v6181_v27, %v6213_v19  ;;  %v6308_v40 = vadd.f32 1e-05, %v6244_v49  ;;  %v12333_v27 = vpop.xlane.xlu1 %6143 }
 0xaf7   : > { %8523 = vmatprep.subr.bf16.mxu0 %v8795_v21  ;;  %v12324_v4 = vmul.f32 0.03125, %v13049_v2  ;;  %v5713_v63 = vmul.f32 %v9061_v38, %v8285_v25  ;;  %9078 = vrsqrt.f32 %v6306_v42  ;;  %v12327_v23 = vmul.f32 0.03125, %v13050_v31 }
 0xaf8   : > { %v9065_v50 = vpop.eup %9064  ;;  %v6246_v47 = vsub.f32 %v6182_v16, %v6214_v22  ;;  %v12330_v52 = vmul.f32 0.03125, %v12178_v34  ;;  %v6307_v53 = vadd.f32 1e-05, %v6243_v11  ;;  %v6183_v55 = vmul.f32 0.03125, %v12167_v35  ;;  %v12347_v11 = vpop.xlane.xlu0 %6140 }
 0xaf9   : > { %v9067_v46 = vpop.eup %9066  ;;  %v5714_v51 = vmul.f32 %v9065_v50, %v8288_v8  ;;  %v6471_v38 = vpack.c.bf16 %v12250_v5, %v12304_v32  ;;  %v12338_v19 = vadd.f32 %v12234_v56, %v6402_v57  ;;  %v6309_v42 = vadd.f32 1e-05, %v6245_v44  ;;  %v13053_v44 = vld [vmem:[#allocation10_spill] sm:$0xff] }
 0xafa   : > { %v9069_v1 = vpop.eup %9068  ;;  %8524 = vmatpush3.bf16.msra.mxu0 %v8795_v21  ;;  %v12341_v25 = vmul.f32 0.03125, %v12187_v60  ;;  %v6186_v34 = vmul.f32 0.03125, %v12236_v28  ;;  %9080 = vrsqrt.f32 %v6308_v40  ;;  %v13051_v21 = vld [vmem:[#allocation15_spill] sm:$0xff]  ;;  %v6215_v35 = vmul.f32 %v12324_v4, %v12324_v4  ;;  %v13054_v40 = vld [vmem:[#allocation12_spill] sm:$0xff] }
 0xafb   : > { %v5719_v49 = vpack.c.bf16 %v5714_v51, %v5713_v63  ;;  %v6184_v16 = vmul.f32 0.03125, %v13051_v21  ;;  %v13052_v5 = vsub.f32 %v11834_v54, %v12185_v43  ;;  %v6216_v60 = vmul.f32 %v12327_v23, %v12327_v23  ;;  %v13055_v63 = vld [vmem:[#allocation13_spill] sm:$0xff]  ;;  %v13056_v51 = vld [vmem:[#allocation14_spill] sm:$0xff] }
 0xafc   : > { %v9071_v57 = vpop.eup %9070  ;;  %v6310_v8 = vadd.f32 1e-05, %v6246_v47  ;;  %v6218_v28 = vmul.f32 %v12330_v52, %v12330_v52  ;;  %v6185_v50 = vmul.f32 0.03125, %v12246_v6  ;;  %9082 = vrsqrt.f32 %v6307_v53  ;;  %v6138_v53 = vpop.xlane.xlu1 %6137 }
 0xafd   : > { %8517 = vmatprep.mubr.bf16.mxu0 %v5719_v49  ;;  %v6365_v32 = vmul.f32 %v9069_v1, %v13052_v5  ;;  %v6247_v22 = vsub.f32 %v6183_v55, %v6215_v35  ;;  %v8291_v2 = vadd.f32 %v13054_v40, %v13053_v44  ;;  %v8294_v31 = vadd.f32 %v13056_v51, %v13055_v63 }
 0xafe   : > { %9084 = vrsqrt.f32 %v6309_v42  ;;  %v6217_v43 = vmul.f32 %v12341_v25, %v12341_v25  ;;  %v6250_v1 = vsub.f32 %v6186_v34, %v6218_v28  ;;  %v13057_v47 = vsub.f32 %v11820_v18, %v12176_v61  ;;  %v13058_v28 = vld [vmem:[#allocation16_spill] sm:$0xff]  ;;  %v6135_v61 = vpop.xlane.xlu0 %6134 }
 0xaff   : > { %v6248_v21 = vsub.f32 %v6184_v16, %v6216_v60  ;;  %v12367_v6 = vmul.f32 0.03125, %v12169_v29  ;;  %v5715_v55 = vmul.f32 %v9071_v57, %v8291_v2  ;;  %9086 = vrsqrt.f32 %v6310_v8  ;;  %v13060_v2 = vld [vmem:[#allocation17_spill] sm:$0xff] }
 0xb00   : > { %v9073_v54 = vpop.eup %9072  ;;  %v6366_v49 = vmul.f32 %v9063_v14, %v13057_v47  ;;  %v6249_v5 = vsub.f32 %v6185_v50, %v6217_v43  ;;  %v12370_v44 = vmul.f32 0.03125, %v12301_v3  ;;  %v6404_v42 = vmul.f32 %v12206_v10, %v6365_v32 }
 0xb01   : > { %v5716_v35 = vmul.f32 %v9073_v54, %v8294_v31  ;;  %v9075_v40 = vpop.eup %9074  ;;  %v6311_v34 = vadd.f32 1e-05, %v6247_v22  ;;  %v12374_v63 = vmul.f32 0.03125, %v13058_v28  ;;  %v6188_v18 = vmul.f32 0.03125, %v12199_v9 }
 0xb02   : > { %v6314_v14 = vadd.f32 1e-05, %v6250_v1  ;;  %v12378_v16 = vmul.f32 0.03125, %v12311_v48  ;;  %v6190_v57 = vmul.f32 0.03125, %v6138_v53  ;;  %v6405_v60 = vmul.f32 %v12206_v10, %v6366_v49 }
 0xb03   : > { %v5720_v29 = vpack.c.bf16 %v5716_v35, %v5715_v55  ;;  %v9077_v3 = vpop.eup %9076  ;;  %v13059_v32 = vsub.f32 %v11827_v45, %v12181_v13  ;;  %v6312_v50 = vadd.f32 1e-05, %v6248_v21  ;;  %v6220_v22 = vmul.f32 %v12367_v6, %v12367_v6 }
 0xb04   : > { %v6187_v9 = vmul.f32 0.03125, %v13060_v2  ;;  %v6367_v48 = vmul.f32 %v9075_v40, %v6271_v0  ;;  %v6313_v51 = vadd.f32 1e-05, %v6249_v5  ;;  %v6222_v31 = vmul.f32 %v12370_v44, %v12370_v44  ;;  %v9079_v45 = vpop.eup %9078 }
 0xb05   : > { %v6368_v8 = vmul.f32 %v9067_v46, %v13059_v32  ;;  %8518 = vmatmul.mubr.bf16.gmra.mxu0 %v5720_v29  ;;  %v6189_v54 = vmul.f32 0.03125, %v6135_v61  ;;  %9088 = vrsqrt.f32 %v6311_v34  ;;  %v6219_v13 = vmul.f32 %v12374_v63, %v12374_v63  ;;  %v9200_v32 = vld [vmem:[#allocation5 + $0x68] sm:$0xff] }
 0xb06   : > { %8525 = vmatprep.mubr.msk.bf16.mxu0 %vm585_vm0, %v6471_v38  ;;  %v6252_v46 = vsub.f32 %v6188_v18, %v6220_v22  ;;  %v6443_v43 = vadd.f32 %v12234_v56, %v6404_v42  ;;  %9090 = vrsqrt.f32 %v6314_v14  ;;  %v6221_v62 = vmul.f32 %v12378_v16, %v12378_v16  ;;  %v9198_v42 = vld [vmem:[#allocation5 + $0x50] sm:$0xff] }
 0xb07   : > { %v6254_v26 = vsub.f32 %v6190_v57, %v6222_v31  ;;  %v6369_v0 = vmul.f32 %v9077_v3, %v6273_v24  ;;  %9092 = vrsqrt.f32 %v6312_v50  ;;  %v6251_v1 = vsub.f32 %v6187_v9, %v6219_v13  ;;  %v9081_v49 = vpop.eup %9080 }
 0xb08   : > { %v12402_v38 = vmul.f32 0.03125, %v12263_v33  ;;  %v6444_v47 = vadd.f32 %v12234_v56, %v6405_v60  ;;  %9094 = vrsqrt.f32 %v6313_v51  ;;  %v6253_v21 = vsub.f32 %v6189_v54, %v6221_v62  ;;  %v9201_v62 = vld [vmem:[#allocation5 + $0x70] sm:$0xff] }
 0xb09   : > { %v6406_v53 = vmul.f32 %v12206_v10, %v6367_v48  ;;  %v13061_v55 = vsub.f32 %v11848_v15, %v12229_v59  ;;  %v6472_v17 = vpack.c.bf16 %v12289_v58, %v12338_v19  ;;  %v6316_v12 = vadd.f32 1e-05, %v6252_v46  ;;  %v9083_v5 = vpop.eup %9082 }
 0xb0a   : > { %v12412_v24 = vmul.f32 0.03125, %v12274_v36  ;;  %v6192_v33 = vmul.f32 0.03125, %v12333_v27  ;;  %v6275_v40 = vsub.f32 %v9198_v42, %v12271_v39  ;;  %v6318_v34 = vadd.f32 1e-05, %v6254_v26  ;;  %v9199_v27 = vld [vmem:[#allocation5 + $0x60] sm:$0xff] }
 0xb0b   : > { %v6370_v35 = vmul.f32 %v9079_v45, %v13061_v55  ;;  %v6473_v28 = vpack.c.bf16 %v6444_v47, %v6443_v43  ;;  %v6408_v18 = vmul.f32 %v12206_v10, %v6369_v0  ;;  %v9085_v61 = vpop.eup %9084  ;;  %v6315_v15 = vadd.f32 1e-05, %v6251_v1  ;;  %v9202_v0 = vld [vmem:[#allocation5 + $0x88] sm:$0xff] }
 0xb0c   : > { %v6224_v59 = vmul.f32 %v12402_v38, %v12402_v38  ;;  %v6191_v58 = vmul.f32 0.03125, %v12347_v11  ;;  %v6407_v36 = vmul.f32 %v12206_v10, %v6368_v8  ;;  %v6277_v19 = vsub.f32 %v9199_v27, %v12279_v7  ;;  %v9087_v57 = vpop.eup %9086  ;;  %v13062_v27 = vld [vmem:[#allocation6_spill] sm:$0xff] }
 0xb0d   : > { %8526 = vmatmul.mubr.msk.bf16.vlgmr.msra.gmra.mxu0 %vm585_vm0, %v6472_v17  ;;  %v6317_v29 = vadd.f32 1e-05, %v6253_v21  ;;  %v6445_v39 = vadd.f32 %v12234_v56, %v6406_v53  ;;  %v6409_v14 = vmul.f32 %v12206_v10, %v6370_v35  ;;  %v6371_v60 = vmul.f32 %v9083_v5, %v6275_v40  ;;  %v9203_v21 = vld [vmem:[#allocation5 + $0x78] sm:$0xff]  ;;  %v9204_v35 = vld [vmem:[#allocation5 + $0x80] sm:$0xff] }
 0xb0e   : > { %8529 = vmatprep.mubr.msk.bf16.mxu0 %vm585_vm0, %v6473_v28  ;;  %9096 = vrsqrt.f32 %v6316_v12  ;;  %v6223_v11 = vmul.f32 %v12412_v24, %v12412_v24  ;;  %v6256_v3 = vsub.f32 %v6192_v33, %v6224_v59  ;;  %v6278_v8 = vsub.f32 %v9200_v32, %v12292_v20  ;;  %v9205_v59 = vld [vmem:[#allocation5 + $0x98] sm:$0xff] }
 0xb0f   : > { %9098 = vrsqrt.f32 %v6318_v34  ;;  %v6447_v7 = vadd.f32 %v12234_v56, %v6408_v18  ;;  %v6373_v50 = vmul.f32 %v9085_v61, %v6277_v19  ;;  %v6372_v22 = vmul.f32 %v9081_v49, %v6276_v30 }
 0xb10   : > { %9100 = vrsqrt.f32 %v6315_v15  ;;  %v6255_v2 = vsub.f32 %v6191_v58, %v6223_v11  ;;  %v6446_v9 = vadd.f32 %v12234_v56, %v6407_v36  ;;  %v6448_v48 = vadd.f32 %v12234_v56, %v6409_v14  ;;  %v9206_v14 = vld [vmem:[#allocation5 + $0x90] sm:$0xff] }
 0xb11   : > { %9102 = vrsqrt.f32 %v6317_v29  ;;  %v6374_v51 = vmul.f32 %v9087_v57, %v6278_v8  ;;  %v6320_v31 = vadd.f32 1e-05, %v6256_v3  ;;  %v6410_v20 = vmul.f32 %v12206_v10, %v6371_v60 }
 0xb12   : > { %v6474_v54 = vpack.c.bf16 %v6446_v9, %v6445_v39  ;;  %v9089_v45 = vpop.eup %9088  ;;  %v6475_v13 = vpack.c.bf16 %v6448_v48, %v6447_v7  ;;  %v6412_v46 = vmul.f32 %v12206_v10, %v6373_v50  ;;  %v6279_v37 = vsub.f32 %v9201_v62, %v12324_v4 }
 0xb13   : > { %v9091_v43 = vpop.eup %9090  ;;  %v6319_v41 = vadd.f32 1e-05, %v6255_v2  ;;  %v6411_v30 = vmul.f32 %v12206_v10, %v6372_v22  ;;  %v6282_v1 = vsub.f32 %v9202_v0, %v12330_v52  ;;  %v6413_v47 = vmul.f32 %v12206_v10, %v6374_v51 }
 0xb14   : > { %v9093_v26 = vpop.eup %9092  ;;  %v6280_v53 = vsub.f32 %v9203_v21, %v12327_v23  ;;  %v6375_v55 = vmul.f32 %v9089_v45, %v6279_v37  ;;  %9104 = vrsqrt.f32 %v6320_v31  ;;  %v6449_v4 = vadd.f32 %v12234_v56, %v6410_v20  ;;  %v9208_v31 = vld [vmem:[#allocation5 + $0xb8] sm:$0xff] }
 0xb15   : > { %8530 = vmatmul.mubr.msk.bf16.gmra.mxu0 %vm585_vm0, %v6474_v54  ;;  %v9095_v49 = vpop.eup %9094  ;;  %v6281_v17 = vsub.f32 %v9204_v35, %v12341_v25  ;;  %v6451_v12 = vadd.f32 %v12234_v56, %v6412_v46  ;;  %v6378_v33 = vmul.f32 %v9091_v43, %v6282_v1  ;;  %9106 = vrsqrt.f32 %v6319_v41  ;;  %v8801_v35 = vld [vmem:[%s13012_s15 + $0x10] sm:$0xff]  }
 0xb16   : > { %8533 = vmatprep.mubr.msk.bf16.mxu0 %vm585_vm0, %v6475_v13  ;;  %v6376_v5 = vmul.f32 %v9093_v26, %v6280_v53  ;;  %v6450_v52 = vadd.f32 %v12234_v56, %v6411_v30  ;;  %v6452_v42 = vadd.f32 %v12234_v56, %v6413_v47  ;;  %v6414_v23 = vmul.f32 %v12206_v10, %v6375_v55  ;;  %v9209_v13 = vld [vmem:[#allocation5 + $0xb0] sm:$0xff]  ;;  %v8796_v53 = vld [vmem:[%s13012_s15 + $0x38] sm:$0xff]   ;;  %v8799_v55 = vld [vmem:[%s13012_s15 + $0x20] sm:$0xff]  }
 0xb17   : > { %v6377_v40 = vmul.f32 %v9095_v49, %v6281_v17  ;;  %v6417_v61 = vmul.f32 %v12206_v10, %v6378_v33  ;;  %v6284_v25 = vsub.f32 %v9205_v59, %v12367_v6  ;;  %v6286_v19 = vsub.f32 %v13062_v27, %v12370_v44  ;;  %v9207_v6 = vld [vmem:[#allocation5 + $0xa0] sm:$0xff]  ;;  %8605 = vmatprep.subr.bf16.mxu1 %v8796_v53  ;;  %v8802_v17 = vld [vmem:[%s13012_s15 + $0x8] sm:$0xff]   ;;  %v4871_v33 = vld [vmem:[%s9362_s30 + $0xd0] sm:$0xff] }
 0xb18   : > { %v6476_v34 = vpack.c.bf16 %v6450_v52, %v6449_v4  ;;  %v6477_v18 = vpack.c.bf16 %v6452_v42, %v6451_v12  ;;  %v6415_v58 = vmul.f32 %v12206_v10, %v6376_v5  ;;  %v6283_v57 = vsub.f32 %v9206_v14, %v12374_v63  ;;  %8557 = vmatprep.subr.bf16.mxu0 %v8796_v53  ;;  %v8800_v4 = vld [vmem:[%s13012_s15 + $0x18] sm:$0xff]   ;;  %v8803_v12 = vld [vmem:[%s13012_s15] sm:$0xff]   ;;  %v4875_v14 = vld [vmem:[%s9362_s30 + $0xf0] sm:$0xff] }
 0xb19   : > { %v6416_v29 = vmul.f32 %v12206_v10, %v6377_v40  ;;  %v6453_v11 = vadd.f32 %v12234_v56, %v6414_v23  ;;  %v6285_v3 = vsub.f32 %v9207_v6, %v12378_v16  ;;  %v6456_v32 = vadd.f32 %v12234_v56, %v6417_v61  ;;  %8613 = vmatpush3.bf16.msra.mxu1 %v8796_v53  ;;  %v7768_v52 = vld [vmem:[%s13005_s8] ss:$0 sm:$0xff]  ;;  %v4872_v23 = vld [vmem:[%s9362_s30 + $0xd8] sm:$0xff] }
 0xb1a   : > { %v6454_v44 = vadd.f32 %v12234_v56, %v6415_v58  ;;  %v6288_v54 = vsub.f32 %v9208_v31, %v12402_v38  ;;  %v6287_v46 = vsub.f32 %v9209_v13, %v12412_v24  ;;  %8558 = vmatpush3.bf16.msra.mxu0 %v8796_v53  ;;  %v4869_v42 = vld [vmem:[%s9362_s30 + $0xc0] sm:$0xff] }
 0xb1b   : > { %v9097_v28 = vpop.eup %9096  ;;  %v6455_v50 = vadd.f32 %v12234_v56, %v6416_v29  ;;  %v4873_v6 = vld [vmem:[%s9362_s30 + $0xe0] sm:$0xff] }
 0xb1c   : > { %v9099_v15 = vpop.eup %9098  ;;  %v6380_v60 = vmul.f32 %v9097_v28, %v6284_v25  ;;  %v6478_v2 = vpack.c.bf16 %v6454_v44, %v6453_v11 }
 0xb1d   : > { %8534 = vmatmul.mubr.msk.bf16.gmra.mxu0 %vm585_vm0, %v6476_v34  ;;  %v9101_v36 = vpop.eup %9100  ;;  %v6382_v8 = vmul.f32 %v9099_v15, %v6286_v19  ;;  %v6479_v63 = vpack.c.bf16 %v6456_v32, %v6455_v50  ;;  %v4870_v15 = vld [vmem:[%s9362_s30 + $0xc8] sm:$0xff]  ;;  %v4876_v50 = vld [vmem:[%s9362_s30 + $0xf8] sm:$0xff] }
 0xb1e   : > { %8537 = vmatprep.mubr.msk.bf16.mxu0 %vm585_vm0, %v6477_v18  ;;  %v9103_v39 = vpop.eup %9102  ;;  %v6379_v7 = vmul.f32 %v9101_v36, %v6283_v57  ;;  %v6419_v9 = vmul.f32 %v12206_v10, %v6380_v60 }
 0xb1f   : > { %v6381_v22 = vmul.f32 %v9103_v39, %v6285_v3  ;;  %v6421_v51 = vmul.f32 %v12206_v10, %v6382_v8 }
 0xb20   : > { %v6418_v16 = vmul.f32 %v12206_v10, %v6379_v7  ;;  %v6458_v62 = vadd.f32 %v12234_v56, %v6419_v9 }
 0xb21   : > { %v9105_v48 = vpop.eup %9104  ;;  %v6420_v45 = vmul.f32 %v12206_v10, %v6381_v22  ;;  %v6460_v37 = vadd.f32 %v12234_v56, %v6421_v51  ;;  %v4874_v51 = vld [vmem:[%s9362_s30 + $0xe8] sm:$0xff] }
 0xb22   : > { %v9107_v20 = vpop.eup %9106  ;;  %v6384_v43 = vmul.f32 %v9105_v48, %v6288_v54  ;;  %v6457_v38 = vadd.f32 %v12234_v56, %v6418_v16 }
 0xb23   : > { %v6383_v41 = vmul.f32 %v9107_v20, %v6287_v46  ;;  %v6459_v30 = vadd.f32 %v12234_v56, %v6420_v45  ;;  %v12549_v46 = vld [vmem:[%s13011_s14] ss:$0 sm:$0xff] }
 0xb24   : > { %v6480_v26 = vpack.c.bf16 %v6458_v62, %v6457_v38  ;;  %v6423_v0 = vmul.f32 %v12206_v10, %v6384_v43 }
 0xb25   : > { %8538 = vmatmul.mubr.msk.bf16.gmra.mxu0 %vm585_vm0, %v6478_v2  ;;  %v6481_v1 = vpack.c.bf16 %v6460_v37, %v6459_v30  ;;  %v6422_v47 = vmul.f32 %v12206_v10, %v6383_v41  ;;  %v8797_v10 = vld [vmem:[%s13012_s15 + $0x30] sm:$0xff]  }
 0xb26   : > { %8541 = vmatprep.mubr.msk.bf16.mxu0 %vm585_vm0, %v6479_v63  ;;  %v6462_v24 = vadd.f32 %v12234_v56, %v6423_v0  ;;  %8606 = vmatprep.subr.bf16.mxu1 %v8797_v10 }
 0xb27   : > { %v6461_v49 = vadd.f32 %v12234_v56, %v6422_v47  ;;  %8559 = vmatprep.subr.bf16.mxu0 %v8797_v10  ;;  %8614 = vmatpush3.bf16.msra.mxu1 %v8797_v10  ;;  %v8798_v56 = vld [vmem:[%s13012_s15 + $0x28] sm:$0xff]  }
 0xb28   : > { %8560 = vmatpush3.bf16.msra.mxu0 %v8797_v10  ;;  %8607 = vmatprep.subr.bf16.mxu1 %v8798_v56 }
 0xb29   : > { %v6482_v21 = vpack.c.bf16 %v6462_v24, %v6461_v49  ;;  %8561 = vmatprep.subr.bf16.mxu0 %v8798_v56 }
 0xb2b   : > { %8615 = vmatpush3.bf16.msra.mxu1 %v8798_v56 }
 0xb2c   : > { %8562 = vmatpush3.bf16.msra.mxu0 %v8798_v56  ;;  %8608 = vmatprep.subr.bf16.mxu1 %v8799_v55 }
 0xb2d   : > { %8542 = vmatmul.mubr.msk.bf16.gmra.mxu0 %vm585_vm0, %v6480_v26  ;;  %8563 = vmatprep.subr.bf16.mxu0 %v8799_v55 }
 0xb2e   : > { %8545 = vmatprep.mubr.msk.bf16.mxu0 %vm585_vm0, %v6481_v1 }
 0xb2f   : > { %8616 = vmatpush3.bf16.msra.mxu1 %v8799_v55 }
 0xb30   : > { %8564 = vmatpush3.bf16.msra.mxu0 %v8799_v55  ;;  %8609 = vmatprep.subr.bf16.mxu1 %v8800_v4 }
 0xb31   : > { %8565 = vmatprep.subr.bf16.mxu0 %v8800_v4 }
 0xb33   : > { %8617 = vmatpush3.bf16.msra.mxu1 %v8800_v4 }
 0xb34   : > { %8566 = vmatpush3.bf16.msra.mxu0 %v8800_v4  ;;  %8610 = vmatprep.subr.bf16.mxu1 %v8801_v35 }
 0xb35   : > { %8546 = vmatmul.mubr.msk.bf16.gmra.mxu0 %vm585_vm0, %v6482_v21  ;;  %8567 = vmatprep.subr.bf16.mxu0 %v8801_v35 }
 0xb37   : > { %8618 = vmatpush3.bf16.msra.mxu1 %v8801_v35 }
 0xb38   : > { %8568 = vmatpush3.bf16.msra.mxu0 %v8801_v35  ;;  %8611 = vmatprep.subr.bf16.mxu1 %v8802_v17 }
 0xb39   : > { %8569 = vmatprep.subr.bf16.mxu0 %v8802_v17 }
 0xb3b   : > { %8619 = vmatpush3.bf16.msra.mxu1 %v8802_v17 }
 0xb3c   : > { %8570 = vmatpush3.bf16.msra.mxu0 %v8802_v17  ;;  %8612 = vmatprep.subr.bf16.mxu1 %v8803_v12 }
 0xb3d   : > { %8571 = vmatprep.subr.bf16.mxu0 %v8803_v12 }
 0xb3f   : > { %8620 = vmatpush3.bf16.msra.mxu1 %v8803_v12 }
 0xb40   : > { %8572 = vmatpush3.bf16.msra.mxu0 %v8803_v12 }
 0xbb5   : > { %v8515_v5 = vpop.f32.mrf.mxu0 }
 0xbb6   : > { %v5852_v40 = vadd.f32 %v8515_v5, %v4871_v33 }
 0xbb7   : > { %v5819_v34 = vpop.f32.mrf.mxu0 }
 0xbb8   : > { %v5867_v28 = vadd.f32 %v7768_v52, %v5852_v40  ;;  %v5850_v18 = vadd.f32 %v5819_v34, %v4869_v42 }
 0xbb9   : > { %v8516_v61 = vpop.f32.mrf.mxu0 }
 0xbba   : > { %5875 = vst.msk [vmem:[#allocation5 + $0xd0] sm:$0xff] %vm585_vm0, %v5867_v28  ;;  %v5865_v59 = vadd.f32 %v7768_v52, %v5850_v18  ;;  %v5853_v25 = vadd.f32 %v8516_v61, %v4872_v23 }
 0xbbb   : > { %v5822_v58 = vpop.f32.mrf.mxu0 }
 0xbbc   : > { %5873 = vst.msk [vmem:[#allocation5 + $0xc0] sm:$0xff] %vm585_vm0, %v5865_v59  ;;  %v5868_v36 = vadd.f32 %v7768_v52, %v5853_v25  ;;  %v5851_v27 = vadd.f32 %v5822_v58, %v4870_v15 }
 0xbbe   : > { %5876 = vst.msk [vmem:[#allocation5 + $0xd8] sm:$0xff] %vm585_vm0, %v5868_v36  ;;  %v5866_v19 = vadd.f32 %v7768_v52, %v5851_v27 }
 0xbc0   : > { %5874 = vst.msk [vmem:[#allocation5 + $0xc8] sm:$0xff] %vm585_vm0, %v5866_v19 }
 0xbc1   : > { %v12518_v29 = vld [vmem:[#allocation5 + $0xd0] sm:$0xff] }
 0xbc2   : > { %v5991_v39 = vsel %vm585_vm0, %v12518_v29, 0.0  ;;  %v6067_v3 = vmul.f32 %v12518_v29, %v12518_v29 }
 0xbc3   : > { %5992 = vadd.xlane.f32.xlu0 %v5991_v39  ;;  %v12523_v57 = vld [vmem:[#allocation5 + $0xc0] sm:$0xff] }
 0xbc4   : > { %v5985_v8 = vsel %vm585_vm0, %v12523_v57, 0.0  ;;  %v6151_v63 = vsel %vm585_vm0, %v6067_v3, 0.0  ;;  %v6065_v31 = vmul.f32 %v12523_v57, %v12523_v57 }
 0xbc5   : > { %v8519_v60 = vpop.f32.mrf.mxu0  ;;  %v12525_v11 = vld [vmem:[#allocation5 + $0xd8] sm:$0xff] }
 0xbc6   : > { %v5856_v32 = vadd.f32 %v8519_v60, %v4875_v14  ;;  %v5994_v7 = vsel %vm585_vm0, %v12525_v11, 0.0  ;;  %v6068_v45 = vmul.f32 %v12525_v11, %v12525_v11  ;;  %v6145_v41 = vsel %vm585_vm0, %v6065_v31, 0.0 }
 0xbc7   : > { %5986 = vadd.xlane.f32.xlu0 %v5985_v8  ;;  %5995 = vadd.xlane.f32.xlu1 %v5994_v7  ;;  %v5835_v44 = vpop.f32.mrf.mxu0  ;;  %v12535_v22 = vld [vmem:[#allocation5 + $0xc8] sm:$0xff] }
 0xbc8   : > { %v5871_v2 = vadd.f32 %v7768_v52, %v5856_v32  ;;  %v5854_v9 = vadd.f32 %v5835_v44, %v4873_v6  ;;  %v5988_v20 = vsel %vm585_vm0, %v12535_v22, 0.0  ;;  %v6154_v26 = vsel %vm585_vm0, %v6068_v45, 0.0 }
 0xbc9   : > { %v8520_v48 = vpop.f32.mrf.mxu0  ;;  %v6066_v0 = vmul.f32 %v12535_v22, %v12535_v22 }
 0xbca   : > { %5879 = vst.msk [vmem:[#allocation5 + $0xf0] sm:$0xff] %vm585_vm0, %v5871_v2  ;;  %v5869_v54 = vadd.f32 %v7768_v52, %v5854_v9  ;;  %v5857_v16 = vadd.f32 %v8520_v48, %v4876_v50 }
 0xbcb   : > { %6152 = vadd.xlane.f32.xlu0 %v6151_v63  ;;  %5989 = vadd.xlane.f32.xlu1 %v5988_v20  ;;  %v5838_v13 = vpop.f32.mrf.mxu0  ;;  %v6148_v10 = vsel %vm585_vm0, %v6066_v0, 0.0 }
 0xbcc   : > { %5877 = vst.msk [vmem:[#allocation5 + $0xe0] sm:$0xff] %vm585_vm0, %v5869_v54  ;;  %v5872_v43 = vadd.f32 %v7768_v52, %v5857_v16  ;;  %v5855_v62 = vadd.f32 %v5838_v13, %v4874_v51 }
 0xbcd   : > { %v8527_v37 = vpop.f32.mrf.mxu0 }
 0xbce   : > { %5880 = vst.msk [vmem:[#allocation5 + $0xf8] sm:$0xff] %vm585_vm0, %v5872_v43  ;;  %v5870_v38 = vadd.f32 %v7768_v52, %v5855_v62  ;;  %v12555_v30 = vadd.f32 %v8527_v37, %v12549_v46 }
 0xbcf   : > { %6146 = vadd.xlane.f32.xlu0 %v6145_v41  ;;  %6155 = vadd.xlane.f32.xlu1 %v6154_v26  ;;  %v12560_v1 = vpop.f32.mrf.mxu0 }
 0xbd0   : > { %5878 = vst.msk [vmem:[#allocation5 + $0xe8] sm:$0xff] %vm585_vm0, %v5870_v38  ;;  %v6753_v47 = vmul.f32 0.044715, %v12555_v30  ;;  %v12636_v38 = vadd.f32 %v12549_v46, %v12560_v1 }
 0xbd1   : > { %v8528_v24 = vpop.f32.mrf.mxu0  ;;  %v12564_v49 = vld [vmem:[#allocation5 + $0xf0] sm:$0xff] }
 0xbd2   : > { %v6785_v21 = vmul.f32 %v6753_v47, %v12555_v30  ;;  %v12568_v53 = vadd.f32 %v8528_v24, %v12549_v46  ;;  %v6003_v56 = vsel %vm585_vm0, %v12564_v49, 0.0  ;;  %v6071_v27 = vmul.f32 %v12564_v49, %v12564_v49 }
 0xbd3   : > { %6149 = vadd.xlane.f32.xlu1 %v6148_v10  ;;  %6004 = vadd.xlane.f32.xlu0 %v6003_v56  ;;  %v12573_v55 = vpop.f32.mrf.mxu0  ;;  %v12575_v4 = vld [vmem:[#allocation5 + $0xe0] sm:$0xff] }
 0xbd4   : > { %v6817_v35 = vmul.f32 %v6785_v21, %v12555_v30  ;;  %v6754_v17 = vmul.f32 0.044715, %v12568_v53  ;;  %v6069_v5 = vmul.f32 %v12575_v4, %v12575_v4  ;;  %v5997_v34 = vsel %vm585_vm0, %v12575_v4, 0.0 }
 0xbd5   : > { %v8531_v12 = vpop.f32.mrf.mxu0  ;;  %v12579_v33 = vld [vmem:[#allocation5 + $0xf8] sm:$0xff]  ;;  %v6163_v48 = vsel %vm585_vm0, %v6071_v27, 0.0 }
 0xbd6   : > { %v6849_v52 = vadd.f32 %v6817_v35, %v12555_v30  ;;  %v6786_v42 = vmul.f32 %v6754_v17, %v12568_v53  ;;  %v12586_v40 = vadd.f32 %v8531_v12, %v12549_v46  ;;  %v6006_v23 = vsel %vm585_vm0, %v12579_v33, 0.0 }
 0xbd7   : > { %5998 = vadd.xlane.f32.xlu0 %v5997_v34  ;;  %v6608_v28 = vpop.f32.mrf.mxu0  ;;  %6007 = vadd.xlane.f32.xlu1 %v6006_v23  ;;  %v12594_v59 = vld [vmem:[#allocation5 + $0xe8] sm:$0xff]  ;;  %v6157_v36 = vsel %vm585_vm0, %v6069_v5, 0.0  ;;  %v6072_v63 = vmul.f32 %v12579_v33, %v12579_v33  ;;  %v6751_v23 = vmul.f32 0.044715, %v12636_v38 }
 0xbd8   : > { %v6881_v18 = vmul.f32 0.7978846, %v6849_v52  ;;  %v6818_v61 = vmul.f32 %v6786_v42, %v12568_v53  ;;  %v6757_v15 = vmul.f32 0.044715, %v12586_v40  ;;  %v12597_v25 = vadd.f32 %v12549_v46, %v6608_v28 }
 0xbd9   : > { %v8532_v58 = vpop.f32.mrf.mxu0  ;;  %v6000_v6 = vsel %vm585_vm0, %v12594_v59, 0.0  ;;  %v6070_v32 = vmul.f32 %v12594_v59, %v12594_v59  ;;  %v6166_v56 = vsel %vm585_vm0, %v6072_v63, 0.0  ;;  %v6783_v63 = vmul.f32 %v6751_v23, %v12636_v38 }
 0xbda   : > { %9108 = vtanh.f32 %v6881_v18  ;;  %v6850_v19 = vadd.f32 %v6818_v61, %v12568_v53  ;;  %v6789_v39 = vmul.f32 %v6757_v15, %v12586_v40  ;;  %v12605_v14 = vadd.f32 %v8532_v58, %v12549_v46 }
 0xbdb   : > { %v6755_v60 = vmul.f32 0.044715, %v12597_v25  ;;  %6158 = vadd.xlane.f32.xlu0 %v6157_v36  ;;  %v6611_v3 = vpop.f32.mrf.mxu0  ;;  %6001 = vadd.xlane.f32.xlu1 %v6000_v6  ;;  %v6160_v45 = vsel %vm585_vm0, %v6070_v32, 0.0 }
 0xbdc   : > { %v6882_v8 = vmul.f32 0.7978846, %v6850_v19  ;;  %v6821_v7 = vmul.f32 %v6789_v39, %v12586_v40  ;;  %v6758_v44 = vmul.f32 0.044715, %v12605_v14  ;;  %v12616_v2 = vadd.f32 %v12549_v46, %v6611_v3 }
 0xbdd   : > { %v6787_v50 = vmul.f32 %v6755_v60, %v12597_v25  ;;  %v8535_v9 = vpop.f32.mrf.mxu0  ;;  %v6721_v19 = vmul.f32 0.5, %v12555_v30 }
 0xbde   : > { %9110 = vtanh.f32 %v6882_v8  ;;  %v6853_v51 = vadd.f32 %v6821_v7, %v12586_v40  ;;  %v6790_v31 = vmul.f32 %v6758_v44, %v12605_v14  ;;  %v12624_v54 = vadd.f32 %v8535_v9, %v12549_v46 }
 0xbdf   : > { %v6819_v16 = vmul.f32 %v6787_v50, %v12597_v25  ;;  %v6756_v20 = vmul.f32 0.044715, %v12616_v2  ;;  %6164 = vadd.xlane.f32.xlu0 %v6163_v48  ;;  %v6624_v13 = vpop.f32.mrf.mxu0  ;;  %6161 = vadd.xlane.f32.xlu1 %v6160_v45  ;;  %v12666_v8 = vadd.f32 %v12549_v46, %v12573_v55 }
 0xbe0   : > { %v6885_v43 = vmul.f32 0.7978846, %v6853_v51  ;;  %v6822_v62 = vmul.f32 %v6790_v31, %v12605_v14  ;;  %v6761_v37 = vmul.f32 0.044715, %v12624_v54  ;;  %v12632_v41 = vadd.f32 %v12549_v46, %v6624_v13 }
 0xbe1   : > { %v6788_v26 = vmul.f32 %v6756_v20, %v12616_v2  ;;  %v8536_v0 = vpop.f32.mrf.mxu0  ;;  %v6851_v47 = vadd.f32 %v6819_v16, %v12597_v25  ;;  %v6722_v51 = vmul.f32 0.5, %v12568_v53 }
 0xbe2   : > { %v6854_v24 = vadd.f32 %v6822_v62, %v12605_v14  ;;  %v6793_v21 = vmul.f32 %v6761_v37, %v12624_v54  ;;  %v6759_v10 = vmul.f32 0.044715, %v12632_v41  ;;  %9112 = vtanh.f32 %v6885_v43 }
 0xbe3   : > { %v6820_v35 = vmul.f32 %v6788_v26, %v12616_v2  ;;  %v12646_v17 = vadd.f32 %v8536_v0, %v12549_v46  ;;  %v6627_v1 = vpop.f32.mrf.mxu0  ;;  %v6883_v12 = vmul.f32 0.7978846, %v6851_v47  ;;  %6167 = vadd.xlane.f32.xlu1 %v6166_v56  ;;  %v6752_v26 = vmul.f32 0.044715, %v12666_v8 }
 0xbe4   : > { %v6886_v5 = vmul.f32 0.7978846, %v6854_v24  ;;  %v6825_v52 = vmul.f32 %v6793_v21, %v12624_v54  ;;  %v6791_v42 = vmul.f32 %v6759_v10, %v12632_v41  ;;  %v12651_v34 = vadd.f32 %v12549_v46, %v6627_v1 }
 0xbe5   : > { %v6762_v28 = vmul.f32 0.044715, %v12646_v17  ;;  %v8539_v18 = vpop.f32.mrf.mxu0  ;;  %v6852_v61 = vadd.f32 %v6820_v35, %v12616_v2  ;;  %9114 = vtanh.f32 %v6883_v12 }
 0xbe6   : > { %9116 = vtanh.f32 %v6886_v5  ;;  %v6857_v15 = vadd.f32 %v6825_v52, %v12624_v54  ;;  %v6823_v58 = vmul.f32 %v6791_v42, %v12632_v41  ;;  %v6760_v36 = vmul.f32 0.044715, %v12651_v34 }
 0xbe7   : > { %v9109_v27 = vpop.eup %9108  ;;  %v6794_v39 = vmul.f32 %v6762_v28, %v12646_v17  ;;  %v12662_v60 = vadd.f32 %v8539_v18, %v12549_v46  ;;  %v6640_v6 = vpop.f32.mrf.mxu0  ;;  %v6884_v3 = vmul.f32 0.7978846, %v6852_v61  ;;  %v12700_v28 = vmul.f32 %v6783_v63, %v12636_v38 }
 0xbe8   : > { %v6945_v32 = vadd.f32 1.0, %v9109_v27  ;;  %v6889_v7 = vmul.f32 0.7978846, %v6857_v15  ;;  %v6792_v44 = vmul.f32 %v6760_v36, %v12651_v34  ;;  %v6855_v48 = vadd.f32 %v6823_v58, %v12632_v41 }
 0xbe9   : > { %v6826_v50 = vmul.f32 %v6794_v39, %v12646_v17  ;;  %v6765_v9 = vmul.f32 0.044715, %v12662_v60  ;;  %v8540_v30 = vpop.f32.mrf.mxu0  ;;  %9118 = vtanh.f32 %v6884_v3  ;;  %v12676_v55 = vadd.f32 %v12549_v46, %v6640_v6 }
 0xbea   : > { %v6824_v31 = vmul.f32 %v6792_v44, %v12651_v34  ;;  %v12681_v13 = vadd.f32 %v8540_v30, %v12549_v46  ;;  %v6887_v62 = vmul.f32 0.7978846, %v6855_v48  ;;  %9120 = vtanh.f32 %v6889_v7 }
 0xbeb   : > { %v9111_v16 = vpop.eup %9110  ;;  %v6858_v20 = vadd.f32 %v6826_v50, %v12646_v17  ;;  %v6797_v45 = vmul.f32 %v6765_v9, %v12662_v60  ;;  %v6643_v43 = vpop.f32.mrf.mxu0  ;;  %v12685_v0 = vmul.f32 %v6945_v32, %v6721_v19  ;;  %v6763_v56 = vmul.f32 0.044715, %v12676_v55 }
 0xbec   : > { %v6946_v37 = vadd.f32 1.0, %v9111_v16  ;;  %v6856_v53 = vadd.f32 %v6824_v31, %v12651_v34  ;;  %v6766_v24 = vmul.f32 0.044715, %v12681_v13  ;;  %9122 = vtanh.f32 %v6887_v62 }
 0xbed   : > { %v6890_v47 = vmul.f32 0.7978846, %v6858_v20  ;;  %v8543_v21 = vpop.f32.mrf.mxu0  ;;  %v12692_v35 = vadd.f32 %v12549_v46, %v6643_v43  ;;  %v6829_v12 = vmul.f32 %v6797_v45, %v12662_v60  ;;  %v6725_v61 = vmul.f32 0.5, %v12586_v40 }
 0xbee   : > { %v12688_v10 = vmul.f32 %v6946_v37, %v6722_v51  ;;  %v12695_v1 = vadd.f32 %v8543_v21, %v12549_v46  ;;  %v6798_v5 = vmul.f32 %v6766_v24, %v12681_v13  ;;  %v6888_v42 = vmul.f32 0.7978846, %v6856_v53 }
 0xbef   : > { %9124 = vtanh.f32 %v6890_v47  ;;  %v6656_v52 = vpop.f32.mrf.mxu0  ;;  %v9113_v23 = vpop.eup %9112  ;;  %v12707_v58 = vmul.f32 %v6752_v26, %v12666_v8  ;;  %v6726_v36 = vmul.f32 0.5, %v12605_v14  ;;  %v6764_v6 = vmul.f32 0.044715, %v12692_v35 }
 0xbf0   : > { %v7008_v18 = vpack.c.bf16 %v12688_v10, %v12685_v0  ;;  %v6769_v15 = vmul.f32 0.044715, %v12695_v1  ;;  %v6830_v27 = vmul.f32 %v6798_v5, %v12681_v13  ;;  %9126 = vtanh.f32 %v6888_v42  ;;  %v9212_v0 = vld [vmem:[#allocation5 + $0x30] sm:$0xff] }
 0xbf1   : > { %v8544_v19 = vpop.f32.mrf.mxu0  ;;  %v12713_v3 = vadd.f32 %v12549_v46, %v6656_v52  ;;  %v6723_v40 = vmul.f32 0.5, %v12597_v25  ;;  %v6949_v44 = vadd.f32 1.0, %v9113_v23  ;;  %v6861_v50 = vadd.f32 %v6829_v12, %v12662_v60 }
 0xbf2   : > { %v9115_v39 = vpop.eup %9114  ;;  %v12716_v32 = vadd.f32 %v8544_v19, %v12549_v46  ;;  %v6795_v14 = vmul.f32 %v6763_v56, %v12676_v55  ;;  %v6724_v30 = vmul.f32 0.5, %v12616_v2  ;;  %v6862_v63 = vadd.f32 %v6830_v27, %v12681_v13 }
 0xbf3   : > { %v9117_v7 = vpop.eup %9116  ;;  %v6659_v9 = vpop.f32.mrf.mxu0  ;;  %v6801_v51 = vmul.f32 %v6769_v15, %v12695_v1  ;;  %v6947_v20 = vadd.f32 1.0, %v9115_v39  ;;  %v6727_v45 = vmul.f32 0.5, %v12632_v41  ;;  %v6729_v43 = vmul.f32 0.5, %v12624_v54 }
 0xbf4   : > { %v6950_v48 = vadd.f32 1.0, %v9117_v7  ;;  %v6770_v31 = vmul.f32 0.044715, %v12716_v32  ;;  %v12726_v16 = vadd.f32 %v12549_v46, %v6659_v9  ;;  %v6796_v37 = vmul.f32 %v6764_v6, %v12692_v35 }
 0xbf5   : > { %v8547_v25 = vpop.f32.mrf.mxu0  ;;  %v6767_v2 = vmul.f32 0.044715, %v12713_v3  ;;  %v6728_v26 = vmul.f32 0.5, %v12651_v34  ;;  %v6730_v53 = vmul.f32 0.5, %v12646_v17  ;;  %v6893_v47 = vmul.f32 0.7978846, %v6861_v50 }
 0xbf6   : > { %v9119_v62 = vpop.eup %9118  ;;  %v6827_v24 = vmul.f32 %v6795_v14, %v12676_v55  ;;  %v6802_v21 = vmul.f32 %v6770_v31, %v12716_v32  ;;  %v6981_v5 = vmul.f32 %v6949_v44, %v6725_v61  ;;  %v6982_v41 = vmul.f32 %v6950_v48, %v6726_v36 }
 0xbf7   : > { %v6672_v56 = vpop.f32.mrf.mxu0  ;;  %v6948_v12 = vadd.f32 1.0, %v9119_v62  ;;  %v6894_v52 = vmul.f32 0.7978846, %v6862_v63  ;;  %v6833_v54 = vmul.f32 %v6801_v51, %v12695_v1  ;;  %v9121_v42 = vpop.eup %9120  ;;  %v6768_v23 = vmul.f32 0.044715, %v12726_v16 }
 0xbf8   : > { %v12739_v15 = vadd.f32 %v12549_v46, %v6672_v56  ;;  %v6979_v17 = vmul.f32 %v6947_v20, %v6723_v40  ;;  %v6828_v39 = vmul.f32 %v6796_v37, %v12692_v35  ;;  %v6799_v6 = vmul.f32 %v6767_v2, %v12713_v3 }
 0xbf9   : > { %v8548_v34 = vpop.f32.mrf.mxu0  ;;  %v6980_v27 = vmul.f32 %v6948_v12, %v6724_v30  ;;  %v9123_v19 = vpop.eup %9122  ;;  %v12744_v61 = vadd.f32 %v8547_v25, %v12549_v46  ;;  %9128 = vtanh.f32 %v6893_v47  ;;  %v6834_v7 = vmul.f32 %v6802_v21, %v12716_v32 }
 0xbfa   : > { %v12747_v36 = vadd.f32 %v8548_v34, %v12549_v46  ;;  %v6771_v44 = vmul.f32 0.044715, %v12739_v15  ;;  %v7010_v9 = vpack.c.bf16 %v6982_v41, %v6981_v5  ;;  %v6865_v30 = vadd.f32 %v6833_v54, %v12695_v1 }
 0xbfb   : > { %v6675_v50 = vpop.f32.mrf.mxu0  ;;  %v7009_v14 = vpack.c.bf16 %v6980_v27, %v6979_v17  ;;  %9130 = vtanh.f32 %v6894_v52  ;;  %v6800_v51 = vmul.f32 %v6768_v23, %v12726_v16  ;;  %v6951_v31 = vadd.f32 1.0, %v9123_v19 }
 0xbfc   : > { %v9125_v40 = vpop.eup %9124  ;;  %v6774_v48 = vmul.f32 0.044715, %v12747_v36  ;;  %v12754_v63 = vadd.f32 %v12549_v46, %v6675_v50  ;;  %v6831_v62 = vmul.f32 %v6799_v6, %v12713_v3  ;;  %v6773_v37 = vmul.f32 0.044715, %v12744_v61 }
 0xbfd   : > { %8577 = vmatprep.mubr.bf16.mxu1 %v7009_v14  ;;  %v6954_v25 = vadd.f32 1.0, %v9125_v40  ;;  %v9127_v20 = vpop.eup %9126  ;;  %v6953_v47 = vadd.f32 1.0, %v9121_v42  ;;  %v6866_v21 = vadd.f32 %v6834_v7, %v12716_v32  ;;  %v6803_v46 = vmul.f32 %v6771_v44, %v12739_v15 }
 0xbfe   : > { %v6772_v2 = vmul.f32 0.044715, %v12754_v63  ;;  %8578 = vmatmul.mubr.bf16.vlgmr.msra.gmra.mxu1 %v7010_v9  ;;  %v6806_v56 = vmul.f32 %v6774_v48, %v12747_v36  ;;  %v6952_v12 = vadd.f32 1.0, %v9127_v20  ;;  %v6859_v52 = vadd.f32 %v6827_v24, %v12676_v55 }
 0xbff   : > { %v6986_v41 = vmul.f32 %v6954_v25, %v6730_v53  ;;  %v6860_v54 = vadd.f32 %v6828_v39, %v12692_v35  ;;  %v6897_v23 = vmul.f32 0.7978846, %v6865_v30  ;;  %v6832_v34 = vmul.f32 %v6800_v51, %v12726_v16 }
 0xc00   : > { %v6804_v5 = vmul.f32 %v6772_v2, %v12754_v63  ;;  %v6983_v17 = vmul.f32 %v6951_v31, %v6727_v45  ;;  %v6984_v27 = vmul.f32 %v6952_v12, %v6728_v26  ;;  %v6805_v42 = vmul.f32 %v6773_v37, %v12744_v61 }
 0xc01   : > { %v6985_v19 = vmul.f32 %v6953_v47, %v6729_v43  ;;  %v6891_v6 = vmul.f32 0.7978846, %v6859_v52  ;;  %v6892_v7 = vmul.f32 0.7978846, %v6860_v54  ;;  %v6816_v44 = vmul.f32 %v12707_v58, %v12666_v8 }
 0xc02   : > { %v6898_v50 = vmul.f32 0.7978846, %v6866_v21  ;;  %v6835_v53 = vmul.f32 %v6803_v46, %v12739_v15  ;;  %v7011_v14 = vpack.c.bf16 %v6984_v27, %v6983_v17  ;;  %v6838_v24 = vmul.f32 %v6806_v56, %v12747_v36 }
 0xc03   : > { %v6836_v39 = vmul.f32 %v6804_v5, %v12754_v63  ;;  %v7012_v40 = vpack.c.bf16 %v6986_v41, %v6985_v19  ;;  %9132 = vtanh.f32 %v6891_v6  ;;  %v6863_v45 = vadd.f32 %v6831_v62, %v12713_v3 }
 0xc04   : > { %8581 = vmatprep.mubr.bf16.mxu1 %v7011_v14  ;;  %9134 = vtanh.f32 %v6892_v7  ;;  %v6837_v43 = vmul.f32 %v6805_v42, %v12744_v61  ;;  %v6864_v58 = vadd.f32 %v6832_v34, %v12726_v16  ;;  %v6847_v9 = vadd.f32 %v12700_v28, %v12636_v38 }
 0xc05   : > { %9136 = vtanh.f32 %v6897_v23  ;;  %v6895_v26 = vmul.f32 0.7978846, %v6863_v45  ;;  %v6848_v30 = vadd.f32 %v6816_v44, %v12666_v8  ;;  %v6870_v51 = vadd.f32 %v6838_v24, %v12747_v36 }
 0xc06   : > { %8582 = vmatmul.mubr.bf16.gmra.mxu1 %v7012_v40  ;;  %9138 = vtanh.f32 %v6898_v50  ;;  %v9129_v48 = vpop.eup %9128  ;;  %v6896_v31 = vmul.f32 0.7978846, %v6864_v58  ;;  %v6867_v25 = vadd.f32 %v6835_v53, %v12739_v15  ;;  %v6868_v20 = vadd.f32 %v6836_v39, %v12754_v63 }
 0xc07   : > { %9140 = vtanh.f32 %v6895_v26  ;;  %v6869_v37 = vadd.f32 %v6837_v43, %v12744_v61  ;;  %v6879_v21 = vmul.f32 0.7978846, %v6847_v9  ;;  %v6880_v46 = vmul.f32 0.7978846, %v6848_v30 }
 0xc08   : > { %v9131_v62 = vpop.eup %9130  ;;  %9142 = vtanh.f32 %v6896_v31  ;;  %v6899_v2 = vmul.f32 0.7978846, %v6867_v25  ;;  %v6900_v47 = vmul.f32 0.7978846, %v6868_v20  ;;  %v6902_v28 = vmul.f32 0.7978846, %v6870_v51 }
 0xc09   : > { %v6901_v56 = vmul.f32 0.7978846, %v6869_v37  ;;  %v6958_v12 = vadd.f32 1.0, %v9131_v62  ;;  %v6734_v54 = vmul.f32 0.5, %v12681_v13  ;;  %v6957_v23 = vadd.f32 1.0, %v9129_v48 }
 0xc0a   : > { %9144 = vtanh.f32 %v6899_v2  ;;  %v6731_v17 = vmul.f32 0.5, %v12676_v55  ;;  %v6732_v27 = vmul.f32 0.5, %v12692_v35  ;;  %v6733_v6 = vmul.f32 0.5, %v12662_v60 }
 0xc0b   : > { %9146 = vtanh.f32 %v6900_v47  ;;  %v6990_v7 = vmul.f32 %v6958_v12, %v6734_v54  ;;  %v6735_v40 = vmul.f32 0.5, %v12713_v3  ;;  %v6736_v43 = vmul.f32 0.5, %v12726_v16 }
 0xc0c   : > { %9148 = vtanh.f32 %v6879_v21  ;;  %v6989_v14 = vmul.f32 %v6957_v23, %v6733_v6  ;;  %v6738_v26 = vmul.f32 0.5, %v12716_v32  ;;  %v6739_v25 = vmul.f32 0.5, %v12739_v15 }
 0xc0d   : > { %9150 = vtanh.f32 %v6880_v46  ;;  %v6740_v3 = vmul.f32 0.5, %v12754_v63  ;;  %v6719_v16 = vmul.f32 0.5, %v12636_v38  ;;  %v6737_v2 = vmul.f32 0.5, %v12695_v1 }
 0xc0e   : > { %9152 = vtanh.f32 %v6902_v28  ;;  %v7014_v45 = vpack.c.bf16 %v6990_v7, %v6989_v14  ;;  %v6742_v23 = vmul.f32 0.5, %v12747_v36 }
 0xc0f   : > { %9154 = vtanh.f32 %v6901_v56  ;;  %v6720_v56 = vmul.f32 0.5, %v12666_v8  ;;  %v6741_v8 = vmul.f32 0.5, %v12744_v61 }
 0xc10   : > { %v9133_v5 = vpop.eup %9132 }
 0xc11   : > { %v9135_v41 = vpop.eup %9134  ;;  %v6955_v52 = vadd.f32 1.0, %v9133_v5 }
 0xc12   : > { %v9137_v34 = vpop.eup %9136  ;;  %v6956_v42 = vadd.f32 1.0, %v9135_v41 }
 0xc13   : > { %v9139_v19 = vpop.eup %9138  ;;  %v6987_v44 = vmul.f32 %v6955_v52, %v6731_v17  ;;  %v6961_v48 = vadd.f32 1.0, %v9137_v34 }
 0xc14   : > { %v6988_v50 = vmul.f32 %v6956_v42, %v6732_v27  ;;  %v9141_v53 = vpop.eup %9140  ;;  %v6962_v58 = vadd.f32 1.0, %v9139_v19 }
 0xc15   : > { %v9143_v24 = vpop.eup %9142  ;;  %v6959_v13 = vadd.f32 1.0, %v9141_v53  ;;  %v6993_v5 = vmul.f32 %v6961_v48, %v6737_v2 }
 0xc16   : > { %v7013_v39 = vpack.c.bf16 %v6988_v50, %v6987_v44  ;;  %v6960_v55 = vadd.f32 1.0, %v9143_v24  ;;  %v6994_v47 = vmul.f32 %v6962_v58, %v6738_v26 }
 0xc17   : > { %v9145_v35 = vpop.eup %9144  ;;  %v6991_v9 = vmul.f32 %v6959_v13, %v6735_v40 }
 0xc18   : > { %8585 = vmatprep.mubr.bf16.mxu1 %v7013_v39  ;;  %v9147_v60 = vpop.eup %9146  ;;  %v6992_v30 = vmul.f32 %v6960_v55, %v6736_v43  ;;  %v6963_v51 = vadd.f32 1.0, %v9145_v35  ;;  %v7016_v38 = vpack.c.bf16 %v6994_v47, %v6993_v5 }
 0xc19   : > { %8586 = vmatmul.mubr.bf16.gmra.mxu1 %v7014_v45  ;;  %v9149_v31 = vpop.eup %9148  ;;  %v6964_v20 = vadd.f32 1.0, %v9147_v60 }
 0xc1a   : > { %v9151_v62 = vpop.eup %9150  ;;  %v7015_v37 = vpack.c.bf16 %v6992_v30, %v6991_v9  ;;  %v6943_v32 = vadd.f32 1.0, %v9149_v31  ;;  %v6995_v46 = vmul.f32 %v6963_v51, %v6739_v25 }
 0xc1b   : > { %v9153_v21 = vpop.eup %9152  ;;  %v6996_v28 = vmul.f32 %v6964_v20, %v6740_v3  ;;  %v6944_v12 = vadd.f32 1.0, %v9151_v62 }
 0xc1c   : > { %8589 = vmatprep.mubr.bf16.mxu1 %v7015_v37  ;;  %v9155_v15 = vpop.eup %9154  ;;  %v12795_v63 = vmul.f32 %v6943_v32, %v6719_v16  ;;  %v6966_v54 = vadd.f32 1.0, %v9153_v21 }
 0xc1d   : > { %v7017_v41 = vpack.c.bf16 %v6996_v28, %v6995_v46  ;;  %v12797_v52 = vmul.f32 %v6944_v12, %v6720_v56  ;;  %v6965_v34 = vadd.f32 1.0, %v9155_v15 }
 0xc1e   : > { %v6998_v17 = vmul.f32 %v6966_v54, %v6742_v23 }
 0xc1f   : > { %v7007_v1 = vpack.c.bf16 %v12797_v52, %v12795_v63  ;;  %v6997_v27 = vmul.f32 %v6965_v34, %v6741_v8 }
 0xc21   : > { %8590 = vmatmul.mubr.bf16.gmra.mxu1 %v7016_v38  ;;  %v7018_v42 = vpack.c.bf16 %v6998_v17, %v6997_v27 }
 0xc22   : > { %8593 = vmatprep.mubr.bf16.mxu1 %v7017_v41 }
 0xc29   : > { %8594 = vmatmul.mubr.bf16.gmra.mxu1 %v7018_v42 }
 0xc4c   : > { %v5993_v19 = vpop.xlane.xlu0 %5992 }
 0xc4d   : > { %v6035_v44 = vmul.f32 0.03125, %v5993_v19 }
 0xc4f   : > { %v6227_v24 = vmul.f32 %v6035_v44, %v6035_v44 }
 0xc50   : > { %v5996_v6 = vpop.xlane.xlu1 %5995  ;;  %v5987_v7 = vpop.xlane.xlu0 %5986 }
 0xc51   : > { %v6036_v50 = vmul.f32 0.03125, %v5996_v6  ;;  %v6033_v39 = vmul.f32 0.03125, %v5987_v7  ;;  %v6291_v6 = vsub.f32 %v12518_v29, %v6035_v44  ;;  %v9210_v29 = vld [vmem:[%s13008_s11] ss:$0 sm:$0xff] }
 0xc53   : > { %v6228_v36 = vmul.f32 %v6036_v50, %v6036_v50  ;;  %v6225_v55 = vmul.f32 %v6033_v39, %v6033_v39  ;;  %v6292_v27 = vsub.f32 %v12525_v11, %v6036_v50  ;;  %v6289_v7 = vsub.f32 %v12523_v57, %v6033_v39 }
 0xc54   : > { %v5990_v53 = vpop.xlane.xlu1 %5989  ;;  %v6153_v14 = vpop.xlane.xlu0 %6152 }
 0xc55   : > { %v6195_v40 = vmul.f32 0.03125, %v6153_v14  ;;  %v6034_v61 = vmul.f32 0.03125, %v5990_v53 }
 0xc57   : > { %v6259_v13 = vsub.f32 %v6195_v40, %v6227_v24  ;;  %v6226_v51 = vmul.f32 %v6034_v61, %v6034_v61 }
 0xc58   : > { %v6156_v45 = vpop.xlane.xlu1 %6155  ;;  %v6147_v43 = vpop.xlane.xlu0 %6146 }
 0xc59   : > { %v6196_v58 = vmul.f32 0.03125, %v6156_v45  ;;  %v6193_v35 = vmul.f32 0.03125, %v6147_v43  ;;  %v6323_v26 = vadd.f32 1e-05, %v6259_v13 }
 0xc5b   : > { %v6260_v60 = vsub.f32 %v6196_v58, %v6228_v36  ;;  %v6257_v9 = vsub.f32 %v6193_v35, %v6225_v55  ;;  %9156 = vrsqrt.f32 %v6323_v26  ;;  %v6290_v35 = vsub.f32 %v12535_v22, %v6034_v61 }
 0xc5c   : > { %v6150_v30 = vpop.xlane.xlu1 %6149  ;;  %v6005_v48 = vpop.xlane.xlu0 %6004 }
 0xc5d   : > { %v6324_v31 = vadd.f32 1e-05, %v6260_v60  ;;  %v6321_v25 = vadd.f32 1e-05, %v6257_v9  ;;  %v6194_v3 = vmul.f32 0.03125, %v6150_v30  ;;  %v6039_v32 = vmul.f32 0.03125, %v6005_v48 }
 0xc5e   : > { %v9211_v30 = vld [vmem:[%s13009_s12] ss:$0 sm:$0xff] }
 0xc5f   : > { %9158 = vrsqrt.f32 %v6324_v31  ;;  %v6258_v20 = vsub.f32 %v6194_v3, %v6226_v51  ;;  %v6231_v15 = vmul.f32 %v6039_v32, %v6039_v32 }
 0xc60   : > { %9160 = vrsqrt.f32 %v6321_v25  ;;  %v5999_v16 = vpop.xlane.xlu0 %5998  ;;  %v6008_v37 = vpop.xlane.xlu1 %6007 }
 0xc61   : > { %v6322_v62 = vadd.f32 1e-05, %v6258_v20  ;;  %v6037_v2 = vmul.f32 0.03125, %v5999_v16  ;;  %v6040_v41 = vmul.f32 0.03125, %v6008_v37  ;;  %v6295_v37 = vsub.f32 %v12564_v49, %v6039_v32 }
 0xc63   : > { %9162 = vrsqrt.f32 %v6322_v62  ;;  %v6229_v21 = vmul.f32 %v6037_v2, %v6037_v2  ;;  %v6232_v40 = vmul.f32 %v6040_v41, %v6040_v41  ;;  %v6293_v3 = vsub.f32 %v12575_v4, %v6037_v2 }
 0xc64   : > { %v6159_v47 = vpop.xlane.xlu0 %6158  ;;  %v6002_v46 = vpop.xlane.xlu1 %6001 }
 0xc65   : > { %v6197_v28 = vmul.f32 0.03125, %v6159_v47  ;;  %v6038_v56 = vmul.f32 0.03125, %v6002_v46 }
 0xc67   : > { %v6261_v12 = vsub.f32 %v6197_v28, %v6229_v21  ;;  %v6230_v34 = vmul.f32 %v6038_v56, %v6038_v56  ;;  %v6294_v47 = vsub.f32 %v12594_v59, %v6038_v56 }
 0xc68   : > { %v6165_v5 = vpop.xlane.xlu0 %6164  ;;  %v6162_v54 = vpop.xlane.xlu1 %6161 }
 0xc69   : > { %v6325_v38 = vadd.f32 1e-05, %v6261_v12  ;;  %v6199_v23 = vmul.f32 0.03125, %v6165_v5  ;;  %v6198_v8 = vmul.f32 0.03125, %v6162_v54  ;;  %v9157_v17 = vpop.eup %9156  ;;  %v6296_v5 = vsub.f32 %v12579_v33, %v6040_v41  ;;  %v12830_v33 = vld [vmem:[%s13013_s16] ss:$0 sm:$0xff] }
 0xc6a   : > { %v6387_v45 = vmul.f32 %v9157_v17, %v6291_v6 }
 0xc6b   : > { %9164 = vrsqrt.f32 %v6325_v38  ;;  %v6263_v42 = vsub.f32 %v6199_v23, %v6231_v15  ;;  %v6262_v53 = vsub.f32 %v6198_v8, %v6230_v34 }
 0xc6c   : > { %v9159_v19 = vpop.eup %9158  ;;  %v6168_v36 = vpop.xlane.xlu1 %6167  ;;  %v6426_v60 = vmul.f32 %v9210_v29, %v6387_v45 }
 0xc6d   : > { %v9161_v14 = vpop.eup %9160  ;;  %v6388_v24 = vmul.f32 %v9159_v19, %v6292_v27  ;;  %v6327_v13 = vadd.f32 1e-05, %v6263_v42  ;;  %v6326_v43 = vadd.f32 1e-05, %v6262_v53  ;;  %v6200_v55 = vmul.f32 0.03125, %v6168_v36  ;;  %v9214_v19 = vld [vmem:[#allocation5 + $0x38] sm:$0xff] }
 0xc6e   : > { %v6385_v58 = vmul.f32 %v9161_v14, %v6289_v7  ;;  %v6465_v51 = vadd.f32 %v9211_v30, %v6426_v60  ;;  %v9215_v14 = vld [vmem:[#allocation5 + $0x28] sm:$0xff]  ;;  %v9216_v36 = vld [vmem:[#allocation5 + $0x50] sm:$0xff] }
 0xc6f   : > { %9166 = vrsqrt.f32 %v6327_v13  ;;  %v6264_v50 = vsub.f32 %v6200_v55, %v6232_v40  ;;  %v6427_v57 = vmul.f32 %v9210_v29, %v6388_v24 }
 0xc70   : > { %v9163_v11 = vpop.eup %9162  ;;  %9168 = vrsqrt.f32 %v6326_v43  ;;  %v6424_v39 = vmul.f32 %v9210_v29, %v6385_v58  ;;  %v9217_v58 = vld [vmem:[#allocation5 + $0x40] sm:$0xff] }
 0xc71   : > { %v6386_v44 = vmul.f32 %v9163_v11, %v6290_v35  ;;  %v6328_v26 = vadd.f32 1e-05, %v6264_v50  ;;  %v6466_v22 = vadd.f32 %v9211_v30, %v6427_v57 }
 0xc72   : > { %v6463_v61 = vadd.f32 %v9211_v30, %v6424_v39  ;;  %v9219_v39 = vld [vmem:[#allocation5 + $0x48] sm:$0xff] }
 0xc73   : > { %v6425_v9 = vmul.f32 %v9210_v29, %v6386_v44  ;;  %9170 = vrsqrt.f32 %v6328_v26  ;;  %v6484_v20 = vpack.c.bf16 %v6466_v22, %v6465_v51  ;;  %v9220_v22 = vld [vmem:[#allocation5 + $0x70] sm:$0xff] }
 0xc75   : > { %v6464_v48 = vadd.f32 %v9211_v30, %v6425_v9 }
 0xc77   : > { %v6483_v31 = vpack.c.bf16 %v6464_v48, %v6463_v61 }
 0xc78   : > { %v9165_v25 = vpop.eup %9164 }
 0xc79   : > { %8549 = vmatprep.mubr.msk.bf16.mxu0 %vm585_vm0, %v6483_v31  ;;  %v6389_v16 = vmul.f32 %v9165_v25, %v6293_v3  ;;  %v9221_v31 = vld [vmem:[#allocation5 + $0x60] sm:$0xff] }
 0xc7a   : > { %8550 = vmatmul.mubr.msk.bf16.gmra.mxu0 %vm585_vm0, %v6484_v20 }
 0xc7b   : > { %v6428_v12 = vmul.f32 %v9210_v29, %v6389_v16  ;;  %v9222_v16 = vld [vmem:[#allocation5 + $0x78] sm:$0xff] }
 0xc7c   : > { %v9167_v62 = vpop.eup %9166 }
 0xc7d   : > { %v9169_v21 = vpop.eup %9168  ;;  %v6391_v46 = vmul.f32 %v9167_v62, %v6295_v37  ;;  %v6467_v2 = vadd.f32 %v9211_v30, %v6428_v12 }
 0xc7e   : > { %v6390_v28 = vmul.f32 %v9169_v21, %v6294_v47  ;;  %v9223_v21 = vld [vmem:[#allocation5 + $0x68] sm:$0xff] }
 0xc7f   : > { %v6430_v23 = vmul.f32 %v9210_v29, %v6391_v46 }
 0xc80   : > { %v6429_v15 = vmul.f32 %v9210_v29, %v6390_v28  ;;  %v9171_v38 = vpop.eup %9170 }
 0xc81   : > { %v6392_v4 = vmul.f32 %v9171_v38, %v6296_v5  ;;  %v6469_v49 = vadd.f32 %v9211_v30, %v6430_v23  ;;  %v9224_v5 = vld [vmem:[#allocation5 + $0x90] sm:$0xff] }
 0xc82   : > { %v6468_v54 = vadd.f32 %v9211_v30, %v6429_v15 }
 0xc83   : > { %v6431_v8 = vmul.f32 %v9210_v29, %v6392_v4  ;;  %v9218_v29 = vld [vmem:[#allocation5 + $0x58] sm:$0xff] }
 0xc84   : > { %v6485_v34 = vpack.c.bf16 %v6468_v54, %v6467_v2  ;;  %v9225_v2 = vld [vmem:[#allocation5 + $0x80] sm:$0xff] }
 0xc85   : > { %v6470_v32 = vadd.f32 %v9211_v30, %v6431_v8  ;;  %v9226_v8 = vld [vmem:[#allocation5 + $0x98] sm:$0xff] }
 0xc86   : > { %8553 = vmatprep.mubr.msk.bf16.mxu0 %vm585_vm0, %v6485_v34 }
 0xc87   : > { %v6486_v59 = vpack.c.bf16 %v6470_v32, %v6469_v49 }
 0xc89   : > { %8554 = vmatmul.mubr.msk.bf16.gmra.mxu0 %vm585_vm0, %v6486_v59 }
 0xc8a   : > { %8573 = vmatprep.mubr.bf16.mxu0 %v7007_v1  ;;  %v9213_v1 = vld [vmem:[#allocation5 + $0x20] sm:$0xff] }
 0xc91   : > { %8574 = vmatmul.mubr.bf16.vlgmr.msra.gmra.mxu0 %v7008_v18 }
 0xcbe   : > { %v8579_v56 = vpop.f32.mrf.mxu1 }
 0xcbf   : > { %v7153_v41 = vadd.f32 %v8579_v56, %v12830_v33  ;;  %v9227_v56 = vld [vmem:[#allocation5 + $0x88] sm:$0xff] }
 0xcc0   : > { %v7144_v63 = vpop.f32.mrf.mxu1 }
 0xcc1   : > { %v7261_v10 = vadd.f32 %v9212_v0, %v7153_v41  ;;  %v7145_v18 = vadd.f32 %v12830_v33, %v7144_v63 }
 0xcc2   : > { %v8580_v52 = vpop.f32.mrf.mxu1 }
 0xcc3   : > { %7293 = vst.msk [vmem:[%s12838_s27 + $0x30] sm:$0xff] %vm585_vm0, %v7261_v10  ;;  %v7259_v17 = vadd.f32 %v9213_v1, %v7145_v18  ;;  %v7156_v27 = vadd.f32 %v8580_v52, %v12830_v33  ;;  %v9228_v10 = vld [vmem:[#allocation5 + $0xb0] sm:$0xff] }
 0xcc4   : > { %v7147_v42 = vpop.f32.mrf.mxu1 }
 0xcc5   : > { %7291 = vst.msk [vmem:[%s12838_s27 + $0x20] sm:$0xff] %vm585_vm0, %v7259_v17  ;;  %v7262_v6 = vadd.f32 %v9214_v19, %v7156_v27  ;;  %v7148_v7 = vadd.f32 %v12830_v33, %v7147_v42  ;;  %v9229_v17 = vld [vmem:[#allocation5 + $0xa0] sm:$0xff] }
 0xcc6   : > { %v8583_v53 = vpop.f32.mrf.mxu1 }
 0xcc7   : > { %7294 = vst.msk [vmem:[%s12838_s27 + $0x38] sm:$0xff] %vm585_vm0, %v7262_v6  ;;  %v7260_v24 = vadd.f32 %v9215_v14, %v7148_v7  ;;  %v7169_v40 = vadd.f32 %v8583_v53, %v12830_v33  ;;  %v9230_v6 = vld [vmem:[#allocation5 + $0xb8] sm:$0xff]  ;;  %v9231_v14 = vld [vmem:[#allocation5 + $0xa8] sm:$0xff] }
 0xcc8   : > { %v7160_v13 = vpop.f32.mrf.mxu1 }
 0xcc9   : > { %7292 = vst.msk [vmem:[%s12838_s27 + $0x28] sm:$0xff] %vm585_vm0, %v7260_v24  ;;  %v7265_v45 = vadd.f32 %v9216_v36, %v7169_v40  ;;  %v7161_v43 = vadd.f32 %v12830_v33, %v7160_v13  ;;  %v9232_v13 = vld [vmem:[%s13011_s14] ss:$0 sm:$0xff] }
 0xcca   : > { %v8584_v55 = vpop.f32.mrf.mxu1 }
 0xccb   : > { %7297 = vst.msk [vmem:[%s12838_s27 + $0x50] sm:$0xff] %vm585_vm0, %v7265_v45  ;;  %v7263_v35 = vadd.f32 %v9217_v58, %v7161_v43  ;;  %v7172_v11 = vadd.f32 %v8584_v55, %v12830_v33 }
 0xccc   : > { %v7163_v50 = vpop.f32.mrf.mxu1 }
 0xccd   : > { %7295 = vst.msk [vmem:[%s12838_s27 + $0x40] sm:$0xff] %vm585_vm0, %v7263_v35  ;;  %v7266_v57 = vadd.f32 %v9218_v29, %v7172_v11  ;;  %v7164_v44 = vadd.f32 %v12830_v33, %v7163_v50 }
 0xccf   : > { %7298 = vst.msk [vmem:[%s12838_s27 + $0x58] sm:$0xff] %vm585_vm0, %v7266_v57  ;;  %v7264_v26 = vadd.f32 %v9219_v39, %v7164_v44 }
 0xcd1   : > { %7296 = vst.msk [vmem:[%s12838_s27 + $0x48] sm:$0xff] %vm585_vm0, %v7264_v26 }
 0xcd9   : > { %v8587_v60 = vpop.f32.mrf.mxu1 }
 0xcda   : > { %v7185_v9 = vadd.f32 %v8587_v60, %v12830_v33 }
 0xcdb   : > { %v7176_v30 = vpop.f32.mrf.mxu1 }
 0xcdc   : > { %v7269_v61 = vadd.f32 %v9220_v22, %v7185_v9  ;;  %v7177_v48 = vadd.f32 %v12830_v33, %v7176_v30 }
 0xcdd   : > { %v8588_v51 = vpop.f32.mrf.mxu1 }
 0xcde   : > { %7301 = vst.msk [vmem:[%s12838_s27 + $0x70] sm:$0xff] %vm585_vm0, %v7269_v61  ;;  %v7267_v25 = vadd.f32 %v9221_v31, %v7177_v48  ;;  %v7188_v3 = vadd.f32 %v8588_v51, %v12830_v33 }
 0xcdf   : > { %v7179_v20 = vpop.f32.mrf.mxu1 }
 0xce0   : > { %7299 = vst.msk [vmem:[%s12838_s27 + $0x60] sm:$0xff] %vm585_vm0, %v7267_v25  ;;  %v7270_v62 = vadd.f32 %v9222_v16, %v7188_v3  ;;  %v7180_v37 = vadd.f32 %v12830_v33, %v7179_v20 }
 0xce1   : > { %v8591_v47 = vpop.f32.mrf.mxu1 }
 0xce2   : > { %7302 = vst.msk [vmem:[%s12838_s27 + $0x78] sm:$0xff] %vm585_vm0, %v7270_v62  ;;  %v7268_v46 = vadd.f32 %v9223_v21, %v7180_v37  ;;  %v7201_v28 = vadd.f32 %v8591_v47, %v12830_v33 }
 0xce3   : > { %v7192_v12 = vpop.f32.mrf.mxu1 }
 0xce4   : > { %7300 = vst.msk [vmem:[%s12838_s27 + $0x68] sm:$0xff] %vm585_vm0, %v7268_v46  ;;  %v7273_v15 = vadd.f32 %v9224_v5, %v7201_v28  ;;  %v7193_v38 = vadd.f32 %v12830_v33, %v7192_v12 }
 0xce5   : > { %v8592_v4 = vpop.f32.mrf.mxu1 }
 0xce6   : > { %7305 = vst.msk [vmem:[%s12838_s27 + $0x90] sm:$0xff] %vm585_vm0, %v7273_v15  ;;  %v7271_v54 = vadd.f32 %v9225_v2, %v7193_v38  ;;  %v7204_v23 = vadd.f32 %v8592_v4, %v12830_v33 }
 0xce7   : > { %v7195_v34 = vpop.f32.mrf.mxu1 }
 0xce8   : > { %7303 = vst.msk [vmem:[%s12838_s27 + $0x80] sm:$0xff] %vm585_vm0, %v7271_v54  ;;  %v7274_v49 = vadd.f32 %v9226_v8, %v7204_v23  ;;  %v7196_v32 = vadd.f32 %v12830_v33, %v7195_v34 }
 0xce9   : > { %v8595_v59 = vpop.f32.mrf.mxu1 }
 0xcea   : > { %7306 = vst.msk [vmem:[%s12838_s27 + $0x98] sm:$0xff] %vm585_vm0, %v7274_v49  ;;  %v7272_v41 = vadd.f32 %v9227_v56, %v7196_v32  ;;  %v7217_v63 = vadd.f32 %v8595_v59, %v12830_v33 }
 0xceb   : > { %v7208_v0 = vpop.f32.mrf.mxu1 }
 0xcec   : > { %7304 = vst.msk [vmem:[%s12838_s27 + $0x88] sm:$0xff] %vm585_vm0, %v7272_v41  ;;  %v7277_v18 = vadd.f32 %v9228_v10, %v7217_v63  ;;  %v7209_v52 = vadd.f32 %v12830_v33, %v7208_v0 }
 0xced   : > { %v8596_v1 = vpop.f32.mrf.mxu1 }
 0xcee   : > { %7309 = vst.msk [vmem:[%s12838_s27 + $0xb0] sm:$0xff] %vm585_vm0, %v7277_v18  ;;  %v7275_v27 = vadd.f32 %v9229_v17, %v7209_v52  ;;  %v7220_v42 = vadd.f32 %v8596_v1, %v12830_v33 }
 0xcef   : > { %v7211_v19 = vpop.f32.mrf.mxu1 }
 0xcf0   : > { %7307 = vst.msk [vmem:[%s12838_s27 + $0xa0] sm:$0xff] %vm585_vm0, %v7275_v27  ;;  %v7278_v7 = vadd.f32 %v9230_v6, %v7220_v42  ;;  %v7212_v53 = vadd.f32 %v12830_v33, %v7211_v19  ;;  %v9233_v27 = vld [vmem:[#allocation5 + $0x10] sm:$0xff] }
 0xcf2   : > { %7310 = vst.msk [vmem:[%s12838_s27 + $0xb8] sm:$0xff] %vm585_vm0, %v7278_v7  ;;  %v7276_v24 = vadd.f32 %v9231_v14, %v7212_v53 }
 0xcf4   : > { %7308 = vst.msk [vmem:[%s12838_s27 + $0xa8] sm:$0xff] %vm585_vm0, %v7276_v24  ;;  %v9234_v24 = vld [vmem:[#allocation5] sm:$0xff] }
 0xd3a   : > { %v8551_v40 = vpop.f32.mrf.mxu0 }
 0xd3b   : > { %v12902_v36 = vadd.f32 %v9232_v13, %v8551_v40 }
 0xd3c   : > { %v6688_v45 = vpop.f32.mrf.mxu0 }
 0xd3d   : > { %v6777_v43 = vmul.f32 0.044715, %v12902_v36  ;;  %v12905_v55 = vadd.f32 %v9232_v13, %v6688_v45 }
 0xd3e   : > { %v8552_v58 = vpop.f32.mrf.mxu0 }
 0xd3f   : > { %v6809_v35 = vmul.f32 %v6777_v43, %v12902_v36  ;;  %v6775_v11 = vmul.f32 0.044715, %v12905_v55  ;;  %v12909_v50 = vadd.f32 %v9232_v13, %v8552_v58 }
 0xd40   : > { %v6691_v29 = vpop.f32.mrf.mxu0 }
 0xd41   : > { %v6841_v57 = vmul.f32 %v6809_v35, %v12902_v36  ;;  %v6807_v44 = vmul.f32 %v6775_v11, %v12905_v55  ;;  %v6778_v39 = vmul.f32 0.044715, %v12909_v50  ;;  %v12914_v26 = vadd.f32 %v9232_v13, %v6691_v29 }
 0xd43   : > { %v6873_v60 = vadd.f32 %v6841_v57, %v12902_v36  ;;  %v6839_v9 = vmul.f32 %v6807_v44, %v12905_v55  ;;  %v6810_v30 = vmul.f32 %v6778_v39, %v12909_v50  ;;  %v6776_v22 = vmul.f32 0.044715, %v12914_v26 }
 0xd45   : > { %v6842_v61 = vmul.f32 %v6810_v30, %v12909_v50  ;;  %v6808_v48 = vmul.f32 %v6776_v22, %v12914_v26  ;;  %v6871_v51 = vadd.f32 %v6839_v9, %v12905_v55  ;;  %v6905_v31 = vmul.f32 0.7978846, %v6873_v60  ;;  %v9235_v60 = vld [vmem:[#allocation5 + $0x18] sm:$0xff] }
 0xd46   : > { %v6746_v30 = vmul.f32 0.5, %v12909_v50 }
 0xd47   : > { %v6874_v25 = vadd.f32 %v6842_v61, %v12909_v50  ;;  %v6840_v3 = vmul.f32 %v6808_v48, %v12914_v26  ;;  %v6903_v20 = vmul.f32 0.7978846, %v6871_v51  ;;  %v9236_v61 = vld [vmem:[#allocation5 + $0x8] sm:$0xff]  ;;  %v6744_v51 = vmul.f32 0.5, %v12914_v26 }
 0xd49   : > { %v6906_v16 = vmul.f32 0.7978846, %v6874_v25  ;;  %v6872_v62 = vadd.f32 %v6840_v3, %v12914_v26  ;;  %9172 = vtanh.f32 %v6903_v20  ;;  %v8555_v37 = vpop.f32.mrf.mxu0  ;;  %v6745_v25 = vmul.f32 0.5, %v12902_v36 }
 0xd4a   : > { %9174 = vtanh.f32 %v6905_v31  ;;  %v12926_v47 = vadd.f32 %v9232_v13, %v8555_v37 }
 0xd4b   : > { %9176 = vtanh.f32 %v6906_v16  ;;  %v6904_v21 = vmul.f32 0.7978846, %v6872_v62  ;;  %v6704_v46 = vpop.f32.mrf.mxu0 }
 0xd4c   : > { %v6781_v28 = vmul.f32 0.044715, %v12926_v47  ;;  %v12929_v12 = vadd.f32 %v9232_v13, %v6704_v46 }
 0xd4d   : > { %9178 = vtanh.f32 %v6904_v21  ;;  %v8556_v5 = vpop.f32.mrf.mxu0 }
 0xd4e   : > { %v6813_v15 = vmul.f32 %v6781_v28, %v12926_v47  ;;  %v6779_v38 = vmul.f32 0.044715, %v12929_v12  ;;  %v12933_v4 = vadd.f32 %v9232_v13, %v8556_v5 }
 0xd4f   : > { %v6707_v2 = vpop.f32.mrf.mxu0 }
 0xd50   : > { %v6845_v54 = vmul.f32 %v6813_v15, %v12926_v47  ;;  %v6811_v23 = vmul.f32 %v6779_v38, %v12929_v12  ;;  %v6782_v34 = vmul.f32 0.044715, %v12933_v4  ;;  %v12938_v8 = vadd.f32 %v9232_v13, %v6707_v2 }
 0xd51   : > { %v8575_v49 = vpop.f32.mrf.mxu0  ;;  %v6743_v13 = vmul.f32 0.5, %v12905_v55  ;;  %v6750_v36 = vmul.f32 0.5, %v12933_v4 }
 0xd52   : > { %v6877_v32 = vadd.f32 %v6845_v54, %v12926_v47  ;;  %v6843_v59 = vmul.f32 %v6811_v23, %v12929_v12  ;;  %v6814_v56 = vmul.f32 %v6782_v34, %v12933_v4  ;;  %v6780_v41 = vmul.f32 0.044715, %v12938_v8 }
 0xd53   : > { %v7137_v63 = vadd.f32 %v8575_v49, %v12830_v33  ;;  %v7128_v0 = vpop.f32.mrf.mxu0  ;;  %v6747_v54 = vmul.f32 0.5, %v12929_v12  ;;  %v6748_v23 = vmul.f32 0.5, %v12938_v8  ;;  %v6749_v49 = vmul.f32 0.5, %v12926_v47 }
 0xd54   : > { %v6909_v10 = vmul.f32 0.7978846, %v6877_v32  ;;  %v6846_v18 = vmul.f32 %v6814_v56, %v12933_v4  ;;  %v6812_v52 = vmul.f32 %v6780_v41, %v12938_v8  ;;  %v7129_v1 = vadd.f32 %v12830_v33, %v7128_v0 }
 0xd55   : > { %v7257_v42 = vadd.f32 %v9233_v27, %v7137_v63  ;;  %v8576_v19 = vpop.f32.mrf.mxu0  ;;  %v6875_v6 = vadd.f32 %v6843_v59, %v12929_v12 }
 0xd56   : > { %v9173_v17 = vpop.eup %9172  ;;  %v6878_v53 = vadd.f32 %v6846_v18, %v12933_v4  ;;  %v6844_v14 = vmul.f32 %v6812_v52, %v12938_v8  ;;  %v7255_v40 = vadd.f32 %v9234_v24, %v7129_v1  ;;  %9180 = vtanh.f32 %v6909_v10  ;;  %v9237_v18 = vld [vmem:[#allocation5 + $0xd0] sm:$0xff]  ;;  %v9238_v1 = vld [vmem:[#allocation5 + $0xc0] sm:$0xff] }
 0xd57   : > { %v9175_v7 = vpop.eup %9174  ;;  %7289 = vst.msk [vmem:[%s12838_s27 + $0x10] sm:$0xff] %vm585_vm0, %v7257_v42  ;;  %v7140_v43 = vadd.f32 %v8576_v19, %v12830_v33  ;;  %v7131_v58 = vpop.f32.mrf.mxu0  ;;  %v6967_v35 = vadd.f32 1.0, %v9173_v17  ;;  %v6907_v11 = vmul.f32 0.7978846, %v6875_v6  ;;  %v9239_v19 = vld [vmem:[#allocation5 + $0xd8] sm:$0xff] }
 0xd58   : > { %v9177_v45 = vpop.eup %9176  ;;  %v6910_v29 = vmul.f32 0.7978846, %v6878_v53  ;;  %7287 = vst.msk [vmem:[%s12838_s27] sm:$0xff] %vm585_vm0, %v7255_v40  ;;  %v7132_v57 = vadd.f32 %v12830_v33, %v7131_v58  ;;  %v6876_v39 = vadd.f32 %v6844_v14, %v12938_v8  ;;  %v6969_v22 = vadd.f32 1.0, %v9175_v7  ;;  %v9240_v53 = vld [vmem:[#allocation5 + $0xc8] sm:$0xff] }
 0xd59   : > { %v6970_v44 = vadd.f32 1.0, %v9177_v45  ;;  %v7258_v9 = vadd.f32 %v9235_v60, %v7140_v43  ;;  %9182 = vtanh.f32 %v6907_v11  ;;  %v6999_v16 = vmul.f32 %v6967_v35, %v6743_v13  ;;  %v9241_v45 = vld [vmem:[#allocation5 + $0xf0] sm:$0xff]  ;;  %v9242_v11 = vld [vmem:[#allocation5 + $0xe0] sm:$0xff] }
 0xd5a   : > { %v9179_v55 = vpop.eup %9178  ;;  %9184 = vtanh.f32 %v6910_v29  ;;  %v7256_v48 = vadd.f32 %v9236_v61, %v7132_v57  ;;  %v6908_v20 = vmul.f32 0.7978846, %v6876_v39  ;;  %v7001_v37 = vmul.f32 %v6969_v22, %v6745_v25  ;;  %v9243_v39 = vld [vmem:[#allocation5 + $0xf8] sm:$0xff] }
 0xd5b   : > { %v6968_v31 = vadd.f32 1.0, %v9179_v55  ;;  %7290 = vst.msk [vmem:[%s12838_s27 + $0x18] sm:$0xff] %vm585_vm0, %v7258_v9  ;;  %v7002_v3 = vmul.f32 %v6970_v44, %v6746_v30  ;;  %v9244_v9 = vld [vmem:[#allocation5 + $0xe8] sm:$0xff] }
 0xd5c   : > { %7288 = vst.msk [vmem:[%s12838_s27 + $0x8] sm:$0xff] %vm585_vm0, %v7256_v48  ;;  %9186 = vtanh.f32 %v6908_v20 }
 0xd5d   : > { %v7000_v62 = vmul.f32 %v6968_v31, %v6744_v51  ;;  %v7020_v21 = vpack.c.bf16 %v7002_v3, %v7001_v37 }
 0xd5f   : > { %v7019_v50 = vpack.c.bf16 %v7000_v62, %v6999_v16 }
 0xd61   : > { %8597 = vmatprep.mubr.bf16.mxu1 %v7019_v50 }
 0xd62   : > { %8598 = vmatmul.mubr.bf16.gmra.mxu1 %v7020_v21 }
 0xd63   : > { %v9181_v46 = vpop.eup %9180 }
 0xd64   : > { %v6973_v2 = vadd.f32 1.0, %v9181_v46 }
 0xd66   : > { %v9183_v28 = vpop.eup %9182  ;;  %v7005_v41 = vmul.f32 %v6973_v2, %v6749_v49 }
 0xd67   : > { %v9185_v26 = vpop.eup %9184  ;;  %v6971_v15 = vadd.f32 1.0, %v9183_v28 }
 0xd68   : > { %v6974_v5 = vadd.f32 1.0, %v9185_v26 }
 0xd69   : > { %v9187_v38 = vpop.eup %9186  ;;  %v7003_v59 = vmul.f32 %v6971_v15, %v6747_v54 }
 0xd6a   : > { %v6972_v34 = vadd.f32 1.0, %v9187_v38  ;;  %v7006_v32 = vmul.f32 %v6974_v5, %v6750_v36 }
 0xd6c   : > { %v7004_v56 = vmul.f32 %v6972_v34, %v6748_v23  ;;  %v7022_v0 = vpack.c.bf16 %v7006_v32, %v7005_v41 }
 0xd6e   : > { %v7021_v63 = vpack.c.bf16 %v7004_v56, %v7003_v59 }
 0xd70   : > { %8601 = vmatprep.mubr.bf16.mxu1 %v7021_v63 }
 0xd71   : > { %8602 = vmatmul.mubr.bf16.gmra.mxu1 %v7022_v0 }
 0xe22   : > { %v8599_v10 = vpop.f32.mrf.mxu1 }
 0xe23   : > { %v7233_v4 = vadd.f32 %v8599_v10, %v12830_v33 }
 0xe24   : > { %v7224_v12 = vpop.f32.mrf.mxu1 }
 0xe25   : > { %v7281_v8 = vadd.f32 %v9237_v18, %v7233_v4  ;;  %v7225_v47 = vadd.f32 %v12830_v33, %v7224_v12 }
 0xe26   : > { %v8600_v52 = vpop.f32.mrf.mxu1 }
 0xe27   : > { %7313 = vst.msk [vmem:[%s12838_s27 + $0xd0] sm:$0xff] %vm585_vm0, %v7281_v8  ;;  %v7279_v17 = vadd.f32 %v9238_v1, %v7225_v47  ;;  %v7236_v27 = vadd.f32 %v8600_v52, %v12830_v33 }
 0xe28   : > { %v7227_v42 = vpop.f32.mrf.mxu1 }
 0xe29   : > { %7311 = vst.msk [vmem:[%s12838_s27 + $0xc0] sm:$0xff] %vm585_vm0, %v7279_v17  ;;  %v7282_v6 = vadd.f32 %v9239_v19, %v7236_v27  ;;  %v7228_v7 = vadd.f32 %v12830_v33, %v7227_v42 }
 0xe2b   : > { %7314 = vst.msk [vmem:[%s12838_s27 + $0xd8] sm:$0xff] %vm585_vm0, %v7282_v6  ;;  %v7280_v14 = vadd.f32 %v9240_v53, %v7228_v7 }
 0xe2d   : > { %7312 = vst.msk [vmem:[%s12838_s27 + $0xc8] sm:$0xff] %vm585_vm0, %v7280_v14 }
 0xe31   : > { %v8603_v24 = vpop.f32.mrf.mxu1 }
 0xe32   : > { %v7249_v40 = vadd.f32 %v8603_v24, %v12830_v33 }
 0xe33   : > { %v7240_v13 = vpop.f32.mrf.mxu1 }
 0xe34   : > { %v7285_v43 = vadd.f32 %v9241_v45, %v7249_v40  ;;  %v7241_v58 = vadd.f32 %v12830_v33, %v7240_v13 }
 0xe35   : > { %v8604_v35 = vpop.f32.mrf.mxu1 }
 0xe36   : > { %7317 = vst.msk [vmem:[%s12838_s27 + $0xf0] sm:$0xff] %vm585_vm0, %v7285_v43  ;;  %v7283_v29 = vadd.f32 %v9242_v11, %v7241_v58  ;;  %v7252_v57 = vadd.f32 %v8604_v35, %v12830_v33 }
 0xe37   : > { %v7243_v44 = vpop.f32.mrf.mxu1 }
 0xe38   : > { %7315 = vst.msk [vmem:[%s12838_s27 + $0xe0] sm:$0xff] %vm585_vm0, %v7283_v29  ;;  %v7286_v55 = vadd.f32 %v9243_v39, %v7252_v57  ;;  %v7244_v60 = vadd.f32 %v12830_v33, %v7243_v44 }
 0xe3a   : > { %7318 = vst.msk [vmem:[%s12838_s27 + $0xf8] sm:$0xff] %vm585_vm0, %v7286_v55  ;;  %v7284_v30 = vadd.f32 %v9244_v9, %v7244_v60 }
 0xe3c   : > { %7316 = vst.msk [vmem:[%s12838_s27 + $0xe8] sm:$0xff] %vm585_vm0, %v7284_v30 }
 0xe3d PF: > { %s27_s24 = sadd.s32 1, %s9251_s24  }
 0xe3e   : > { %p24_p4 = scmp.ge.s32.totalorder %s27_s24, 4  }
 0xe40   :  { %26 = sbr.rel (!%p24_p4) target bundleno = 4 (0x4), region = 127 }

</bundles_post_ra>
